<compile_context>
chip_gen: v7x
topology: tpu7x:2x2x1
jax: 0.10.0
libtpu: 0.0.40
codegen_flags: <defaults>
</compile_context>

<pallas_src>
import functools
import math

import numpy as np
import jax
import jax.numpy as jnp
from jax.experimental import pallas as pl
from jax.experimental.pallas import tpu as pltpu

# ---------------- small hyper-params consistent with the module -------------
BATCH = 2
EMBED = 32            # embed_dim
HEIGHT = WIDTH = 16   # input_resolution (== x_size, so the registered mask is used)
HEADS = 4             # num_heads
WINDOW = 8            # window_size
BLK_DEPTH = 2         # blk_depth (module default 6; kept small)
NUM_RSTB = 4
MLP_RATIO = 4.0
MLP_HIDDEN = int(EMBED * MLP_RATIO)
LN_EPS = 1e-5


# --------------------------- static tables (numpy) ---------------------------
def _relative_position_index(ws):
    coords = np.stack(np.meshgrid(np.arange(ws), np.arange(ws), indexing='ij'))
    flat = coords.reshape(2, -1)
    rel = (flat[:, :, None] - flat[:, None, :]).transpose(1, 2, 0).astype(np.int64)
    rel[:, :, 0] += ws - 1
    rel[:, :, 1] += ws - 1
    rel[:, :, 0] *= 2 * ws - 1
    return rel.sum(-1)                                    # (N, N)


def _attn_mask(H, W, ws, shift):
    img_mask = np.zeros((1, H, W, 1), np.float32)
    slices = (slice(0, -ws), slice(-ws, -shift), slice(-shift, None))
    cnt = 0
    for hs in slices:
        for wss in slices:
            img_mask[:, hs, wss, :] = cnt
            cnt += 1
    mw = img_mask.reshape(1, H // ws, ws, W // ws, ws, 1)
    mw = mw.transpose(0, 1, 3, 2, 4, 5).reshape(-1, ws * ws)
    am = mw[:, None, :] - mw[:, :, None]
    return jnp.asarray(np.where(am != 0, -100.0, 0.0).astype(np.float32))  # (nW, N, N)


REL_POS_INDEX = jnp.asarray(_relative_position_index(WINDOW))
ATTN_MASK = _attn_mask(HEIGHT, WIDTH, WINDOW, WINDOW // 2)


# ----------------------------- in-kernel helpers ------------------------------
def _layernorm(x, g, b):
    mu = jnp.mean(x, axis=-1, keepdims=True)
    var = jnp.mean(jnp.square(x - mu), axis=-1, keepdims=True)
    return (x - mu) * jax.lax.rsqrt(var + LN_EPS) * g + b


def _erf_approx(x):
    # Abramowitz & Stegun 7.1.26 rational approximation (|err| < 1.5e-7) — matches
    # torch.erf used by the exact nn.GELU at float32 level.  exp() runs on the EUP.
    a1, a2, a3, a4, a5 = (0.254829592, -0.284496736, 1.421413741,
                          -1.453152027, 1.061405429)
    p = 0.3275911
    xa = jnp.where(x >= 0.0, x, -x)
    t = 1.0 / (1.0 + p * xa)
    poly = ((((a5 * t + a4) * t + a3) * t + a2) * t + a1) * t
    y = 1.0 - poly * jnp.exp(-xa * xa)
    return jnp.where(x >= 0.0, y, -y)


def _gelu_exact(x):
    # nn.GELU() default is the exact erf form.
    return 0.5 * x * (1.0 + _erf_approx(x * (1.0 / math.sqrt(2.0))))


# ------------------------ fused Swin-block Pallas kernel ----------------------
def _swin_block_kernel(x_ref, bias_ref, mask_ref,
                       ln1g_ref, ln1b_ref, qkvw_ref, qkvb_ref,
                       projw_ref, projb_ref, ln2g_ref, ln2b_ref,
                       fc1w_ref, fc1b_ref, fc2w_ref, fc2b_ref,
                       o_ref, *, num_heads, head_dim, scale):
    bf16 = jnp.bfloat16
    x = x_ref[0]                                      # (N, C) f32, windowed tokens
    N, C = x.shape

    # ---- attention branch ----------------------------------------------------
    xs = _layernorm(x, ln1g_ref[...], ln1b_ref[...])
    qkv = jnp.dot(xs.astype(bf16), qkvw_ref[...],
                  preferred_element_type=jnp.float32) + qkvb_ref[...]   # (N, 3C)
    mask = mask_ref[0]                                # (N, N) shift mask (zeros if unshifted)

    attn = jnp.zeros((N, C), jnp.float32)
    for h in range(num_heads):                        # static unroll; all heads in-kernel
        lo = h * head_dim
        q = qkv[:, lo:lo + head_dim] * scale          # (N, hd)
        k = qkv[:, C + lo:C + lo + head_dim]
        v = qkv[:, 2 * C + lo:2 * C + lo + head_dim]
        s = jax.lax.dot_general(q.astype(bf16), k.astype(bf16),
                                (((1,), (1,)), ((), ())),
                                preferred_element_type=jnp.float32)     # (N, N) = q @ k^T
        s = s + bias_ref[h] + mask
        s = s - jnp.max(s, axis=-1, keepdims=True)
        p = jnp.exp(s)
        p = p * pl.reciprocal(jnp.sum(p, axis=-1, keepdims=True), approx=True)
        ho = jnp.dot(p.astype(bf16), v.astype(bf16),
                     preferred_element_type=jnp.float32)                # (N, hd)
        # fold the output projection per head: concat(ho_h) @ W == sum_h ho_h @ W[h]
        attn = attn + jnp.dot(ho.astype(bf16), projw_ref[lo:lo + head_dim, :],
                              preferred_element_type=jnp.float32)       # (N, C)
    x = x + attn + projb_ref[...]                     # attention residual

    # ---- MLP branch ------------------------------------------------------------
    xs2 = _layernorm(x, ln2g_ref[...], ln2b_ref[...])
    h1 = jnp.dot(xs2.astype(bf16), fc1w_ref[...],
                 preferred_element_type=jnp.float32) + fc1b_ref[...]
    h1 = _gelu_exact(h1)
    mlp = jnp.dot(h1.astype(bf16), fc2w_ref[...],
                  preferred_element_type=jnp.float32) + fc2b_ref[...]
    o_ref[0] = (x + mlp).astype(o_ref.dtype)          # MLP residual


def swin_block(x, p, x_size, shift):
    """One Swin transformer block; fused into a single pallas_call over windows."""
    Hh, Ww = x_size
    B, L, C = x.shape
    ws, nh = WINDOW, HEADS
    N = ws * ws
    hd = C // nh
    bf16 = jnp.bfloat16

    # roll + window partition (pure layout, plain JAX)
    xi = x.reshape(B, Hh, Ww, C)
    if shift > 0:
        xi = jnp.roll(xi, shift=(-shift, -shift), axis=(1, 2))
    xw = xi.reshape(B, Hh // ws, ws, Ww // ws, ws, C).transpose(0, 1, 3, 2, 4, 5)
    xw = xw.reshape(-1, N, C)                             # (B_, N, C)
    B_ = xw.shape[0]

    # relative-position bias table gather -> (nh, N, N); tiny, stays in JAX
    rel = p['rel_table'][REL_POS_INDEX.reshape(-1)]
    rel = rel.reshape(N, N, nh).transpose(2, 0, 1)

    mask = ATTN_MASK if shift > 0 else jnp.zeros((1, N, N), jnp.float32)
    nM = mask.shape[0]

    kern = functools.partial(_swin_block_kernel, num_heads=nh, head_dim=hd,
                             scale=hd ** -0.5)
    yw = pl.pallas_call(
        kern,
        out_shape=jax.ShapeDtypeStruct((B_, N, C), jnp.float32),
        grid=(B_,),
        in_specs=[
            pl.BlockSpec((1, N, C), lambda i: (i, 0, 0)),        # x window
            pl.BlockSpec((nh, N, N), lambda i: (0, 0, 0)),       # rel-pos bias (resident)
            pl.BlockSpec((1, N, N), lambda i: (i % nM, 0, 0)),   # shift mask for this window
            pl.BlockSpec((1, C), lambda i: (0, 0)),              # ln1 gamma
            pl.BlockSpec((1, C), lambda i: (0, 0)),              # ln1 beta
            pl.BlockSpec((C, 3 * C), lambda i: (0, 0)),          # qkv W (bf16)
            pl.BlockSpec((1, 3 * C), lambda i: (0, 0)),          # qkv b
            pl.BlockSpec((C, C), lambda i: (0, 0)),              # proj W (bf16)
            pl.BlockSpec((1, C), lambda i: (0, 0)),              # proj b
            pl.BlockSpec((1, C), lambda i: (0, 0)),              # ln2 gamma
            pl.BlockSpec((1, C), lambda i: (0, 0)),              # ln2 beta
            pl.BlockSpec((C, MLP_HIDDEN), lambda i: (0, 0)),     # fc1 W (bf16)
            pl.BlockSpec((1, MLP_HIDDEN), lambda i: (0, 0)),     # fc1 b
            pl.BlockSpec((MLP_HIDDEN, C), lambda i: (0, 0)),     # fc2 W (bf16)
            pl.BlockSpec((1, C), lambda i: (0, 0)),              # fc2 b
        ],
        out_specs=pl.BlockSpec((1, N, C), lambda i: (i, 0, 0)),
        compiler_params=pltpu.CompilerParams(dimension_semantics=("parallel",)),
    )(xw, rel, mask,
      p['ln1_g'].reshape(1, C), p['ln1_b'].reshape(1, C),
      p['qkv_w'].astype(bf16), p['qkv_b'].reshape(1, 3 * C),
      p['proj_w'].astype(bf16), p['proj_b'].reshape(1, C),
      p['ln2_g'].reshape(1, C), p['ln2_b'].reshape(1, C),
      p['fc1_w'].astype(bf16), p['fc1_b'].reshape(1, MLP_HIDDEN),
      p['fc2_w'].astype(bf16), p['fc2_b'].reshape(1, C))

    # window reverse + un-roll (pure layout)
    yr = yw.reshape(B, Hh // ws, Ww // ws, ws, ws, C).transpose(0, 1, 3, 2, 4, 5)
    yr = yr.reshape(B, Hh, Ww, C)
    if shift > 0:
        yr = jnp.roll(yr, shift=(shift, shift), axis=(1, 2))
    return yr.reshape(B, L, C)


# ------------------ 3x3 conv (+ RSTB residual) Pallas kernel -------------------
def _conv_acc_kernel(taps_ref, w_ref, b_ref, res_ref, o_ref, acc_ref):
    t = pl.program_id(0)

    @pl.when(t == 0)
    def _():
        acc_ref[...] = jnp.zeros_like(acc_ref)

    acc_ref[...] += jnp.dot(taps_ref[0].astype(jnp.bfloat16), w_ref[0],
                            preferred_element_type=jnp.float32)

    @pl.when(t == pl.num_programs(0) - 1)
    def _():
        o_ref[...] = (acc_ref[...] + b_ref[...] + res_ref[...]).astype(o_ref.dtype)


def conv3x3_residual(x_tokens, conv_w, conv_b, res_tokens, x_size):
    """Conv2d(dim, dim, 3, 1, 1) on token-major data + residual add, as one kernel."""
    Hh, Ww = x_size
    B, L, C = x_tokens.shape
    M = B * Hh * Ww
    # zero-pad + 9 shifted taps (pure layout slicing in JAX; one matmul per tap below)
    x_img = x_tokens.reshape(B, Hh, Ww, C)
    xp = jnp.pad(x_img, ((0, 0), (1, 1), (1, 1), (0, 0)))
    taps = jnp.stack([xp[:, dh:dh + Hh, dw:dw + Ww, :].reshape(M, C)
                      for dh in range(3) for dw in range(3)], axis=0)      # (9, M, C)
    # per-tap (Cin, Cout) matrices from PyTorch (Cout, Cin, kh, kw), cross-correlation
    w9 = jnp.transpose(conv_w, (2, 3, 1, 0)).reshape(9, C, C).astype(jnp.bfloat16)

    y = pl.pallas_call(
        _conv_acc_kernel,
        out_shape=jax.ShapeDtypeStruct((M, C), jnp.float32),
        grid=(9,),
        in_specs=[
            pl.BlockSpec((1, M, C), lambda t: (t, 0, 0)),   # shifted tap
            pl.BlockSpec((1, C, C), lambda t: (t, 0, 0)),   # tap weight (bf16)
            pl.BlockSpec((1, C), lambda t: (0, 0)),         # conv bias
            pl.BlockSpec((M, C), lambda t: (0, 0)),         # RSTB residual tokens
        ],
        out_specs=pl.BlockSpec((M, C), lambda t: (0, 0)),
        scratch_shapes=[pltpu.VMEM((M, C), jnp.float32)],
        compiler_params=pltpu.CompilerParams(dimension_semantics=("arbitrary",)),
    )(taps, w9, conv_b.reshape(1, C), res_tokens.reshape(M, C))
    return y.reshape(B, L, C)


# ------------------------------- model glue -----------------------------------
def rstb_forward(x, p, x_size):
    res = x
    for i in range(BLK_DEPTH):
        shift = 0 if (i % 2 == 0) else WINDOW // 2
        x = swin_block(x, p['blocks'][i], x_size, shift)
    # patch_unembed -> conv3x3 -> patch_embed -> + residual (fused in the conv kernel)
    return conv3x3_residual(x, p['conv_w'], p['conv_b'], res, x_size)


def swin_layers_forward(x_nchw, params):
    b, c, h, w = x_nchw.shape
    x = jnp.transpose(x_nchw.reshape(b, c, h * w), (0, 2, 1))   # (B, L, C)
    for rp in params:
        x = rstb_forward(x, rp, (h, w))
    return jnp.transpose(x, (0, 2, 1)).reshape(b, c, h, w)


# ------------------------------ parameters -------------------------------------
def init_params(key):
    def randn(k, shape, std=0.02):
        return std * jax.random.normal(k, shape, dtype=jnp.float32)

    params = []
    for _ in range(NUM_RSTB):
        blocks = []
        for _ in range(BLK_DEPTH):
            key, k0, k1, k2, k3, k4 = jax.random.split(key, 6)
            blocks.append(dict(
                ln1_g=jnp.ones((EMBED,), jnp.float32),
                ln1_b=jnp.zeros((EMBED,), jnp.float32),
                qkv_w=randn(k0, (EMBED, 3 * EMBED)),
                qkv_b=jnp.zeros((3 * EMBED,), jnp.float32),
                rel_table=randn(k1, ((2 * WINDOW - 1) ** 2, HEADS)),
                proj_w=randn(k2, (EMBED, EMBED)),
                proj_b=jnp.zeros((EMBED,), jnp.float32),
                ln2_g=jnp.ones((EMBED,), jnp.float32),
                ln2_b=jnp.zeros((EMBED,), jnp.float32),
                fc1_w=randn(k3, (EMBED, MLP_HIDDEN)),
                fc1_b=jnp.zeros((MLP_HIDDEN,), jnp.float32),
                fc2_w=randn(k4, (MLP_HIDDEN, EMBED)),
                fc2_b=jnp.zeros((EMBED,), jnp.float32),
            ))
        key, kc = jax.random.split(key)
        params.append(dict(
            blocks=blocks,
            conv_w=randn(kc, (EMBED, EMBED, 3, 3), std=0.05),
            conv_b=jnp.zeros((EMBED,), jnp.float32),
        ))
    return params


if __name__ == "__main__":
    key = jax.random.PRNGKey(0)
    kx, kp = jax.random.split(key)
    x = jax.random.normal(kx, (BATCH, EMBED, HEIGHT, WIDTH), dtype=jnp.float32)
    params = init_params(kp)

    fwd = jax.jit(swin_layers_forward)
    out = jax.block_until_ready(fwd(x, params))

    assert out.shape == x.shape, out.shape
    assert bool(jnp.all(jnp.isfinite(out)))
    print("KERNEL_OK")
</pallas_src>

<mosaic_0001>
module attributes {stable_mosaic.version = 11 : i64} {
  func.func @_swin_block_kernel(%arg0: i32, %arg1: memref<1x64x32xf32, #tpu.memory_space<vmem>>, %arg2: memref<4x64x64xf32, #tpu.memory_space<vmem>>, %arg3: memref<1x64x64xf32, #tpu.memory_space<vmem>>, %arg4: memref<1x32xf32, #tpu.memory_space<vmem>>, %arg5: memref<1x32xf32, #tpu.memory_space<vmem>>, %arg6: memref<32x96xbf16, #tpu.memory_space<vmem>>, %arg7: memref<1x96xf32, #tpu.memory_space<vmem>>, %arg8: memref<32x32xbf16, #tpu.memory_space<vmem>>, %arg9: memref<1x32xf32, #tpu.memory_space<vmem>>, %arg10: memref<1x32xf32, #tpu.memory_space<vmem>>, %arg11: memref<1x32xf32, #tpu.memory_space<vmem>>, %arg12: memref<32x128xbf16, #tpu.memory_space<vmem>>, %arg13: memref<1x128xf32, #tpu.memory_space<vmem>>, %arg14: memref<128x32xbf16, #tpu.memory_space<vmem>>, %arg15: memref<1x32xf32, #tpu.memory_space<vmem>>, %arg16: memref<1x64x32xf32, #tpu.memory_space<vmem>>) attributes {dimension_semantics = [#tpu.dimension_semantics<parallel>], iteration_bounds = array<i64: 8>, scalar_prefetch = 0 : i64, scratch_operands = 0 : i64, tpu.core_type = #tpu.core_type<tc>, window_params = [{transform_indices = @transform_0, window_bounds = array<i64: 1, 64, 32>}, {pipeline_mode = #tpu.pipeline_mode<synchronous>, transform_indices = @transform_1, window_bounds = array<i64: 4, 64, 64>}, {transform_indices = @transform_2, window_bounds = array<i64: 1, 64, 64>}, {pipeline_mode = #tpu.pipeline_mode<synchronous>, transform_indices = @transform_3, window_bounds = array<i64: 1, 32>}, {pipeline_mode = #tpu.pipeline_mode<synchronous>, transform_indices = @transform_4, window_bounds = array<i64: 1, 32>}, {pipeline_mode = #tpu.pipeline_mode<synchronous>, transform_indices = @transform_5, window_bounds = array<i64: 32, 96>}, {pipeline_mode = #tpu.pipeline_mode<synchronous>, transform_indices = @transform_6, window_bounds = array<i64: 1, 96>}, {pipeline_mode = #tpu.pipeline_mode<synchronous>, transform_indices = @transform_7, window_bounds = array<i64: 32, 32>}, {pipeline_mode = #tpu.pipeline_mode<synchronous>, transform_indices = @transform_8, window_bounds = array<i64: 1, 32>}, {pipeline_mode = #tpu.pipeline_mode<synchronous>, transform_indices = @transform_9, window_bounds = array<i64: 1, 32>}, {pipeline_mode = #tpu.pipeline_mode<synchronous>, transform_indices = @transform_10, window_bounds = array<i64: 1, 32>}, {pipeline_mode = #tpu.pipeline_mode<synchronous>, transform_indices = @transform_11, window_bounds = array<i64: 32, 128>}, {pipeline_mode = #tpu.pipeline_mode<synchronous>, transform_indices = @transform_12, window_bounds = array<i64: 1, 128>}, {pipeline_mode = #tpu.pipeline_mode<synchronous>, transform_indices = @transform_13, window_bounds = array<i64: 128, 32>}, {pipeline_mode = #tpu.pipeline_mode<synchronous>, transform_indices = @transform_14, window_bounds = array<i64: 1, 32>}, {transform_indices = @transform_15, window_bounds = array<i64: 1, 64, 32>}]} {
    %c0 = arith.constant 0 : index
    %c0_0 = arith.constant 0 : index
    %c0_1 = arith.constant 0 : index
    %0 = vector.load %arg1[%c0, %c0_0, %c0_1] : memref<1x64x32xf32, #tpu.memory_space<vmem>>, vector<1x64x32xf32>
    %1 = vector.shape_cast %0 : vector<1x64x32xf32> to vector<64x32xf32>
    %c0_2 = arith.constant 0 : index
    %c0_3 = arith.constant 0 : index
    %2 = vector.load %arg4[%c0_2, %c0_3] : memref<1x32xf32, #tpu.memory_space<vmem>>, vector<1x32xf32>
    %c0_4 = arith.constant 0 : index
    %c0_5 = arith.constant 0 : index
    %3 = vector.load %arg5[%c0_4, %c0_5] : memref<1x32xf32, #tpu.memory_space<vmem>>, vector<1x32xf32>
    %cst = arith.constant dense<0.000000e+00> : vector<64xf32>
    %4 = vector.multi_reduction <add>, %1, %cst [1] : vector<64x32xf32> to vector<64xf32>
    %5 = vector.shape_cast %4 : vector<64xf32> to vector<64x1xf32>
    %cst_6 = arith.constant 3.200000e+01 : f32
    %6 = vector.broadcast %cst_6 : f32 to vector<64x1xf32>
    %7 = arith.divf %5, %6 : vector<64x1xf32>
    %8 = vector.broadcast %7 : vector<64x1xf32> to vector<64x32xf32>
    %9 = arith.subf %1, %8 : vector<64x32xf32>
    %10 = arith.mulf %9, %9 : vector<64x32xf32>
    %cst_7 = arith.constant dense<0.000000e+00> : vector<64xf32>
    %11 = vector.multi_reduction <add>, %10, %cst_7 [1] : vector<64x32xf32> to vector<64xf32>
    %12 = vector.shape_cast %11 : vector<64xf32> to vector<64x1xf32>
    %cst_8 = arith.constant 3.200000e+01 : f32
    %13 = vector.broadcast %cst_8 : f32 to vector<64x1xf32>
    %14 = arith.divf %12, %13 : vector<64x1xf32>
    %15 = vector.broadcast %7 : vector<64x1xf32> to vector<64x32xf32>
    %16 = arith.subf %1, %15 : vector<64x32xf32>
    %cst_9 = arith.constant 9.99999974E-6 : f32
    %17 = vector.broadcast %cst_9 : f32 to vector<64x1xf32>
    %18 = arith.addf %14, %17 : vector<64x1xf32>
    %19 = math.rsqrt %18 : vector<64x1xf32>
    %20 = vector.broadcast %19 : vector<64x1xf32> to vector<64x32xf32>
    %21 = arith.mulf %16, %20 : vector<64x32xf32>
    %22 = vector.broadcast %2 : vector<1x32xf32> to vector<64x32xf32>
    %23 = arith.mulf %21, %22 : vector<64x32xf32>
    %24 = vector.broadcast %3 : vector<1x32xf32> to vector<64x32xf32>
    %25 = arith.addf %23, %24 : vector<64x32xf32>
    %26 = arith.truncf %25 : vector<64x32xf32> to vector<64x32xbf16>
    %c0_10 = arith.constant 0 : index
    %c0_11 = arith.constant 0 : index
    %27 = vector.load %arg6[%c0_10, %c0_11] : memref<32x96xbf16, #tpu.memory_space<vmem>>, vector<32x96xbf16>
    %cst_12 = arith.constant dense<0.000000e+00> : vector<64x96xf32>
    %28 = tpu.matmul %26, %27, %cst_12 {dimension_numbers = #tpu.dot_dimension_numbers<[1], [0], [0], [1], [0, 0, 1, 1], [], []>} : vector<64x32xbf16>, vector<32x96xbf16>, vector<64x96xf32> -> vector<64x96xf32>
    %c0_13 = arith.constant 0 : index
    %c0_14 = arith.constant 0 : index
    %29 = vector.load %arg7[%c0_13, %c0_14] : memref<1x96xf32, #tpu.memory_space<vmem>>, vector<1x96xf32>
    %30 = vector.broadcast %29 : vector<1x96xf32> to vector<64x96xf32>
    %31 = arith.addf %28, %30 : vector<64x96xf32>
    %c0_15 = arith.constant 0 : index
    %c0_16 = arith.constant 0 : index
    %c0_17 = arith.constant 0 : index
    %32 = vector.load %arg3[%c0_15, %c0_16, %c0_17] : memref<1x64x64xf32, #tpu.memory_space<vmem>>, vector<1x64x64xf32>
    %33 = vector.shape_cast %32 : vector<1x64x64xf32> to vector<64x64xf32>
    %cst_18 = arith.constant 0.000000e+00 : f32
    %34 = vector.broadcast %cst_18 : f32 to vector<64x32xf32>
    %35 = vector.extract_strided_slice %31 {offsets = [0, 0], sizes = [64, 8], strides = [1, 1]} : vector<64x96xf32> to vector<64x8xf32>
    %cst_19 = arith.constant 0.353553385 : f32
    %36 = vector.broadcast %cst_19 : f32 to vector<64x8xf32>
    %37 = arith.mulf %35, %36 : vector<64x8xf32>
    %38 = vector.extract_strided_slice %31 {offsets = [0, 32], sizes = [64, 8], strides = [1, 1]} : vector<64x96xf32> to vector<64x8xf32>
    %39 = vector.extract_strided_slice %31 {offsets = [0, 64], sizes = [64, 8], strides = [1, 1]} : vector<64x96xf32> to vector<64x8xf32>
    %40 = arith.truncf %37 : vector<64x8xf32> to vector<64x8xbf16>
    %41 = arith.truncf %38 : vector<64x8xf32> to vector<64x8xbf16>
    %cst_20 = arith.constant dense<0.000000e+00> : vector<64x64xf32>
    %42 = tpu.matmul %40, %41, %cst_20 {dimension_numbers = #tpu.dot_dimension_numbers<[1], [1], [0], [0], [0, 0, 1, 0], [], []>} : vector<64x8xbf16>, vector<64x8xbf16>, vector<64x64xf32> -> vector<64x64xf32>
    %c0_21 = arith.constant 0 : index
    %c0_22 = arith.constant 0 : index
    %c0_23 = arith.constant 0 : index
    %43 = vector.load %arg2[%c0_21, %c0_22, %c0_23] : memref<4x64x64xf32, #tpu.memory_space<vmem>>, vector<1x64x64xf32>
    %44 = vector.shape_cast %43 : vector<1x64x64xf32> to vector<64x64xf32>
    %45 = arith.addf %42, %44 : vector<64x64xf32>
    %46 = arith.addf %45, %33 : vector<64x64xf32>
    %cst_24 = arith.constant dense<0xFF800000> : vector<64xf32>
    %47 = vector.multi_reduction <maximumf>, %46, %cst_24 [1] : vector<64x64xf32> to vector<64xf32>
    %48 = vector.shape_cast %47 : vector<64xf32> to vector<64x1xf32>
    %49 = vector.broadcast %48 : vector<64x1xf32> to vector<64x64xf32>
    %50 = arith.subf %46, %49 : vector<64x64xf32>
    %51 = math.exp %50 : vector<64x64xf32>
    %cst_25 = arith.constant dense<0.000000e+00> : vector<64xf32>
    %52 = vector.multi_reduction <add>, %51, %cst_25 [1] : vector<64x64xf32> to vector<64xf32>
    %53 = vector.shape_cast %52 : vector<64xf32> to vector<64x1xf32>
    %54 = tpu.reciprocal %53 {approx = true} : vector<64x1xf32> -> vector<64x1xf32>
    %55 = vector.broadcast %54 : vector<64x1xf32> to vector<64x64xf32>
    %56 = arith.mulf %51, %55 : vector<64x64xf32>
    %57 = arith.truncf %56 : vector<64x64xf32> to vector<64x64xbf16>
    %58 = arith.truncf %39 : vector<64x8xf32> to vector<64x8xbf16>
    %cst_26 = arith.constant dense<0.000000e+00> : vector<64x8xf32>
    %59 = tpu.matmul %57, %58, %cst_26 {dimension_numbers = #tpu.dot_dimension_numbers<[1], [0], [0], [1], [0, 0, 1, 1], [], []>} : vector<64x64xbf16>, vector<64x8xbf16>, vector<64x8xf32> -> vector<64x8xf32>
    %60 = arith.truncf %59 : vector<64x8xf32> to vector<64x8xbf16>
    %c0_27 = arith.constant 0 : index
    %c0_28 = arith.constant 0 : index
    %61 = vector.load %arg8[%c0_27, %c0_28] : memref<32x32xbf16, #tpu.memory_space<vmem>>, vector<8x32xbf16>
    %cst_29 = arith.constant dense<0.000000e+00> : vector<64x32xf32>
    %62 = tpu.matmul %60, %61, %cst_29 {dimension_numbers = #tpu.dot_dimension_numbers<[1], [0], [0], [1], [0, 0, 1, 1], [], []>} : vector<64x8xbf16>, vector<8x32xbf16>, vector<64x32xf32> -> vector<64x32xf32>
    %63 = arith.addf %34, %62 : vector<64x32xf32>
    %64 = vector.extract_strided_slice %31 {offsets = [0, 8], sizes = [64, 8], strides = [1, 1]} : vector<64x96xf32> to vector<64x8xf32>
    %cst_30 = arith.constant 0.353553385 : f32
    %65 = vector.broadcast %cst_30 : f32 to vector<64x8xf32>
    %66 = arith.mulf %64, %65 : vector<64x8xf32>
    %67 = vector.extract_strided_slice %31 {offsets = [0, 40], sizes = [64, 8], strides = [1, 1]} : vector<64x96xf32> to vector<64x8xf32>
    %68 = vector.extract_strided_slice %31 {offsets = [0, 72], sizes = [64, 8], strides = [1, 1]} : vector<64x96xf32> to vector<64x8xf32>
    %69 = arith.truncf %66 : vector<64x8xf32> to vector<64x8xbf16>
    %70 = arith.truncf %67 : vector<64x8xf32> to vector<64x8xbf16>
    %cst_31 = arith.constant dense<0.000000e+00> : vector<64x64xf32>
    %71 = tpu.matmul %69, %70, %cst_31 {dimension_numbers = #tpu.dot_dimension_numbers<[1], [1], [0], [0], [0, 0, 1, 0], [], []>} : vector<64x8xbf16>, vector<64x8xbf16>, vector<64x64xf32> -> vector<64x64xf32>
    %c1 = arith.constant 1 : index
    %c0_32 = arith.constant 0 : index
    %c0_33 = arith.constant 0 : index
    %72 = vector.load %arg2[%c1, %c0_32, %c0_33] : memref<4x64x64xf32, #tpu.memory_space<vmem>>, vector<1x64x64xf32>
    %73 = vector.shape_cast %72 : vector<1x64x64xf32> to vector<64x64xf32>
    %74 = arith.addf %71, %73 : vector<64x64xf32>
    %75 = arith.addf %74, %33 : vector<64x64xf32>
    %cst_34 = arith.constant dense<0xFF800000> : vector<64xf32>
    %76 = vector.multi_reduction <maximumf>, %75, %cst_34 [1] : vector<64x64xf32> to vector<64xf32>
    %77 = vector.shape_cast %76 : vector<64xf32> to vector<64x1xf32>
    %78 = vector.broadcast %77 : vector<64x1xf32> to vector<64x64xf32>
    %79 = arith.subf %75, %78 : vector<64x64xf32>
    %80 = math.exp %79 : vector<64x64xf32>
    %cst_35 = arith.constant dense<0.000000e+00> : vector<64xf32>
    %81 = vector.multi_reduction <add>, %80, %cst_35 [1] : vector<64x64xf32> to vector<64xf32>
    %82 = vector.shape_cast %81 : vector<64xf32> to vector<64x1xf32>
    %83 = tpu.reciprocal %82 {approx = true} : vector<64x1xf32> -> vector<64x1xf32>
    %84 = vector.broadcast %83 : vector<64x1xf32> to vector<64x64xf32>
    %85 = arith.mulf %80, %84 : vector<64x64xf32>
    %86 = arith.truncf %85 : vector<64x64xf32> to vector<64x64xbf16>
    %87 = arith.truncf %68 : vector<64x8xf32> to vector<64x8xbf16>
    %cst_36 = arith.constant dense<0.000000e+00> : vector<64x8xf32>
    %88 = tpu.matmul %86, %87, %cst_36 {dimension_numbers = #tpu.dot_dimension_numbers<[1], [0], [0], [1], [0, 0, 1, 1], [], []>} : vector<64x64xbf16>, vector<64x8xbf16>, vector<64x8xf32> -> vector<64x8xf32>
    %89 = arith.truncf %88 : vector<64x8xf32> to vector<64x8xbf16>
    %c8 = arith.constant 8 : index
    %c0_37 = arith.constant 0 : index
    %90 = vector.load %arg8[%c8, %c0_37] : memref<32x32xbf16, #tpu.memory_space<vmem>>, vector<8x32xbf16>
    %cst_38 = arith.constant dense<0.000000e+00> : vector<64x32xf32>
    %91 = tpu.matmul %89, %90, %cst_38 {dimension_numbers = #tpu.dot_dimension_numbers<[1], [0], [0], [1], [0, 0, 1, 1], [], []>} : vector<64x8xbf16>, vector<8x32xbf16>, vector<64x32xf32> -> vector<64x32xf32>
    %92 = arith.addf %63, %91 : vector<64x32xf32>
    %93 = vector.extract_strided_slice %31 {offsets = [0, 16], sizes = [64, 8], strides = [1, 1]} : vector<64x96xf32> to vector<64x8xf32>
    %cst_39 = arith.constant 0.353553385 : f32
    %94 = vector.broadcast %cst_39 : f32 to vector<64x8xf32>
    %95 = arith.mulf %93, %94 : vector<64x8xf32>
    %96 = vector.extract_strided_slice %31 {offsets = [0, 48], sizes = [64, 8], strides = [1, 1]} : vector<64x96xf32> to vector<64x8xf32>
    %97 = vector.extract_strided_slice %31 {offsets = [0, 80], sizes = [64, 8], strides = [1, 1]} : vector<64x96xf32> to vector<64x8xf32>
    %98 = arith.truncf %95 : vector<64x8xf32> to vector<64x8xbf16>
    %99 = arith.truncf %96 : vector<64x8xf32> to vector<64x8xbf16>
    %cst_40 = arith.constant dense<0.000000e+00> : vector<64x64xf32>
    %100 = tpu.matmul %98, %99, %cst_40 {dimension_numbers = #tpu.dot_dimension_numbers<[1], [1], [0], [0], [0, 0, 1, 0], [], []>} : vector<64x8xbf16>, vector<64x8xbf16>, vector<64x64xf32> -> vector<64x64xf32>
    %c2 = arith.constant 2 : index
    %c0_41 = arith.constant 0 : index
    %c0_42 = arith.constant 0 : index
    %101 = vector.load %arg2[%c2, %c0_41, %c0_42] : memref<4x64x64xf32, #tpu.memory_space<vmem>>, vector<1x64x64xf32>
    %102 = vector.shape_cast %101 : vector<1x64x64xf32> to vector<64x64xf32>
    %103 = arith.addf %100, %102 : vector<64x64xf32>
    %104 = arith.addf %103, %33 : vector<64x64xf32>
    %cst_43 = arith.constant dense<0xFF800000> : vector<64xf32>
    %105 = vector.multi_reduction <maximumf>, %104, %cst_43 [1] : vector<64x64xf32> to vector<64xf32>
    %106 = vector.shape_cast %105 : vector<64xf32> to vector<64x1xf32>
    %107 = vector.broadcast %106 : vector<64x1xf32> to vector<64x64xf32>
    %108 = arith.subf %104, %107 : vector<64x64xf32>
    %109 = math.exp %108 : vector<64x64xf32>
    %cst_44 = arith.constant dense<0.000000e+00> : vector<64xf32>
    %110 = vector.multi_reduction <add>, %109, %cst_44 [1] : vector<64x64xf32> to vector<64xf32>
    %111 = vector.shape_cast %110 : vector<64xf32> to vector<64x1xf32>
    %112 = tpu.reciprocal %111 {approx = true} : vector<64x1xf32> -> vector<64x1xf32>
    %113 = vector.broadcast %112 : vector<64x1xf32> to vector<64x64xf32>
    %114 = arith.mulf %109, %113 : vector<64x64xf32>
    %115 = arith.truncf %114 : vector<64x64xf32> to vector<64x64xbf16>
    %116 = arith.truncf %97 : vector<64x8xf32> to vector<64x8xbf16>
    %cst_45 = arith.constant dense<0.000000e+00> : vector<64x8xf32>
    %117 = tpu.matmul %115, %116, %cst_45 {dimension_numbers = #tpu.dot_dimension_numbers<[1], [0], [0], [1], [0, 0, 1, 1], [], []>} : vector<64x64xbf16>, vector<64x8xbf16>, vector<64x8xf32> -> vector<64x8xf32>
    %118 = arith.truncf %117 : vector<64x8xf32> to vector<64x8xbf16>
    %c16 = arith.constant 16 : index
    %c0_46 = arith.constant 0 : index
    %119 = vector.load %arg8[%c16, %c0_46] : memref<32x32xbf16, #tpu.memory_space<vmem>>, vector<8x32xbf16>
    %cst_47 = arith.constant dense<0.000000e+00> : vector<64x32xf32>
    %120 = tpu.matmul %118, %119, %cst_47 {dimension_numbers = #tpu.dot_dimension_numbers<[1], [0], [0], [1], [0, 0, 1, 1], [], []>} : vector<64x8xbf16>, vector<8x32xbf16>, vector<64x32xf32> -> vector<64x32xf32>
    %121 = arith.addf %92, %120 : vector<64x32xf32>
    %122 = vector.extract_strided_slice %31 {offsets = [0, 24], sizes = [64, 8], strides = [1, 1]} : vector<64x96xf32> to vector<64x8xf32>
    %cst_48 = arith.constant 0.353553385 : f32
    %123 = vector.broadcast %cst_48 : f32 to vector<64x8xf32>
    %124 = arith.mulf %122, %123 : vector<64x8xf32>
    %125 = vector.extract_strided_slice %31 {offsets = [0, 56], sizes = [64, 8], strides = [1, 1]} : vector<64x96xf32> to vector<64x8xf32>
    %126 = vector.extract_strided_slice %31 {offsets = [0, 88], sizes = [64, 8], strides = [1, 1]} : vector<64x96xf32> to vector<64x8xf32>
    %127 = arith.truncf %124 : vector<64x8xf32> to vector<64x8xbf16>
    %128 = arith.truncf %125 : vector<64x8xf32> to vector<64x8xbf16>
    %cst_49 = arith.constant dense<0.000000e+00> : vector<64x64xf32>
    %129 = tpu.matmul %127, %128, %cst_49 {dimension_numbers = #tpu.dot_dimension_numbers<[1], [1], [0], [0], [0, 0, 1, 0], [], []>} : vector<64x8xbf16>, vector<64x8xbf16>, vector<64x64xf32> -> vector<64x64xf32>
    %c3 = arith.constant 3 : index
    %c0_50 = arith.constant 0 : index
    %c0_51 = arith.constant 0 : index
    %130 = vector.load %arg2[%c3, %c0_50, %c0_51] : memref<4x64x64xf32, #tpu.memory_space<vmem>>, vector<1x64x64xf32>
    %131 = vector.shape_cast %130 : vector<1x64x64xf32> to vector<64x64xf32>
    %132 = arith.addf %129, %131 : vector<64x64xf32>
    %133 = arith.addf %132, %33 : vector<64x64xf32>
    %cst_52 = arith.constant dense<0xFF800000> : vector<64xf32>
    %134 = vector.multi_reduction <maximumf>, %133, %cst_52 [1] : vector<64x64xf32> to vector<64xf32>
    %135 = vector.shape_cast %134 : vector<64xf32> to vector<64x1xf32>
    %136 = vector.broadcast %135 : vector<64x1xf32> to vector<64x64xf32>
    %137 = arith.subf %133, %136 : vector<64x64xf32>
    %138 = math.exp %137 : vector<64x64xf32>
    %cst_53 = arith.constant dense<0.000000e+00> : vector<64xf32>
    %139 = vector.multi_reduction <add>, %138, %cst_53 [1] : vector<64x64xf32> to vector<64xf32>
    %140 = vector.shape_cast %139 : vector<64xf32> to vector<64x1xf32>
    %141 = tpu.reciprocal %140 {approx = true} : vector<64x1xf32> -> vector<64x1xf32>
    %142 = vector.broadcast %141 : vector<64x1xf32> to vector<64x64xf32>
    %143 = arith.mulf %138, %142 : vector<64x64xf32>
    %144 = arith.truncf %143 : vector<64x64xf32> to vector<64x64xbf16>
    %145 = arith.truncf %126 : vector<64x8xf32> to vector<64x8xbf16>
    %cst_54 = arith.constant dense<0.000000e+00> : vector<64x8xf32>
    %146 = tpu.matmul %144, %145, %cst_54 {dimension_numbers = #tpu.dot_dimension_numbers<[1], [0], [0], [1], [0, 0, 1, 1], [], []>} : vector<64x64xbf16>, vector<64x8xbf16>, vector<64x8xf32> -> vector<64x8xf32>
    %147 = arith.truncf %146 : vector<64x8xf32> to vector<64x8xbf16>
    %c24 = arith.constant 24 : index
    %c0_55 = arith.constant 0 : index
    %148 = vector.load %arg8[%c24, %c0_55] : memref<32x32xbf16, #tpu.memory_space<vmem>>, vector<8x32xbf16>
    %cst_56 = arith.constant dense<0.000000e+00> : vector<64x32xf32>
    %149 = tpu.matmul %147, %148, %cst_56 {dimension_numbers = #tpu.dot_dimension_numbers<[1], [0], [0], [1], [0, 0, 1, 1], [], []>} : vector<64x8xbf16>, vector<8x32xbf16>, vector<64x32xf32> -> vector<64x32xf32>
    %150 = arith.addf %121, %149 : vector<64x32xf32>
    %151 = arith.addf %1, %150 : vector<64x32xf32>
    %c0_57 = arith.constant 0 : index
    %c0_58 = arith.constant 0 : index
    %152 = vector.load %arg9[%c0_57, %c0_58] : memref<1x32xf32, #tpu.memory_space<vmem>>, vector<1x32xf32>
    %153 = vector.broadcast %152 : vector<1x32xf32> to vector<64x32xf32>
    %154 = arith.addf %151, %153 : vector<64x32xf32>
    %c0_59 = arith.constant 0 : index
    %c0_60 = arith.constant 0 : index
    %155 = vector.load %arg10[%c0_59, %c0_60] : memref<1x32xf32, #tpu.memory_space<vmem>>, vector<1x32xf32>
    %c0_61 = arith.constant 0 : index
    %c0_62 = arith.constant 0 : index
    %156 = vector.load %arg11[%c0_61, %c0_62] : memref<1x32xf32, #tpu.memory_space<vmem>>, vector<1x32xf32>
    %cst_63 = arith.constant dense<0.000000e+00> : vector<64xf32>
    %157 = vector.multi_reduction <add>, %154, %cst_63 [1] : vector<64x32xf32> to vector<64xf32>
    %158 = vector.shape_cast %157 : vector<64xf32> to vector<64x1xf32>
    %cst_64 = arith.constant 3.200000e+01 : f32
    %159 = vector.broadcast %cst_64 : f32 to vector<64x1xf32>
    %160 = arith.divf %158, %159 : vector<64x1xf32>
    %161 = vector.broadcast %160 : vector<64x1xf32> to vector<64x32xf32>
    %162 = arith.subf %154, %161 : vector<64x32xf32>
    %163 = arith.mulf %162, %162 : vector<64x32xf32>
    %cst_65 = arith.constant dense<0.000000e+00> : vector<64xf32>
    %164 = vector.multi_reduction <add>, %163, %cst_65 [1] : vector<64x32xf32> to vector<64xf32>
    %165 = vector.shape_cast %164 : vector<64xf32> to vector<64x1xf32>
    %cst_66 = arith.constant 3.200000e+01 : f32
    %166 = vector.broadcast %cst_66 : f32 to vector<64x1xf32>
    %167 = arith.divf %165, %166 : vector<64x1xf32>
    %168 = vector.broadcast %160 : vector<64x1xf32> to vector<64x32xf32>
    %169 = arith.subf %154, %168 : vector<64x32xf32>
    %cst_67 = arith.constant 9.99999974E-6 : f32
    %170 = vector.broadcast %cst_67 : f32 to vector<64x1xf32>
    %171 = arith.addf %167, %170 : vector<64x1xf32>
    %172 = math.rsqrt %171 : vector<64x1xf32>
    %173 = vector.broadcast %172 : vector<64x1xf32> to vector<64x32xf32>
    %174 = arith.mulf %169, %173 : vector<64x32xf32>
    %175 = vector.broadcast %155 : vector<1x32xf32> to vector<64x32xf32>
    %176 = arith.mulf %174, %175 : vector<64x32xf32>
    %177 = vector.broadcast %156 : vector<1x32xf32> to vector<64x32xf32>
    %178 = arith.addf %176, %177 : vector<64x32xf32>
    %179 = arith.truncf %178 : vector<64x32xf32> to vector<64x32xbf16>
    %c0_68 = arith.constant 0 : index
    %c0_69 = arith.constant 0 : index
    %180 = vector.load %arg12[%c0_68, %c0_69] : memref<32x128xbf16, #tpu.memory_space<vmem>>, vector<32x128xbf16>
    %cst_70 = arith.constant dense<0.000000e+00> : vector<64x128xf32>
    %181 = tpu.matmul %179, %180, %cst_70 {dimension_numbers = #tpu.dot_dimension_numbers<[1], [0], [0], [1], [0, 0, 1, 1], [], []>} : vector<64x32xbf16>, vector<32x128xbf16>, vector<64x128xf32> -> vector<64x128xf32>
    %c0_71 = arith.constant 0 : index
    %c0_72 = arith.constant 0 : index
    %182 = vector.load %arg13[%c0_71, %c0_72] : memref<1x128xf32, #tpu.memory_space<vmem>>, vector<1x128xf32>
    %183 = vector.broadcast %182 : vector<1x128xf32> to vector<64x128xf32>
    %184 = arith.addf %181, %183 : vector<64x128xf32>
    %cst_73 = arith.constant 5.000000e-01 : f32
    %185 = vector.broadcast %cst_73 : f32 to vector<64x128xf32>
    %186 = arith.mulf %185, %184 : vector<64x128xf32>
    %cst_74 = arith.constant 0.707106769 : f32
    %187 = vector.broadcast %cst_74 : f32 to vector<64x128xf32>
    %188 = arith.mulf %184, %187 : vector<64x128xf32>
    %cst_75 = arith.constant 0.000000e+00 : f32
    %189 = vector.broadcast %cst_75 : f32 to vector<64x128xf32>
    %190 = arith.cmpf oge, %188, %189 : vector<64x128xf32>
    %cst_76 = arith.constant 0.000000e+00 : f32
    %191 = vector.broadcast %cst_76 : f32 to vector<64x128xf32>
    %192 = arith.subf %191, %188 : vector<64x128xf32>
    %193 = arith.select %190, %188, %192 : vector<64x128xi1>, vector<64x128xf32>
    %cst_77 = arith.constant 0.327591091 : f32
    %194 = vector.broadcast %cst_77 : f32 to vector<64x128xf32>
    %195 = arith.mulf %194, %193 : vector<64x128xf32>
    %cst_78 = arith.constant 1.000000e+00 : f32
    %196 = vector.broadcast %cst_78 : f32 to vector<64x128xf32>
    %197 = arith.addf %196, %195 : vector<64x128xf32>
    %cst_79 = arith.constant 1.000000e+00 : f32
    %198 = vector.broadcast %cst_79 : f32 to vector<64x128xf32>
    %199 = arith.divf %198, %197 : vector<64x128xf32>
    %cst_80 = arith.constant 1.06140542 : f32
    %200 = vector.broadcast %cst_80 : f32 to vector<64x128xf32>
    %201 = arith.mulf %200, %199 : vector<64x128xf32>
    %cst_81 = arith.constant -1.45315206 : f32
    %202 = vector.broadcast %cst_81 : f32 to vector<64x128xf32>
    %203 = arith.addf %201, %202 : vector<64x128xf32>
    %204 = arith.mulf %203, %199 : vector<64x128xf32>
    %cst_82 = arith.constant 1.42141378 : f32
    %205 = vector.broadcast %cst_82 : f32 to vector<64x128xf32>
    %206 = arith.addf %204, %205 : vector<64x128xf32>
    %207 = arith.mulf %206, %199 : vector<64x128xf32>
    %cst_83 = arith.constant -0.284496725 : f32
    %208 = vector.broadcast %cst_83 : f32 to vector<64x128xf32>
    %209 = arith.addf %207, %208 : vector<64x128xf32>
    %210 = arith.mulf %209, %199 : vector<64x128xf32>
    %cst_84 = arith.constant 0.254829586 : f32
    %211 = vector.broadcast %cst_84 : f32 to vector<64x128xf32>
    %212 = arith.addf %210, %211 : vector<64x128xf32>
    %213 = arith.mulf %212, %199 : vector<64x128xf32>
    %cst_85 = arith.constant 0.000000e+00 : f32
    %214 = vector.broadcast %cst_85 : f32 to vector<64x128xf32>
    %215 = arith.subf %214, %193 : vector<64x128xf32>
    %216 = arith.mulf %215, %193 : vector<64x128xf32>
    %217 = math.exp %216 : vector<64x128xf32>
    %218 = arith.mulf %213, %217 : vector<64x128xf32>
    %cst_86 = arith.constant 1.000000e+00 : f32
    %219 = vector.broadcast %cst_86 : f32 to vector<64x128xf32>
    %220 = arith.subf %219, %218 : vector<64x128xf32>
    %cst_87 = arith.constant 0.000000e+00 : f32
    %221 = vector.broadcast %cst_87 : f32 to vector<64x128xf32>
    %222 = arith.cmpf oge, %188, %221 : vector<64x128xf32>
    %cst_88 = arith.constant 0.000000e+00 : f32
    %223 = vector.broadcast %cst_88 : f32 to vector<64x128xf32>
    %224 = arith.subf %223, %220 : vector<64x128xf32>
    %225 = arith.select %222, %220, %224 : vector<64x128xi1>, vector<64x128xf32>
    %cst_89 = arith.constant 1.000000e+00 : f32
    %226 = vector.broadcast %cst_89 : f32 to vector<64x128xf32>
    %227 = arith.addf %226, %225 : vector<64x128xf32>
    %228 = arith.mulf %186, %227 : vector<64x128xf32>
    %229 = arith.truncf %228 : vector<64x128xf32> to vector<64x128xbf16>
    %c0_90 = arith.constant 0 : index
    %c0_91 = arith.constant 0 : index
    %230 = vector.load %arg14[%c0_90, %c0_91] : memref<128x32xbf16, #tpu.memory_space<vmem>>, vector<128x32xbf16>
    %cst_92 = arith.constant dense<0.000000e+00> : vector<64x32xf32>
    %231 = tpu.matmul %229, %230, %cst_92 {dimension_numbers = #tpu.dot_dimension_numbers<[1], [0], [0], [1], [0, 0, 1, 1], [], []>} : vector<64x128xbf16>, vector<128x32xbf16>, vector<64x32xf32> -> vector<64x32xf32>
    %c0_93 = arith.constant 0 : index
    %c0_94 = arith.constant 0 : index
    %232 = vector.load %arg15[%c0_93, %c0_94] : memref<1x32xf32, #tpu.memory_space<vmem>>, vector<1x32xf32>
    %233 = vector.broadcast %232 : vector<1x32xf32> to vector<64x32xf32>
    %234 = arith.addf %231, %233 : vector<64x32xf32>
    %235 = arith.addf %154, %234 : vector<64x32xf32>
    %c0_95 = arith.constant 0 : index
    %c0_96 = arith.constant 0 : index
    %c0_97 = arith.constant 0 : index
    %236 = vector.load %arg16[%c0_95, %c0_96, %c0_97] : memref<1x64x32xf32, #tpu.memory_space<vmem>>, vector<1x64x32xf32>
    %237 = vector.shape_cast %236 : vector<1x64x32xf32> to vector<64x32xf32>
    %238 = vector.shape_cast %235 : vector<64x32xf32> to vector<1x64x32xf32>
    tpu.vector_store %arg16[%c0_95, %c0_96, %c0_97], %238 {strides = array<i32>} : memref<1x64x32xf32, #tpu.memory_space<vmem>>, vector<1x64x32xf32>,
    return
  }
  func.func @transform_0(%arg0: i32) -> (i32, i32, i32) {
    %c0_i32 = arith.constant 0 : i32
    %c0_i32_0 = arith.constant 0 : i32
    %c0_i32_1 = arith.constant 0 : i32
    return %arg0, %c0_i32, %c0_i32_0 : i32, i32, i32
  }
  func.func @transform_1(%arg0: i32) -> (i32, i32, i32) {
    %c0_i32 = arith.constant 0 : i32
    %c0_i32_0 = arith.constant 0 : i32
    %c0_i32_1 = arith.constant 0 : i32
    %c0_i32_2 = arith.constant 0 : i32
    return %c0_i32, %c0_i32_0, %c0_i32_1 : i32, i32, i32
  }
  func.func @transform_2(%arg0: i32) -> (i32, i32, i32) {
    %c1_i32 = arith.constant 1 : i32
    %c0_i32 = arith.constant 0 : i32
    %0 = arith.cmpi eq, %c1_i32, %c0_i32 : i32
    %c1_i32_0 = arith.constant 1 : i32
    %1 = arith.select %0, %c1_i32_0, %c1_i32 : i32
    %2 = arith.remsi %arg0, %1 : i32
    %c0_i32_1 = arith.constant 0 : i32
    %3 = arith.cmpi ne, %2, %c0_i32_1 : i32
    %c0_i32_2 = arith.constant 0 : i32
    %4 = arith.cmpi slt, %2, %c0_i32_2 : i32
    %c0_i32_3 = arith.constant 0 : i32
    %5 = arith.cmpi slt, %1, %c0_i32_3 : i32
    %6 = arith.xori %4, %5 : i1
    %7 = arith.andi %6, %3 : i1
    %8 = arith.addi %2, %1 : i32
    %9 = arith.select %7, %8, %2 : i32
    %c0_i32_4 = arith.constant 0 : i32
    %c0_i32_5 = arith.constant 0 : i32
    %c0_i32_6 = arith.constant 0 : i32
    return %9, %c0_i32_4, %c0_i32_5 : i32, i32, i32
  }
  func.func @transform_3(%arg0: i32) -> (i32, i32) {
    %c0_i32 = arith.constant 0 : i32
    %c0_i32_0 = arith.constant 0 : i32
    %c0_i32_1 = arith.constant 0 : i32
    return %c0_i32, %c0_i32_0 : i32, i32
  }
  func.func @transform_4(%arg0: i32) -> (i32, i32) {
    %c0_i32 = arith.constant 0 : i32
    %c0_i32_0 = arith.constant 0 : i32
    %c0_i32_1 = arith.constant 0 : i32
    return %c0_i32, %c0_i32_0 : i32, i32
  }
  func.func @transform_5(%arg0: i32) -> (i32, i32) {
    %c0_i32 = arith.constant 0 : i32
    %c0_i32_0 = arith.constant 0 : i32
    %c0_i32_1 = arith.constant 0 : i32
    return %c0_i32, %c0_i32_0 : i32, i32
  }
  func.func @transform_6(%arg0: i32) -> (i32, i32) {
    %c0_i32 = arith.constant 0 : i32
    %c0_i32_0 = arith.constant 0 : i32
    %c0_i32_1 = arith.constant 0 : i32
    return %c0_i32, %c0_i32_0 : i32, i32
  }
  func.func @transform_7(%arg0: i32) -> (i32, i32) {
    %c0_i32 = arith.constant 0 : i32
    %c0_i32_0 = arith.constant 0 : i32
    %c0_i32_1 = arith.constant 0 : i32
    return %c0_i32, %c0_i32_0 : i32, i32
  }
  func.func @transform_8(%arg0: i32) -> (i32, i32) {
    %c0_i32 = arith.constant 0 : i32
    %c0_i32_0 = arith.constant 0 : i32
    %c0_i32_1 = arith.constant 0 : i32
    return %c0_i32, %c0_i32_0 : i32, i32
  }
  func.func @transform_9(%arg0: i32) -> (i32, i32) {
    %c0_i32 = arith.constant 0 : i32
    %c0_i32_0 = arith.constant 0 : i32
    %c0_i32_1 = arith.constant 0 : i32
    return %c0_i32, %c0_i32_0 : i32, i32
  }
  func.func @transform_10(%arg0: i32) -> (i32, i32) {
    %c0_i32 = arith.constant 0 : i32
    %c0_i32_0 = arith.constant 0 : i32
    %c0_i32_1 = arith.constant 0 : i32
    return %c0_i32, %c0_i32_0 : i32, i32
  }
  func.func @transform_11(%arg0: i32) -> (i32, i32) {
    %c0_i32 = arith.constant 0 : i32
    %c0_i32_0 = arith.constant 0 : i32
    %c0_i32_1 = arith.constant 0 : i32
    return %c0_i32, %c0_i32_0 : i32, i32
  }
  func.func @transform_12(%arg0: i32) -> (i32, i32) {
    %c0_i32 = arith.constant 0 : i32
    %c0_i32_0 = arith.constant 0 : i32
    %c0_i32_1 = arith.constant 0 : i32
    return %c0_i32, %c0_i32_0 : i32, i32
  }
  func.func @transform_13(%arg0: i32) -> (i32, i32) {
    %c0_i32 = arith.constant 0 : i32
    %c0_i32_0 = arith.constant 0 : i32
    %c0_i32_1 = arith.constant 0 : i32
    return %c0_i32, %c0_i32_0 : i32, i32
  }
  func.func @transform_14(%arg0: i32) -> (i32, i32) {
    %c0_i32 = arith.constant 0 : i32
    %c0_i32_0 = arith.constant 0 : i32
    %c0_i32_1 = arith.constant 0 : i32
    return %c0_i32, %c0_i32_0 : i32, i32
  }
  func.func @transform_15(%arg0: i32) -> (i32, i32, i32) {
    %c0_i32 = arith.constant 0 : i32
    %c0_i32_0 = arith.constant 0 : i32
    %c0_i32_1 = arith.constant 0 : i32
    return %arg0, %c0_i32, %c0_i32_0 : i32, i32, i32
  }
}

module attributes {stable_mosaic.version = 11 : i64} {
  func.func @_swin_block_kernel(%arg0: i32, %arg1: memref<1x64x32xf32, #tpu.memory_space<vmem>>, %arg2: memref<4x64x64xf32, #tpu.memory_space<vmem>>, %arg3: memref<1x64x64xf32, #tpu.memory_space<vmem>>, %arg4: memref<1x32xf32, #tpu.memory_space<vmem>>, %arg5: memref<1x32xf32, #tpu.memory_space<vmem>>, %arg6: memref<32x96xbf16, #tpu.memory_space<vmem>>, %arg7: memref<1x96xf32, #tpu.memory_space<vmem>>, %arg8: memref<32x32xbf16, #tpu.memory_space<vmem>>, %arg9: memref<1x32xf32, #tpu.memory_space<vmem>>, %arg10: memref<1x32xf32, #tpu.memory_space<vmem>>, %arg11: memref<1x32xf32, #tpu.memory_space<vmem>>, %arg12: memref<32x128xbf16, #tpu.memory_space<vmem>>, %arg13: memref<1x128xf32, #tpu.memory_space<vmem>>, %arg14: memref<128x32xbf16, #tpu.memory_space<vmem>>, %arg15: memref<1x32xf32, #tpu.memory_space<vmem>>, %arg16: memref<1x64x32xf32, #tpu.memory_space<vmem>>) attributes {dimension_semantics = [#tpu.dimension_semantics<parallel>], iteration_bounds = array<i64: 8>, scalar_prefetch = 0 : i64, scratch_operands = 0 : i64, tpu.core_type = #tpu.core_type<tc>, window_params = [{transform_indices = @transform_0, window_bounds = array<i64: 1, 64, 32>}, {pipeline_mode = #tpu.pipeline_mode<synchronous>, transform_indices = @transform_1, window_bounds = array<i64: 4, 64, 64>}, {transform_indices = @transform_2, window_bounds = array<i64: 1, 64, 64>}, {pipeline_mode = #tpu.pipeline_mode<synchronous>, transform_indices = @transform_3, window_bounds = array<i64: 1, 32>}, {pipeline_mode = #tpu.pipeline_mode<synchronous>, transform_indices = @transform_4, window_bounds = array<i64: 1, 32>}, {pipeline_mode = #tpu.pipeline_mode<synchronous>, transform_indices = @transform_5, window_bounds = array<i64: 32, 96>}, {pipeline_mode = #tpu.pipeline_mode<synchronous>, transform_indices = @transform_6, window_bounds = array<i64: 1, 96>}, {pipeline_mode = #tpu.pipeline_mode<synchronous>, transform_indices = @transform_7, window_bounds = array<i64: 32, 32>}, {pipeline_mode = #tpu.pipeline_mode<synchronous>, transform_indices = @transform_8, window_bounds = array<i64: 1, 32>}, {pipeline_mode = #tpu.pipeline_mode<synchronous>, transform_indices = @transform_9, window_bounds = array<i64: 1, 32>}, {pipeline_mode = #tpu.pipeline_mode<synchronous>, transform_indices = @transform_10, window_bounds = array<i64: 1, 32>}, {pipeline_mode = #tpu.pipeline_mode<synchronous>, transform_indices = @transform_11, window_bounds = array<i64: 32, 128>}, {pipeline_mode = #tpu.pipeline_mode<synchronous>, transform_indices = @transform_12, window_bounds = array<i64: 1, 128>}, {pipeline_mode = #tpu.pipeline_mode<synchronous>, transform_indices = @transform_13, window_bounds = array<i64: 128, 32>}, {pipeline_mode = #tpu.pipeline_mode<synchronous>, transform_indices = @transform_14, window_bounds = array<i64: 1, 32>}, {transform_indices = @transform_15, window_bounds = array<i64: 1, 64, 32>}]} {
    %c0 = arith.constant 0 : index
    %c0_0 = arith.constant 0 : index
    %c0_1 = arith.constant 0 : index
    %0 = vector.load %arg1[%c0, %c0_0, %c0_1] : memref<1x64x32xf32, #tpu.memory_space<vmem>>, vector<1x64x32xf32>
    %1 = vector.shape_cast %0 : vector<1x64x32xf32> to vector<64x32xf32>
    %c0_2 = arith.constant 0 : index
    %c0_3 = arith.constant 0 : index
    %2 = vector.load %arg4[%c0_2, %c0_3] : memref<1x32xf32, #tpu.memory_space<vmem>>, vector<1x32xf32>
    %c0_4 = arith.constant 0 : index
    %c0_5 = arith.constant 0 : index
    %3 = vector.load %arg5[%c0_4, %c0_5] : memref<1x32xf32, #tpu.memory_space<vmem>>, vector<1x32xf32>
    %cst = arith.constant dense<0.000000e+00> : vector<64xf32>
    %4 = vector.multi_reduction <add>, %1, %cst [1] : vector<64x32xf32> to vector<64xf32>
    %5 = vector.shape_cast %4 : vector<64xf32> to vector<64x1xf32>
    %cst_6 = arith.constant 3.200000e+01 : f32
    %6 = vector.broadcast %cst_6 : f32 to vector<64x1xf32>
    %7 = arith.divf %5, %6 : vector<64x1xf32>
    %8 = vector.broadcast %7 : vector<64x1xf32> to vector<64x32xf32>
    %9 = arith.subf %1, %8 : vector<64x32xf32>
    %10 = arith.mulf %9, %9 : vector<64x32xf32>
    %cst_7 = arith.constant dense<0.000000e+00> : vector<64xf32>
    %11 = vector.multi_reduction <add>, %10, %cst_7 [1] : vector<64x32xf32> to vector<64xf32>
    %12 = vector.shape_cast %11 : vector<64xf32> to vector<64x1xf32>
    %cst_8 = arith.constant 3.200000e+01 : f32
    %13 = vector.broadcast %cst_8 : f32 to vector<64x1xf32>
    %14 = arith.divf %12, %13 : vector<64x1xf32>
    %15 = vector.broadcast %7 : vector<64x1xf32> to vector<64x32xf32>
    %16 = arith.subf %1, %15 : vector<64x32xf32>
    %cst_9 = arith.constant 9.99999974E-6 : f32
    %17 = vector.broadcast %cst_9 : f32 to vector<64x1xf32>
    %18 = arith.addf %14, %17 : vector<64x1xf32>
    %19 = math.rsqrt %18 : vector<64x1xf32>
    %20 = vector.broadcast %19 : vector<64x1xf32> to vector<64x32xf32>
    %21 = arith.mulf %16, %20 : vector<64x32xf32>
    %22 = vector.broadcast %2 : vector<1x32xf32> to vector<64x32xf32>
    %23 = arith.mulf %21, %22 : vector<64x32xf32>
    %24 = vector.broadcast %3 : vector<1x32xf32> to vector<64x32xf32>
    %25 = arith.addf %23, %24 : vector<64x32xf32>
    %26 = arith.truncf %25 : vector<64x32xf32> to vector<64x32xbf16>
    %c0_10 = arith.constant 0 : index
    %c0_11 = arith.constant 0 : index
    %27 = vector.load %arg6[%c0_10, %c0_11] : memref<32x96xbf16, #tpu.memory_space<vmem>>, vector<32x96xbf16>
    %cst_12 = arith.constant dense<0.000000e+00> : vector<64x96xf32>
    %28 = tpu.matmul %26, %27, %cst_12 {dimension_numbers = #tpu.dot_dimension_numbers<[1], [0], [0], [1], [0, 0, 1, 1], [], []>} : vector<64x32xbf16>, vector<32x96xbf16>, vector<64x96xf32> -> vector<64x96xf32>
    %c0_13 = arith.constant 0 : index
    %c0_14 = arith.constant 0 : index
    %29 = vector.load %arg7[%c0_13, %c0_14] : memref<1x96xf32, #tpu.memory_space<vmem>>, vector<1x96xf32>
    %30 = vector.broadcast %29 : vector<1x96xf32> to vector<64x96xf32>
    %31 = arith.addf %28, %30 : vector<64x96xf32>
    %c0_15 = arith.constant 0 : index
    %c0_16 = arith.constant 0 : index
    %c0_17 = arith.constant 0 : index
    %32 = vector.load %arg3[%c0_15, %c0_16, %c0_17] : memref<1x64x64xf32, #tpu.memory_space<vmem>>, vector<1x64x64xf32>
    %33 = vector.shape_cast %32 : vector<1x64x64xf32> to vector<64x64xf32>
    %cst_18 = arith.constant 0.000000e+00 : f32
    %34 = vector.broadcast %cst_18 : f32 to vector<64x32xf32>
    %35 = vector.extract_strided_slice %31 {offsets = [0, 0], sizes = [64, 8], strides = [1, 1]} : vector<64x96xf32> to vector<64x8xf32>
    %cst_19 = arith.constant 0.353553385 : f32
    %36 = vector.broadcast %cst_19 : f32 to vector<64x8xf32>
    %37 = arith.mulf %35, %36 : vector<64x8xf32>
    %38 = vector.extract_strided_slice %31 {offsets = [0, 32], sizes = [64, 8], strides = [1, 1]} : vector<64x96xf32> to vector<64x8xf32>
    %39 = vector.extract_strided_slice %31 {offsets = [0, 64], sizes = [64, 8], strides = [1, 1]} : vector<64x96xf32> to vector<64x8xf32>
    %40 = arith.truncf %37 : vector<64x8xf32> to vector<64x8xbf16>
    %41 = arith.truncf %38 : vector<64x8xf32> to vector<64x8xbf16>
    %cst_20 = arith.constant dense<0.000000e+00> : vector<64x64xf32>
    %42 = tpu.matmul %40, %41, %cst_20 {dimension_numbers = #tpu.dot_dimension_numbers<[1], [1], [0], [0], [0, 0, 1, 0], [], []>} : vector<64x8xbf16>, vector<64x8xbf16>, vector<64x64xf32> -> vector<64x64xf32>
    %c0_21 = arith.constant 0 : index
    %c0_22 = arith.constant 0 : index
    %c0_23 = arith.constant 0 : index
    %43 = vector.load %arg2[%c0_21, %c0_22, %c0_23] : memref<4x64x64xf32, #tpu.memory_space<vmem>>, vector<1x64x64xf32>
    %44 = vector.shape_cast %43 : vector<1x64x64xf32> to vector<64x64xf32>
    %45 = arith.addf %42, %44 : vector<64x64xf32>
    %46 = arith.addf %45, %33 : vector<64x64xf32>
    %cst_24 = arith.constant dense<0xFF800000> : vector<64xf32>
    %47 = vector.multi_reduction <maximumf>, %46, %cst_24 [1] : vector<64x64xf32> to vector<64xf32>
    %48 = vector.shape_cast %47 : vector<64xf32> to vector<64x1xf32>
    %49 = vector.broadcast %48 : vector<64x1xf32> to vector<64x64xf32>
    %50 = arith.subf %46, %49 : vector<64x64xf32>
    %51 = math.exp %50 : vector<64x64xf32>
    %cst_25 = arith.constant dense<0.000000e+00> : vector<64xf32>
    %52 = vector.multi_reduction <add>, %51, %cst_25 [1] : vector<64x64xf32> to vector<64xf32>
    %53 = vector.shape_cast %52 : vector<64xf32> to vector<64x1xf32>
    %54 = tpu.reciprocal %53 {approx = true} : vector<64x1xf32> -> vector<64x1xf32>
    %55 = vector.broadcast %54 : vector<64x1xf32> to vector<64x64xf32>
    %56 = arith.mulf %51, %55 : vector<64x64xf32>
    %57 = arith.truncf %56 : vector<64x64xf32> to vector<64x64xbf16>
    %58 = arith.truncf %39 : vector<64x8xf32> to vector<64x8xbf16>
    %cst_26 = arith.constant dense<0.000000e+00> : vector<64x8xf32>
    %59 = tpu.matmul %57, %58, %cst_26 {dimension_numbers = #tpu.dot_dimension_numbers<[1], [0], [0], [1], [0, 0, 1, 1], [], []>} : vector<64x64xbf16>, vector<64x8xbf16>, vector<64x8xf32> -> vector<64x8xf32>
    %60 = arith.truncf %59 : vector<64x8xf32> to vector<64x8xbf16>
    %c0_27 = arith.constant 0 : index
    %c0_28 = arith.constant 0 : index
    %61 = vector.load %arg8[%c0_27, %c0_28] : memref<32x32xbf16, #tpu.memory_space<vmem>>, vector<8x32xbf16>
    %cst_29 = arith.constant dense<0.000000e+00> : vector<64x32xf32>
    %62 = tpu.matmul %60, %61, %cst_29 {dimension_numbers = #tpu.dot_dimension_numbers<[1], [0], [0], [1], [0, 0, 1, 1], [], []>} : vector<64x8xbf16>, vector<8x32xbf16>, vector<64x32xf32> -> vector<64x32xf32>
    %63 = arith.addf %34, %62 : vector<64x32xf32>
    %64 = vector.extract_strided_slice %31 {offsets = [0, 8], sizes = [64, 8], strides = [1, 1]} : vector<64x96xf32> to vector<64x8xf32>
    %cst_30 = arith.constant 0.353553385 : f32
    %65 = vector.broadcast %cst_30 : f32 to vector<64x8xf32>
    %66 = arith.mulf %64, %65 : vector<64x8xf32>
    %67 = vector.extract_strided_slice %31 {offsets = [0, 40], sizes = [64, 8], strides = [1, 1]} : vector<64x96xf32> to vector<64x8xf32>
    %68 = vector.extract_strided_slice %31 {offsets = [0, 72], sizes = [64, 8], strides = [1, 1]} : vector<64x96xf32> to vector<64x8xf32>
    %69 = arith.truncf %66 : vector<64x8xf32> to vector<64x8xbf16>
    %70 = arith.truncf %67 : vector<64x8xf32> to vector<64x8xbf16>
    %cst_31 = arith.constant dense<0.000000e+00> : vector<64x64xf32>
    %71 = tpu.matmul %69, %70, %cst_31 {dimension_numbers = #tpu.dot_dimension_numbers<[1], [1], [0], [0], [0, 0, 1, 0], [], []>} : vector<64x8xbf16>, vector<64x8xbf16>, vector<64x64xf32> -> vector<64x64xf32>
    %c1 = arith.constant 1 : index
    %c0_32 = arith.constant 0 : index
    %c0_33 = arith.constant 0 : index
    %72 = vector.load %arg2[%c1, %c0_32, %c0_33] : memref<4x64x64xf32, #tpu.memory_space<vmem>>, vector<1x64x64xf32>
    %73 = vector.shape_cast %72 : vector<1x64x64xf32> to vector<64x64xf32>
    %74 = arith.addf %71, %73 : vector<64x64xf32>
    %75 = arith.addf %74, %33 : vector<64x64xf32>
    %cst_34 = arith.constant dense<0xFF800000> : vector<64xf32>
    %76 = vector.multi_reduction <maximumf>, %75, %cst_34 [1] : vector<64x64xf32> to vector<64xf32>
    %77 = vector.shape_cast %76 : vector<64xf32> to vector<64x1xf32>
    %78 = vector.broadcast %77 : vector<64x1xf32> to vector<64x64xf32>
    %79 = arith.subf %75, %78 : vector<64x64xf32>
    %80 = math.exp %79 : vector<64x64xf32>
    %cst_35 = arith.constant dense<0.000000e+00> : vector<64xf32>
    %81 = vector.multi_reduction <add>, %80, %cst_35 [1] : vector<64x64xf32> to vector<64xf32>
    %82 = vector.shape_cast %81 : vector<64xf32> to vector<64x1xf32>
    %83 = tpu.reciprocal %82 {approx = true} : vector<64x1xf32> -> vector<64x1xf32>
    %84 = vector.broadcast %83 : vector<64x1xf32> to vector<64x64xf32>
    %85 = arith.mulf %80, %84 : vector<64x64xf32>
    %86 = arith.truncf %85 : vector<64x64xf32> to vector<64x64xbf16>
    %87 = arith.truncf %68 : vector<64x8xf32> to vector<64x8xbf16>
    %cst_36 = arith.constant dense<0.000000e+00> : vector<64x8xf32>
    %88 = tpu.matmul %86, %87, %cst_36 {dimension_numbers = #tpu.dot_dimension_numbers<[1], [0], [0], [1], [0, 0, 1, 1], [], []>} : vector<64x64xbf16>, vector<64x8xbf16>, vector<64x8xf32> -> vector<64x8xf32>
    %89 = arith.truncf %88 : vector<64x8xf32> to vector<64x8xbf16>
    %c8 = arith.constant 8 : index
    %c0_37 = arith.constant 0 : index
    %90 = vector.load %arg8[%c8, %c0_37] : memref<32x32xbf16, #tpu.memory_space<vmem>>, vector<8x32xbf16>
    %cst_38 = arith.constant dense<0.000000e+00> : vector<64x32xf32>
    %91 = tpu.matmul %89, %90, %cst_38 {dimension_numbers = #tpu.dot_dimension_numbers<[1], [0], [0], [1], [0, 0, 1, 1], [], []>} : vector<64x8xbf16>, vector<8x32xbf16>, vector<64x32xf32> -> vector<64x32xf32>
    %92 = arith.addf %63, %91 : vector<64x32xf32>
    %93 = vector.extract_strided_slice %31 {offsets = [0, 16], sizes = [64, 8], strides = [1, 1]} : vector<64x96xf32> to vector<64x8xf32>
    %cst_39 = arith.constant 0.353553385 : f32
    %94 = vector.broadcast %cst_39 : f32 to vector<64x8xf32>
    %95 = arith.mulf %93, %94 : vector<64x8xf32>
    %96 = vector.extract_strided_slice %31 {offsets = [0, 48], sizes = [64, 8], strides = [1, 1]} : vector<64x96xf32> to vector<64x8xf32>
    %97 = vector.extract_strided_slice %31 {offsets = [0, 80], sizes = [64, 8], strides = [1, 1]} : vector<64x96xf32> to vector<64x8xf32>
    %98 = arith.truncf %95 : vector<64x8xf32> to vector<64x8xbf16>
    %99 = arith.truncf %96 : vector<64x8xf32> to vector<64x8xbf16>
    %cst_40 = arith.constant dense<0.000000e+00> : vector<64x64xf32>
    %100 = tpu.matmul %98, %99, %cst_40 {dimension_numbers = #tpu.dot_dimension_numbers<[1], [1], [0], [0], [0, 0, 1, 0], [], []>} : vector<64x8xbf16>, vector<64x8xbf16>, vector<64x64xf32> -> vector<64x64xf32>
    %c2 = arith.constant 2 : index
    %c0_41 = arith.constant 0 : index
    %c0_42 = arith.constant 0 : index
    %101 = vector.load %arg2[%c2, %c0_41, %c0_42] : memref<4x64x64xf32, #tpu.memory_space<vmem>>, vector<1x64x64xf32>
    %102 = vector.shape_cast %101 : vector<1x64x64xf32> to vector<64x64xf32>
    %103 = arith.addf %100, %102 : vector<64x64xf32>
    %104 = arith.addf %103, %33 : vector<64x64xf32>
    %cst_43 = arith.constant dense<0xFF800000> : vector<64xf32>
    %105 = vector.multi_reduction <maximumf>, %104, %cst_43 [1] : vector<64x64xf32> to vector<64xf32>
    %106 = vector.shape_cast %105 : vector<64xf32> to vector<64x1xf32>
    %107 = vector.broadcast %106 : vector<64x1xf32> to vector<64x64xf32>
    %108 = arith.subf %104, %107 : vector<64x64xf32>
    %109 = math.exp %108 : vector<64x64xf32>
    %cst_44 = arith.constant dense<0.000000e+00> : vector<64xf32>
    %110 = vector.multi_reduction <add>, %109, %cst_44 [1] : vector<64x64xf32> to vector<64xf32>
    %111 = vector.shape_cast %110 : vector<64xf32> to vector<64x1xf32>
    %112 = tpu.reciprocal %111 {approx = true} : vector<64x1xf32> -> vector<64x1xf32>
    %113 = vector.broadcast %112 : vector<64x1xf32> to vector<64x64xf32>
    %114 = arith.mulf %109, %113 : vector<64x64xf32>
    %115 = arith.truncf %114 : vector<64x64xf32> to vector<64x64xbf16>
    %116 = arith.truncf %97 : vector<64x8xf32> to vector<64x8xbf16>
    %cst_45 = arith.constant dense<0.000000e+00> : vector<64x8xf32>
    %117 = tpu.matmul %115, %116, %cst_45 {dimension_numbers = #tpu.dot_dimension_numbers<[1], [0], [0], [1], [0, 0, 1, 1], [], []>} : vector<64x64xbf16>, vector<64x8xbf16>, vector<64x8xf32> -> vector<64x8xf32>
    %118 = arith.truncf %117 : vector<64x8xf32> to vector<64x8xbf16>
    %c16 = arith.constant 16 : index
    %c0_46 = arith.constant 0 : index
    %119 = vector.load %arg8[%c16, %c0_46] : memref<32x32xbf16, #tpu.memory_space<vmem>>, vector<8x32xbf16>
    %cst_47 = arith.constant dense<0.000000e+00> : vector<64x32xf32>
    %120 = tpu.matmul %118, %119, %cst_47 {dimension_numbers = #tpu.dot_dimension_numbers<[1], [0], [0], [1], [0, 0, 1, 1], [], []>} : vector<64x8xbf16>, vector<8x32xbf16>, vector<64x32xf32> -> vector<64x32xf32>
    %121 = arith.addf %92, %120 : vector<64x32xf32>
    %122 = vector.extract_strided_slice %31 {offsets = [0, 24], sizes = [64, 8], strides = [1, 1]} : vector<64x96xf32> to vector<64x8xf32>
    %cst_48 = arith.constant 0.353553385 : f32
    %123 = vector.broadcast %cst_48 : f32 to vector<64x8xf32>
    %124 = arith.mulf %122, %123 : vector<64x8xf32>
    %125 = vector.extract_strided_slice %31 {offsets = [0, 56], sizes = [64, 8], strides = [1, 1]} : vector<64x96xf32> to vector<64x8xf32>
    %126 = vector.extract_strided_slice %31 {offsets = [0, 88], sizes = [64, 8], strides = [1, 1]} : vector<64x96xf32> to vector<64x8xf32>
    %127 = arith.truncf %124 : vector<64x8xf32> to vector<64x8xbf16>
    %128 = arith.truncf %125 : vector<64x8xf32> to vector<64x8xbf16>
    %cst_49 = arith.constant dense<0.000000e+00> : vector<64x64xf32>
    %129 = tpu.matmul %127, %128, %cst_49 {dimension_numbers = #tpu.dot_dimension_numbers<[1], [1], [0], [0], [0, 0, 1, 0], [], []>} : vector<64x8xbf16>, vector<64x8xbf16>, vector<64x64xf32> -> vector<64x64xf32>
    %c3 = arith.constant 3 : index
    %c0_50 = arith.constant 0 : index
    %c0_51 = arith.constant 0 : index
    %130 = vector.load %arg2[%c3, %c0_50, %c0_51] : memref<4x64x64xf32, #tpu.memory_space<vmem>>, vector<1x64x64xf32>
    %131 = vector.shape_cast %130 : vector<1x64x64xf32> to vector<64x64xf32>
    %132 = arith.addf %129, %131 : vector<64x64xf32>
    %133 = arith.addf %132, %33 : vector<64x64xf32>
    %cst_52 = arith.constant dense<0xFF800000> : vector<64xf32>
    %134 = vector.multi_reduction <maximumf>, %133, %cst_52 [1] : vector<64x64xf32> to vector<64xf32>
    %135 = vector.shape_cast %134 : vector<64xf32> to vector<64x1xf32>
    %136 = vector.broadcast %135 : vector<64x1xf32> to vector<64x64xf32>
    %137 = arith.subf %133, %136 : vector<64x64xf32>
    %138 = math.exp %137 : vector<64x64xf32>
    %cst_53 = arith.constant dense<0.000000e+00> : vector<64xf32>
    %139 = vector.multi_reduction <add>, %138, %cst_53 [1] : vector<64x64xf32> to vector<64xf32>
    %140 = vector.shape_cast %139 : vector<64xf32> to vector<64x1xf32>
    %141 = tpu.reciprocal %140 {approx = true} : vector<64x1xf32> -> vector<64x1xf32>
    %142 = vector.broadcast %141 : vector<64x1xf32> to vector<64x64xf32>
    %143 = arith.mulf %138, %142 : vector<64x64xf32>
    %144 = arith.truncf %143 : vector<64x64xf32> to vector<64x64xbf16>
    %145 = arith.truncf %126 : vector<64x8xf32> to vector<64x8xbf16>
    %cst_54 = arith.constant dense<0.000000e+00> : vector<64x8xf32>
    %146 = tpu.matmul %144, %145, %cst_54 {dimension_numbers = #tpu.dot_dimension_numbers<[1], [0], [0], [1], [0, 0, 1, 1], [], []>} : vector<64x64xbf16>, vector<64x8xbf16>, vector<64x8xf32> -> vector<64x8xf32>
    %147 = arith.truncf %146 : vector<64x8xf32> to vector<64x8xbf16>
    %c24 = arith.constant 24 : index
    %c0_55 = arith.constant 0 : index
    %148 = vector.load %arg8[%c24, %c0_55] : memref<32x32xbf16, #tpu.memory_space<vmem>>, vector<8x32xbf16>
    %cst_56 = arith.constant dense<0.000000e+00> : vector<64x32xf32>
    %149 = tpu.matmul %147, %148, %cst_56 {dimension_numbers = #tpu.dot_dimension_numbers<[1], [0], [0], [1], [0, 0, 1, 1], [], []>} : vector<64x8xbf16>, vector<8x32xbf16>, vector<64x32xf32> -> vector<64x32xf32>
    %150 = arith.addf %121, %149 : vector<64x32xf32>
    %151 = arith.addf %1, %150 : vector<64x32xf32>
    %c0_57 = arith.constant 0 : index
    %c0_58 = arith.constant 0 : index
    %152 = vector.load %arg9[%c0_57, %c0_58] : memref<1x32xf32, #tpu.memory_space<vmem>>, vector<1x32xf32>
    %153 = vector.broadcast %152 : vector<1x32xf32> to vector<64x32xf32>
    %154 = arith.addf %151, %153 : vector<64x32xf32>
    %c0_59 = arith.constant 0 : index
    %c0_60 = arith.constant 0 : index
    %155 = vector.load %arg10[%c0_59, %c0_60] : memref<1x32xf32, #tpu.memory_space<vmem>>, vector<1x32xf32>
    %c0_61 = arith.constant 0 : index
    %c0_62 = arith.constant 0 : index
    %156 = vector.load %arg11[%c0_61, %c0_62] : memref<1x32xf32, #tpu.memory_space<vmem>>, vector<1x32xf32>
    %cst_63 = arith.constant dense<0.000000e+00> : vector<64xf32>
    %157 = vector.multi_reduction <add>, %154, %cst_63 [1] : vector<64x32xf32> to vector<64xf32>
    %158 = vector.shape_cast %157 : vector<64xf32> to vector<64x1xf32>
    %cst_64 = arith.constant 3.200000e+01 : f32
    %159 = vector.broadcast %cst_64 : f32 to vector<64x1xf32>
    %160 = arith.divf %158, %159 : vector<64x1xf32>
    %161 = vector.broadcast %160 : vector<64x1xf32> to vector<64x32xf32>
    %162 = arith.subf %154, %161 : vector<64x32xf32>
    %163 = arith.mulf %162, %162 : vector<64x32xf32>
    %cst_65 = arith.constant dense<0.000000e+00> : vector<64xf32>
    %164 = vector.multi_reduction <add>, %163, %cst_65 [1] : vector<64x32xf32> to vector<64xf32>
    %165 = vector.shape_cast %164 : vector<64xf32> to vector<64x1xf32>
    %cst_66 = arith.constant 3.200000e+01 : f32
    %166 = vector.broadcast %cst_66 : f32 to vector<64x1xf32>
    %167 = arith.divf %165, %166 : vector<64x1xf32>
    %168 = vector.broadcast %160 : vector<64x1xf32> to vector<64x32xf32>
    %169 = arith.subf %154, %168 : vector<64x32xf32>
    %cst_67 = arith.constant 9.99999974E-6 : f32
    %170 = vector.broadcast %cst_67 : f32 to vector<64x1xf32>
    %171 = arith.addf %167, %170 : vector<64x1xf32>
    %172 = math.rsqrt %171 : vector<64x1xf32>
    %173 = vector.broadcast %172 : vector<64x1xf32> to vector<64x32xf32>
    %174 = arith.mulf %169, %173 : vector<64x32xf32>
    %175 = vector.broadcast %155 : vector<1x32xf32> to vector<64x32xf32>
    %176 = arith.mulf %174, %175 : vector<64x32xf32>
    %177 = vector.broadcast %156 : vector<1x32xf32> to vector<64x32xf32>
    %178 = arith.addf %176, %177 : vector<64x32xf32>
    %179 = arith.truncf %178 : vector<64x32xf32> to vector<64x32xbf16>
    %c0_68 = arith.constant 0 : index
    %c0_69 = arith.constant 0 : index
    %180 = vector.load %arg12[%c0_68, %c0_69] : memref<32x128xbf16, #tpu.memory_space<vmem>>, vector<32x128xbf16>
    %cst_70 = arith.constant dense<0.000000e+00> : vector<64x128xf32>
    %181 = tpu.matmul %179, %180, %cst_70 {dimension_numbers = #tpu.dot_dimension_numbers<[1], [0], [0], [1], [0, 0, 1, 1], [], []>} : vector<64x32xbf16>, vector<32x128xbf16>, vector<64x128xf32> -> vector<64x128xf32>
    %c0_71 = arith.constant 0 : index
    %c0_72 = arith.constant 0 : index
    %182 = vector.load %arg13[%c0_71, %c0_72] : memref<1x128xf32, #tpu.memory_space<vmem>>, vector<1x128xf32>
    %183 = vector.broadcast %182 : vector<1x128xf32> to vector<64x128xf32>
    %184 = arith.addf %181, %183 : vector<64x128xf32>
    %cst_73 = arith.constant 5.000000e-01 : f32
    %185 = vector.broadcast %cst_73 : f32 to vector<64x128xf32>
    %186 = arith.mulf %185, %184 : vector<64x128xf32>
    %cst_74 = arith.constant 0.707106769 : f32
    %187 = vector.broadcast %cst_74 : f32 to vector<64x128xf32>
    %188 = arith.mulf %184, %187 : vector<64x128xf32>
    %cst_75 = arith.constant 0.000000e+00 : f32
    %189 = vector.broadcast %cst_75 : f32 to vector<64x128xf32>
    %190 = arith.cmpf oge, %188, %189 : vector<64x128xf32>
    %cst_76 = arith.constant 0.000000e+00 : f32
    %191 = vector.broadcast %cst_76 : f32 to vector<64x128xf32>
    %192 = arith.subf %191, %188 : vector<64x128xf32>
    %193 = arith.select %190, %188, %192 : vector<64x128xi1>, vector<64x128xf32>
    %cst_77 = arith.constant 0.327591091 : f32
    %194 = vector.broadcast %cst_77 : f32 to vector<64x128xf32>
    %195 = arith.mulf %194, %193 : vector<64x128xf32>
    %cst_78 = arith.constant 1.000000e+00 : f32
    %196 = vector.broadcast %cst_78 : f32 to vector<64x128xf32>
    %197 = arith.addf %196, %195 : vector<64x128xf32>
    %cst_79 = arith.constant 1.000000e+00 : f32
    %198 = vector.broadcast %cst_79 : f32 to vector<64x128xf32>
    %199 = arith.divf %198, %197 : vector<64x128xf32>
    %cst_80 = arith.constant 1.06140542 : f32
    %200 = vector.broadcast %cst_80 : f32 to vector<64x128xf32>
    %201 = arith.mulf %200, %199 : vector<64x128xf32>
    %cst_81 = arith.constant -1.45315206 : f32
    %202 = vector.broadcast %cst_81 : f32 to vector<64x128xf32>
    %203 = arith.addf %201, %202 : vector<64x128xf32>
    %204 = arith.mulf %203, %199 : vector<64x128xf32>
    %cst_82 = arith.constant 1.42141378 : f32
    %205 = vector.broadcast %cst_82 : f32 to vector<64x128xf32>
    %206 = arith.addf %204, %205 : vector<64x128xf32>
    %207 = arith.mulf %206, %199 : vector<64x128xf32>
    %cst_83 = arith.constant -0.284496725 : f32
    %208 = vector.broadcast %cst_83 : f32 to vector<64x128xf32>
    %209 = arith.addf %207, %208 : vector<64x128xf32>
    %210 = arith.mulf %209, %199 : vector<64x128xf32>
    %cst_84 = arith.constant 0.254829586 : f32
    %211 = vector.broadcast %cst_84 : f32 to vector<64x128xf32>
    %212 = arith.addf %210, %211 : vector<64x128xf32>
    %213 = arith.mulf %212, %199 : vector<64x128xf32>
    %cst_85 = arith.constant 0.000000e+00 : f32
    %214 = vector.broadcast %cst_85 : f32 to vector<64x128xf32>
    %215 = arith.subf %214, %193 : vector<64x128xf32>
    %216 = arith.mulf %215, %193 : vector<64x128xf32>
    %217 = math.exp %216 : vector<64x128xf32>
    %218 = arith.mulf %213, %217 : vector<64x128xf32>
    %cst_86 = arith.constant 1.000000e+00 : f32
    %219 = vector.broadcast %cst_86 : f32 to vector<64x128xf32>
    %220 = arith.subf %219, %218 : vector<64x128xf32>
    %cst_87 = arith.constant 0.000000e+00 : f32
    %221 = vector.broadcast %cst_87 : f32 to vector<64x128xf32>
    %222 = arith.cmpf oge, %188, %221 : vector<64x128xf32>
    %cst_88 = arith.constant 0.000000e+00 : f32
    %223 = vector.broadcast %cst_88 : f32 to vector<64x128xf32>
    %224 = arith.subf %223, %220 : vector<64x128xf32>
    %225 = arith.select %222, %220, %224 : vector<64x128xi1>, vector<64x128xf32>
    %cst_89 = arith.constant 1.000000e+00 : f32
    %226 = vector.broadcast %cst_89 : f32 to vector<64x128xf32>
    %227 = arith.addf %226, %225 : vector<64x128xf32>
    %228 = arith.mulf %186, %227 : vector<64x128xf32>
    %229 = arith.truncf %228 : vector<64x128xf32> to vector<64x128xbf16>
    %c0_90 = arith.constant 0 : index
    %c0_91 = arith.constant 0 : index
    %230 = vector.load %arg14[%c0_90, %c0_91] : memref<128x32xbf16, #tpu.memory_space<vmem>>, vector<128x32xbf16>
    %cst_92 = arith.constant dense<0.000000e+00> : vector<64x32xf32>
    %231 = tpu.matmul %229, %230, %cst_92 {dimension_numbers = #tpu.dot_dimension_numbers<[1], [0], [0], [1], [0, 0, 1, 1], [], []>} : vector<64x128xbf16>, vector<128x32xbf16>, vector<64x32xf32> -> vector<64x32xf32>
    %c0_93 = arith.constant 0 : index
    %c0_94 = arith.constant 0 : index
    %232 = vector.load %arg15[%c0_93, %c0_94] : memref<1x32xf32, #tpu.memory_space<vmem>>, vector<1x32xf32>
    %233 = vector.broadcast %232 : vector<1x32xf32> to vector<64x32xf32>
    %234 = arith.addf %231, %233 : vector<64x32xf32>
    %235 = arith.addf %154, %234 : vector<64x32xf32>
    %c0_95 = arith.constant 0 : index
    %c0_96 = arith.constant 0 : index
    %c0_97 = arith.constant 0 : index
    %236 = vector.load %arg16[%c0_95, %c0_96, %c0_97] : memref<1x64x32xf32, #tpu.memory_space<vmem>>, vector<1x64x32xf32>
    %237 = vector.shape_cast %236 : vector<1x64x32xf32> to vector<64x32xf32>
    %238 = vector.shape_cast %235 : vector<64x32xf32> to vector<1x64x32xf32>
    tpu.vector_store %arg16[%c0_95, %c0_96, %c0_97], %238 {strides = array<i32>} : memref<1x64x32xf32, #tpu.memory_space<vmem>>, vector<1x64x32xf32>,
    return
  }
  func.func @transform_0(%arg0: i32) -> (i32, i32, i32) {
    %c0_i32 = arith.constant 0 : i32
    %c0_i32_0 = arith.constant 0 : i32
    %c0_i32_1 = arith.constant 0 : i32
    return %arg0, %c0_i32, %c0_i32_0 : i32, i32, i32
  }
  func.func @transform_1(%arg0: i32) -> (i32, i32, i32) {
    %c0_i32 = arith.constant 0 : i32
    %c0_i32_0 = arith.constant 0 : i32
    %c0_i32_1 = arith.constant 0 : i32
    %c0_i32_2 = arith.constant 0 : i32
    return %c0_i32, %c0_i32_0, %c0_i32_1 : i32, i32, i32
  }
  func.func @transform_2(%arg0: i32) -> (i32, i32, i32) {
    %c4_i32 = arith.constant 4 : i32
    %c0_i32 = arith.constant 0 : i32
    %0 = arith.cmpi eq, %c4_i32, %c0_i32 : i32
    %c1_i32 = arith.constant 1 : i32
    %1 = arith.select %0, %c1_i32, %c4_i32 : i32
    %2 = arith.remsi %arg0, %1 : i32
    %c0_i32_0 = arith.constant 0 : i32
    %3 = arith.cmpi ne, %2, %c0_i32_0 : i32
    %c0_i32_1 = arith.constant 0 : i32
    %4 = arith.cmpi slt, %2, %c0_i32_1 : i32
    %c0_i32_2 = arith.constant 0 : i32
    %5 = arith.cmpi slt, %1, %c0_i32_2 : i32
    %6 = arith.xori %4, %5 : i1
    %7 = arith.andi %6, %3 : i1
    %8 = arith.addi %2, %1 : i32
    %9 = arith.select %7, %8, %2 : i32
    %c0_i32_3 = arith.constant 0 : i32
    %c0_i32_4 = arith.constant 0 : i32
    %c0_i32_5 = arith.constant 0 : i32
    return %9, %c0_i32_3, %c0_i32_4 : i32, i32, i32
  }
  func.func @transform_3(%arg0: i32) -> (i32, i32) {
    %c0_i32 = arith.constant 0 : i32
    %c0_i32_0 = arith.constant 0 : i32
    %c0_i32_1 = arith.constant 0 : i32
    return %c0_i32, %c0_i32_0 : i32, i32
  }
  func.func @transform_4(%arg0: i32) -> (i32, i32) {
    %c0_i32 = arith.constant 0 : i32
    %c0_i32_0 = arith.constant 0 : i32
    %c0_i32_1 = arith.constant 0 : i32
    return %c0_i32, %c0_i32_0 : i32, i32
  }
  func.func @transform_5(%arg0: i32) -> (i32, i32) {
    %c0_i32 = arith.constant 0 : i32
    %c0_i32_0 = arith.constant 0 : i32
    %c0_i32_1 = arith.constant 0 : i32
    return %c0_i32, %c0_i32_0 : i32, i32
  }
  func.func @transform_6(%arg0: i32) -> (i32, i32) {
    %c0_i32 = arith.constant 0 : i32
    %c0_i32_0 = arith.constant 0 : i32
    %c0_i32_1 = arith.constant 0 : i32
    return %c0_i32, %c0_i32_0 : i32, i32
  }
  func.func @transform_7(%arg0: i32) -> (i32, i32) {
    %c0_i32 = arith.constant 0 : i32
    %c0_i32_0 = arith.constant 0 : i32
    %c0_i32_1 = arith.constant 0 : i32
    return %c0_i32, %c0_i32_0 : i32, i32
  }
  func.func @transform_8(%arg0: i32) -> (i32, i32) {
    %c0_i32 = arith.constant 0 : i32
    %c0_i32_0 = arith.constant 0 : i32
    %c0_i32_1 = arith.constant 0 : i32
    return %c0_i32, %c0_i32_0 : i32, i32
  }
  func.func @transform_9(%arg0: i32) -> (i32, i32) {
    %c0_i32 = arith.constant 0 : i32
    %c0_i32_0 = arith.constant 0 : i32
    %c0_i32_1 = arith.constant 0 : i32
    return %c0_i32, %c0_i32_0 : i32, i32
  }
  func.func @transform_10(%arg0: i32) -> (i32, i32) {
    %c0_i32 = arith.constant 0 : i32
    %c0_i32_0 = arith.constant 0 : i32
    %c0_i32_1 = arith.constant 0 : i32
    return %c0_i32, %c0_i32_0 : i32, i32
  }
  func.func @transform_11(%arg0: i32) -> (i32, i32) {
    %c0_i32 = arith.constant 0 : i32
    %c0_i32_0 = arith.constant 0 : i32
    %c0_i32_1 = arith.constant 0 : i32
    return %c0_i32, %c0_i32_0 : i32, i32
  }
  func.func @transform_12(%arg0: i32) -> (i32, i32) {
    %c0_i32 = arith.constant 0 : i32
    %c0_i32_0 = arith.constant 0 : i32
    %c0_i32_1 = arith.constant 0 : i32
    return %c0_i32, %c0_i32_0 : i32, i32
  }
  func.func @transform_13(%arg0: i32) -> (i32, i32) {
    %c0_i32 = arith.constant 0 : i32
    %c0_i32_0 = arith.constant 0 : i32
    %c0_i32_1 = arith.constant 0 : i32
    return %c0_i32, %c0_i32_0 : i32, i32
  }
  func.func @transform_14(%arg0: i32) -> (i32, i32) {
    %c0_i32 = arith.constant 0 : i32
    %c0_i32_0 = arith.constant 0 : i32
    %c0_i32_1 = arith.constant 0 : i32
    return %c0_i32, %c0_i32_0 : i32, i32
  }
  func.func @transform_15(%arg0: i32) -> (i32, i32, i32) {
    %c0_i32 = arith.constant 0 : i32
    %c0_i32_0 = arith.constant 0 : i32
    %c0_i32_1 = arith.constant 0 : i32
    return %arg0, %c0_i32, %c0_i32_0 : i32, i32, i32
  }
}

module attributes {stable_mosaic.version = 11 : i64} {
  func.func @_conv_acc_kernel(%arg0: i32, %arg1: memref<1x512x32xf32, #tpu.memory_space<vmem>>, %arg2: memref<1x32x32xbf16, #tpu.memory_space<vmem>>, %arg3: memref<1x32xf32, #tpu.memory_space<vmem>>, %arg4: memref<512x32xf32, #tpu.memory_space<vmem>>, %arg5: memref<512x32xf32, #tpu.memory_space<vmem>>, %arg6: memref<512x32xf32, #tpu.memory_space<vmem>>) attributes {dimension_semantics = [#tpu.dimension_semantics<arbitrary>], iteration_bounds = array<i64: 9>, scalar_prefetch = 0 : i64, scratch_operands = 1 : i64, tpu.core_type = #tpu.core_type<tc>, window_params = [{transform_indices = @transform_0, window_bounds = array<i64: 1, 512, 32>}, {transform_indices = @transform_1, window_bounds = array<i64: 1, 32, 32>}, {pipeline_mode = #tpu.pipeline_mode<synchronous>, transform_indices = @transform_2, window_bounds = array<i64: 1, 32>}, {pipeline_mode = #tpu.pipeline_mode<synchronous>, transform_indices = @transform_3, window_bounds = array<i64: 512, 32>}, {pipeline_mode = #tpu.pipeline_mode<synchronous>, transform_indices = @transform_4, window_bounds = array<i64: 512, 32>}]} {
    %c0_i32 = arith.constant 0 : i32
    %0 = arith.cmpi eq, %arg0, %c0_i32 : i32
    %1 = arith.extui %0 : i1 to i32
    %c0_i32_0 = arith.constant 0 : i32
    %2 = arith.cmpi ne, %1, %c0_i32_0 : i32
    scf.if %2 {
      %cst_11 = arith.constant 0.000000e+00 : f32
      %15 = vector.broadcast %cst_11 : f32 to vector<512x32xf32>
      %c0_12 = arith.constant 0 : index
      %c0_13 = arith.constant 0 : index
      %16 = vector.load %arg6[%c0_12, %c0_13] : memref<512x32xf32, #tpu.memory_space<vmem>>, vector<512x32xf32>
      tpu.vector_store %arg6[%c0_12, %c0_13], %15 {strides = array<i32>} : memref<512x32xf32, #tpu.memory_space<vmem>>, vector<512x32xf32>,
    } else {
    }
    %c0 = arith.constant 0 : index
    %c0_1 = arith.constant 0 : index
    %3 = vector.load %arg6[%c0, %c0_1] : memref<512x32xf32, #tpu.memory_space<vmem>>, vector<512x32xf32>
    %c0_2 = arith.constant 0 : index
    %c0_3 = arith.constant 0 : index
    %c0_4 = arith.constant 0 : index
    %4 = vector.load %arg1[%c0_2, %c0_3, %c0_4] : memref<1x512x32xf32, #tpu.memory_space<vmem>>, vector<1x512x32xf32>
    %5 = vector.shape_cast %4 : vector<1x512x32xf32> to vector<512x32xf32>
    %6 = arith.truncf %5 : vector<512x32xf32> to vector<512x32xbf16>
    %c0_5 = arith.constant 0 : index
    %c0_6 = arith.constant 0 : index
    %c0_7 = arith.constant 0 : index
    %7 = vector.load %arg2[%c0_5, %c0_6, %c0_7] : memref<1x32x32xbf16, #tpu.memory_space<vmem>>, vector<1x32x32xbf16>
    %8 = vector.shape_cast %7 : vector<1x32x32xbf16> to vector<32x32xbf16>
    %cst = arith.constant dense<0.000000e+00> : vector<512x32xf32>
    %9 = tpu.matmul %6, %8, %cst {dimension_numbers = #tpu.dot_dimension_numbers<[1], [0], [0], [1], [0, 0, 1, 1], [], []>} : vector<512x32xbf16>, vector<32x32xbf16>, vector<512x32xf32> -> vector<512x32xf32>
    %10 = arith.addf %3, %9 : vector<512x32xf32>
    %c0_8 = arith.constant 0 : index
    %c0_9 = arith.constant 0 : index
    %11 = vector.load %arg6[%c0_8, %c0_9] : memref<512x32xf32, #tpu.memory_space<vmem>>, vector<512x32xf32>
    tpu.vector_store %arg6[%c0_8, %c0_9], %10 {strides = array<i32>} : memref<512x32xf32, #tpu.memory_space<vmem>>, vector<512x32xf32>,
    %c8_i32 = arith.constant 8 : i32
    %12 = arith.cmpi eq, %arg0, %c8_i32 : i32
    %13 = arith.extui %12 : i1 to i32
    %c0_i32_10 = arith.constant 0 : i32
    %14 = arith.cmpi ne, %13, %c0_i32_10 : i32
    scf.if %14 {
      %c0_11 = arith.constant 0 : index
      %c0_12 = arith.constant 0 : index
      %15 = vector.load %arg6[%c0_11, %c0_12] : memref<512x32xf32, #tpu.memory_space<vmem>>, vector<512x32xf32>
      %c0_13 = arith.constant 0 : index
      %c0_14 = arith.constant 0 : index
      %16 = vector.load %arg3[%c0_13, %c0_14] : memref<1x32xf32, #tpu.memory_space<vmem>>, vector<1x32xf32>
      %17 = vector.broadcast %16 : vector<1x32xf32> to vector<512x32xf32>
      %18 = arith.addf %15, %17 : vector<512x32xf32>
      %c0_15 = arith.constant 0 : index
      %c0_16 = arith.constant 0 : index
      %19 = vector.load %arg4[%c0_15, %c0_16] : memref<512x32xf32, #tpu.memory_space<vmem>>, vector<512x32xf32>
      %20 = arith.addf %18, %19 : vector<512x32xf32>
      %c0_17 = arith.constant 0 : index
      %c0_18 = arith.constant 0 : index
      %21 = vector.load %arg5[%c0_17, %c0_18] : memref<512x32xf32, #tpu.memory_space<vmem>>, vector<512x32xf32>
      tpu.vector_store %arg5[%c0_17, %c0_18], %20 {strides = array<i32>} : memref<512x32xf32, #tpu.memory_space<vmem>>, vector<512x32xf32>,
    } else {
    }
    return
  }
  func.func @transform_0(%arg0: i32) -> (i32, i32, i32) {
    %c0_i32 = arith.constant 0 : i32
    %c0_i32_0 = arith.constant 0 : i32
    %c0_i32_1 = arith.constant 0 : i32
    return %arg0, %c0_i32, %c0_i32_0 : i32, i32, i32
  }
  func.func @transform_1(%arg0: i32) -> (i32, i32, i32) {
    %c0_i32 = arith.constant 0 : i32
    %c0_i32_0 = arith.constant 0 : i32
    %c0_i32_1 = arith.constant 0 : i32
    return %arg0, %c0_i32, %c0_i32_0 : i32, i32, i32
  }
  func.func @transform_2(%arg0: i32) -> (i32, i32) {
    %c0_i32 = arith.constant 0 : i32
    %c0_i32_0 = arith.constant 0 : i32
    %c0_i32_1 = arith.constant 0 : i32
    return %c0_i32, %c0_i32_0 : i32, i32
  }
  func.func @transform_3(%arg0: i32) -> (i32, i32) {
    %c0_i32 = arith.constant 0 : i32
    %c0_i32_0 = arith.constant 0 : i32
    %c0_i32_1 = arith.constant 0 : i32
    return %c0_i32, %c0_i32_0 : i32, i32
  }
  func.func @transform_4(%arg0: i32) -> (i32, i32) {
    %c0_i32 = arith.constant 0 : i32
    %c0_i32_0 = arith.constant 0 : i32
    %c0_i32_1 = arith.constant 0 : i32
    return %c0_i32, %c0_i32_0 : i32, i32
  }
}

module attributes {stable_mosaic.version = 11 : i64} {
  func.func @_conv_acc_kernel(%arg0: i32, %arg1: memref<1x512x32xf32, #tpu.memory_space<vmem>>, %arg2: memref<1x32x32xbf16, #tpu.memory_space<vmem>>, %arg3: memref<1x32xf32, #tpu.memory_space<vmem>>, %arg4: memref<512x32xf32, #tpu.memory_space<vmem>>, %arg5: memref<512x32xf32, #tpu.memory_space<vmem>>, %arg6: memref<512x32xf32, #tpu.memory_space<vmem>>) attributes {dimension_semantics = [#tpu.dimension_semantics<arbitrary>], iteration_bounds = array<i64: 9>, scalar_prefetch = 0 : i64, scratch_operands = 1 : i64, tpu.core_type = #tpu.core_type<tc>, window_params = [{transform_indices = @transform_0, window_bounds = array<i64: 1, 512, 32>}, {transform_indices = @transform_1, window_bounds = array<i64: 1, 32, 32>}, {pipeline_mode = #tpu.pipeline_mode<synchronous>, transform_indices = @transform_2, window_bounds = array<i64: 1, 32>}, {pipeline_mode = #tpu.pipeline_mode<synchronous>, transform_indices = @transform_3, window_bounds = array<i64: 512, 32>}, {pipeline_mode = #tpu.pipeline_mode<synchronous>, transform_indices = @transform_4, window_bounds = array<i64: 512, 32>}]} {
    %c0_i32 = arith.constant 0 : i32
    %0 = arith.cmpi eq, %arg0, %c0_i32 : i32
    %1 = arith.extui %0 : i1 to i32
    %c0_i32_0 = arith.constant 0 : i32
    %2 = arith.cmpi ne, %1, %c0_i32_0 : i32
    scf.if %2 {
      %cst_11 = arith.constant 0.000000e+00 : f32
      %15 = vector.broadcast %cst_11 : f32 to vector<512x32xf32>
      %c0_12 = arith.constant 0 : index
      %c0_13 = arith.constant 0 : index
      %16 = vector.load %arg6[%c0_12, %c0_13] : memref<512x32xf32, #tpu.memory_space<vmem>>, vector<512x32xf32>
      tpu.vector_store %arg6[%c0_12, %c0_13], %15 {strides = array<i32>} : memref<512x32xf32, #tpu.memory_space<vmem>>, vector<512x32xf32>,
    } else {
    }
    %c0 = arith.constant 0 : index
    %c0_1 = arith.constant 0 : index
    %3 = vector.load %arg6[%c0, %c0_1] : memref<512x32xf32, #tpu.memory_space<vmem>>, vector<512x32xf32>
    %c0_2 = arith.constant 0 : index
    %c0_3 = arith.constant 0 : index
    %c0_4 = arith.constant 0 : index
    %4 = vector.load %arg1[%c0_2, %c0_3, %c0_4] : memref<1x512x32xf32, #tpu.memory_space<vmem>>, vector<1x512x32xf32>
    %5 = vector.shape_cast %4 : vector<1x512x32xf32> to vector<512x32xf32>
    %6 = arith.truncf %5 : vector<512x32xf32> to vector<512x32xbf16>
    %c0_5 = arith.constant 0 : index
    %c0_6 = arith.constant 0 : index
    %c0_7 = arith.constant 0 : index
    %7 = vector.load %arg2[%c0_5, %c0_6, %c0_7] : memref<1x32x32xbf16, #tpu.memory_space<vmem>>, vector<1x32x32xbf16>
    %8 = vector.shape_cast %7 : vector<1x32x32xbf16> to vector<32x32xbf16>
    %cst = arith.constant dense<0.000000e+00> : vector<512x32xf32>
    %9 = tpu.matmul %6, %8, %cst {dimension_numbers = #tpu.dot_dimension_numbers<[1], [0], [0], [1], [0, 0, 1, 1], [], []>} : vector<512x32xbf16>, vector<32x32xbf16>, vector<512x32xf32> -> vector<512x32xf32>
    %10 = arith.addf %3, %9 : vector<512x32xf32>
    %c0_8 = arith.constant 0 : index
    %c0_9 = arith.constant 0 : index
    %11 = vector.load %arg6[%c0_8, %c0_9] : memref<512x32xf32, #tpu.memory_space<vmem>>, vector<512x32xf32>
    tpu.vector_store %arg6[%c0_8, %c0_9], %10 {strides = array<i32>} : memref<512x32xf32, #tpu.memory_space<vmem>>, vector<512x32xf32>,
    %c8_i32 = arith.constant 8 : i32
    %12 = arith.cmpi eq, %arg0, %c8_i32 : i32
    %13 = arith.extui %12 : i1 to i32
    %c0_i32_10 = arith.constant 0 : i32
    %14 = arith.cmpi ne, %13, %c0_i32_10 : i32
    scf.if %14 {
      %c0_11 = arith.constant 0 : index
      %c0_12 = arith.constant 0 : index
      %15 = vector.load %arg6[%c0_11, %c0_12] : memref<512x32xf32, #tpu.memory_space<vmem>>, vector<512x32xf32>
      %c0_13 = arith.constant 0 : index
      %c0_14 = arith.constant 0 : index
      %16 = vector.load %arg3[%c0_13, %c0_14] : memref<1x32xf32, #tpu.memory_space<vmem>>, vector<1x32xf32>
      %17 = vector.broadcast %16 : vector<1x32xf32> to vector<512x32xf32>
      %18 = arith.addf %15, %17 : vector<512x32xf32>
      %c0_15 = arith.constant 0 : index
      %c0_16 = arith.constant 0 : index
      %19 = vector.load %arg4[%c0_15, %c0_16] : memref<512x32xf32, #tpu.memory_space<vmem>>, vector<512x32xf32>
      %20 = arith.addf %18, %19 : vector<512x32xf32>
      %c0_17 = arith.constant 0 : index
      %c0_18 = arith.constant 0 : index
      %21 = vector.load %arg5[%c0_17, %c0_18] : memref<512x32xf32, #tpu.memory_space<vmem>>, vector<512x32xf32>
      tpu.vector_store %arg5[%c0_17, %c0_18], %20 {strides = array<i32>} : memref<512x32xf32, #tpu.memory_space<vmem>>, vector<512x32xf32>,
    } else {
    }
    return
  }
  func.func @transform_0(%arg0: i32) -> (i32, i32, i32) {
    %c0_i32 = arith.constant 0 : i32
    %c0_i32_0 = arith.constant 0 : i32
    %c0_i32_1 = arith.constant 0 : i32
    return %arg0, %c0_i32, %c0_i32_0 : i32, i32, i32
  }
  func.func @transform_1(%arg0: i32) -> (i32, i32, i32) {
    %c0_i32 = arith.constant 0 : i32
    %c0_i32_0 = arith.constant 0 : i32
    %c0_i32_1 = arith.constant 0 : i32
    return %arg0, %c0_i32, %c0_i32_0 : i32, i32, i32
  }
  func.func @transform_2(%arg0: i32) -> (i32, i32) {
    %c0_i32 = arith.constant 0 : i32
    %c0_i32_0 = arith.constant 0 : i32
    %c0_i32_1 = arith.constant 0 : i32
    return %c0_i32, %c0_i32_0 : i32, i32
  }
  func.func @transform_3(%arg0: i32) -> (i32, i32) {
    %c0_i32 = arith.constant 0 : i32
    %c0_i32_0 = arith.constant 0 : i32
    %c0_i32_1 = arith.constant 0 : i32
    return %c0_i32, %c0_i32_0 : i32, i32
  }
  func.func @transform_4(%arg0: i32) -> (i32, i32) {
    %c0_i32 = arith.constant 0 : i32
    %c0_i32_0 = arith.constant 0 : i32
    %c0_i32_1 = arith.constant 0 : i32
    return %c0_i32, %c0_i32_0 : i32, i32
  }
}

</mosaic_0001>

<bundles_post_ra>
// kernel: swin_layers_forward.12
= control target key start
LH: loop header
LB: loop body
LE: loop exit
PB: predicated region body
PF: predicated region fallthrough
CT: control target
= control target key end

     0   :  { %s3853_s18 = smov 0   ;;  %s4990_s0 = inlined_call_operand.vmem [shape: f32[8,64,32], index: 0, kind: input, shape index: {}]   ;;  %s4991_s1 = inlined_call_operand.vmem [shape: f32[4,64,64], index: 1, kind: input, shape index: {}]   ;;  %s4992_s2 = inlined_call_operand.vmem [shape: f32[1,64,64], index: 2, kind: input, shape index: {}]   ;;  %s4993_s3 = inlined_call_operand.vmem [shape: f32[1,32], index: 3, kind: input, shape index: {}]   ;;  %s4994_s4 = inlined_call_operand.vmem [shape: f32[1,32], index: 4, kind: input, shape index: {}]   ;;  %s4995_s5 = inlined_call_operand.vmem [shape: bf16[32,96], index: 5, kind: input, shape index: {}]   ;;  %s4996_s6 = inlined_call_operand.vmem [shape: f32[1,96], index: 6, kind: input, shape index: {}]   ;;  %s4997_s7 = inlined_call_operand.vmem [shape: bf16[32,32], index: 7, kind: input, shape index: {}]   ;;  %s4998_s8 = inlined_call_operand.vmem [shape: f32[1,32], index: 8, kind: input, shape index: {}]   ;;  %s4999_s9 = inlined_call_operand.vmem [shape: f32[1,32], index: 9, kind: input, shape index: {}]   ;;  %s5000_s10 = inlined_call_operand.vmem [shape: f32[1,32], index: 10, kind: input, shape index: {}]   ;;  %s5001_s11 = inlined_call_operand.vmem [shape: bf16[32,128], index: 11, kind: input, shape index: {}]   ;;  %s5002_s12 = inlined_call_operand.vmem [shape: f32[1,128], index: 12, kind: input, shape index: {}]   ;;  %s5003_s13 = inlined_call_operand.vmem [shape: bf16[128,32], index: 13, kind: input, shape index: {}]   ;;  %s5004_s14 = inlined_call_operand.vmem [shape: f32[1,32], index: 14, kind: input, shape index: {}]   ;;  %s5005_s15 = inlined_call_operand.vmem [shape: f32[8,64,32], index: 15, kind: output, shape index: {}]  }
   0x1 LB: > { %s3034_s19 = sadd.s32 4294967295, %s3760_s18   ;;  %p3038_p0 = scmp.ge.s32.totalorder %s3760_s18, 1  ;;  %s3760_s18 = sphi %s3853_s18, %s25_s18  }
   0x2   : > { %p437_p1 = scmp.lt.s32.totalorder %s3760_s18, 9 }
   0x4   : > { %p438_p2 = pnand %p3038_p0, %p437_p1 }
   0x5   : > { %p485_p3 = scmp.lt.s32.totalorder (!%p438_p2), %s3034_s19, 7  ;;  %vm506_vm0 = vcmask (!%p438_p2), 261120   ;;  %v3534_v56 = vld [vmem:[%s4995_s5] sm:$0xff] (!%p438_p2)   ;;  %v3535_v57 = vld [vmem:[%s4995_s5 + $0x8] sm:$0xff] (!%p438_p2)   ;;  %s3762_s22 = smov (!%p438_p2), 96   ;;  %vm788_vm1 = vcmask (!%p438_p2), 64512  }
   0x6   : > { %441 = sbr.rel (%p438_p2) target bundleno = 3807 (0xedf), region = 80  ;;  %3255 = vmatprep.subr.bf16.mxu1 (!%p438_p2), %v3534_v56  ;;  %vm886_vm2 = vcmask (!%p438_p2), 523264   ;;  %s3763_s26 = smov (!%p438_p2), 64   ;;  %vm1397_vm3 = vcmask (!%p438_p2), 1043456  }
   0x7   : > { %3256 = vmatpush3.bf16.msra.mxu1 (!%p438_p2), %v3534_v56  ;;  %s3764_s24 = smov (!%p438_p2), 88   ;;  %s3765_s25 = smov (!%p438_p2), 120  }
   0x8   : > { %3257 = vmatprep.subr.bf16.mxu1 (!%p438_p2), %v3535_v57  ;;  %s3767_s27 = smov (!%p438_p2), 112   ;;  %s3768_s21 = smov (!%p438_p2), 56  }
   0xb   : > { %3258 = vmatpush3.bf16.msra.mxu1 (!%p438_p2), %v3535_v57 }
   0xd   : > { %s5007_s19 = smov (!%p485_p3, %s3034_s19), 7 }
   0xe   : > { %s3145_s20 = sshll.u32 %s5007_s19, 6 }
   0xf   : > { %s3869_s23 = scalar_lea.vmem %s4990_s0, %s3145_s20 }
  0x10   : > { %v496_v0 = vld [vmem:[%s3869_s23] sm:$0xff]  ;;  %v498_v1 = vld [vmem:[%s3869_s23 + $0x10] sm:$0xff]  ;;  %v497_v2 = vld [vmem:[%s3869_s23 + $0x8] sm:$0xff] }
  0x11   : > { %v507_v3 = vsel %vm506_vm0, %v496_v0, 0.0  ;;  %v513_v4 = vsel %vm506_vm0, %v498_v1, 0.0  ;;  %v499_v5 = vld [vmem:[%s3869_s23 + $0x18] sm:$0xff]  ;;  %v510_v6 = vsel %vm506_vm0, %v497_v2, 0.0  ;;  %v500_v7 = vld [vmem:[%s3869_s23 + $0x20] sm:$0xff]  ;;  %v501_v9 = vld [vmem:[%s3869_s23 + $0x28] sm:$0xff] }
  0x12   : > { %508 = vadd.xlane.f32.xlu0 %v507_v3  ;;  %514 = vadd.xlane.f32.xlu1 %v513_v4  ;;  %v516_v8 = vsel %vm506_vm0, %v499_v5, 0.0  ;;  %v519_v10 = vsel %vm506_vm0, %v500_v7, 0.0  ;;  %v522_v11 = vsel %vm506_vm0, %v501_v9, 0.0  ;;  %v502_v12 = vld [vmem:[%s3869_s23 + $0x30] sm:$0xff]  ;;  %v503_v13 = vld [vmem:[%s3869_s23 + $0x38] sm:$0xff] }
  0x13   : > { %v525_v14 = vsel %vm506_vm0, %v502_v12, 0.0  ;;  %v528_v15 = vsel %vm506_vm0, %v503_v13, 0.0 }
  0x16   : > { %511 = vadd.xlane.f32.xlu0 %v510_v6  ;;  %517 = vadd.xlane.f32.xlu1 %v516_v8 }
  0x1a   : > { %520 = vadd.xlane.f32.xlu0 %v519_v10  ;;  %523 = vadd.xlane.f32.xlu1 %v522_v11 }
  0x1e   : > { %526 = vadd.xlane.f32.xlu0 %v525_v14  ;;  %529 = vadd.xlane.f32.xlu1 %v528_v15 }
  0x9f   : > { %v509_v16 = vpop.xlane.xlu0 %508  ;;  %v515_v17 = vpop.xlane.xlu1 %514 }
  0xa0   : > { %v532_v18 = vmul.f32 0.03125, %v509_v16  ;;  %v534_v19 = vmul.f32 0.03125, %v515_v17 }
  0xa2   : > { %v3887_v20 = vsub.f32 %v496_v0, %v532_v18  ;;  %v3889_v21 = vsub.f32 %v498_v1, %v534_v19  ;;  %v3043_v19 = vld [vmem:[%s4993_s3] ss:$0 sm:$0xff] }
  0xa3   : > { %v512_v22 = vpop.xlane.xlu0 %511  ;;  %v518_v23 = vpop.xlane.xlu1 %517 }
  0xa4   : > { %v533_v24 = vmul.f32 0.03125, %v512_v22  ;;  %v535_v25 = vmul.f32 0.03125, %v518_v23  ;;  %v548_v26 = vmul.f32 %v3887_v20, %v3887_v20  ;;  %v550_v27 = vmul.f32 %v3889_v21, %v3889_v21 }
  0xa6   : > { %v3895_v28 = vsub.f32 %v497_v2, %v533_v24  ;;  %v3897_v29 = vsub.f32 %v499_v5, %v535_v25  ;;  %v556_v30 = vsel %vm506_vm0, %v548_v26, 0.0  ;;  %v562_v33 = vsel %vm506_vm0, %v550_v27, 0.0  ;;  %v3044_v27 = vld [vmem:[%s4994_s4] ss:$0 sm:$0xff] }
  0xa7   : > { %557 = vadd.xlane.f32.xlu0 %v556_v30  ;;  %v521_v31 = vpop.xlane.xlu0 %520  ;;  %v524_v32 = vpop.xlane.xlu1 %523 }
  0xa8   : > { %v536_v34 = vmul.f32 0.03125, %v521_v31  ;;  %v537_v35 = vmul.f32 0.03125, %v524_v32  ;;  %v549_v36 = vmul.f32 %v3895_v28, %v3895_v28  ;;  %v551_v37 = vmul.f32 %v3897_v29, %v3897_v29 }
  0xaa   : > { %v3905_v38 = vsub.f32 %v500_v7, %v536_v34  ;;  %v3907_v39 = vsub.f32 %v501_v9, %v537_v35  ;;  %v559_v40 = vsel %vm506_vm0, %v549_v36, 0.0  ;;  %v565_v43 = vsel %vm506_vm0, %v551_v37, 0.0 }
  0xab   : > { %563 = vadd.xlane.f32.xlu0 %v562_v33  ;;  %560 = vadd.xlane.f32.xlu1 %v559_v40  ;;  %v527_v41 = vpop.xlane.xlu0 %526  ;;  %v530_v42 = vpop.xlane.xlu1 %529 }
  0xac   : > { %v538_v44 = vmul.f32 0.03125, %v527_v41  ;;  %v539_v45 = vmul.f32 0.03125, %v530_v42  ;;  %v552_v46 = vmul.f32 %v3905_v38, %v3905_v38  ;;  %v553_v47 = vmul.f32 %v3907_v39, %v3907_v39 }
  0xae   : > { %v3915_v48 = vsub.f32 %v502_v12, %v538_v44  ;;  %v3917_v49 = vsub.f32 %v503_v13, %v539_v45  ;;  %v568_v50 = vsel %vm506_vm0, %v552_v46, 0.0  ;;  %v571_v51 = vsel %vm506_vm0, %v553_v47, 0.0 }
  0xaf   : > { %566 = vadd.xlane.f32.xlu1 %v565_v43  ;;  %569 = vadd.xlane.f32.xlu0 %v568_v50 }
  0xb0   : > { %v554_v52 = vmul.f32 %v3915_v48, %v3915_v48  ;;  %v555_v53 = vmul.f32 %v3917_v49, %v3917_v49 }
  0xb2   : > { %v574_v54 = vsel %vm506_vm0, %v554_v52, 0.0  ;;  %v577_v55 = vsel %vm506_vm0, %v555_v53, 0.0 }
  0xb3   : > { %572 = vadd.xlane.f32.xlu1 %v571_v51  ;;  %575 = vadd.xlane.f32.xlu0 %v574_v54 }
  0xb7   : > { %578 = vadd.xlane.f32.xlu1 %v577_v55 }
 0x134   : > { %v558_v58 = vpop.xlane.xlu0 %557 }
 0x135   : > { %v580_v59 = vmul.f32 0.03125, %v558_v58 }
 0x137   : > { %v588_v60 = vadd.f32 1e-05, %v580_v59 }
 0x138   : > { %v561_v61 = vpop.xlane.xlu1 %560  ;;  %v564_v62 = vpop.xlane.xlu0 %563 }
 0x139   : > { %3546 = vrsqrt.f32 %v588_v60  ;;  %v581_v63 = vmul.f32 0.03125, %v561_v61  ;;  %v582_v0 = vmul.f32 0.03125, %v564_v62 }
 0x13b   : > { %v589_v1 = vadd.f32 1e-05, %v581_v63  ;;  %v590_v2 = vadd.f32 1e-05, %v582_v0 }
 0x13c   : > { %v567_v3 = vpop.xlane.xlu1 %566  ;;  %v570_v4 = vpop.xlane.xlu0 %569 }
 0x13d   : > { %3548 = vrsqrt.f32 %v589_v1  ;;  %v583_v5 = vmul.f32 0.03125, %v567_v3  ;;  %v584_v6 = vmul.f32 0.03125, %v570_v4 }
 0x13e   : > { %3550 = vrsqrt.f32 %v590_v2 }
 0x13f   : > { %v591_v7 = vadd.f32 1e-05, %v583_v5  ;;  %v592_v8 = vadd.f32 1e-05, %v584_v6 }
 0x140   : > { %v573_v9 = vpop.xlane.xlu1 %572  ;;  %v576_v10 = vpop.xlane.xlu0 %575 }
 0x141   : > { %3552 = vrsqrt.f32 %v591_v7  ;;  %v585_v11 = vmul.f32 0.03125, %v573_v9  ;;  %v586_v12 = vmul.f32 0.03125, %v576_v10 }
 0x142   : > { %3554 = vrsqrt.f32 %v592_v8 }
 0x143   : > { %v3547_v13 = vpop.eup %3546  ;;  %v593_v14 = vadd.f32 1e-05, %v585_v11  ;;  %v594_v15 = vadd.f32 1e-05, %v586_v12 }
 0x144   : > { %v579_v16 = vpop.xlane.xlu1 %578  ;;  %v604_v17 = vmul.f32 %v3547_v13, %v3887_v20 }
 0x145   : > { %3556 = vrsqrt.f32 %v593_v14  ;;  %v587_v18 = vmul.f32 0.03125, %v579_v16 }
 0x146   : > { %3558 = vrsqrt.f32 %v594_v15  ;;  %v618_v26 = vmul.f32 %v3043_v19, %v604_v17 }
 0x147   : > { %v3549_v22 = vpop.eup %3548  ;;  %v595_v23 = vadd.f32 1e-05, %v587_v18 }
 0x148   : > { %v3551_v24 = vpop.eup %3550  ;;  %v605_v25 = vmul.f32 %v3549_v22, %v3895_v28  ;;  %v632_v33 = vadd.f32 %v3044_v27, %v618_v26 }
 0x149   : > { %3560 = vrsqrt.f32 %v595_v23  ;;  %v606_v20 = vmul.f32 %v3551_v24, %v3889_v21 }
 0x14a   : > { %v619_v30 = vmul.f32 %v3043_v19, %v605_v25 }
 0x14b   : > { %v3553_v31 = vpop.eup %3552  ;;  %v620_v36 = vmul.f32 %v3043_v19, %v606_v20 }
 0x14c   : > { %v3555_v32 = vpop.eup %3554  ;;  %v633_v34 = vadd.f32 %v3044_v27, %v619_v30  ;;  %v607_v35 = vmul.f32 %v3553_v31, %v3897_v29 }
 0x14d   : > { %v608_v37 = vmul.f32 %v3555_v32, %v3905_v38  ;;  %v634_v43 = vadd.f32 %v3044_v27, %v620_v36  ;;  %v770_v36 = vld [vmem:[%s4991_s1 + $0x10] sm:$0xff] }
 0x14e   : > { %v640_v40 = vpack.c.bf16 %v633_v34, %v632_v33  ;;  %v621_v28 = vmul.f32 %v3043_v19, %v607_v35 }
 0x14f   : > { %v3557_v41 = vpop.eup %3556  ;;  %v622_v45 = vmul.f32 %v3043_v19, %v608_v37  ;;  %v768_v37 = vld [vmem:[%s4991_s1] sm:$0xff] }
 0x150   : > { %v3559_v42 = vpop.eup %3558  ;;  %3259 = vmatprep.mubr.msk.bf16.mxu1 %vm506_vm0, %v640_v40  ;;  %v635_v44 = vadd.f32 %v3044_v27, %v621_v28  ;;  %v609_v21 = vmul.f32 %v3557_v41, %v3907_v39  ;;  %v3999_v28 = vld [vmem:[%s4992_s2 + $0x10] sm:$0xff] }
 0x151   : > { %v610_v46 = vmul.f32 %v3559_v42, %v3915_v48  ;;  %v636_v29 = vadd.f32 %v3044_v27, %v622_v45  ;;  %v3045_v48 = vld [vmem:[%s4996_s6] ss:$0 sm:$0xff] }
 0x152   : > { %v641_v47 = vpack.c.bf16 %v635_v44, %v634_v43  ;;  %v623_v50 = vmul.f32 %v3043_v19, %v609_v21  ;;  %v769_v43 = vld [vmem:[%s4991_s1 + $0x8] sm:$0xff]  ;;  %v771_v21 = vld [vmem:[%s4991_s1 + $0x18] sm:$0xff] }
 0x153   : > { %v3561_v51 = vpop.eup %3560  ;;  %v624_v53 = vmul.f32 %v3043_v19, %v610_v46  ;;  %v4010_v46 = vld [vmem:[%s4992_s2] sm:$0xff] }
 0x154   : > { %3260 = vmatmul.mubr.msk.bf16.vlgmr.msra.gmra.mrb[0].mxu1 %vm506_vm0, %v641_v47  ;;  %v637_v38 = vadd.f32 %v3044_v27, %v623_v50  ;;  %v611_v52 = vmul.f32 %v3561_v51, %v3917_v49  ;;  %v4016_v51 = vld [vmem:[%s4992_s2 + $0x8] sm:$0xff] }
 0x155   : > { %v638_v56 = vadd.f32 %v3044_v27, %v624_v53 }
 0x156   : > { %v642_v54 = vpack.c.bf16 %v637_v38, %v636_v29  ;;  %v625_v55 = vmul.f32 %v3043_v19, %v611_v52 }
 0x158   : > { %3263 = vmatprep.mubr.msk.bf16.mxu1 %vm506_vm0, %v642_v54  ;;  %v639_v57 = vadd.f32 %v3044_v27, %v625_v55  ;;  %v774_v54 = vld [vmem:[%s4991_s1 + $0x30] sm:$0xff] }
 0x15a   : > { %v643_v39 = vpack.c.bf16 %v639_v57, %v638_v56  ;;  %v4027_v56 = vld [vmem:[%s4992_s2 + $0x18] sm:$0xff] }
 0x15c   : > { %3264 = vmatmul.mubr.msk.bf16.gmra.mrb[4].mxu1 %vm506_vm0, %v643_v39 }
 0x227   : > { %v3261_v58 = vpop.f32.mrb[0].mxu1 }
 0x228   : > { %v722_v59 = vadd.f32 %v3261_v58, %v3045_v48  ;;  %v713_v60 = vpop.f32.mrb[1].mxu1 }
 0x229   : > { %v714_v61 = vadd.f32 %v3045_v48, %v713_v60  ;;  %v3262_v62 = vpop.f32.mrb[2].mxu1 }
 0x22a   : > { %v725_v49 = vadd.f32 %v3262_v62, %v3045_v48  ;;  %v716_v63 = vpop.f32.mrb[3].mxu1  ;;  %v754_v1 = vmul.f32 0.35355338, %v722_v59 }
 0x22b   : > { %v717_v0 = vadd.f32 %v3045_v48, %v716_v63  ;;  %v752_v4 = vmul.f32 0.35355338, %v714_v61 }
 0x22c   : > { %v755_v2 = vmul.f32 0.35355338, %v725_v49  ;;  %v3954_v3 = vpack.c.bf16 %v725_v49, %v722_v59  ;;  %v4038_v49 = vld [vmem:[%s4992_s2 + $0x30] sm:$0xff] }
 0x22d   : > { %v753_v5 = vmul.f32 0.35355338, %v717_v0  ;;  %v3956_v6 = vpack.c.bf16 %v717_v0, %v714_v61  ;;  %v772_v61 = vld [vmem:[%s4991_s1 + $0x20] sm:$0xff] }
 0x22e   : > { %v3958_v7 = vpack.c.bf16 %v755_v2, %v754_v1  ;;  %782 = vrot.lane.b32.xlu1 %v3954_v3, %s3762_s22 }
 0x22f   : > { %v3961_v8 = vpack.c.bf16 %v753_v5, %v752_v4  ;;  %780 = vrot.lane.b32.xlu0 %v3956_v6, %s3762_s22  ;;  %v3265_v9 = vpop.f32.mrb[4].mxu1  ;;  %v4045_v4 = vld [vmem:[%s4992_s2 + $0x20] sm:$0xff] }
 0x230   : > { %v738_v10 = vadd.f32 %v3265_v9, %v3045_v48  ;;  %v729_v11 = vpop.f32.mrb[5].mxu1 }
 0x231   : > { %v730_v12 = vadd.f32 %v3045_v48, %v729_v11  ;;  %v3266_v13 = vpop.f32.mrb[6].mxu1  ;;  %3275 = vmatprep.mubr.msk.bf16.mxu1 %vm788_vm1, %v3961_v8  ;;  %v775_v11 = vld [vmem:[%s4991_s1 + $0x38] sm:$0xff] }
 0x232   : > { %v741_v14 = vadd.f32 %v3266_v13, %v3045_v48  ;;  %v732_v15 = vpop.f32.mrb[7].mxu1  ;;  %v758_v17 = vmul.f32 0.35355338, %v738_v10  ;;  %v773_v13 = vld [vmem:[%s4991_s1 + $0x28] sm:$0xff] }
 0x233   : > { %v733_v16 = vadd.f32 %v3045_v48, %v732_v15  ;;  %v756_v22 = vmul.f32 0.35355338, %v730_v12 }
 0x234   : > { %v759_v18 = vmul.f32 0.35355338, %v741_v14  ;;  %v3966_v19 = vpack.c.bf16 %v741_v14, %v738_v10  ;;  %v4062_v14 = vld [vmem:[%s4992_s2 + $0x38] sm:$0xff] }
 0x235   : > { %v757_v23 = vmul.f32 0.35355338, %v733_v16  ;;  %v3968_v24 = vpack.c.bf16 %v733_v16, %v730_v12 }
 0x236   : > { %v3970_v25 = vpack.c.bf16 %v759_v18, %v758_v17  ;;  %v4070_v17 = vld [vmem:[%s4992_s2 + $0x28] sm:$0xff] }
 0x237   : > { %v3972_v26 = vpack.c.bf16 %v757_v23, %v756_v22  ;;  %784 = vrot.lane.b32.xlu1 %v3968_v24, %s3762_s22 }
 0x23b   : > { %786 = vrot.lane.b32.xlu1 %v3966_v19, %s3762_s22  ;;  %s3769_s22 = smov 72  }
 0x2a0   : > { %v783_v30 = vpop.permute.xlu1 %782 }
 0x2a1   : > { %v781_v27 = vpop.permute.xlu0 %780  ;;  %v805_v31 = vsel %vm788_vm1, %v783_v30, 0 }
 0x2a2   : > { %3495 = vmatprep.subr.msk.bf16.mxu1 %vm788_vm1, %v781_v27  ;;  %v802_v20 = vsel %vm788_vm1, %v781_v27, 0 }
 0x2a3   : > { %3268 = vmatpush3.bf16.xpose.msra.mxu1 %v802_v20 }
 0x2a4   : > { %3496 = vmatprep.subr.msk.bf16.mxu1 %vm788_vm1, %v783_v30 }
 0x2a9   : > { %v785_v32 = vpop.permute.xlu1 %784 }
 0x2aa   : > { %v808_v33 = vsel %vm788_vm1, %v785_v32, 0 }
 0x2ab   : > { %3270 = vmatpush3.bf16.xpose.msra.mxu1 %v805_v31 }
 0x2ac   : > { %3497 = vmatprep.subr.msk.bf16.mxu1 %vm788_vm1, %v785_v32 }
 0x2ad   : > { %v787_v34 = vpop.permute.xlu1 %786 }
 0x2ae   : > { %v811_v35 = vsel %vm788_vm1, %v787_v34, 0 }
 0x2b3   : > { %3272 = vmatpush3.bf16.xpose.msra.mxu1 %v808_v33 }
 0x2b4   : > { %3498 = vmatprep.subr.msk.bf16.mxu1 %vm788_vm1, %v787_v34 }
 0x2bb   : > { %3274 = vmatpush3.bf16.xpose.msra.mxu1 %v811_v35 }
 0x2c2   : > { %3276 = vmatmul.mubr.msk.bf16.vlgmr.msra.gmra.mrb[8].mxu1 %vm788_vm1, %v3958_v7 }
 0x2c3   : > { %3279 = vmatprep.mubr.msk.bf16.mxu1 %vm788_vm1, %v3972_v26 }
 0x2ca   : > { %3280 = vmatmul.mubr.msk.bf16.gmra.mrb[12].mxu1 %vm788_vm1, %v3970_v25 }
 0x395   : > { %v3277_v40 = vpop.f32.mrb[8].mxu1 }
 0x396   : > { %v856_v41 = vadd.f32 %v3277_v40, %v770_v36  ;;  %v847_v42 = vpop.f32.mrb[9].mxu1 }
 0x397   : > { %v848_v44 = vadd.f32 %v847_v42, %v768_v37  ;;  %v3278_v45 = vpop.f32.mrb[10].mxu1 }
 0x398   : > { %v850_v47 = vpop.f32.mrb[11].mxu1  ;;  %v880_v50 = vadd.f32 %v856_v41, %v3999_v28  ;;  %v859_v38 = vadd.f32 %v3278_v45, %v771_v21 }
 0x399   : > { %v851_v29 = vadd.f32 %v850_v47, %v769_v43  ;;  %v878_v53 = vadd.f32 %v848_v44, %v4010_v46 }
 0x39a   : > { %v893_v52 = vsel %vm886_vm2, %v880_v50, -inf  ;;  %v881_v60 = vadd.f32 %v859_v38, %v4027_v56 }
 0x39b   : > { %894 = vmax.xlane.f32.xlu0 %v893_v52  ;;  %v879_v55 = vadd.f32 %v851_v29, %v4016_v51  ;;  %v887_v59 = vsel %vm886_vm2, %v878_v53, -inf }
 0x39c   : > { %v896_v1 = vsel %vm886_vm2, %v881_v60, -inf }
 0x39d   : > { %v3281_v57 = vpop.f32.mrb[12].mxu1  ;;  %v890_v39 = vsel %vm886_vm2, %v879_v55, -inf }
 0x39e   : > { %v872_v48 = vadd.f32 %v3281_v57, %v774_v54  ;;  %v863_v58 = vpop.f32.mrb[13].mxu1  ;;  %891 = vmax.xlane.f32.xlu1 %v890_v39 }
 0x39f   : > { %v3282_v62 = vpop.f32.mrb[14].mxu1  ;;  %888 = vmax.xlane.f32.xlu0 %v887_v59  ;;  %v864_v0 = vadd.f32 %v863_v58, %v772_v61 }
 0x3a0   : > { %v866_v63 = vpop.f32.mrb[15].mxu1  ;;  %v884_v2 = vadd.f32 %v872_v48, %v4038_v49  ;;  %v875_v12 = vadd.f32 %v3282_v62, %v775_v11 }
 0x3a1   : > { %v882_v9 = vadd.f32 %v864_v0, %v4045_v4  ;;  %v867_v15 = vadd.f32 %v866_v63, %v773_v13 }
 0x3a2   : > { %v905_v5 = vsel %vm886_vm2, %v884_v2, -inf  ;;  %v4065_v16 = vadd.f32 %v875_v12, %v4062_v14 }
 0x3a3   : > { %897 = vmax.xlane.f32.xlu0 %v896_v1  ;;  %v899_v10 = vsel %vm886_vm2, %v882_v9, -inf  ;;  %v4075_v22 = vadd.f32 %v867_v15, %v4070_v17 }
 0x3a4   : > { %v908_v18 = vsel %vm886_vm2, %v4065_v16, -inf }
 0x3a5   : > { %v902_v23 = vsel %vm886_vm2, %v4075_v22, -inf }
 0x3a7   : > { %906 = vmax.xlane.f32.xlu0 %v905_v5 }
 0x3ab   : > { %900 = vmax.xlane.f32.xlu0 %v899_v10 }
 0x3af   : > { %981 = vrot.lane.b32.xlu1 %v3954_v3, %s3763_s26 }
 0x3b3   : > { %983 = vrot.lane.b32.xlu1 %v3968_v24, %s3763_s26 }
 0x3c1   : > { %979 = vrot.lane.b32.xlu0 %v3956_v6, %s3763_s26 }
 0x3d7   : > { %909 = vmax.xlane.f32.xlu1 %v908_v18 }
 0x3db   : > { %903 = vmax.xlane.f32.xlu1 %v902_v23 }
 0x3ec   : > { %985 = vrot.lane.b32.xlu1 %v3966_v19, %s3763_s26  ;;  %s3766_s26 = smov 80  }
 0x428   : > { %v895_v27 = vpop.xlane.xlu0 %894 }
 0x429   : > { %v913_v20 = vsub.f32 %v880_v50, %v895_v27 }
 0x42b   : > { %v923_v30 = vmul.f32 1.442695, %v913_v20  ;;  %v892_v31 = vpop.xlane.xlu1 %891 }
 0x42c   : > { %v889_v32 = vpop.xlane.xlu0 %888  ;;  %v912_v34 = vsub.f32 %v879_v55, %v892_v31 }
 0x42d   : > { %3562 = vpow2.f32 %v923_v30  ;;  %v911_v33 = vsub.f32 %v878_v53, %v889_v32 }
 0x42e   : > { %v921_v40 = vmul.f32 1.442695, %v912_v34 }
 0x42f   : > { %v919_v35 = vmul.f32 1.442695, %v911_v33  ;;  %v982_v52 = vpop.permute.xlu1 %981 }
 0x430   : > { %v898_v36 = vpop.xlane.xlu0 %897 }
 0x431   : > { %3564 = vpow2.f32 %v919_v35  ;;  %v914_v37 = vsub.f32 %v881_v60, %v898_v36 }
 0x433   : > { %v925_v41 = vmul.f32 1.442695, %v914_v37  ;;  %v984_v48 = vpop.permute.xlu1 %983 }
 0x434   : > { %v907_v42 = vpop.xlane.xlu0 %906 }
 0x435   : > { %3566 = vpow2.f32 %v925_v41  ;;  %v917_v43 = vsub.f32 %v884_v2, %v907_v42 }
 0x436   : > { %3568 = vpow2.f32 %v921_v40 }
 0x437   : > { %v4080_v44 = vpop.eup %3562  ;;  %v931_v21 = vmul.f32 1.442695, %v917_v43 }
 0x438   : > { %v901_v45 = vpop.xlane.xlu0 %900  ;;  %v941_v47 = vsel %vm886_vm2, %v4080_v44, 0.0 }
 0x439   : > { %3570 = vpow2.f32 %v931_v21  ;;  %v915_v50 = vsub.f32 %v882_v9, %v901_v45  ;;  %942 = vadd.xlane.f32.xlu0 %v941_v47 }
 0x43b   : > { %v4084_v29 = vpop.eup %3564  ;;  %v927_v38 = vmul.f32 1.442695, %v915_v50 }
 0x43c   : > { %v980_v53 = vpop.permute.xlu0 %979  ;;  %v935_v54 = vsel %vm886_vm2, %v4084_v29, 0.0 }
 0x43d   : > { %3572 = vpow2.f32 %v927_v38  ;;  %936 = vadd.xlane.f32.xlu0 %v935_v54  ;;  %3283 = vmatprep.subr.bf16.mxu0 %v980_v53 }
 0x43e   : > { %3284 = vmatpush3.bf16.msra.mxu0 %v980_v53 }
 0x43f   : > { %v4088_v55 = vpop.eup %3566  ;;  %3285 = vmatprep.subr.bf16.mxu0 %v982_v52 }
 0x440   : > { %v944_v57 = vsel %vm886_vm2, %v4088_v55, 0.0  ;;  %v4092_v39 = vpop.eup %3568 }
 0x441   : > { %945 = vadd.xlane.f32.xlu1 %v944_v57  ;;  %v938_v59 = vsel %vm886_vm2, %v4092_v39, 0.0 }
 0x442   : > { %3286 = vmatpush3.bf16.msra.mxu0 %v982_v52 }
 0x443   : > { %v4094_v58 = vpop.eup %3570  ;;  %3287 = vmatprep.subr.bf16.mxu0 %v984_v48 }
 0x444   : > { %v953_v60 = vsel %vm886_vm2, %v4094_v58, 0.0 }
 0x445   : > { %939 = vadd.xlane.f32.xlu1 %v938_v59  ;;  %954 = vadd.xlane.f32.xlu0 %v953_v60 }
 0x446   : > { %3288 = vmatpush3.bf16.msra.mxu0 %v984_v48 }
 0x447   : > { %v4100_v61 = vpop.eup %3572 }
 0x448   : > { %v947_v62 = vsel %vm886_vm2, %v4100_v61, 0.0 }
 0x449   : > { %948 = vadd.xlane.f32.xlu0 %v947_v62 }
 0x456   : > { %1096 = vrot.lane.b32.xlu1 %v3954_v3, %s3764_s24 }
 0x45a   : > { %1098 = vrot.lane.b32.xlu1 %v3968_v24, %s3764_s24 }
 0x464   : > { %v910_v63 = vpop.xlane.xlu1 %909 }
 0x465   : > { %v918_v0 = vsub.f32 %v4065_v16, %v910_v63 }
 0x467   : > { %v933_v1 = vmul.f32 1.442695, %v918_v0 }
 0x468   : > { %v904_v2 = vpop.xlane.xlu1 %903 }
 0x469   : > { %3574 = vpow2.f32 %v933_v1  ;;  %v916_v5 = vsub.f32 %v4075_v22, %v904_v2 }
 0x46b   : > { %v929_v9 = vmul.f32 1.442695, %v916_v5 }
 0x46c   : > { %v986_v10 = vpop.permute.xlu1 %985 }
 0x46d   : > { %3289 = vmatprep.subr.bf16.mxu0 %v986_v10  ;;  %3576 = vpow2.f32 %v929_v9 }
 0x46e   : > { %3290 = vmatpush3.bf16.msra.mxu0 %v986_v10 }
 0x473   : > { %v4108_v11 = vpop.eup %3574 }
 0x474   : > { %v956_v12 = vsel %vm886_vm2, %v4108_v11, 0.0 }
 0x475   : > { %957 = vadd.xlane.f32.xlu0 %v956_v12 }
 0x477   : > { %v4112_v13 = vpop.eup %3576 }
 0x478   : > { %v950_v15 = vsel %vm886_vm2, %v4112_v13, 0.0 }
 0x47e   : > { %951 = vadd.xlane.f32.xlu1 %v950_v15 }
 0x48b   : > { %1094 = vrot.lane.b32.xlu0 %v3956_v6, %s3764_s24 }
 0x48f   : > { %1100 = vrot.lane.b32.xlu1 %v3966_v19, %s3764_s24  ;;  %1086 = vrot.lane.b32.xlu0 %v3961_v8, %s3765_s25  ;;  %s3770_s24 = smov 104  }
 0x493   : > { %1088 = vrot.lane.b32.xlu1 %v3958_v7, %s3765_s25  ;;  %1090 = vrot.lane.b32.xlu0 %v3972_v26, %s3765_s25 }
 0x497   : > { %1092 = vrot.lane.b32.xlu1 %v3970_v25, %s3765_s25  ;;  %1563 = vrot.lane.b32.xlu0 %v3956_v6, %s3766_s26 }
 0x49b   : > { %1565 = vrot.lane.b32.xlu1 %v3954_v3, %s3766_s26  ;;  %1567 = vrot.lane.b32.xlu0 %v3968_v24, %s3766_s26 }
 0x49f   : > { %1569 = vrot.lane.b32.xlu1 %v3966_v19, %s3766_s26  ;;  %1555 = vrot.lane.b32.xlu0 %v3961_v8, %s3767_s27 }
 0x4a3   : > { %1557 = vrot.lane.b32.xlu1 %v3958_v7, %s3767_s27  ;;  %1559 = vrot.lane.b32.xlu0 %v3972_v26, %s3767_s27 }
 0x4a7   : > { %1561 = vrot.lane.b32.xlu1 %v3970_v25, %s3767_s27  ;;  %s3772_s27 = smov 40  }
 0x4c6   : > { %v943_v16 = vpop.xlane.xlu0 %942 }
 0x4ca   : > { %v937_v18 = vpop.xlane.xlu0 %936 }
 0x4ce   : > { %v946_v22 = vpop.xlane.xlu1 %945 }
 0x4cf   : > { %3578 = vrcp.f32 %v946_v22 }
 0x4d0   : > { %3580 = vrcp.f32 %v937_v18 }
 0x4d1   : > { %3582 = vrcp.f32 %v943_v16 }
 0x4d2   : > { %v940_v23 = vpop.xlane.xlu1 %939  ;;  %v955_v40 = vpop.xlane.xlu0 %954 }
 0x4d3   : > { %3584 = vrcp.f32 %v940_v23 }
 0x4d6   : > { %v949_v41 = vpop.xlane.xlu0 %948  ;;  %v1097_v42 = vpop.permute.xlu1 %1096 }
 0x4d7   : > { %v1118_v50 = vsel %vm788_vm1, %v1097_v42, 0 }
 0x4d9   : > { %v3579_v27 = vpop.eup %3578 }
 0x4da   : > { %v3581_v20 = vpop.eup %3580  ;;  %v970_v32 = vmul.f32 %v3579_v27, %v4088_v55  ;;  %v1099_v45 = vpop.permute.xlu1 %1098 }
 0x4db   : > { %v3583_v30 = vpop.eup %3582  ;;  %v967_v33 = vmul.f32 %v3581_v20, %v4084_v29 }
 0x4dc   : > { %v969_v35 = vmul.f32 %v3583_v30, %v4080_v44 }
 0x4dd   : > { %v3585_v31 = vpop.eup %3584 }
 0x4de   : > { %v968_v34 = vmul.f32 %v3585_v31, %v4092_v39  ;;  %v976_v37 = vpack.c.bf16 %v970_v32, %v969_v35  ;;  %v1121_v39 = vsel %vm788_vm1, %v1099_v45, 0 }
 0x4e0   : > { %v975_v36 = vpack.c.bf16 %v968_v34, %v967_v33 }
 0x4e2   : > { %3291 = vmatprep.mubr.msk.bf16.mxu0 %vm886_vm2, %v975_v36 }
 0x4e3   : > { %3292 = vmatmul.mubr.msk.bf16.vlgmr.msra.gmra.mrb[0].mxu0 %vm886_vm2, %v976_v37 }
 0x502   : > { %v958_v43 = vpop.xlane.xlu0 %957 }
 0x503   : > { %3586 = vrcp.f32 %v958_v43  ;;  %v3060_v43 = vld [vmem:[%s4991_s1 + $0x40] sm:$0xff] }
 0x504   : > { %3588 = vrcp.f32 %v949_v41 }
 0x505   : > { %3590 = vrcp.f32 %v955_v40 }
 0x506   : > { %v1095_v21 = vpop.permute.xlu0 %1094 }
 0x507   : > { %3499 = vmatprep.subr.msk.bf16.mxu0 %vm788_vm1, %v1095_v21  ;;  %v1115_v47 = vsel %vm788_vm1, %v1095_v21, 0 }
 0x508   : > { %3300 = vmatpush3.bf16.xpose.msra.mxu0 %v1115_v47  ;;  %v3061_v47 = vld [vmem:[%s4991_s1 + $0x48] sm:$0xff] }
 0x509   : > { %3500 = vmatprep.subr.msk.bf16.mxu0 %vm788_vm1, %v1097_v42  ;;  %v3062_v42 = vld [vmem:[%s4991_s1 + $0x50] sm:$0xff] }
 0x50a   : > { %v1087_v52 = vpop.permute.xlu0 %1086 }
 0x50b   : > { %v952_v44 = vpop.xlane.xlu1 %951 }
 0x50c   : > { %3592 = vrcp.f32 %v952_v44 }
 0x50d   : > { %v3587_v29 = vpop.eup %3586 }
 0x50e   : > { %v3589_v38 = vpop.eup %3588  ;;  %v974_v57 = vmul.f32 %v3587_v29, %v4108_v11  ;;  %v1091_v63 = vpop.permute.xlu0 %1090 }
 0x50f   : > { %v3591_v53 = vpop.eup %3590  ;;  %v1101_v55 = vpop.permute.xlu1 %1100  ;;  %v971_v48 = vmul.f32 %v3589_v38, %v4100_v61  ;;  %v3063_v38 = vld [vmem:[%s4991_s1 + $0x58] sm:$0xff] }
 0x510   : > { %3302 = vmatpush3.bf16.xpose.msra.mxu0 %v1118_v50  ;;  %v973_v60 = vmul.f32 %v3591_v53, %v4094_v58  ;;  %v1124_v2 = vsel %vm788_vm1, %v1101_v55, 0 }
 0x511   : > { %3501 = vmatprep.subr.msk.bf16.mxu0 %vm788_vm1, %v1099_v45 }
 0x512   : > { %v978_v0 = vpack.c.bf16 %v974_v57, %v973_v60  ;;  %v1564_v61 = vpop.permute.xlu0 %1563 }
 0x513   : > { %v1089_v1 = vpop.permute.xlu1 %1088  ;;  %v1584_v58 = vsel %vm788_vm1, %v1564_v61, 0 }
 0x516   : > { %v3593_v54 = vpop.eup %3592  ;;  %v1568_v10 = vpop.permute.xlu0 %1567 }
 0x517   : > { %v972_v59 = vmul.f32 %v3593_v54, %v4112_v13  ;;  %v1093_v5 = vpop.permute.xlu1 %1092  ;;  %v1590_v13 = vsel %vm788_vm1, %v1568_v10, 0 }
 0x518   : > { %3304 = vmatpush3.bf16.xpose.msra.mxu0 %v1121_v39 }
 0x519   : > { %3502 = vmatprep.subr.msk.bf16.mxu0 %vm788_vm1, %v1101_v55  ;;  %v977_v62 = vpack.c.bf16 %v972_v59, %v971_v48  ;;  %v3064_v59 = vld [vmem:[%s4991_s1 + $0x60] sm:$0xff] }
 0x51a   : > { %v1556_v11 = vpop.permute.xlu0 %1555 }
 0x51b   : > { %3295 = vmatprep.mubr.msk.bf16.mxu0 %vm886_vm2, %v977_v62  ;;  %v1566_v9 = vpop.permute.xlu1 %1565 }
 0x51c   : > { %3296 = vmatmul.mubr.msk.bf16.gmra.mrb[4].mxu0 %vm886_vm2, %v978_v0  ;;  %v1587_v12 = vsel %vm788_vm1, %v1566_v9, 0  ;;  %v3067_v0 = vld [vmem:[%s4991_s1 + $0x78] sm:$0xff] }
 0x51d   : > { %3307 = vmatprep.mubr.msk.bf16.mxu0 %vm788_vm1, %v1087_v52 }
 0x51e   : > { %v1560_v22 = vpop.permute.xlu0 %1559 }
 0x51f   : > { %v1570_v15 = vpop.permute.xlu1 %1569 }
 0x520   : > { %3306 = vmatpush3.bf16.xpose.msra.mxu0 %v1124_v2  ;;  %v1593_v16 = vsel %vm788_vm1, %v1570_v15, 0 }
 0x521   : > { %3505 = vmatprep.subr.msk.bf16.mxu0 %vm788_vm1, %v1564_v61 }
 0x523   : > { %v1558_v18 = vpop.permute.xlu1 %1557 }
 0x527   : > { %3308 = vmatmul.mubr.msk.bf16.vlgmr.msra.gmra.mrb[8].mxu0 %vm788_vm1, %v1089_v1  ;;  %v1562_v23 = vpop.permute.xlu1 %1561  ;;  %v3065_v1 = vld [vmem:[%s4991_s1 + $0x68] sm:$0xff] }
 0x528   : > { %3311 = vmatprep.mubr.msk.bf16.mxu0 %vm788_vm1, %v1091_v63  ;;  %3352 = vmatpush3.bf16.xpose.msra.mxu0 %v1584_v58 }
 0x529   : > { %3506 = vmatprep.subr.msk.bf16.mxu0 %vm788_vm1, %v1566_v9  ;;  %v3066_v9 = vld [vmem:[%s4991_s1 + $0x70] sm:$0xff] }
 0x52f   : > { %3312 = vmatmul.mubr.msk.bf16.gmra.mrb[12].mxu0 %vm788_vm1, %v1093_v5 }
 0x530   : > { %3354 = vmatpush3.bf16.xpose.msra.mxu0 %v1587_v12  ;;  %3359 = vmatprep.mubr.msk.bf16.mxu0 %vm788_vm1, %v1556_v11 }
 0x531   : > { %3507 = vmatprep.subr.msk.bf16.mxu0 %vm788_vm1, %v1568_v10 }
 0x538   : > { %3356 = vmatpush3.bf16.xpose.msra.mxu0 %v1590_v13 }
 0x539   : > { %3508 = vmatprep.subr.msk.bf16.mxu0 %vm788_vm1, %v1570_v15 }
 0x540   : > { %3358 = vmatpush3.bf16.xpose.msra.mxu0 %v1593_v16 }
 0x547   : > { %3360 = vmatmul.mubr.msk.bf16.vlgmr.msra.gmra.mrb[16].mxu0 %vm788_vm1, %v1558_v18 }
 0x548   : > { %3363 = vmatprep.mubr.msk.bf16.mxu0 %vm788_vm1, %v1560_v22 }
 0x54f   : > { %3364 = vmatmul.mubr.msk.bf16.gmra.mrb[20].mxu0 %vm788_vm1, %v1562_v23 }
 0x5b6   : > { %v4166_v27 = vpop.f32.mrb[0].mxu0 }
 0x5b7   : > { %v4168_v20 = vpop.f32.mrb[1].mxu0 }
 0x5b8   : > { %v4170_v30 = vpop.f32.mrb[2].mxu0 }
 0x5b9   : > { %v1069_v31 = vpack.c.bf16 %v4170_v30, %v4166_v27  ;;  %v4174_v32 = vpop.f32.mrb[3].mxu0  ;;  %v3105_v30 = vld [vmem:[%s4991_s1 + $0xc8] sm:$0xff] }
 0x5ba   : > { %v1068_v33 = vpack.c.bf16 %v4174_v32, %v4168_v20 }
 0x5ef   : > { %v4178_v34 = vpop.f32.mrb[4].mxu0 }
 0x5f0   : > { %v4180_v35 = vpop.f32.mrb[5].mxu0 }
 0x5f1   : > { %v4182_v36 = vpop.f32.mrb[6].mxu0 }
 0x5f2   : > { %v1071_v37 = vpack.c.bf16 %v4182_v36, %v4178_v34  ;;  %v4186_v40 = vpop.f32.mrb[7].mxu0  ;;  %v3111_v34 = vld [vmem:[%s4991_s1 + $0xf8] sm:$0xff]  ;;  %v3109_v36 = vld [vmem:[%s4991_s1 + $0xe8] sm:$0xff] }
 0x5f3   : > { %v1070_v41 = vpack.c.bf16 %v4186_v40, %v4180_v35 }
 0x5fa   : > { %v3309_v21 = vpop.f32.mrb[8].mxu0 }
 0x5fb   : > { %v1160_v45 = vpop.f32.mrb[9].mxu0  ;;  %v1169_v44 = vadd.f32 %v3309_v21, %v3062_v42 }
 0x5fc   : > { %v1161_v50 = vadd.f32 %v3060_v43, %v1160_v45  ;;  %v3310_v29 = vpop.f32.mrb[10].mxu0 }
 0x5fd   : > { %v1163_v52 = vpop.f32.mrb[11].mxu0  ;;  %v1172_v55 = vadd.f32 %v3310_v29, %v3063_v38  ;;  %v1193_v48 = vadd.f32 %v1169_v44, %v3999_v28 }
 0x5fe   : > { %v1164_v53 = vadd.f32 %v3061_v47, %v1163_v52  ;;  %v1191_v54 = vadd.f32 %v1161_v50, %v4010_v46 }
 0x5ff   : > { %v1205_v5 = vsel %vm886_vm2, %v1193_v48, -inf  ;;  %v1194_v58 = vadd.f32 %v1172_v55, %v4027_v56 }
 0x600   : > { %v1199_v57 = vsel %vm886_vm2, %v1191_v54, -inf  ;;  %v1192_v39 = vadd.f32 %v1164_v53, %v4016_v51 }
 0x601   : > { %1200 = vmax.xlane.f32.xlu0 %v1199_v57  ;;  %v1208_v15 = vsel %vm886_vm2, %v1194_v58, -inf }
 0x602   : > { %v3313_v60 = vpop.f32.mrb[12].mxu0  ;;  %v1202_v62 = vsel %vm886_vm2, %v1192_v39, -inf }
 0x603   : > { %1203 = vmax.xlane.f32.xlu1 %v1202_v62  ;;  %v1176_v63 = vpop.f32.mrb[13].mxu0  ;;  %v1185_v13 = vadd.f32 %v3313_v60, %v3066_v9 }
 0x604   : > { %v1177_v2 = vadd.f32 %v3064_v59, %v1176_v63  ;;  %v3314_v61 = vpop.f32.mrb[14].mxu0 }
 0x605   : > { %1206 = vmax.xlane.f32.xlu0 %v1205_v5  ;;  %v1179_v10 = vpop.f32.mrb[15].mxu0  ;;  %v1188_v11 = vadd.f32 %v3314_v61, %v3067_v0  ;;  %v1197_v43 = vadd.f32 %v1185_v13, %v4038_v49 }
 0x606   : > { %v1180_v12 = vadd.f32 %v3065_v1, %v1179_v10  ;;  %v1195_v18 = vadd.f32 %v1177_v2, %v4045_v4 }
 0x607   : > { %v4229_v23 = vadd.f32 %v1188_v11, %v4062_v14  ;;  %v1217_v45 = vsel %vm886_vm2, %v1197_v43, -inf }
 0x608   : > { %v4223_v16 = vadd.f32 %v1180_v12, %v4070_v17  ;;  %v1211_v42 = vsel %vm886_vm2, %v1195_v18, -inf }
 0x609   : > { %1209 = vmax.xlane.f32.xlu0 %v1208_v15  ;;  %v1220_v21 = vsel %vm886_vm2, %v4229_v23, -inf }
 0x60a   : > { %v1214_v22 = vsel %vm886_vm2, %v4223_v16, -inf }
 0x60b   : > { %1215 = vmax.xlane.f32.xlu1 %v1214_v22 }
 0x60d   : > { %1212 = vmax.xlane.f32.xlu0 %v1211_v42 }
 0x60f   : > { %1221 = vmax.xlane.f32.xlu1 %v1220_v21 }
 0x611   : > { %1218 = vmax.xlane.f32.xlu0 %v1217_v45 }
 0x61a   : > { %v4236_v47 = vpop.f32.mrb[16].mxu0 }
 0x61b   : > { %v4238_v44 = vpop.f32.mrb[17].mxu0 }
 0x61c   : > { %v4240_v50 = vpop.f32.mrb[18].mxu0 }
 0x61d   : > { %v4242_v29 = vpop.f32.mrb[19].mxu0 }
 0x622   : > { %v4244_v38 = vpop.f32.mrb[20].mxu0 }
 0x623   : > { %v4246_v52 = vpop.f32.mrb[21].mxu0 }
 0x624   : > { %v4248_v53 = vpop.f32.mrb[22].mxu0 }
 0x625   : > { %v4250_v55 = vpop.f32.mrb[23].mxu0 }
 0x68e   : > { %v1201_v57 = vpop.xlane.xlu0 %1200 }
 0x68f   : > { %v1223_v59 = vsub.f32 %v1191_v54, %v1201_v57 }
 0x690   : > { %v1204_v60 = vpop.xlane.xlu1 %1203 }
 0x691   : > { %v1231_v0 = vmul.f32 1.442695, %v1223_v59  ;;  %v1224_v1 = vsub.f32 %v1192_v39, %v1204_v60 }
 0x692   : > { %v1207_v62 = vpop.xlane.xlu0 %1206 }
 0x693   : > { %v1225_v63 = vsub.f32 %v1193_v48, %v1207_v62  ;;  %v1233_v9 = vmul.f32 1.442695, %v1224_v1 }
 0x695   : > { %v1235_v2 = vmul.f32 1.442695, %v1225_v63 }
 0x696   : > { %v1210_v61 = vpop.xlane.xlu0 %1209 }
 0x697   : > { %3594 = vpow2.f32 %v1235_v2  ;;  %v1226_v5 = vsub.f32 %v1194_v58, %v1210_v61 }
 0x698   : > { %3596 = vpow2.f32 %v1231_v0  ;;  %v1216_v63 = vpop.xlane.xlu1 %1215 }
 0x699   : > { %v1237_v10 = vmul.f32 1.442695, %v1226_v5  ;;  %v1228_v2 = vsub.f32 %v4223_v16, %v1216_v63  ;;  %v3091_v63 = vld [vmem:[%s4991_s1 + $0xb8] sm:$0xff] }
 0x69a   : > { %v1213_v11 = vpop.xlane.xlu0 %1212 }
 0x69b   : > { %3598 = vpow2.f32 %v1237_v10  ;;  %v1227_v12 = vsub.f32 %v1195_v18, %v1213_v11  ;;  %v1241_v5 = vmul.f32 1.442695, %v1228_v2 }
 0x69c   : > { %3600 = vpow2.f32 %v1233_v9  ;;  %v1222_v0 = vpop.xlane.xlu1 %1221 }
 0x69d   : > { %v1239_v54 = vmul.f32 1.442695, %v1227_v12  ;;  %v1230_v1 = vsub.f32 %v4229_v23, %v1222_v0 }
 0x69e   : > { %v1219_v13 = vpop.xlane.xlu0 %1218 }
 0x69f   : > { %v1229_v15 = vsub.f32 %v1197_v43, %v1219_v13  ;;  %v1245_v61 = vmul.f32 1.442695, %v1230_v1 }
 0x6a1   : > { %v4252_v22 = vpop.eup %3594  ;;  %v1243_v42 = vmul.f32 1.442695, %v1229_v15  ;;  %v3087_v15 = vld [vmem:[%s4991_s1 + $0x98] sm:$0xff] }
 0x6a2   : > { %v1253_v39 = vsel %vm886_vm2, %v4252_v22, 0.0  ;;  %v4256_v48 = vpop.eup %3596 }
 0x6a3   : > { %3602 = vpow2.f32 %v1243_v42  ;;  %1254 = vadd.xlane.f32.xlu0 %v1253_v39  ;;  %v1247_v21 = vsel %vm886_vm2, %v4256_v48, 0.0  ;;  %v3088_v39 = vld [vmem:[%s4991_s1 + $0xa0] sm:$0xff] }
 0x6a4   : > { %3604 = vpow2.f32 %v1239_v54  ;;  %v1641_v54 = vadd.f32 %v4240_v50, %v3087_v15 }
 0x6a5   : > { %v4258_v58 = vpop.eup %3598  ;;  %3606 = vpow2.f32 %v1245_v61 }
 0x6a6   : > { %v1256_v18 = vsel %vm886_vm2, %v4258_v58, 0.0  ;;  %v4264_v43 = vpop.eup %3600  ;;  %3608 = vpow2.f32 %v1241_v5  ;;  %v4329_v50 = vadd.f32 %v1641_v54, %v4027_v56 }
 0x6a7   : > { %1248 = vadd.xlane.f32.xlu0 %v1247_v21  ;;  %1257 = vadd.xlane.f32.xlu1 %v1256_v18  ;;  %v1250_v45 = vsel %vm886_vm2, %v4264_v43, 0.0 }
 0x6a8   : > { %v1677_v18 = vsel %vm886_vm2, %v4329_v50, -inf }
 0x6ab   : > { %1251 = vadd.xlane.f32.xlu1 %v1250_v45 }
 0x6ad   : > { %v4268_v57 = vpop.eup %3602 }
 0x6ae   : > { %v1265_v59 = vsel %vm886_vm2, %v4268_v57, 0.0  ;;  %v4272_v60 = vpop.eup %3604 }
 0x6af   : > { %1266 = vadd.xlane.f32.xlu0 %v1265_v59  ;;  %v1259_v62 = vsel %vm886_vm2, %v4272_v60, 0.0  ;;  %v4292_v9 = vpop.eup %3606 }
 0x6b0   : > { %v1268_v23 = vsel %vm886_vm2, %v4292_v9, 0.0  ;;  %v4296_v10 = vpop.eup %3608 }
 0x6b1   : > { %v1262_v16 = vsel %vm886_vm2, %v4296_v10, 0.0 }
 0x6b3   : > { %1260 = vadd.xlane.f32.xlu0 %v1259_v62 }
 0x6bc   : > { %1293 = vrot.lane.b32.xlu1 %v3954_v3, %s3768_s21 }
 0x6c0   : > { %1295 = vrot.lane.b32.xlu1 %v3968_v24, %s3768_s21 }
 0x6c9   : > { %1291 = vrot.lane.b32.xlu0 %v3956_v6, %s3768_s21 }
 0x6cd   : > { %1959 = vrot.lane.b32.xlu0 %v3956_v6, %s3769_s22 }
 0x6d1   : > { %1963 = vrot.lane.b32.xlu0 %v3968_v24, %s3769_s22 }
 0x6d5   : > { %1951 = vrot.lane.b32.xlu0 %v3961_v8, %s3770_s24  ;;  %v3084_v8 = vld [vmem:[%s4991_s1 + $0x80] sm:$0xff] }
 0x6d6   : > { %v1630_v11 = vadd.f32 %v3084_v8, %v4238_v44 }
 0x6d8   : > { %v4309_v13 = vadd.f32 %v1630_v11, %v4010_v46  ;;  %v1646_v46 = vadd.f32 %v3088_v39, %v4246_v52 }
 0x6d9   : > { %1955 = vrot.lane.b32.xlu0 %v3972_v26, %s3770_s24  ;;  %v3086_v26 = vld [vmem:[%s4991_s1 + $0x90] sm:$0xff] }
 0x6da   : > { %v1638_v12 = vadd.f32 %v4236_v47, %v3086_v26  ;;  %v1668_v42 = vsel %vm886_vm2, %v4309_v13, -inf  ;;  %v4340_v52 = vadd.f32 %v1646_v46, %v4045_v4  ;;  %v3085_v4 = vld [vmem:[%s4991_s1 + $0x88] sm:$0xff] }
 0x6db   : > { %v1633_v59 = vadd.f32 %v3085_v4, %v4242_v29 }
 0x6dc   : > { %v4318_v44 = vadd.f32 %v1638_v12, %v3999_v28  ;;  %v3090_v28 = vld [vmem:[%s4991_s1 + $0xb0] sm:$0xff]  ;;  %v1680_v56 = vsel %vm886_vm2, %v4340_v52, -inf }
 0x6dd   : > { %v1654_v21 = vadd.f32 %v4244_v38, %v3090_v28 }
 0x6de   : > { %v1674_v47 = vsel %vm886_vm2, %v4318_v44, -inf }
 0x6df   : > { %v4347_v45 = vadd.f32 %v1654_v21, %v4038_v49  ;;  %v3089_v49 = vld [vmem:[%s4991_s1 + $0xa8] sm:$0xff] }
 0x6e0   : > { %v1649_v62 = vadd.f32 %v3089_v49, %v4250_v55 }
 0x6e1   : > { %v1686_v38 = vsel %vm886_vm2, %v4347_v45, -inf }
 0x6e2   : > { %v4373_v29 = vadd.f32 %v1649_v62, %v4070_v17 }
 0x6e4   : > { %1269 = vadd.xlane.f32.xlu1 %v1268_v23  ;;  %v1683_v55 = vsel %vm886_vm2, %v4373_v29, -inf }
 0x6e8   : > { %1263 = vadd.xlane.f32.xlu1 %v1262_v16 }
 0x6f8   : > { %1669 = vmax.xlane.f32.xlu0 %v1668_v42 }
 0x6f9   : > { %1297 = vrot.lane.b32.xlu1 %v3966_v19, %s3768_s21  ;;  %s494_s21 = scalar_lea.vmem %s5005_s15, %s3145_s20 }
 0x6fc   : > { %1675 = vmax.xlane.f32.xlu0 %v1674_v47 }
 0x6fd   : > { %1961 = vrot.lane.b32.xlu1 %v3954_v3, %s3769_s22 }
 0x700   : > { %1678 = vmax.xlane.f32.xlu0 %v1677_v18 }
 0x701   : > { %1965 = vrot.lane.b32.xlu1 %v3966_v19, %s3769_s22 }
 0x704   : > { %1681 = vmax.xlane.f32.xlu0 %v1680_v56 }
 0x705   : > { %1953 = vrot.lane.b32.xlu1 %v3958_v7, %s3770_s24  ;;  %v4364_v7 = vadd.f32 %v1633_v59, %v4016_v51 }
 0x707   : > { %v1671_v0 = vsel %vm886_vm2, %v4364_v7, -inf }
 0x708   : > { %1687 = vmax.xlane.f32.xlu0 %v1686_v38 }
 0x709   : > { %1957 = vrot.lane.b32.xlu1 %v3970_v25, %s3770_s24  ;;  %v1657_v25 = vadd.f32 %v4248_v53, %v3091_v63  ;;  %s3771_s24 = smov 48  }
 0x70b   : > { %v4378_v51 = vadd.f32 %v1657_v25, %v4062_v14 }
 0x70d   : > { %v1689_v53 = vsel %vm886_vm2, %v4378_v51, -inf }
 0x72d   : > { %1672 = vmax.xlane.f32.xlu1 %v1671_v0 }
 0x730   : > { %v1255_v1 = vpop.xlane.xlu0 %1254 }
 0x731   : > { %1684 = vmax.xlane.f32.xlu1 %v1683_v55 }
 0x734   : > { %v1258_v2 = vpop.xlane.xlu1 %1257  ;;  %v1249_v61 = vpop.xlane.xlu0 %1248 }
 0x735   : > { %1690 = vmax.xlane.f32.xlu1 %v1689_v53  ;;  %3610 = vrcp.f32 %v1249_v61 }
 0x738   : > { %v1252_v5 = vpop.xlane.xlu1 %1251 }
 0x739   : > { %3612 = vrcp.f32 %v1252_v5 }
 0x73a   : > { %3614 = vrcp.f32 %v1258_v2 }
 0x73b   : > { %3616 = vrcp.f32 %v1255_v1 }
 0x73c   : > { %v1267_v17 = vpop.xlane.xlu0 %1266  ;;  %v1294_v11 = vpop.permute.xlu1 %1293 }
 0x73f   : > { %v3611_v16 = vpop.eup %3610 }
 0x740   : > { %v1261_v23 = vpop.xlane.xlu0 %1260  ;;  %v1279_v12 = vmul.f32 %v3611_v16, %v4256_v48  ;;  %v1296_v39 = vpop.permute.xlu1 %1295 }
 0x743   : > { %v3613_v8 = vpop.eup %3612 }
 0x744   : > { %v1292_v26 = vpop.permute.xlu0 %1291  ;;  %v1280_v14 = vmul.f32 %v3613_v8, %v4264_v43  ;;  %v3615_v47 = vpop.eup %3614 }
 0x745   : > { %3315 = vmatprep.subr.bf16.mxu1 %v1292_v26  ;;  %v3617_v21 = vpop.eup %3616  ;;  %v1282_v18 = vmul.f32 %v3615_v47, %v4258_v58 }
 0x746   : > { %3316 = vmatpush3.bf16.msra.mxu1 %v1292_v26  ;;  %v1287_v15 = vpack.c.bf16 %v1280_v14, %v1279_v12  ;;  %v1281_v38 = vmul.f32 %v3617_v21, %v4252_v22 }
 0x747   : > { %3317 = vmatprep.subr.bf16.mxu1 %v1294_v11 }
 0x748   : > { %3323 = vmatprep.mubr.msk.bf16.mxu1 %vm886_vm2, %v1287_v15  ;;  %v1960_v54 = vpop.permute.xlu0 %1959  ;;  %v1288_v4 = vpack.c.bf16 %v1282_v18, %v1281_v38 }
 0x749   : > { %v1980_v42 = vsel %vm788_vm1, %v1960_v54, 0  ;;  %3510 = vmatprep.subr.msk.bf16.mxu0 %vm788_vm1, %v1960_v54 }
 0x74a   : > { %3318 = vmatpush3.bf16.msra.mxu1 %v1294_v11  ;;  %3394 = vmatpush3.bf16.xpose.msra.mxu0 %v1980_v42 }
 0x74b   : > { %3319 = vmatprep.subr.bf16.mxu1 %v1296_v39 }
 0x74c   : > { %v1964_v46 = vpop.permute.xlu0 %1963 }
 0x74e   : > { %3320 = vmatpush3.bf16.msra.mxu1 %v1296_v39 }
 0x750   : > { %v1952_v48 = vpop.permute.xlu0 %1951 }
 0x751   : > { %3401 = vmatprep.mubr.msk.bf16.mxu0 %vm788_vm1, %v1952_v48 }
 0x754   : > { %v1956_v22 = vpop.permute.xlu0 %1955 }
 0x771   : > { %v1270_v43 = vpop.xlane.xlu1 %1269 }
 0x772   : > { %3618 = vrcp.f32 %v1270_v43 }
 0x773   : > { %3620 = vrcp.f32 %v1261_v23 }
 0x774   : > { %3622 = vrcp.f32 %v1267_v17  ;;  %v1986_v17 = vsel %vm788_vm1, %v1964_v46, 0 }
 0x775   : > { %v1264_v28 = vpop.xlane.xlu1 %1263 }
 0x776   : > { %3624 = vrcp.f32 %v1264_v28 }
 0x779   : > { %v1298_v56 = vpop.permute.xlu1 %1297 }
 0x77a   : > { %3321 = vmatprep.subr.bf16.mxu1 %v1298_v56 }
 0x77b   : > { %3322 = vmatpush3.bf16.msra.mxu1 %v1298_v56 }
 0x77c   : > { %v3619_v59 = vpop.eup %3618 }
 0x77d   : > { %v1962_v49 = vpop.permute.xlu1 %1961  ;;  %v3621_v62 = vpop.eup %3620  ;;  %v1286_v58 = vmul.f32 %v3619_v59, %v4292_v9 }
 0x77e   : > { %v1983_v63 = vsel %vm788_vm1, %v1962_v49, 0  ;;  %3324 = vmatmul.mubr.msk.bf16.vlgmr.msra.gmra.mrb[16].mxu1 %vm886_vm2, %v1288_v4  ;;  %3511 = vmatprep.subr.msk.bf16.mxu0 %vm788_vm1, %v1962_v49  ;;  %v3623_v25 = vpop.eup %3622  ;;  %v1283_v1 = vmul.f32 %v3621_v62, %v4272_v60 }
 0x77f   : > { %3396 = vmatpush3.bf16.xpose.msra.mxu0 %v1983_v63  ;;  %v1285_v2 = vmul.f32 %v3623_v25, %v4268_v57  ;;  %v1384_v63 = vld [vmem:[%s4997_s7 + $0x4] sm:$0xf]  ;;  %v1072_v25 = vld [vmem:[%s4997_s7] sm:$0xf] }
 0x780   : > { %v3625_v0 = vpop.eup %3624  ;;  %3512 = vmatprep.subr.msk.bf16.mxu0 %vm788_vm1, %v1964_v46  ;;  %3503 = vmatprep.subr.msk.bf16.mxu1 %vm1397_vm3, %v1384_v63 }
 0x781   : > { %v1284_v55 = vmul.f32 %v3625_v0, %v4296_v10  ;;  %v1290_v53 = vpack.c.bf16 %v1286_v58, %v1285_v2  ;;  %v1966_v23 = vpop.permute.xlu1 %1965 }
 0x782   : > { %v1989_v11 = vsel %vm788_vm1, %v1966_v23, 0 }
 0x783   : > { %v1289_v61 = vpack.c.bf16 %v1284_v55, %v1283_v1 }
 0x785   : > { %3327 = vmatprep.mubr.msk.bf16.mxu1 %vm886_vm2, %v1289_v61  ;;  %v1670_v5 = vpop.xlane.xlu0 %1669  ;;  %v1954_v15 = vpop.permute.xlu1 %1953 }
 0x786   : > { %3328 = vmatmul.mubr.msk.bf16.gmra.mrb[20].mxu1 %vm886_vm2, %v1290_v53  ;;  %v1692_v9 = vsub.f32 %v4309_v13, %v1670_v5 }
 0x787   : > { %3398 = vmatpush3.bf16.xpose.msra.mxu0 %v1986_v17 }
 0x788   : > { %3513 = vmatprep.subr.msk.bf16.mxu0 %vm788_vm1, %v1966_v23  ;;  %v1700_v16 = vmul.f32 1.442695, %v1692_v9 }
 0x789   : > { %v1676_v60 = vpop.xlane.xlu0 %1675  ;;  %v1958_v43 = vpop.permute.xlu1 %1957 }
 0x78a   : > { %v1694_v10 = vsub.f32 %v4318_v44, %v1676_v60 }
 0x78c   : > { %v1704_v57 = vmul.f32 1.442695, %v1694_v10 }
 0x78d   : > { %v1679_v8 = vpop.xlane.xlu0 %1678 }
 0x78e   : > { %3626 = vpow2.f32 %v1704_v57  ;;  %v1695_v26 = vsub.f32 %v4329_v50, %v1679_v8 }
 0x78f   : > { %3400 = vmatpush3.bf16.xpose.msra.mxu0 %v1989_v11  ;;  %3628 = vpow2.f32 %v1700_v16 }
 0x790   : > { %v1706_v12 = vmul.f32 1.442695, %v1695_v26 }
 0x791   : > { %v1682_v14 = vpop.xlane.xlu0 %1681 }
 0x792   : > { %3630 = vpow2.f32 %v1706_v12  ;;  %v1696_v13 = vsub.f32 %v4340_v52, %v1682_v14  ;;  %v1479_v12 = vsel %vm1397_vm3, %v1072_v25, 0 }
 0x794   : > { %v1708_v39 = vmul.f32 1.442695, %v1696_v13 }
 0x795   : > { %v1688_v54 = vpop.xlane.xlu0 %1687 }
 0x796   : > { %v1698_v42 = vsub.f32 %v4347_v45, %v1688_v54  ;;  %3402 = vmatmul.mubr.msk.bf16.vlgmr.msra.gmra.mrb[24].mxu0 %vm788_vm1, %v1954_v15 }
 0x797   : > { %3405 = vmatprep.mubr.msk.bf16.mxu0 %vm788_vm1, %v1956_v22 }
 0x798   : > { %v4410_v44 = vpop.eup %3626  ;;  %v1712_v46 = vmul.f32 1.442695, %v1698_v42 }
 0x799   : > { %v1722_v50 = vsel %vm886_vm2, %v4410_v44, 0.0  ;;  %v4414_v48 = vpop.eup %3628 }
 0x79a   : > { %3632 = vpow2.f32 %v1712_v46  ;;  %1723 = vadd.xlane.f32.xlu0 %v1722_v50  ;;  %v1716_v45 = vsel %vm886_vm2, %v4414_v48, 0.0 }
 0x79b   : > { %3634 = vpow2.f32 %v1708_v39 }
 0x79c   : > { %v4416_v52 = vpop.eup %3630 }
 0x79d   : > { %v1725_v47 = vsel %vm886_vm2, %v4416_v52, 0.0 }
 0x79e   : > { %3406 = vmatmul.mubr.msk.bf16.gmra.mrb[28].mxu0 %vm788_vm1, %v1958_v43  ;;  %1717 = vadd.xlane.f32.xlu0 %v1716_v45 }
 0x79f   : > { %1726 = vadd.xlane.f32.xlu1 %v1725_v47  ;;  %v3106_v47 = vld [vmem:[%s4991_s1 + $0xd0] sm:$0xff] }
 0x7a4   : > { %v4423_v28 = vpop.eup %3632 }
 0x7a5   : > { %v1734_v21 = vsel %vm886_vm2, %v4423_v28, 0.0  ;;  %v4427_v18 = vpop.eup %3634 }
 0x7a6   : > { %1735 = vadd.xlane.f32.xlu0 %v1734_v21  ;;  %v1728_v56 = vsel %vm886_vm2, %v4427_v18, 0.0  ;;  %v3104_v21 = vld [vmem:[%s4991_s1 + $0xc0] sm:$0xff] }
 0x7aa   : > { %1729 = vadd.xlane.f32.xlu0 %v1728_v56 }
 0x7ba   : > { %v1673_v38 = vpop.xlane.xlu1 %1672 }
 0x7bb   : > { %v1693_v4 = vsub.f32 %v4364_v7, %v1673_v38  ;;  %v1399_v7 = vsel %vm1397_vm3, %v1384_v63, 0 }
 0x7bc   : > { %3332 = vmatpush3.bf16.msra.mxu1 %v1399_v7  ;;  %v3739_v7 = vld [vmem:[%s4992_s2 + $0x10] sm:$0xff] }
 0x7bd   : > { %v1702_v59 = vmul.f32 1.442695, %v1693_v4  ;;  %3504 = vmatprep.subr.msk.bf16.mxu1 %vm1397_vm3, %v1072_v25  ;;  %v3107_v4 = vld [vmem:[%s4991_s1 + $0xd8] sm:$0xff] }
 0x7be   : > { %v1685_v0 = vpop.xlane.xlu1 %1684 }
 0x7bf   : > { %3636 = vpow2.f32 %v1702_v59  ;;  %v1697_v1 = vsub.f32 %v4373_v29, %v1685_v0 }
 0x7c0   : > { %1760 = vrot.lane.b32.xlu0 %v3956_v6, %s3771_s24 }
 0x7c1   : > { %v1710_v2 = vmul.f32 1.442695, %v1697_v1  ;;  %v3108_v1 = vld [vmem:[%s4991_s1 + $0xe0] sm:$0xff] }
 0x7c2   : > { %v1691_v58 = vpop.xlane.xlu1 %1690 }
 0x7c3   : > { %v1699_v22 = vsub.f32 %v4378_v51, %v1691_v58 }
 0x7c5   : > { %v1714_v55 = vmul.f32 1.442695, %v1699_v22 }
 0x7c7   : > { %3638 = vpow2.f32 %v1714_v55 }
 0x7c8   : > { %3640 = vpow2.f32 %v1710_v2 }
 0x7c9   : > { %v4433_v49 = vpop.eup %3636 }
 0x7ca   : > { %v1719_v62 = vsel %vm886_vm2, %v4433_v49, 0.0 }
 0x7cb   : > { %1720 = vadd.xlane.f32.xlu1 %v1719_v62 }
 0x7d1   : > { %v4450_v61 = vpop.eup %3638 }
 0x7d2   : > { %v1737_v53 = vsel %vm886_vm2, %v4450_v61, 0.0  ;;  %v4454_v5 = vpop.eup %3640 }
 0x7d3   : > { %v1731_v17 = vsel %vm886_vm2, %v4454_v5, 0.0 }
 0x7dc   : > { %1762 = vrot.lane.b32.xlu1 %v3954_v3, %s3771_s24 }
 0x7e0   : > { %1764 = vrot.lane.b32.xlu1 %v3968_v24, %s3771_s24 }
 0x804   : > { %1738 = vadd.xlane.f32.xlu1 %v1737_v53 }
 0x808   : > { %1732 = vadd.xlane.f32.xlu1 %v1731_v17 }
 0x819   : > { %1766 = vrot.lane.b32.xlu1 %v3966_v19, %s3771_s24 }
 0x827   : > { %v4459_v51 = vpop.xlane.xlu0 %1723 }
 0x82b   : > { %v1718_v29 = vpop.xlane.xlu0 %1717 }
 0x82c   : > { %v4465_v26 = vpop.xlane.xlu1 %1726 }
 0x833   : > { %v4461_v23 = vpop.xlane.xlu0 %1735 }
 0x837   : > { %v4463_v10 = vpop.xlane.xlu0 %1729 }
 0x83b   : > { %v1761_v14 = vpop.permute.xlu0 %1760 }
 0x851   : > { %v3325_v9 = vpop.f32.mrb[16].mxu1 }
 0x852   : > { %v1349_v60 = vpop.f32.mrb[17].mxu1 }
 0x853   : > { %v3326_v16 = vpop.f32.mrb[18].mxu1 }
 0x854   : > { %v1381_v57 = vpack.c.bf16 %v3326_v16, %v3325_v9  ;;  %v1352_v8 = vpop.f32.mrb[19].mxu1  ;;  %v3110_v16 = vld [vmem:[%s4991_s1 + $0xf0] sm:$0xff] }
 0x855   : > { %v1380_v11 = vpack.c.bf16 %v1352_v8, %v1349_v60 }
 0x857   : > { %3333 = vmatprep.mubr.msk.bf16.mxu1 %vm788_vm1, %v1380_v11 }
 0x858   : > { %3334 = vmatmul.mubr.msk.bf16.vlgmr.msra.gmra.mrb[24].mxu1 %vm788_vm1, %v1381_v57  ;;  %v1721_v15 = vpop.xlane.xlu1 %1720 }
 0x859   : > { %3342 = vmatpush3.bf16.msra.mxu1 %v1479_v12  ;;  %v3329_v13 = vpop.f32.mrb[20].mxu1  ;;  %3642 = vrcp.f32 %v1721_v15  ;;  %v3743_v15 = vld [vmem:[%s4992_s2 + $0x28] sm:$0xff] }
 0x85a   : > { %3367 = vmatprep.subr.bf16.mxu1 %v1761_v14  ;;  %v1365_v54 = vpop.f32.mrb[21].mxu1  ;;  %3644 = vrcp.f32 %v1718_v29 }
 0x85b   : > { %v3330_v42 = vpop.f32.mrb[22].mxu1  ;;  %3646 = vrcp.f32 %v4465_v26 }
 0x85c   : > { %v1383_v39 = vpack.c.bf16 %v3330_v42, %v3329_v13  ;;  %v1368_v46 = vpop.f32.mrb[23].mxu1  ;;  %v1763_v45 = vpop.permute.xlu1 %1762  ;;  %3648 = vrcp.f32 %v4459_v51 }
 0x85d   : > { %v1382_v50 = vpack.c.bf16 %v1368_v46, %v1365_v54 }
 0x85f   : > { %3337 = vmatprep.mubr.msk.bf16.mxu1 %vm788_vm1, %v1382_v50 }
 0x860   : > { %3338 = vmatmul.mubr.msk.bf16.gmra.mrb[28].mxu1 %vm788_vm1, %v1383_v39  ;;  %v1765_v40 = vpop.permute.xlu1 %1764  ;;  %v3744_v39 = vld [vmem:[%s4992_s2 + $0x38] sm:$0xff] }
 0x861   : > { %3343 = vmatprep.mubr.msk.bf16.mxu1 %vm788_vm1, %v1068_v33 }
 0x863   : > { %v3643_v43 = vpop.eup %3642 }
 0x864   : > { %v3645_v56 = vpop.eup %3644 }
 0x865   : > { %v1748_v35 = vmul.f32 %v3645_v56, %v4414_v48  ;;  %v3740_v48 = vld [vmem:[%s4992_s2 + $0x8] sm:$0xff] }
 0x868   : > { %3344 = vmatmul.mubr.msk.bf16.vlgmr.msra.gmra.mrb[24].mxu1 %vm788_vm1, %v1069_v31  ;;  %v1749_v31 = vmul.f32 %v3643_v43, %v4433_v49  ;;  %v3745_v43 = vld [vmem:[%s4992_s2 + $0x30] sm:$0xff] }
 0x869   : > { %3368 = vmatpush3.bf16.msra.mxu1 %v1761_v14  ;;  %3347 = vmatprep.mubr.msk.bf16.mxu1 %vm788_vm1, %v1070_v41  ;;  %v3403_v20 = vpop.f32.mrb[24].mxu0  ;;  %v3738_v41 = vld [vmem:[%s4992_s2] sm:$0xff] }
 0x86a   : > { %3369 = vmatprep.subr.bf16.mxu1 %v1763_v45  ;;  %v2025_v27 = vpop.f32.mrb[25].mxu0  ;;  %v2034_v32 = vadd.f32 %v3403_v20, %v3106_v47  ;;  %v1756_v49 = vpack.c.bf16 %v1749_v31, %v1748_v35  ;;  %v3742_v14 = vld [vmem:[%s4992_s2 + $0x20] sm:$0xff] }
 0x86b   : > { %v2026_v33 = vadd.f32 %v3104_v21, %v2025_v27  ;;  %v3404_v38 = vpop.f32.mrb[26].mxu0  ;;  %v3647_v27 = vpop.eup %3646 }
 0x86c   : > { %v2028_v59 = vpop.f32.mrb[27].mxu0  ;;  %v4506_v25 = vadd.f32 %v3739_v7, %v2034_v32  ;;  %v2037_v0 = vadd.f32 %v3404_v38, %v3107_v4  ;;  %v3649_v31 = vpop.eup %3648  ;;  %v1751_v32 = vmul.f32 %v3647_v27, %v4416_v52 }
 0x86d   : > { %v4501_v62 = vadd.f32 %v3738_v41, %v2026_v33  ;;  %3370 = vmatpush3.bf16.msra.mxu1 %v1763_v45  ;;  %v2029_v63 = vadd.f32 %v3105_v30, %v2028_v59  ;;  %v1750_v38 = vmul.f32 %v3649_v31, %v4410_v44  ;;  %v1853_v44 = vld [vmem:[%s4997_s7 + $0x8] sm:$0xf] }
 0x86e   : > { %3371 = vmatprep.subr.bf16.mxu1 %v1765_v40  ;;  %v2070_v60 = vsel %vm886_vm2, %v4506_v25, -inf }
 0x86f   : > { %v4511_v58 = vadd.f32 %v3740_v48, %v2029_v63  ;;  %v2064_v22 = vsel %vm886_vm2, %v4501_v62, -inf  ;;  %v1757_v26 = vpack.c.bf16 %v1751_v32, %v1750_v38 }
 0x870   : > { %3348 = vmatmul.mubr.msk.bf16.gmra.mrb[28].mxu1 %vm788_vm1, %v1071_v37  ;;  %2065 = vmax.xlane.f32.xlu0 %v2064_v22  ;;  %v3741_v37 = vld [vmem:[%s4992_s2 + $0x18] sm:$0xff] }
 0x871   : > { %3372 = vmatpush3.bf16.msra.mxu1 %v1765_v40  ;;  %3375 = vmatprep.mubr.msk.bf16.mxu1 %vm886_vm2, %v1756_v49  ;;  %v3407_v55 = vpop.f32.mrb[28].mxu0  ;;  %v2067_v2 = vsel %vm886_vm2, %v4511_v58, -inf  ;;  %v4534_v17 = vadd.f32 %v3741_v37, %v2037_v0 }
 0x872   : > { %v2041_v53 = vpop.f32.mrb[29].mxu0  ;;  %2068 = vmax.xlane.f32.xlu1 %v2067_v2  ;;  %v2050_v12 = vadd.f32 %v3407_v55, %v3110_v16 }
 0x873   : > { %v2042_v29 = vadd.f32 %v3108_v1, %v2041_v53  ;;  %v3408_v9 = vpop.f32.mrb[30].mxu0  ;;  %v2073_v42 = vsel %vm886_vm2, %v4534_v17, -inf }
 0x874   : > { %v2044_v57 = vpop.f32.mrb[31].mxu0  ;;  %2071 = vmax.xlane.f32.xlu0 %v2070_v60  ;;  %v2053_v8 = vadd.f32 %v3408_v9, %v3111_v34  ;;  %v2062_v45 = vadd.f32 %v3745_v43, %v2050_v12 }
 0x875   : > { %v2045_v11 = vadd.f32 %v3109_v36, %v2044_v57  ;;  %v4544_v13 = vadd.f32 %v3742_v14, %v2042_v29 }
 0x876   : > { %v4556_v46 = vadd.f32 %v3744_v39, %v2053_v8  ;;  %v2082_v56 = vsel %vm886_vm2, %v2062_v45, -inf }
 0x877   : > { %v4549_v54 = vadd.f32 %v3743_v15, %v2045_v11  ;;  %v2076_v47 = vsel %vm886_vm2, %v4544_v13, -inf }
 0x878   : > { %2074 = vmax.xlane.f32.xlu0 %v2073_v42  ;;  %v2085_v21 = vsel %vm886_vm2, %v4556_v46, -inf }
 0x879   : > { %v2079_v50 = vsel %vm886_vm2, %v4549_v54, -inf }
 0x87a   : > { %2080 = vmax.xlane.f32.xlu1 %v2079_v50 }
 0x87c   : > { %2077 = vmax.xlane.f32.xlu0 %v2076_v47 }
 0x87e   : > { %2086 = vmax.xlane.f32.xlu1 %v2085_v21 }
 0x880   : > { %2083 = vmax.xlane.f32.xlu0 %v2082_v56 }
 0x891   : > { %v1739_v20 = vpop.xlane.xlu1 %1738 }
 0x892   : > { %3650 = vrcp.f32 %v1739_v20 }
 0x893   : > { %3652 = vrcp.f32 %v4463_v10 }
 0x894   : > { %3654 = vrcp.f32 %v4461_v23 }
 0x895   : > { %v1733_v30 = vpop.xlane.xlu1 %1732 }
 0x896   : > { %3656 = vrcp.f32 %v1733_v30 }
 0x899   : > { %v1767_v33 = vpop.permute.xlu1 %1766 }
 0x89a   : > { %3373 = vmatprep.subr.bf16.mxu1 %v1767_v33 }
 0x89b   : > { %3374 = vmatpush3.bf16.msra.mxu1 %v1767_v33 }
 0x89c   : > { %v3651_v4 = vpop.eup %3650  ;;  %3509 = vmatprep.subr.msk.bf16.mxu1 %vm1397_vm3, %v1853_v44 }
 0x89d   : > { %v3653_v51 = vpop.eup %3652  ;;  %v1755_v35 = vmul.f32 %v3651_v4, %v4450_v61  ;;  %v1867_v61 = vsel %vm1397_vm3, %v1853_v44, 0 }
 0x89e   : > { %3376 = vmatmul.mubr.msk.bf16.vlgmr.msra.gmra.mrb[32].mxu1 %vm886_vm2, %v1757_v26  ;;  %v3655_v59 = vpop.eup %3654  ;;  %v1752_v23 = vmul.f32 %v3653_v51, %v4427_v18 }
 0x89f   : > { %v1754_v52 = vmul.f32 %v3655_v59, %v4423_v28  ;;  %3384 = vmatpush3.bf16.msra.mxu1 %v1867_v61 }
 0x8a0   : > { %v3657_v10 = vpop.eup %3656 }
 0x8a1   : > { %v1753_v40 = vmul.f32 %v3657_v10, %v4454_v5  ;;  %v1759_v63 = vpack.c.bf16 %v1755_v35, %v1754_v52 }
 0x8a3   : > { %v1758_v41 = vpack.c.bf16 %v1753_v40, %v1752_v23 }
 0x8a5   : > { %3379 = vmatprep.mubr.msk.bf16.mxu1 %vm886_vm2, %v1758_v41 }
 0x8a6   : > { %3380 = vmatmul.mubr.msk.bf16.gmra.mrb[36].mxu1 %vm886_vm2, %v1759_v63 }
 0x8fd   : > { %v2066_v18 = vpop.xlane.xlu0 %2065 }
 0x8fe   : > { %v2088_v5 = vsub.f32 %v4501_v62, %v2066_v18 }
 0x8ff   : > { %v2069_v49 = vpop.xlane.xlu1 %2068 }
 0x900   : > { %v2096_v0 = vmul.f32 1.442695, %v2088_v5  ;;  %v2089_v48 = vsub.f32 %v4511_v58, %v2069_v49 }
 0x901   : > { %v2072_v28 = vpop.xlane.xlu0 %2071 }
 0x902   : > { %v2090_v7 = vsub.f32 %v4506_v25, %v2072_v28  ;;  %v2098_v2 = vmul.f32 1.442695, %v2089_v48 }
 0x904   : > { %v2100_v22 = vmul.f32 1.442695, %v2090_v7 }
 0x905   : > { %v2075_v1 = vpop.xlane.xlu0 %2074 }
 0x906   : > { %3658 = vpow2.f32 %v2100_v22  ;;  %v2091_v55 = vsub.f32 %v4534_v17, %v2075_v1  ;;  %v2249_v1 = vld [vmem:[%s4997_s7 + $0xc] sm:$0xf] }
 0x907   : > { %3660 = vpow2.f32 %v2096_v0  ;;  %v2081_v42 = vpop.xlane.xlu1 %2080 }
 0x908   : > { %v2102_v53 = vmul.f32 1.442695, %v2091_v55  ;;  %v2093_v43 = vsub.f32 %v4549_v54, %v2081_v42 }
 0x909   : > { %v2078_v34 = vpop.xlane.xlu0 %2077 }
 0x90a   : > { %3662 = vpow2.f32 %v2102_v53  ;;  %v2092_v62 = vsub.f32 %v4544_v13, %v2078_v34  ;;  %v2106_v47 = vmul.f32 1.442695, %v2093_v43  ;;  %v2263_v53 = vsel %vm1397_vm3, %v2249_v1, 0 }
 0x90b   : > { %3664 = vpow2.f32 %v2098_v2  ;;  %v2087_v39 = vpop.xlane.xlu1 %2086 }
 0x90c   : > { %v2104_v25 = vmul.f32 1.442695, %v2092_v62  ;;  %v2095_v50 = vsub.f32 %v4556_v46, %v2087_v39 }
 0x90d   : > { %v2084_v36 = vpop.xlane.xlu0 %2083 }
 0x90e   : > { %v2094_v37 = vsub.f32 %v2062_v45, %v2084_v36  ;;  %v2110_v45 = vmul.f32 1.442695, %v2095_v50 }
 0x910   : > { %v4591_v29 = vpop.eup %3658  ;;  %v2108_v9 = vmul.f32 1.442695, %v2094_v37 }
 0x911   : > { %v2118_v58 = vsel %vm886_vm2, %v4591_v29, 0.0  ;;  %v4595_v60 = vpop.eup %3660 }
 0x912   : > { %3666 = vpow2.f32 %v2108_v9  ;;  %2119 = vadd.xlane.f32.xlu0 %v2118_v58  ;;  %v2112_v16 = vsel %vm886_vm2, %v4595_v60, 0.0 }
 0x913   : > { %3668 = vpow2.f32 %v2104_v25 }
 0x914   : > { %v4597_v17 = vpop.eup %3662  ;;  %3670 = vpow2.f32 %v2110_v45 }
 0x915   : > { %v2121_v57 = vsel %vm886_vm2, %v4597_v17, 0.0  ;;  %v3665_v8 = vpop.eup %3664  ;;  %3672 = vpow2.f32 %v2106_v47  ;;  %v3124_v47 = vld [vmem:[%s4998_s8] ss:$0 sm:$0xff] }
 0x916   : > { %2113 = vadd.xlane.f32.xlu0 %v2112_v16  ;;  %2122 = vadd.xlane.f32.xlu1 %v2121_v57  ;;  %v2115_v11 = vsel %vm886_vm2, %v3665_v8, 0.0 }
 0x91a   : > { %2116 = vadd.xlane.f32.xlu1 %v2115_v11 }
 0x91c   : > { %v4604_v12 = vpop.eup %3666 }
 0x91d   : > { %v2130_v14 = vsel %vm886_vm2, %v4604_v12, 0.0  ;;  %v4608_v13 = vpop.eup %3668 }
 0x91e   : > { %2131 = vadd.xlane.f32.xlu0 %v2130_v14  ;;  %v2124_v15 = vsel %vm886_vm2, %v4608_v13, 0.0  ;;  %v4617_v21 = vpop.eup %3670 }
 0x91f   : > { %v2133_v56 = vsel %vm886_vm2, %v4617_v21, 0.0 }
 0x922   : > { %2125 = vadd.xlane.f32.xlu0 %v2124_v15 }
 0x92b   : > { %2158 = vrot.lane.b32.xlu1 %v3954_v3, %s3772_s27  ;;  %v4621_v3 = vpop.eup %3672 }
 0x92f   : > { %2160 = vrot.lane.b32.xlu1 %v3968_v24, %s3772_s27 }
 0x938   : > { %2156 = vrot.lane.b32.xlu0 %v3956_v6, %s3772_s27  ;;  %v2127_v6 = vsel %vm886_vm2, %v4621_v3, 0.0 }
 0x953   : > { %2134 = vadd.xlane.f32.xlu1 %v2133_v56  ;;  %v3746_v56 = vld [vmem:[%s3869_s23 + $0x10] sm:$0xff] }
 0x957   : > { %2128 = vadd.xlane.f32.xlu1 %v2127_v6  ;;  %v3747_v6 = vld [vmem:[%s3869_s23] sm:$0xff] }
 0x968   : > { %2162 = vrot.lane.b32.xlu1 %v3966_v19, %s3772_s27 }
 0x971   : > { %v3377_v24 = vpop.f32.mrb[32].mxu1 }
 0x972   : > { %v1818_v54 = vpop.f32.mrb[33].mxu1 }
 0x973   : > { %v3378_v46 = vpop.f32.mrb[34].mxu1 }
 0x974   : > { %v1850_v20 = vpack.c.bf16 %v3378_v46, %v3377_v24  ;;  %v1821_v27 = vpop.f32.mrb[35].mxu1 }
 0x975   : > { %v1849_v30 = vpack.c.bf16 %v1821_v27, %v1818_v54  ;;  %v3748_v27 = vld [vmem:[%s3869_s23 + $0x8] sm:$0xff] }
 0x977   : > { %3385 = vmatprep.mubr.msk.bf16.mxu1 %vm788_vm1, %v1849_v30 }
 0x978   : > { %3386 = vmatmul.mubr.msk.bf16.vlgmr.msra.gmra.mrb[24].mxu1 %vm788_vm1, %v1850_v20 }
 0x979   : > { %v3381_v31 = vpop.f32.mrb[36].mxu1 }
 0x97a   : > { %v1834_v32 = vpop.f32.mrb[37].mxu1 }
 0x97b   : > { %v3382_v33 = vpop.f32.mrb[38].mxu1 }
 0x97c   : > { %v1852_v38 = vpack.c.bf16 %v3382_v33, %v3381_v31  ;;  %v1837_v26 = vpop.f32.mrb[39].mxu1 }
 0x97d   : > { %v1851_v4 = vpack.c.bf16 %v1837_v26, %v1834_v32  ;;  %v3749_v32 = vld [vmem:[%s3869_s23 + $0x18] sm:$0xff] }
 0x97f   : > { %3389 = vmatprep.mubr.msk.bf16.mxu1 %vm788_vm1, %v1851_v4 }
 0x980   : > { %3390 = vmatmul.mubr.msk.bf16.gmra.mrb[28].mxu1 %vm788_vm1, %v1852_v38 }
 0x99f   : > { %v2120_v19 = vpop.xlane.xlu0 %2119 }
 0x9a3   : > { %v2123_v51 = vpop.xlane.xlu1 %2122  ;;  %v2114_v59 = vpop.xlane.xlu0 %2113 }
 0x9a4   : > { %3674 = vrcp.f32 %v2114_v59 }
 0x9a7   : > { %v2117_v10 = vpop.xlane.xlu1 %2116 }
 0x9a8   : > { %3676 = vrcp.f32 %v2117_v10  ;;  %v3750_v10 = vld [vmem:[%s3869_s23 + $0x20] sm:$0xff] }
 0x9a9   : > { %3678 = vrcp.f32 %v2123_v51 }
 0x9aa   : > { %3680 = vrcp.f32 %v2120_v19 }
 0x9ab   : > { %v2132_v35 = vpop.xlane.xlu0 %2131  ;;  %v2159_v41 = vpop.permute.xlu1 %2158 }
 0x9ae   : > { %v3675_v40 = vpop.eup %3674 }
 0x9af   : > { %v2126_v23 = vpop.xlane.xlu0 %2125  ;;  %v2144_v44 = vmul.f32 %v3675_v40, %v4595_v60  ;;  %v2161_v5 = vpop.permute.xlu1 %2160 }
 0x9b2   : > { %v3677_v52 = vpop.eup %3676 }
 0x9b3   : > { %v2157_v63 = vpop.permute.xlu0 %2156  ;;  %v2145_v61 = vmul.f32 %v3677_v52, %v3665_v8  ;;  %v3679_v28 = vpop.eup %3678 }
 0x9b4   : > { %3409 = vmatprep.subr.bf16.mxu1 %v2157_v63  ;;  %v3681_v0 = vpop.eup %3680  ;;  %v2147_v48 = vmul.f32 %v3679_v28, %v4597_v17 }
 0x9b5   : > { %3410 = vmatpush3.bf16.msra.mxu1 %v2157_v63  ;;  %v2152_v18 = vpack.c.bf16 %v2145_v61, %v2144_v44  ;;  %v2146_v55 = vmul.f32 %v3681_v0, %v4591_v29  ;;  %v3752_v44 = vld [vmem:[%s3869_s23 + $0x28] sm:$0xff] }
 0x9b6   : > { %3411 = vmatprep.subr.bf16.mxu1 %v2159_v41 }
 0x9b7   : > { %3417 = vmatprep.mubr.msk.bf16.mxu1 %vm886_vm2, %v2152_v18  ;;  %v2153_v2 = vpack.c.bf16 %v2147_v48, %v2146_v55  ;;  %v3753_v18 = vld [vmem:[%s3869_s23 + $0x30] sm:$0xff] }
 0x9b9   : > { %3412 = vmatpush3.bf16.msra.mxu1 %v2159_v41  ;;  %v3751_v41 = vld [vmem:[%s3869_s23 + $0x38] sm:$0xff] }
 0x9ba   : > { %3413 = vmatprep.subr.bf16.mxu1 %v2161_v5 }
 0x9bd   : > { %3414 = vmatpush3.bf16.msra.mxu1 %v2161_v5 }
 0x9e0   : > { %v2135_v49 = vpop.xlane.xlu1 %2134 }
 0x9e1   : > { %3682 = vrcp.f32 %v2135_v49 }
 0x9e2   : > { %3684 = vrcp.f32 %v2126_v23 }
 0x9e3   : > { %3686 = vrcp.f32 %v2132_v35 }
 0x9e4   : > { %v2129_v7 = vpop.xlane.xlu1 %2128 }
 0x9e5   : > { %3688 = vrcp.f32 %v2129_v7 }
 0x9e8   : > { %v2163_v22 = vpop.permute.xlu1 %2162 }
 0x9e9   : > { %3415 = vmatprep.subr.bf16.mxu1 %v2163_v22 }
 0x9ea   : > { %3416 = vmatpush3.bf16.msra.mxu1 %v2163_v22 }
 0x9eb   : > { %3514 = vmatprep.subr.msk.bf16.mxu1 %vm1397_vm3, %v2249_v1  ;;  %v3683_v34 = vpop.eup %3682 }
 0x9ec   : > { %v3685_v62 = vpop.eup %3684  ;;  %v2151_v25 = vmul.f32 %v3683_v34, %v4617_v21 }
 0x9ed   : > { %3418 = vmatmul.mubr.msk.bf16.vlgmr.msra.gmra.mrb[40].mxu1 %vm886_vm2, %v2153_v2  ;;  %v3687_v36 = vpop.eup %3686  ;;  %v2148_v9 = vmul.f32 %v3685_v62, %v4608_v13 }
 0x9ee   : > { %3426 = vmatpush3.bf16.msra.mxu1 %v2263_v53  ;;  %v2150_v58 = vmul.f32 %v3687_v36, %v4604_v12 }
 0x9ef   : > { %v3689_v37 = vpop.eup %3688 }
 0x9f0   : > { %v2149_v29 = vmul.f32 %v3689_v37, %v4621_v3  ;;  %v2155_v17 = vpack.c.bf16 %v2151_v25, %v2150_v58 }
 0x9f2   : > { %v2154_v60 = vpack.c.bf16 %v2149_v29, %v2148_v9 }
 0x9f4   : > { %3421 = vmatprep.mubr.msk.bf16.mxu1 %vm886_vm2, %v2154_v60 }
 0x9f5   : > { %3422 = vmatmul.mubr.msk.bf16.gmra.mrb[44].mxu1 %vm886_vm2, %v2155_v17 }
 0xac0   : > { %v3419_v16 = vpop.f32.mrb[40].mxu1 }
 0xac1   : > { %v2214_v57 = vpop.f32.mrb[41].mxu1 }
 0xac2   : > { %v3420_v8 = vpop.f32.mrb[42].mxu1 }
 0xac3   : > { %v2246_v11 = vpack.c.bf16 %v3420_v8, %v3419_v16  ;;  %v2217_v14 = vpop.f32.mrb[43].mxu1 }
 0xac4   : > { %v2245_v15 = vpack.c.bf16 %v2217_v14, %v2214_v57 }
 0xac6   : > { %3427 = vmatprep.mubr.msk.bf16.mxu1 %vm788_vm1, %v2245_v15 }
 0xac7   : > { %3428 = vmatmul.mubr.msk.bf16.vlgmr.msra.gmra.mrb[24].mxu1 %vm788_vm1, %v2246_v11 }
 0xac8   : > { %v3423_v13 = vpop.f32.mrb[44].mxu1 }
 0xac9   : > { %v2230_v12 = vpop.f32.mrb[45].mxu1 }
 0xaca   : > { %v3424_v42 = vpop.f32.mrb[46].mxu1 }
 0xacb   : > { %v2248_v39 = vpack.c.bf16 %v3424_v42, %v3423_v13  ;;  %v2233_v50 = vpop.f32.mrb[47].mxu1 }
 0xacc   : > { %v2247_v43 = vpack.c.bf16 %v2233_v50, %v2230_v12 }
 0xace   : > { %3431 = vmatprep.mubr.msk.bf16.mxu1 %vm788_vm1, %v2247_v43 }
 0xacf   : > { %3432 = vmatmul.mubr.msk.bf16.gmra.mrb[28].mxu1 %vm788_vm1, %v2248_v39 }
 0xb9a   : > { %v3429_v45 = vpop.f32.mrb[24].mxu1 }
 0xb9b   : > { %v2299_v21 = vpop.f32.mrb[25].mxu1  ;;  %v2340_v3 = vadd.f32 %v3746_v56, %v3429_v45 }
 0xb9c   : > { %v2338_v24 = vadd.f32 %v3747_v6, %v2299_v21  ;;  %v3430_v54 = vpop.f32.mrb[26].mxu1 }
 0xb9d   : > { %v2302_v46 = vpop.f32.mrb[27].mxu1  ;;  %v4658_v31 = vadd.f32 %v3124_v47, %v2340_v3  ;;  %v2341_v33 = vadd.f32 %v3749_v32, %v3430_v54 }
 0xb9e   : > { %v4655_v20 = vadd.f32 %v3124_v47, %v2338_v24  ;;  %v2339_v30 = vadd.f32 %v3748_v27, %v2302_v46 }
 0xb9f   : > { %v4667_v59 = vadd.f32 %v3124_v47, %v2341_v33  ;;  %v2369_v40 = vsel %vm506_vm0, %v4658_v31, 0.0 }
 0xba0   : > { %v4661_v38 = vadd.f32 %v3124_v47, %v2339_v30  ;;  %v2363_v26 = vsel %vm506_vm0, %v4655_v20, 0.0 }
 0xba1   : > { %2364 = vadd.xlane.f32.xlu0 %v2363_v26  ;;  %v2372_v7 = vsel %vm506_vm0, %v4667_v59, 0.0 }
 0xba2   : > { %v3433_v4 = vpop.f32.mrb[28].mxu1  ;;  %v2366_v19 = vsel %vm506_vm0, %v4661_v38, 0.0 }
 0xba3   : > { %2367 = vadd.xlane.f32.xlu1 %v2366_v19  ;;  %v2315_v51 = vpop.f32.mrb[29].mxu1  ;;  %v2344_v5 = vadd.f32 %v3753_v18, %v3433_v4 }
 0xba4   : > { %v2342_v35 = vadd.f32 %v3750_v10, %v2315_v51  ;;  %v3434_v23 = vpop.f32.mrb[30].mxu1  ;;  %v3536_v10 = vld [vmem:[%s5001_s11] sm:$0xff]  }
 0xba5   : > { %2370 = vadd.xlane.f32.xlu0 %v2369_v40  ;;  %v2318_v52 = vpop.f32.mrb[31].mxu1  ;;  %v2345_v63 = vadd.f32 %v3751_v41, %v3434_v23  ;;  %v4685_v22 = vadd.f32 %v3124_v47, %v2344_v5  ;;  %3435 = vmatprep.subr.bf16.mxu0 %v3536_v10 }
 0xba6   : > { %v2343_v61 = vadd.f32 %v3752_v44, %v2318_v52  ;;  %v4675_v49 = vadd.f32 %v3124_v47, %v2342_v35  ;;  %3436 = vmatpush3.bf16.msra.mxu0 %v3536_v10  ;;  %v3537_v35 = vld [vmem:[%s5001_s11 + $0x8] sm:$0xff]  }
 0xba7   : > { %v4681_v0 = vadd.f32 %v3124_v47, %v2345_v63  ;;  %v2381_v2 = vsel %vm506_vm0, %v4685_v22, 0.0  ;;  %3437 = vmatprep.subr.bf16.mxu0 %v3537_v35 }
 0xba8   : > { %v4677_v28 = vadd.f32 %v3124_v47, %v2343_v61  ;;  %v2375_v1 = vsel %vm506_vm0, %v4675_v49, 0.0 }
 0xba9   : > { %2373 = vadd.xlane.f32.xlu0 %v2372_v7  ;;  %v2384_v55 = vsel %vm506_vm0, %v4681_v0, 0.0 }
 0xbaa   : > { %v2378_v48 = vsel %vm506_vm0, %v4677_v28, 0.0  ;;  %3438 = vmatpush3.bf16.msra.mxu0 %v3537_v35 }
 0xbab   : > { %2379 = vadd.xlane.f32.xlu1 %v2378_v48 }
 0xbad   : > { %2376 = vadd.xlane.f32.xlu0 %v2375_v1 }
 0xbaf   : > { %2385 = vadd.xlane.f32.xlu1 %v2384_v55 }
 0xbb1   : > { %2382 = vadd.xlane.f32.xlu0 %v2381_v2 }
 0xc2e   : > { %v2365_v53 = vpop.xlane.xlu0 %2364 }
 0xc2f   : > { %v2387_v34 = vmul.f32 0.03125, %v2365_v53 }
 0xc30   : > { %v2368_v62 = vpop.xlane.xlu1 %2367 }
 0xc31   : > { %v4694_v36 = vsub.f32 %v4655_v20, %v2387_v34  ;;  %v2388_v37 = vmul.f32 0.03125, %v2368_v62 }
 0xc32   : > { %v2371_v25 = vpop.xlane.xlu0 %2370 }
 0xc33   : > { %v4697_v9 = vsub.f32 %v4661_v38, %v2388_v37  ;;  %v2389_v29 = vmul.f32 0.03125, %v2371_v25  ;;  %v2403_v58 = vmul.f32 %v4694_v36, %v4694_v36  ;;  %v3125_v37 = vld [vmem:[%s4999_s9] ss:$0 sm:$0xff] }
 0xc35   : > { %v4702_v60 = vsub.f32 %v4658_v31, %v2389_v29  ;;  %v2411_v17 = vsel %vm506_vm0, %v2403_v58, 0.0  ;;  %v2404_v16 = vmul.f32 %v4697_v9, %v4697_v9 }
 0xc36   : > { %v2374_v57 = vpop.xlane.xlu0 %2373  ;;  %2412 = vadd.xlane.f32.xlu0 %v2411_v17 }
 0xc37   : > { %v2390_v8 = vmul.f32 0.03125, %v2374_v57  ;;  %v2414_v11 = vsel %vm506_vm0, %v2404_v16, 0.0  ;;  %v2405_v14 = vmul.f32 %v4702_v60, %v4702_v60 }
 0xc38   : > { %2415 = vadd.xlane.f32.xlu1 %v2414_v11  ;;  %v2380_v15 = vpop.xlane.xlu1 %2379 }
 0xc39   : > { %v4711_v13 = vsub.f32 %v4667_v59, %v2390_v8  ;;  %v2392_v12 = vmul.f32 0.03125, %v2380_v15  ;;  %v2417_v42 = vsel %vm506_vm0, %v2405_v14, 0.0 }
 0xc3a   : > { %2418 = vadd.xlane.f32.xlu0 %v2417_v42  ;;  %v2377_v39 = vpop.xlane.xlu0 %2376  ;;  %v3126_v42 = vld [vmem:[%s5000_s10] ss:$0 sm:$0xff] }
 0xc3b   : > { %v4715_v50 = vsub.f32 %v4677_v28, %v2392_v12  ;;  %v2391_v43 = vmul.f32 0.03125, %v2377_v39  ;;  %v2406_v45 = vmul.f32 %v4711_v13, %v4711_v13 }
 0xc3c   : > { %v2386_v47 = vpop.xlane.xlu1 %2385 }
 0xc3d   : > { %v4720_v21 = vsub.f32 %v4675_v49, %v2391_v43  ;;  %v2394_v56 = vmul.f32 0.03125, %v2386_v47  ;;  %v2420_v3 = vsel %vm506_vm0, %v2406_v45, 0.0  ;;  %v2408_v6 = vmul.f32 %v4715_v50, %v4715_v50 }
 0xc3e   : > { %v2383_v24 = vpop.xlane.xlu0 %2382  ;;  %2421 = vadd.xlane.f32.xlu1 %v2420_v3 }
 0xc3f   : > { %v4726_v54 = vsub.f32 %v4681_v0, %v2394_v56  ;;  %v2393_v46 = vmul.f32 0.03125, %v2383_v24  ;;  %v2407_v27 = vmul.f32 %v4720_v21, %v4720_v21  ;;  %v2426_v33 = vsel %vm506_vm0, %v2408_v6, 0.0 }
 0xc41   : > { %v4731_v30 = vsub.f32 %v4685_v22, %v2393_v46  ;;  %v2423_v32 = vsel %vm506_vm0, %v2407_v27, 0.0  ;;  %v2410_v26 = vmul.f32 %v4726_v54, %v4726_v54 }
 0xc42   : > { %2424 = vadd.xlane.f32.xlu0 %v2423_v32  ;;  %2427 = vadd.xlane.f32.xlu1 %v2426_v33 }
 0xc43   : > { %v2409_v4 = vmul.f32 %v4731_v30, %v4731_v30  ;;  %v2432_v51 = vsel %vm506_vm0, %v2410_v26, 0.0 }
 0xc45   : > { %v2429_v19 = vsel %vm506_vm0, %v2409_v4, 0.0 }
 0xc46   : > { %2430 = vadd.xlane.f32.xlu0 %v2429_v19  ;;  %2433 = vadd.xlane.f32.xlu1 %v2432_v51 }
 0xcc3   : > { %v2413_v23 = vpop.xlane.xlu0 %2412 }
 0xcc4   : > { %v2435_v40 = vmul.f32 0.03125, %v2413_v23 }
 0xcc5   : > { %v2416_v52 = vpop.xlane.xlu1 %2415 }
 0xcc6   : > { %v2443_v41 = vadd.f32 1e-05, %v2435_v40  ;;  %v2436_v63 = vmul.f32 0.03125, %v2416_v52 }
 0xcc7   : > { %v2419_v44 = vpop.xlane.xlu0 %2418 }
 0xcc8   : > { %3690 = vrsqrt.f32 %v2443_v41  ;;  %v2444_v61 = vadd.f32 1e-05, %v2436_v63  ;;  %v2437_v18 = vmul.f32 0.03125, %v2419_v44 }
 0xcca   : > { %3692 = vrsqrt.f32 %v2444_v61  ;;  %v2445_v5 = vadd.f32 1e-05, %v2437_v18 }
 0xccb   : > { %v2422_v7 = vpop.xlane.xlu1 %2421 }
 0xccc   : > { %3694 = vrsqrt.f32 %v2445_v5  ;;  %v2438_v48 = vmul.f32 0.03125, %v2422_v7  ;;  %v3540_v5 = vld [vmem:[%s5003_s13 + $0x10] sm:$0xff]   ;;  %v3541_v7 = vld [vmem:[%s5003_s13 + $0x18] sm:$0xff]  }
 0xcce   : > { %v2446_v1 = vadd.f32 1e-05, %v2438_v48  ;;  %v3542_v48 = vld [vmem:[%s5003_s13 + $0x20] sm:$0xff]  }
 0xccf   : > { %v2425_v55 = vpop.xlane.xlu0 %2424  ;;  %v2428_v2 = vpop.xlane.xlu1 %2427 }
 0xcd0   : > { %3696 = vrsqrt.f32 %v2446_v1  ;;  %v2439_v53 = vmul.f32 0.03125, %v2425_v55  ;;  %v2440_v34 = vmul.f32 0.03125, %v2428_v2  ;;  %v3543_v1 = vld [vmem:[%s5003_s13 + $0x28] sm:$0xff]   ;;  %v3544_v55 = vld [vmem:[%s5003_s13 + $0x30] sm:$0xff]   ;;  %v3545_v2 = vld [vmem:[%s5003_s13 + $0x38] sm:$0xff]  }
 0xcd2   : > { %v3691_v62 = vpop.eup %3690  ;;  %v2447_v25 = vadd.f32 1e-05, %v2439_v53  ;;  %v2448_v29 = vadd.f32 1e-05, %v2440_v34  ;;  %v3127_v53 = vld [vmem:[%s5002_s12] ss:$0 sm:$0xff] }
 0xcd3   : > { %v2459_v58 = vmul.f32 %v3691_v62, %v4694_v36  ;;  %v2431_v17 = vpop.xlane.xlu0 %2430  ;;  %v2434_v16 = vpop.xlane.xlu1 %2433 }
 0xcd4   : > { %v3693_v57 = vpop.eup %3692  ;;  %3698 = vrsqrt.f32 %v2447_v25  ;;  %v2441_v8 = vmul.f32 0.03125, %v2431_v17  ;;  %v2442_v11 = vmul.f32 0.03125, %v2434_v16 }
 0xcd5   : > { %v2460_v14 = vmul.f32 %v3693_v57, %v4697_v9  ;;  %3700 = vrsqrt.f32 %v2448_v29  ;;  %v2473_v15 = vmul.f32 %v3125_v37, %v2459_v58 }
 0xcd6   : > { %v3695_v12 = vpop.eup %3694  ;;  %v2449_v39 = vadd.f32 1e-05, %v2441_v8  ;;  %v2450_v43 = vadd.f32 1e-05, %v2442_v11 }
 0xcd7   : > { %v2461_v45 = vmul.f32 %v3695_v12, %v4702_v60  ;;  %v2474_v36 = vmul.f32 %v3125_v37, %v2460_v14  ;;  %v2487_v47 = vadd.f32 %v3126_v42, %v2473_v15 }
 0xcd8   : > { %3702 = vrsqrt.f32 %v2449_v39 }
 0xcd9   : > { %3704 = vrsqrt.f32 %v2450_v43  ;;  %v2488_v56 = vadd.f32 %v3126_v42, %v2474_v36  ;;  %v2475_v6 = vmul.f32 %v3125_v37, %v2461_v45 }
 0xcda   : > { %v3697_v3 = vpop.eup %3696 }
 0xcdb   : > { %v2462_v9 = vmul.f32 %v3697_v3, %v4711_v13  ;;  %v2495_v24 = vpack.c.bf16 %v2488_v56, %v2487_v47  ;;  %v2489_v33 = vadd.f32 %v3126_v42, %v2475_v6 }
 0xcdd   : > { %v2476_v46 = vmul.f32 %v3125_v37, %v2462_v9  ;;  %3439 = vmatprep.mubr.msk.bf16.mxu0 %vm506_vm0, %v2495_v24 }
 0xcde   : > { %v3699_v27 = vpop.eup %3698 }
 0xcdf   : > { %v3701_v32 = vpop.eup %3700  ;;  %v2490_v26 = vadd.f32 %v3126_v42, %v2476_v46  ;;  %v2463_v4 = vmul.f32 %v3699_v27, %v4720_v21 }
 0xce0   : > { %v2464_v60 = vmul.f32 %v3701_v32, %v4715_v50 }
 0xce1   : > { %v2496_v19 = vpack.c.bf16 %v2490_v26, %v2489_v33  ;;  %v2477_v51 = vmul.f32 %v3125_v37, %v2463_v4 }
 0xce2   : > { %v3703_v10 = vpop.eup %3702  ;;  %v2478_v35 = vmul.f32 %v3125_v37, %v2464_v60 }
 0xce3   : > { %v3705_v23 = vpop.eup %3704  ;;  %v2465_v40 = vmul.f32 %v3703_v10, %v4731_v30  ;;  %3440 = vmatmul.mubr.msk.bf16.vlgmr.msra.gmra.mrb[32].mxu0 %vm506_vm0, %v2496_v19  ;;  %v2491_v13 = vadd.f32 %v3126_v42, %v2477_v51  ;;  %v3538_v30 = vld [vmem:[%s5003_s13] sm:$0xff]  }
 0xce4   : > { %v2466_v52 = vmul.f32 %v3705_v23, %v4726_v54  ;;  %v2492_v41 = vadd.f32 %v3126_v42, %v2478_v35  ;;  %3447 = vmatprep.subr.bf16.mxu0 %v3538_v30  ;;  %v3539_v54 = vld [vmem:[%s5003_s13 + $0x8] sm:$0xff]  }
 0xce5   : > { %v2479_v63 = vmul.f32 %v3125_v37, %v2465_v40  ;;  %3448 = vmatpush3.bf16.msra.mxu0 %v3538_v30 }
 0xce6   : > { %v2497_v44 = vpack.c.bf16 %v2492_v41, %v2491_v13  ;;  %v2480_v61 = vmul.f32 %v3125_v37, %v2466_v52  ;;  %3449 = vmatprep.subr.bf16.mxu0 %v3539_v54 }
 0xce7   : > { %v2493_v18 = vadd.f32 %v3126_v42, %v2479_v63 }
 0xce8   : > { %3443 = vmatprep.mubr.msk.bf16.mxu0 %vm506_vm0, %v2497_v44  ;;  %v2494_v50 = vadd.f32 %v3126_v42, %v2480_v61 }
 0xce9   : > { %3450 = vmatpush3.bf16.msra.mxu0 %v3539_v54 }
 0xcea   : > { %v2498_v21 = vpack.c.bf16 %v2494_v50, %v2493_v18  ;;  %3451 = vmatprep.subr.bf16.mxu0 %v3540_v5 }
 0xcec   : > { %3444 = vmatmul.mubr.msk.bf16.gmra.mrb[36].mxu0 %vm506_vm0, %v2498_v21 }
 0xced   : > { %3452 = vmatpush3.bf16.msra.mxu0 %v3540_v5 }
 0xcee   : > { %3453 = vmatprep.subr.bf16.mxu0 %v3541_v7 }
 0xcf1   : > { %3454 = vmatpush3.bf16.msra.mxu0 %v3541_v7 }
 0xcf2   : > { %3455 = vmatprep.subr.bf16.mxu0 %v3542_v48 }
 0xcf5   : > { %3456 = vmatpush3.bf16.msra.mxu0 %v3542_v48 }
 0xcf6   : > { %3457 = vmatprep.subr.bf16.mxu0 %v3543_v1 }
 0xcf9   : > { %3458 = vmatpush3.bf16.msra.mxu0 %v3543_v1 }
 0xcfa   : > { %3459 = vmatprep.subr.bf16.mxu0 %v3544_v55 }
 0xcfd   : > { %3460 = vmatpush3.bf16.msra.mxu0 %v3544_v55 }
 0xcfe   : > { %3461 = vmatprep.subr.bf16.mxu0 %v3545_v2 }
 0xd01   : > { %3462 = vmatpush3.bf16.msra.mxu0 %v3545_v2 }
 0xdb6   : > { %v3441_v34 = vpop.f32.mrb[32].mxu0 }
 0xdb7   : > { %v4792_v62 = vadd.f32 %v3441_v34, %v3127_v53  ;;  %v2568_v37 = vpop.f32.mrb[33].mxu0 }
 0xdb8   : > { %v4794_v25 = vadd.f32 %v3127_v53, %v2568_v37  ;;  %v3442_v29 = vpop.f32.mrb[34].mxu0 }
 0xdb9   : > { %v4797_v58 = vmul.f32 0.70710677, %v4792_v62  ;;  %v4799_v17 = vadd.f32 %v3442_v29, %v3127_v53  ;;  %v2571_v16 = vpop.f32.mrb[35].mxu0  ;;  %v4861_v2 = vmul.f32 0.5, %v4792_v62 }
 0xdba   : > { %v4802_v57 = vmul.f32 0.70710677, %v4794_v25  ;;  %v4804_v8 = vadd.f32 %v3127_v53, %v2571_v16 }
 0xdbb   : > { %vm2617_vm4 = vcmp.ge.f32.partialorder %v4797_v58, 0.0  ;;  %v2625_v11 = vsub.f32 0.0, %v4797_v58  ;;  %v4809_v14 = vmul.f32 0.70710677, %v4799_v17 }
 0xdbc   : > { %vm2615_vm5 = vcmp.ge.f32.partialorder %v4802_v57, 0.0  ;;  %v2623_v15 = vsub.f32 0.0, %v4802_v57  ;;  %v4814_v12 = vmul.f32 0.70710677, %v4804_v8 }
 0xdbd   : > { %v2633_v42 = vsel %vm2617_vm4, %v4797_v58, %v2625_v11  ;;  %vm2618_vm6 = vcmp.ge.f32.partialorder %v4809_v14, 0.0  ;;  %v2626_v39 = vsub.f32 0.0, %v4809_v14 }
 0xdbe   : > { %v2641_v43 = vmul.f32 0.3275911, %v2633_v42  ;;  %v2631_v45 = vsel %vm2615_vm5, %v4802_v57, %v2623_v15  ;;  %vm2616_vm7 = vcmp.ge.f32.partialorder %v4814_v12, 0.0  ;;  %v2624_v56 = vsub.f32 0.0, %v4814_v12 }
 0xdbf   : > { %v2639_v36 = vmul.f32 0.3275911, %v2631_v45  ;;  %v2634_v47 = vsel %vm2618_vm6, %v4809_v14, %v2626_v39  ;;  %v3445_v3 = vpop.f32.mrb[36].mxu0  ;;  %v2745_v46 = vsub.f32 0.0, %v2633_v42  ;;  %v2743_v35 = vsub.f32 0.0, %v2631_v45 }
 0xdc0   : > { %v2649_v6 = vadd.f32 1.0, %v2641_v43  ;;  %v2642_v9 = vmul.f32 0.3275911, %v2634_v47  ;;  %v2584_v24 = vpop.f32.mrb[37].mxu0  ;;  %v2632_v32 = vsel %vm2616_vm7, %v4814_v12, %v2624_v56  ;;  %v4832_v33 = vadd.f32 %v3445_v3, %v3127_v53 }
 0xdc1   : > { %v2647_v27 = vadd.f32 1.0, %v2639_v36  ;;  %v3446_v26 = vpop.f32.mrb[38].mxu0  ;;  %v2640_v19 = vmul.f32 0.3275911, %v2632_v32  ;;  %v2753_v10 = vmul.f32 %v2745_v46, %v2633_v42  ;;  %v4837_v40 = vadd.f32 %v3127_v53, %v2584_v24 }
 0xdc2   : > { %3706 = vrcp.f32 %v2649_v6  ;;  %v2650_v4 = vadd.f32 1.0, %v2642_v9  ;;  %v2587_v60 = vpop.f32.mrb[39].mxu0  ;;  %v4835_v51 = vmul.f32 0.70710677, %v4832_v33  ;;  %v4841_v52 = vadd.f32 %v3446_v26, %v3127_v53 }
 0xdc3   : > { %3708 = vrcp.f32 %v2647_v27  ;;  %v2648_v23 = vadd.f32 1.0, %v2640_v19  ;;  %v2746_v41 = vsub.f32 0.0, %v2634_v47  ;;  %v4844_v63 = vmul.f32 0.70710677, %v4837_v40 }
 0xdc4   : > { %3710 = vrcp.f32 %v2650_v4  ;;  %vm2621_vm8 = vcmp.ge.f32.partialorder %v4835_v51, 0.0  ;;  %v2629_v13 = vsub.f32 0.0, %v4835_v51  ;;  %v4850_v61 = vmul.f32 0.70710677, %v4841_v52 }
 0xdc5   : > { %3712 = vrcp.f32 %v2648_v23  ;;  %v2763_v18 = vmul.f32 1.442695, %v2753_v10  ;;  %v2751_v50 = vmul.f32 %v2743_v35, %v2631_v45  ;;  %vm2619_vm9 = vcmp.ge.f32.partialorder %v4844_v63, 0.0 }
 0xdc6   : > { %v2637_v44 = vsel %vm2621_vm8, %v4835_v51, %v2629_v13  ;;  %v2627_v30 = vsub.f32 0.0, %v4844_v63  ;;  %vm2622_vm10 = vcmp.ge.f32.partialorder %v4850_v61, 0.0  ;;  %v2630_v54 = vsub.f32 0.0, %v4850_v61 }
 0xdc7   : > { %v2645_v21 = vmul.f32 0.3275911, %v2637_v44  ;;  %v4856_v5 = vadd.f32 %v3127_v53, %v2587_v60  ;;  %v2754_v7 = vmul.f32 %v2746_v41, %v2634_v47  ;;  %v2744_v48 = vsub.f32 0.0, %v2632_v32 }
 0xdc8   : > { %v2635_v34 = vsel %vm2619_vm9, %v4844_v63, %v2627_v30  ;;  %v2638_v37 = vsel %vm2622_vm10, %v4850_v61, %v2630_v54  ;;  %v2759_v11 = vmul.f32 1.442695, %v2751_v50  ;;  %v2749_v42 = vsub.f32 0.0, %v2637_v44  ;;  %v3134_v63 = vld [vmem:[%s5004_s14] ss:$0 sm:$0xff] }
 0xdc9   : > { %v2653_v1 = vadd.f32 1.0, %v2645_v21  ;;  %v4870_v29 = vmul.f32 0.70710677, %v4856_v5  ;;  %v2643_v15 = vmul.f32 0.3275911, %v2635_v34  ;;  %v2752_v36 = vmul.f32 %v2744_v48, %v2632_v32 }
 0xdca   : > { %v2646_v39 = vmul.f32 0.3275911, %v2638_v37  ;;  %v2765_v45 = vmul.f32 1.442695, %v2754_v7  ;;  %v2747_v6 = vsub.f32 0.0, %v2635_v34  ;;  %v2757_v32 = vmul.f32 %v2749_v42, %v2637_v44 }
 0xdcb   : > { %3714 = vrcp.f32 %v2653_v1  ;;  %v2651_v47 = vadd.f32 1.0, %v2643_v15  ;;  %vm2620_vm11 = vcmp.ge.f32.partialorder %v4870_v29, 0.0  ;;  %v2628_v27 = vsub.f32 0.0, %v4870_v29 }
 0xdcc   : > { %v4858_v55 = vpop.eup %3706  ;;  %3716 = vpow2.f32 %v2763_v18  ;;  %v2654_v9 = vadd.f32 1.0, %v2646_v39  ;;  %v2750_v60 = vsub.f32 0.0, %v2638_v37  ;;  %v2755_v41 = vmul.f32 %v2747_v6, %v2635_v34 }
 0xdcd   : > { %v4872_v53 = vpop.eup %3708  ;;  %v2673_v16 = vmul.f32 1.0614054, %v4858_v55  ;;  %3718 = vrcp.f32 %v2651_v47  ;;  %v4889_v23 = vsel %vm2620_vm11, %v4870_v29, %v2628_v27  ;;  %v2761_v30 = vmul.f32 1.442695, %v2752_v36 }
 0xdce   : > { %v2671_v62 = vmul.f32 1.0614054, %v4872_v53  ;;  %v4876_v56 = vpop.eup %3710  ;;  %3720 = vrcp.f32 %v2654_v9  ;;  %v2644_v18 = vmul.f32 0.3275911, %v4889_v23  ;;  %v2771_v7 = vmul.f32 1.442695, %v2757_v32 }
 0xdcf   : > { %v2681_v43 = vadd.f32 -1.4531521, %v2673_v16  ;;  %v2674_v46 = vmul.f32 1.0614054, %v4876_v56  ;;  %v4882_v26 = vpop.eup %3712  ;;  %3722 = vpow2.f32 %v2759_v11  ;;  %v2758_v34 = vmul.f32 %v2750_v60, %v2638_v37 }
 0xdd0   : > { %v2679_v3 = vadd.f32 -1.4531521, %v2671_v62  ;;  %v2672_v35 = vmul.f32 1.0614054, %v4882_v26  ;;  %3724 = vpow2.f32 %v2765_v45  ;;  %v2652_v48 = vadd.f32 1.0, %v2644_v18 }
 0xdd1   : > { %v2689_v24 = vmul.f32 %v4858_v55, %v2681_v43  ;;  %v2682_v10 = vadd.f32 -1.4531521, %v2674_v46  ;;  %v2767_v43 = vmul.f32 1.442695, %v2755_v41 }
 0xdd2   : > { %v2687_v4 = vmul.f32 %v4872_v53, %v2679_v3  ;;  %v2680_v21 = vadd.f32 -1.4531521, %v2672_v35  ;;  %3726 = vrcp.f32 %v2652_v48  ;;  %v4902_v3 = vmul.f32 0.5, %v4794_v25 }
 0xdd3   : > { %v2697_v19 = vadd.f32 1.4214138, %v2689_v24  ;;  %v2690_v44 = vmul.f32 %v4876_v56, %v2682_v10  ;;  %3728 = vpow2.f32 %v2761_v30  ;;  %v2748_v30 = vsub.f32 0.0, %v4889_v23 }
 0xdd4   : > { %v2695_v13 = vadd.f32 1.4214138, %v2687_v4  ;;  %v2688_v11 = vmul.f32 %v4882_v26, %v2680_v21  ;;  %3730 = vpow2.f32 %v2771_v7  ;;  %v2773_v4 = vmul.f32 1.442695, %v2758_v34 }
 0xdd5   : > { %v2705_v50 = vmul.f32 %v4858_v55, %v2697_v19  ;;  %v4895_v1 = vpop.eup %3714  ;;  %v2698_v15 = vadd.f32 1.4214138, %v2690_v44  ;;  %3732 = vpow2.f32 %v2767_v43 }
 0xdd6   : > { %v2703_v54 = vmul.f32 %v4872_v53, %v2695_v13  ;;  %v3717_v62 = vpop.eup %3716  ;;  %v2677_v39 = vmul.f32 1.0614054, %v4895_v1  ;;  %v2696_v45 = vadd.f32 1.4214138, %v2688_v11  ;;  %3734 = vpow2.f32 %v2773_v4 }
 0xdd7   : > { %v2713_v16 = vadd.f32 -0.28449672, %v2705_v50  ;;  %v2706_v47 = vmul.f32 %v4876_v56, %v2698_v15  ;;  %v4905_v37 = vpop.eup %3718 }
 0xdd8   : > { %v2711_v42 = vadd.f32 -0.28449672, %v2703_v54  ;;  %v2685_v9 = vadd.f32 -1.4531521, %v2677_v39  ;;  %v2704_v27 = vmul.f32 %v4882_v26, %v2696_v45  ;;  %v4908_v32 = vpop.eup %3720  ;;  %v2675_v10 = vmul.f32 1.0614054, %v4905_v37 }
 0xdd9   : > { %v2721_v36 = vmul.f32 %v4858_v55, %v2713_v16  ;;  %v2714_v46 = vadd.f32 -0.28449672, %v2706_v47  ;;  %v2678_v41 = vmul.f32 1.0614054, %v4908_v32  ;;  %v3723_v18 = vpop.eup %3722 }
 0xdda   : > { %v2719_v6 = vmul.f32 %v4872_v53, %v2711_v42  ;;  %v2693_v19 = vmul.f32 %v4895_v1, %v2685_v9  ;;  %v2712_v13 = vadd.f32 -0.28449672, %v2704_v27  ;;  %v2683_v21 = vadd.f32 -1.4531521, %v2675_v10  ;;  %v3725_v15 = vpop.eup %3724 }
 0xddb   : > { %v2729_v24 = vadd.f32 0.2548296, %v2721_v36  ;;  %v2722_v35 = vmul.f32 %v4876_v56, %v2714_v46  ;;  %v2686_v16 = vadd.f32 -1.4531521, %v2678_v41 }
 0xddc   : > { %v2727_v60 = vadd.f32 0.2548296, %v2719_v6  ;;  %v2701_v44 = vadd.f32 1.4214138, %v2693_v19  ;;  %v2720_v48 = vmul.f32 %v4882_v26, %v2712_v13  ;;  %v2691_v34 = vmul.f32 %v4905_v37, %v2683_v21  ;;  %v4922_v36 = vpop.eup %3726 }
 0xddd   : > { %v2737_v25 = vmul.f32 %v4858_v55, %v2729_v24  ;;  %v2730_v7 = vadd.f32 0.2548296, %v2722_v35  ;;  %v2694_v43 = vmul.f32 %v4908_v32, %v2686_v16  ;;  %v2756_v6 = vmul.f32 %v2748_v30, %v4889_v23  ;;  %v3729_v9 = vpop.eup %3728 }
 0xdde   : > { %v2735_v50 = vmul.f32 %v4872_v53, %v2727_v60  ;;  %v2709_v55 = vmul.f32 %v4895_v1, %v2701_v44  ;;  %v2728_v53 = vadd.f32 0.2548296, %v2720_v48  ;;  %v2699_v45 = vadd.f32 1.4214138, %v2691_v34  ;;  %v3731_v4 = vpop.eup %3730 }
 0xddf   : > { %v2777_v54 = vmul.f32 %v3717_v62, %v2737_v25  ;;  %v2738_v39 = vmul.f32 %v4876_v56, %v2730_v7  ;;  %v2702_v60 = vadd.f32 1.4214138, %v2694_v43  ;;  %v2676_v25 = vmul.f32 1.0614054, %v4922_v36 }
 0xde0   : > { %v2775_v11 = vmul.f32 %v3723_v18, %v2735_v50  ;;  %v2717_v47 = vadd.f32 -0.28449672, %v2709_v55  ;;  %v2736_v27 = vmul.f32 %v4882_v26, %v2728_v53  ;;  %v2707_v10 = vmul.f32 %v4905_v37, %v2699_v45  ;;  %v3733_v18 = vpop.eup %3732 }
 0xde1   : > { %v2785_v42 = vsub.f32 1.0, %v2777_v54  ;;  %v2778_v46 = vmul.f32 %v3725_v15, %v2738_v39  ;;  %v2710_v23 = vmul.f32 %v4908_v32, %v2702_v60  ;;  %v2602_v50 = vmul.f32 0.5, %v4799_v17  ;;  %v3735_v17 = vpop.eup %3734 }
 0xde2   : > { %v2783_v62 = vsub.f32 1.0, %v2775_v11  ;;  %v2725_v56 = vmul.f32 %v4895_v1, %v2717_v47  ;;  %v2776_v41 = vmul.f32 %v3729_v9, %v2736_v27  ;;  %v2715_v21 = vadd.f32 -0.28449672, %v2707_v10 }
 0xde3   : > { %v2793_v24 = vsub.f32 0.0, %v2785_v42  ;;  %v2786_v13 = vsub.f32 1.0, %v2778_v46  ;;  %v2718_v48 = vadd.f32 -0.28449672, %v2710_v23  ;;  %v2684_v15 = vadd.f32 -1.4531521, %v2676_v25 }
 0xde4   : > { %v2791_v19 = vsub.f32 0.0, %v2783_v62  ;;  %v2733_v44 = vadd.f32 0.2548296, %v2725_v56  ;;  %v2784_v7 = vsub.f32 1.0, %v2776_v41  ;;  %v2723_v58 = vmul.f32 %v4905_v37, %v2715_v21 }
 0xde5   : > { %v2801_v35 = vsel %vm2617_vm4, %v2785_v42, %v2793_v24  ;;  %v2794_v54 = vsub.f32 0.0, %v2786_v13  ;;  %v2769_v11 = vmul.f32 1.442695, %v2756_v6  ;;  %v2726_v42 = vmul.f32 %v4908_v32, %v2718_v48 }
 0xde6   : > { %v2799_v26 = vsel %vm2615_vm5, %v2783_v62, %v2791_v19  ;;  %v2809_v30 = vadd.f32 1.0, %v2801_v35  ;;  %v2741_v16 = vmul.f32 %v4895_v1, %v2733_v44  ;;  %v2792_v57 = vsub.f32 0.0, %v2784_v7 }
 0xde7   : > { %v2807_v55 = vadd.f32 1.0, %v2799_v26  ;;  %v2802_v34 = vsel %vm2618_vm6, %v2786_v13, %v2794_v54  ;;  %v2731_v43 = vadd.f32 0.2548296, %v2723_v58  ;;  %v2692_v62 = vmul.f32 %v4922_v36, %v2684_v15 }
 0xde8   : > { %v2810_v39 = vadd.f32 1.0, %v2802_v34  ;;  %v2781_v53 = vmul.f32 %v3731_v4, %v2741_v16  ;;  %v2817_v47 = vmul.f32 %v2809_v30, %v4861_v2  ;;  %v2600_v1 = vmul.f32 0.5, %v4804_v8 }
 0xde9   : > { %v2800_v45 = vsel %vm2616_vm7, %v2784_v7, %v2792_v57  ;;  %v2734_v6 = vadd.f32 0.2548296, %v2726_v42  ;;  %v2739_v46 = vmul.f32 %v4905_v37, %v2731_v43  ;;  %v2700_v60 = vadd.f32 1.4214138, %v2692_v62 }
 0xdea   : > { %v2818_v9 = vmul.f32 %v2810_v39, %v2602_v50  ;;  %v2808_v14 = vadd.f32 1.0, %v2800_v45  ;;  %v2789_v24 = vsub.f32 1.0, %v2781_v53  ;;  %3736 = vpow2.f32 %v2769_v11 }
 0xdeb   : > { %v2742_v27 = vmul.f32 %v4908_v32, %v2734_v6  ;;  %v2815_v4 = vmul.f32 %v2807_v55, %v4902_v3  ;;  %v2779_v10 = vmul.f32 %v3733_v18, %v2739_v46  ;;  %v2708_v12 = vmul.f32 %v4922_v36, %v2700_v60 }
 0xdec   : > { %v2824_v19 = vpack.c.bf16 %v2818_v9, %v2817_v47  ;;  %v2816_v56 = vmul.f32 %v2808_v14, %v2600_v1  ;;  %v2797_v2 = vsub.f32 0.0, %v2789_v24  ;;  %v2605_v50 = vmul.f32 0.5, %v4832_v33 }
 0xded   : > { %v2782_v8 = vmul.f32 %v3735_v17, %v2742_v27  ;;  %v2716_v41 = vadd.f32 -0.28449672, %v2708_v12  ;;  %v2787_v37 = vsub.f32 1.0, %v2779_v10  ;;  %v2606_v44 = vmul.f32 0.5, %v4841_v52 }
 0xdee   : > { %v2823_v25 = vpack.c.bf16 %v2816_v56, %v2815_v4  ;;  %v2805_v35 = vsel %vm2621_vm8, %v2789_v24, %v2797_v2  ;;  %v2603_v52 = vmul.f32 0.5, %v4837_v40  ;;  %v2604_v34 = vmul.f32 0.5, %v4856_v5 }
 0xdef   : > { %v2790_v13 = vsub.f32 1.0, %v2782_v8  ;;  %v2724_v23 = vmul.f32 %v4922_v36, %v2716_v41  ;;  %v2813_v3 = vadd.f32 1.0, %v2805_v35  ;;  %v2795_v30 = vsub.f32 0.0, %v2787_v37 }
 0xdf0   : > { %3463 = vmatprep.mubr.bf16.mxu0 %v2823_v25 }
 0xdf1   : > { %v2798_v32 = vsub.f32 0.0, %v2790_v13  ;;  %3464 = vmatmul.mubr.bf16.vlgmr.msra.gmra.mrb[40].mxu0 %v2824_v19  ;;  %v2732_v18 = vadd.f32 0.2548296, %v2724_v23  ;;  %v2821_v7 = vmul.f32 %v2813_v3, %v2605_v50  ;;  %v2803_v15 = vsel %vm2619_vm9, %v2787_v37, %v2795_v30 }
 0xdf2   : > { %v2811_v55 = vadd.f32 1.0, %v2803_v15 }
 0xdf3   : > { %v2806_v26 = vsel %vm2622_vm10, %v2790_v13, %v2798_v32  ;;  %v2740_v54 = vmul.f32 %v4922_v36, %v2732_v18 }
 0xdf4   : > { %v2814_v21 = vadd.f32 1.0, %v2806_v26  ;;  %v3737_v51 = vpop.eup %3736  ;;  %v2819_v36 = vmul.f32 %v2811_v55, %v2603_v52 }
 0xdf5   : > { %v2780_v16 = vmul.f32 %v3737_v51, %v2740_v54 }
 0xdf6   : > { %v2822_v48 = vmul.f32 %v2814_v21, %v2606_v44 }
 0xdf7   : > { %v2788_v11 = vsub.f32 1.0, %v2780_v16 }
 0xdf8   : > { %v2826_v58 = vpack.c.bf16 %v2822_v48, %v2821_v7 }
 0xdf9   : > { %v2796_v61 = vsub.f32 0.0, %v2788_v11 }
 0xdfb   : > { %v2804_v33 = vsel %vm2620_vm11, %v2788_v11, %v2796_v61 }
 0xdfc   : > { %v2812_v57 = vadd.f32 1.0, %v2804_v33 }
 0xdfe   : > { %v2820_v42 = vmul.f32 %v2812_v57, %v2604_v34 }
 0xe00   : > { %v2825_v17 = vpack.c.bf16 %v2820_v42, %v2819_v36 }
 0xe02   : > { %3467 = vmatprep.mubr.bf16.mxu0 %v2825_v17 }
 0xe03   : > { %3468 = vmatmul.mubr.bf16.gmra.mrb[44].mxu0 %v2826_v58 }
 0xec4   : > { %v3465_v39 = vpop.f32.mrb[40].mxu0 }
 0xec5   : > { %v2941_v53 = vadd.f32 %v3465_v39, %v3134_v63  ;;  %v2932_v43 = vpop.f32.mrb[41].mxu0 }
 0xec6   : > { %v2933_v40 = vadd.f32 %v3134_v63, %v2932_v43  ;;  %v3466_v5 = vpop.f32.mrb[42].mxu0 }
 0xec7   : > { %v2965_v29 = vadd.f32 %v2941_v53, %v4658_v31  ;;  %v2944_v62 = vadd.f32 %v3466_v5, %v3134_v63  ;;  %v2935_v47 = vpop.f32.mrb[43].mxu0 }
 0xec8   : > { %v2963_v1 = vadd.f32 %v2933_v40, %v4655_v20  ;;  %v2936_v45 = vadd.f32 %v3134_v63, %v2935_v47 }
 0xec9   : > { %2973 = vst.msk [vmem:[%s494_s21 + $0x10] sm:$0xff] %vm506_vm0, %v2965_v29  ;;  %v2966_v6 = vadd.f32 %v2944_v62, %v4667_v59 }
 0xeca   : > { %2971 = vst.msk [vmem:[%s494_s21] sm:$0xff] %vm506_vm0, %v2963_v1  ;;  %v2964_v9 = vadd.f32 %v2936_v45, %v4661_v38 }
 0xecb   : > { %2974 = vst.msk [vmem:[%s494_s21 + $0x18] sm:$0xff] %vm506_vm0, %v2966_v6 }
 0xecc   : > { %2972 = vst.msk [vmem:[%s494_s21 + $0x8] sm:$0xff] %vm506_vm0, %v2964_v9 }
 0xed6   : > { %v3469_v14 = vpop.f32.mrb[44].mxu0 }
 0xed7   : > { %v2957_v24 = vadd.f32 %v3469_v14, %v3134_v63  ;;  %v2948_v31 = vpop.f32.mrb[45].mxu0 }
 0xed8   : > { %v2949_v46 = vadd.f32 %v3134_v63, %v2948_v31  ;;  %v3470_v27 = vpop.f32.mrb[46].mxu0 }
 0xed9   : > { %v2969_v20 = vadd.f32 %v2957_v24, %v4685_v22  ;;  %v2960_v60 = vadd.f32 %v3470_v27, %v3134_v63  ;;  %v2951_v4 = vpop.f32.mrb[47].mxu0 }
 0xeda   : > { %v2967_v19 = vadd.f32 %v2949_v46, %v4675_v49  ;;  %v2952_v59 = vadd.f32 %v3134_v63, %v2951_v4 }
 0xedb   : > { %2977 = vst.msk [vmem:[%s494_s21 + $0x30] sm:$0xff] %vm506_vm0, %v2969_v20  ;;  %v2970_v38 = vadd.f32 %v2960_v60, %v4681_v0 }
 0xedc   : > { %2975 = vst.msk [vmem:[%s494_s21 + $0x20] sm:$0xff] %vm506_vm0, %v2967_v19  ;;  %v2968_v56 = vadd.f32 %v2952_v59, %v4677_v28 }
 0xedd   : > { %2978 = vst.msk [vmem:[%s494_s21 + $0x38] sm:$0xff] %vm506_vm0, %v2970_v38 }
 0xede   : > { %2976 = vst.msk [vmem:[%s494_s21 + $0x28] sm:$0xff] %vm506_vm0, %v2968_v56 }
 0xedf PF: > { %s25_s18 = sadd.s32 1, %s3760_s18  }
 0xee0   : > { %p22_p4 = scmp.ge.s32.totalorder %s25_s18, 10  }
 0xee2   :  { %24 = sbr.rel (!%p22_p4) target bundleno = 1 (0x1), region = 113 }

// kernel: swin_layers_forward.13
= control target key start
LH: loop header
LB: loop body
LE: loop exit
PB: predicated region body
PF: predicated region fallthrough
CT: control target
= control target key end

     0   :  { %s3981_s18 = smov 0   ;;  %s5098_s0 = inlined_call_operand.vmem [shape: f32[8,64,32], index: 0, kind: input, shape index: {}]   ;;  %s5099_s1 = inlined_call_operand.vmem [shape: f32[4,64,64], index: 1, kind: input, shape index: {}]   ;;  %s5100_s2 = inlined_call_operand.vmem [shape: f32[4,64,64], index: 2, kind: input, shape index: {}]   ;;  %s5101_s3 = inlined_call_operand.vmem [shape: f32[1,32], index: 3, kind: input, shape index: {}]   ;;  %s5102_s4 = inlined_call_operand.vmem [shape: f32[1,32], index: 4, kind: input, shape index: {}]   ;;  %s5103_s5 = inlined_call_operand.vmem [shape: bf16[32,96], index: 5, kind: input, shape index: {}]   ;;  %s5104_s6 = inlined_call_operand.vmem [shape: f32[1,96], index: 6, kind: input, shape index: {}]   ;;  %s5105_s7 = inlined_call_operand.vmem [shape: bf16[32,32], index: 7, kind: input, shape index: {}]   ;;  %s5106_s8 = inlined_call_operand.vmem [shape: f32[1,32], index: 8, kind: input, shape index: {}]   ;;  %s5107_s9 = inlined_call_operand.vmem [shape: f32[1,32], index: 9, kind: input, shape index: {}]   ;;  %s5108_s10 = inlined_call_operand.vmem [shape: f32[1,32], index: 10, kind: input, shape index: {}]   ;;  %s5109_s11 = inlined_call_operand.vmem [shape: bf16[32,128], index: 11, kind: input, shape index: {}]   ;;  %s5110_s12 = inlined_call_operand.vmem [shape: f32[1,128], index: 12, kind: input, shape index: {}]   ;;  %s5111_s13 = inlined_call_operand.vmem [shape: bf16[128,32], index: 13, kind: input, shape index: {}]   ;;  %s5112_s14 = inlined_call_operand.vmem [shape: f32[1,32], index: 14, kind: input, shape index: {}]   ;;  %s5113_s15 = inlined_call_operand.vmem [shape: f32[8,64,32], index: 15, kind: output, shape index: {}]  }
   0x1 LB: > { %s3987_s19 = sadd.s32 4294967295, %s3888_s18   ;;  %p3160_p0 = scmp.ge.s32.totalorder %s3888_s18, 1  ;;  %s3888_s18 = sphi %s3981_s18, %s25_s18  }
   0x2   : > { %p495_p1 = scmp.lt.s32.totalorder %s3888_s18, 9 }
   0x4   : > { %p496_p2 = pnand %p3160_p0, %p495_p1 }
   0x5   : > { %p560_p3 = scmp.lt.s32.totalorder (!%p496_p2), %s3987_s19, 7  ;;  %vm610_vm0 = vcmask (!%p496_p2), 261120   ;;  %v3662_v56 = vld [vmem:[%s5103_s5] sm:$0xff] (!%p496_p2)   ;;  %v3663_v57 = vld [vmem:[%s5103_s5 + $0x8] sm:$0xff] (!%p496_p2)   ;;  %s3890_s25 = smov (!%p496_p2), 96   ;;  %vm892_vm1 = vcmask (!%p496_p2), 64512  }
   0x6   : > { %499 = sbr.rel (%p496_p2) target bundleno = 3808 (0xee0), region = 80  ;;  %3383 = vmatprep.subr.bf16.mxu1 (!%p496_p2), %v3662_v56  ;;  %s566_s26 = ssub.s32 (!%p496_p2), 0, %s3987_s19  ;;  %vm990_vm2 = vcmask (!%p496_p2), 523264   ;;  %vm1501_vm3 = vcmask (!%p496_p2), 1043456  }
   0x7   : > { %3384 = vmatpush3.bf16.msra.mxu1 (!%p496_p2), %v3662_v56  ;;  %s3163_s27 = smin.u32 (!%p496_p2), %s3987_s19, %s566_s26  ;;  %p565_p4 = scmp.lt.s32.totalorder (!%p496_p2), %s3987_s19, 0 }
   0x8   : > { %3385 = vmatprep.subr.bf16.mxu1 (!%p496_p2), %v3663_v57  ;;  %s568_s28 = sand.u32 (!%p496_p2), 3, %s3163_s27   ;;  %s3896_s27 = smov (!%p496_p2), 56  }
   0x9   : > { %s569_s29 = ssub.s32 (!%p496_p2), 0, %s568_s28 }
   0xb   : > { %3386 = vmatpush3.bf16.msra.mxu1 (!%p496_p2), %v3663_v57 }
   0xd   : > { %s3993_s20 = scalar_select %p560_p3, %s3987_s19, 7 }
   0xe   : > { %s5117_s29 = smov (!%p565_p4, %s569_s29), %s568_s28  ;;  %s3897_s28 = smov 72  }
   0xf   : > { %s5114_s21 = sshll.u32 %s3993_s20, 6  ;;  %p3165_p5 = scmp.lt.s32.totalorder %s5117_s29, 0 }
  0x10   : > { %s4001_s24 = scalar_lea.vmem %s5098_s0, %s5114_s21  ;;  %s575_s30 = sadd.s32 4, %s5117_s29 }
  0x11   : > { %v600_v0 = vld [vmem:[%s4001_s24] sm:$0xff]  ;;  %v602_v1 = vld [vmem:[%s4001_s24 + $0x10] sm:$0xff]  ;;  %v601_v2 = vld [vmem:[%s4001_s24 + $0x8] sm:$0xff]  ;;  %s5119_s30 = smov (!%p3165_p5, %s575_s30), %s5117_s29  ;;  %s3892_s21 = smov 88  }
  0x12   : > { %v611_v3 = vsel %vm610_vm0, %v600_v0, 0.0  ;;  %v617_v4 = vsel %vm610_vm0, %v602_v1, 0.0  ;;  %v603_v5 = vld [vmem:[%s4001_s24 + $0x18] sm:$0xff]  ;;  %v614_v6 = vsel %vm610_vm0, %v601_v2, 0.0  ;;  %v604_v7 = vld [vmem:[%s4001_s24 + $0x20] sm:$0xff]  ;;  %v605_v9 = vld [vmem:[%s4001_s24 + $0x28] sm:$0xff] }
  0x13   : > { %612 = vadd.xlane.f32.xlu0 %v611_v3  ;;  %618 = vadd.xlane.f32.xlu1 %v617_v4  ;;  %v620_v8 = vsel %vm610_vm0, %v603_v5, 0.0  ;;  %v623_v10 = vsel %vm610_vm0, %v604_v7, 0.0  ;;  %v626_v11 = vsel %vm610_vm0, %v605_v9, 0.0  ;;  %v606_v12 = vld [vmem:[%s4001_s24 + $0x30] sm:$0xff]  ;;  %v607_v13 = vld [vmem:[%s4001_s24 + $0x38] sm:$0xff]  ;;  %p577_p6 = scmp.lt.s32.totalorder %s5119_s30, 3 }
  0x14   : > { %v629_v14 = vsel %vm610_vm0, %v606_v12, 0.0  ;;  %v632_v15 = vsel %vm610_vm0, %v607_v13, 0.0  ;;  %s3893_s29 = smov 120  }
  0x15   : > { %s5121_s30 = smov (!%p577_p6, %s5119_s30), 3 }
  0x16   : > { %s3273_s16 = sshll.u32 %s5121_s30, 6  ;;  %s3894_s30 = smov 80  }
  0x17   : > { %615 = vadd.xlane.f32.xlu0 %v614_v6  ;;  %621 = vadd.xlane.f32.xlu1 %v620_v8  ;;  %s4128_s23 = scalar_lea.vmem %s5100_s2, %s3273_s16  ;;  %s3895_s16 = smov 112  }
  0x1b   : > { %624 = vadd.xlane.f32.xlu0 %v623_v10  ;;  %627 = vadd.xlane.f32.xlu1 %v626_v11 }
  0x1f   : > { %630 = vadd.xlane.f32.xlu0 %v629_v14  ;;  %633 = vadd.xlane.f32.xlu1 %v632_v15 }
  0xa0   : > { %v613_v16 = vpop.xlane.xlu0 %612  ;;  %v619_v17 = vpop.xlane.xlu1 %618 }
  0xa1   : > { %v636_v18 = vmul.f32 0.03125, %v613_v16  ;;  %v638_v19 = vmul.f32 0.03125, %v619_v17 }
  0xa3   : > { %v4019_v20 = vsub.f32 %v600_v0, %v636_v18  ;;  %v4021_v21 = vsub.f32 %v602_v1, %v638_v19  ;;  %v3170_v19 = vld [vmem:[%s5101_s3] ss:$0 sm:$0xff] }
  0xa4   : > { %v616_v22 = vpop.xlane.xlu0 %615  ;;  %v622_v23 = vpop.xlane.xlu1 %621 }
  0xa5   : > { %v637_v24 = vmul.f32 0.03125, %v616_v22  ;;  %v639_v25 = vmul.f32 0.03125, %v622_v23  ;;  %v652_v26 = vmul.f32 %v4019_v20, %v4019_v20  ;;  %v654_v27 = vmul.f32 %v4021_v21, %v4021_v21 }
  0xa7   : > { %v4027_v28 = vsub.f32 %v601_v2, %v637_v24  ;;  %v4029_v29 = vsub.f32 %v603_v5, %v639_v25  ;;  %v660_v30 = vsel %vm610_vm0, %v652_v26, 0.0  ;;  %v666_v33 = vsel %vm610_vm0, %v654_v27, 0.0  ;;  %v3171_v27 = vld [vmem:[%s5102_s4] ss:$0 sm:$0xff] }
  0xa8   : > { %661 = vadd.xlane.f32.xlu0 %v660_v30  ;;  %v625_v31 = vpop.xlane.xlu0 %624  ;;  %v628_v32 = vpop.xlane.xlu1 %627 }
  0xa9   : > { %v640_v34 = vmul.f32 0.03125, %v625_v31  ;;  %v641_v35 = vmul.f32 0.03125, %v628_v32  ;;  %v653_v36 = vmul.f32 %v4027_v28, %v4027_v28  ;;  %v655_v37 = vmul.f32 %v4029_v29, %v4029_v29 }
  0xab   : > { %v4037_v38 = vsub.f32 %v604_v7, %v640_v34  ;;  %v4039_v39 = vsub.f32 %v605_v9, %v641_v35  ;;  %v663_v40 = vsel %vm610_vm0, %v653_v36, 0.0  ;;  %v669_v43 = vsel %vm610_vm0, %v655_v37, 0.0 }
  0xac   : > { %667 = vadd.xlane.f32.xlu0 %v666_v33  ;;  %664 = vadd.xlane.f32.xlu1 %v663_v40  ;;  %v631_v41 = vpop.xlane.xlu0 %630  ;;  %v634_v42 = vpop.xlane.xlu1 %633 }
  0xad   : > { %v642_v44 = vmul.f32 0.03125, %v631_v41  ;;  %v643_v45 = vmul.f32 0.03125, %v634_v42  ;;  %v656_v46 = vmul.f32 %v4037_v38, %v4037_v38  ;;  %v657_v47 = vmul.f32 %v4039_v39, %v4039_v39 }
  0xaf   : > { %v4047_v48 = vsub.f32 %v606_v12, %v642_v44  ;;  %v4049_v49 = vsub.f32 %v607_v13, %v643_v45  ;;  %v672_v50 = vsel %vm610_vm0, %v656_v46, 0.0  ;;  %v675_v51 = vsel %vm610_vm0, %v657_v47, 0.0 }
  0xb0   : > { %670 = vadd.xlane.f32.xlu1 %v669_v43  ;;  %673 = vadd.xlane.f32.xlu0 %v672_v50 }
  0xb1   : > { %v658_v52 = vmul.f32 %v4047_v48, %v4047_v48  ;;  %v659_v53 = vmul.f32 %v4049_v49, %v4049_v49 }
  0xb3   : > { %v678_v54 = vsel %vm610_vm0, %v658_v52, 0.0  ;;  %v681_v55 = vsel %vm610_vm0, %v659_v53, 0.0 }
  0xb4   : > { %676 = vadd.xlane.f32.xlu1 %v675_v51  ;;  %679 = vadd.xlane.f32.xlu0 %v678_v54 }
  0xb8   : > { %682 = vadd.xlane.f32.xlu1 %v681_v55 }
 0x135   : > { %v662_v58 = vpop.xlane.xlu0 %661 }
 0x136   : > { %v684_v59 = vmul.f32 0.03125, %v662_v58 }
 0x138   : > { %v692_v60 = vadd.f32 1e-05, %v684_v59 }
 0x139   : > { %v665_v61 = vpop.xlane.xlu1 %664  ;;  %v668_v62 = vpop.xlane.xlu0 %667 }
 0x13a   : > { %3674 = vrsqrt.f32 %v692_v60  ;;  %v685_v63 = vmul.f32 0.03125, %v665_v61  ;;  %v686_v0 = vmul.f32 0.03125, %v668_v62 }
 0x13c   : > { %v693_v1 = vadd.f32 1e-05, %v685_v63  ;;  %v694_v2 = vadd.f32 1e-05, %v686_v0 }
 0x13d   : > { %v671_v3 = vpop.xlane.xlu1 %670  ;;  %v674_v4 = vpop.xlane.xlu0 %673 }
 0x13e   : > { %3676 = vrsqrt.f32 %v693_v1  ;;  %v687_v5 = vmul.f32 0.03125, %v671_v3  ;;  %v688_v6 = vmul.f32 0.03125, %v674_v4 }
 0x13f   : > { %3678 = vrsqrt.f32 %v694_v2 }
 0x140   : > { %v695_v7 = vadd.f32 1e-05, %v687_v5  ;;  %v696_v8 = vadd.f32 1e-05, %v688_v6 }
 0x141   : > { %v677_v9 = vpop.xlane.xlu1 %676  ;;  %v680_v10 = vpop.xlane.xlu0 %679 }
 0x142   : > { %3680 = vrsqrt.f32 %v695_v7  ;;  %v689_v11 = vmul.f32 0.03125, %v677_v9  ;;  %v690_v12 = vmul.f32 0.03125, %v680_v10 }
 0x143   : > { %3682 = vrsqrt.f32 %v696_v8 }
 0x144   : > { %v3675_v13 = vpop.eup %3674  ;;  %v697_v14 = vadd.f32 1e-05, %v689_v11  ;;  %v698_v15 = vadd.f32 1e-05, %v690_v12 }
 0x145   : > { %v683_v16 = vpop.xlane.xlu1 %682  ;;  %v708_v17 = vmul.f32 %v3675_v13, %v4019_v20 }
 0x146   : > { %3684 = vrsqrt.f32 %v697_v14  ;;  %v691_v18 = vmul.f32 0.03125, %v683_v16 }
 0x147   : > { %3686 = vrsqrt.f32 %v698_v15  ;;  %v722_v26 = vmul.f32 %v3170_v19, %v708_v17 }
 0x148   : > { %v3677_v22 = vpop.eup %3676  ;;  %v699_v23 = vadd.f32 1e-05, %v691_v18 }
 0x149   : > { %v3679_v24 = vpop.eup %3678  ;;  %v709_v25 = vmul.f32 %v3677_v22, %v4027_v28  ;;  %v736_v33 = vadd.f32 %v3171_v27, %v722_v26 }
 0x14a   : > { %3688 = vrsqrt.f32 %v699_v23  ;;  %v710_v20 = vmul.f32 %v3679_v24, %v4021_v21 }
 0x14b   : > { %v723_v30 = vmul.f32 %v3170_v19, %v709_v25 }
 0x14c   : > { %v3681_v31 = vpop.eup %3680  ;;  %v724_v36 = vmul.f32 %v3170_v19, %v710_v20 }
 0x14d   : > { %v3683_v32 = vpop.eup %3682  ;;  %v737_v34 = vadd.f32 %v3171_v27, %v723_v30  ;;  %v711_v35 = vmul.f32 %v3681_v31, %v4029_v29 }
 0x14e   : > { %v712_v37 = vmul.f32 %v3683_v32, %v4037_v38  ;;  %v738_v43 = vadd.f32 %v3171_v27, %v724_v36  ;;  %v874_v36 = vld [vmem:[%s5099_s1 + $0x10] sm:$0xff] }
 0x14f   : > { %v744_v40 = vpack.c.bf16 %v737_v34, %v736_v33  ;;  %v725_v28 = vmul.f32 %v3170_v19, %v711_v35 }
 0x150   : > { %v3685_v41 = vpop.eup %3684  ;;  %v726_v45 = vmul.f32 %v3170_v19, %v712_v37  ;;  %v872_v37 = vld [vmem:[%s5099_s1] sm:$0xff] }
 0x151   : > { %v3687_v42 = vpop.eup %3686  ;;  %3387 = vmatprep.mubr.msk.bf16.mxu1 %vm610_vm0, %v744_v40  ;;  %v739_v44 = vadd.f32 %v3171_v27, %v725_v28  ;;  %v713_v21 = vmul.f32 %v3685_v41, %v4039_v39  ;;  %v4137_v28 = vld [vmem:[%s4128_s23 + $0x10] sm:$0xff] }
 0x152   : > { %v714_v46 = vmul.f32 %v3687_v42, %v4047_v48  ;;  %v740_v29 = vadd.f32 %v3171_v27, %v726_v45  ;;  %v3172_v48 = vld [vmem:[%s5104_s6] ss:$0 sm:$0xff] }
 0x153   : > { %v745_v47 = vpack.c.bf16 %v739_v44, %v738_v43  ;;  %v727_v50 = vmul.f32 %v3170_v19, %v713_v21  ;;  %v873_v43 = vld [vmem:[%s5099_s1 + $0x8] sm:$0xff]  ;;  %v875_v21 = vld [vmem:[%s5099_s1 + $0x18] sm:$0xff] }
 0x154   : > { %v3689_v51 = vpop.eup %3688  ;;  %v728_v53 = vmul.f32 %v3170_v19, %v714_v46  ;;  %v4146_v46 = vld [vmem:[%s4128_s23] sm:$0xff] }
 0x155   : > { %3388 = vmatmul.mubr.msk.bf16.vlgmr.msra.gmra.mrb[0].mxu1 %vm610_vm0, %v745_v47  ;;  %v741_v38 = vadd.f32 %v3171_v27, %v727_v50  ;;  %v715_v52 = vmul.f32 %v3689_v51, %v4049_v49  ;;  %v4150_v51 = vld [vmem:[%s4128_s23 + $0x8] sm:$0xff] }
 0x156   : > { %v742_v56 = vadd.f32 %v3171_v27, %v728_v53 }
 0x157   : > { %v746_v54 = vpack.c.bf16 %v741_v38, %v740_v29  ;;  %v729_v55 = vmul.f32 %v3170_v19, %v715_v52 }
 0x159   : > { %3391 = vmatprep.mubr.msk.bf16.mxu1 %vm610_vm0, %v746_v54  ;;  %v743_v57 = vadd.f32 %v3171_v27, %v729_v55  ;;  %v878_v54 = vld [vmem:[%s5099_s1 + $0x30] sm:$0xff] }
 0x15b   : > { %v747_v39 = vpack.c.bf16 %v743_v57, %v742_v56  ;;  %v4159_v56 = vld [vmem:[%s4128_s23 + $0x18] sm:$0xff] }
 0x15d   : > { %3392 = vmatmul.mubr.msk.bf16.gmra.mrb[4].mxu1 %vm610_vm0, %v747_v39 }
 0x228   : > { %v3389_v58 = vpop.f32.mrb[0].mxu1 }
 0x229   : > { %v826_v59 = vadd.f32 %v3389_v58, %v3172_v48  ;;  %v817_v60 = vpop.f32.mrb[1].mxu1 }
 0x22a   : > { %v818_v61 = vadd.f32 %v3172_v48, %v817_v60  ;;  %v3390_v62 = vpop.f32.mrb[2].mxu1 }
 0x22b   : > { %v829_v49 = vadd.f32 %v3390_v62, %v3172_v48  ;;  %v820_v63 = vpop.f32.mrb[3].mxu1  ;;  %v858_v1 = vmul.f32 0.35355338, %v826_v59 }
 0x22c   : > { %v821_v0 = vadd.f32 %v3172_v48, %v820_v63  ;;  %v856_v4 = vmul.f32 0.35355338, %v818_v61 }
 0x22d   : > { %v859_v2 = vmul.f32 0.35355338, %v829_v49  ;;  %v4086_v3 = vpack.c.bf16 %v829_v49, %v826_v59  ;;  %v4168_v49 = vld [vmem:[%s4128_s23 + $0x30] sm:$0xff] }
 0x22e   : > { %v857_v5 = vmul.f32 0.35355338, %v821_v0  ;;  %v4088_v6 = vpack.c.bf16 %v821_v0, %v818_v61  ;;  %v876_v61 = vld [vmem:[%s5099_s1 + $0x20] sm:$0xff] }
 0x22f   : > { %v4090_v7 = vpack.c.bf16 %v859_v2, %v858_v1  ;;  %886 = vrot.lane.b32.xlu1 %v4086_v3, %s3890_s25 }
 0x230   : > { %v4093_v8 = vpack.c.bf16 %v857_v5, %v856_v4  ;;  %884 = vrot.lane.b32.xlu0 %v4088_v6, %s3890_s25  ;;  %v3393_v9 = vpop.f32.mrb[4].mxu1  ;;  %v4173_v4 = vld [vmem:[%s4128_s23 + $0x20] sm:$0xff] }
 0x231   : > { %v842_v10 = vadd.f32 %v3393_v9, %v3172_v48  ;;  %v833_v11 = vpop.f32.mrb[5].mxu1 }
 0x232   : > { %v834_v12 = vadd.f32 %v3172_v48, %v833_v11  ;;  %v3394_v13 = vpop.f32.mrb[6].mxu1  ;;  %3403 = vmatprep.mubr.msk.bf16.mxu1 %vm892_vm1, %v4093_v8  ;;  %v879_v11 = vld [vmem:[%s5099_s1 + $0x38] sm:$0xff] }
 0x233   : > { %v845_v14 = vadd.f32 %v3394_v13, %v3172_v48  ;;  %v836_v15 = vpop.f32.mrb[7].mxu1  ;;  %v862_v17 = vmul.f32 0.35355338, %v842_v10  ;;  %v877_v13 = vld [vmem:[%s5099_s1 + $0x28] sm:$0xff] }
 0x234   : > { %v837_v16 = vadd.f32 %v3172_v48, %v836_v15  ;;  %v860_v22 = vmul.f32 0.35355338, %v834_v12 }
 0x235   : > { %v863_v18 = vmul.f32 0.35355338, %v845_v14  ;;  %v4098_v19 = vpack.c.bf16 %v845_v14, %v842_v10  ;;  %v4188_v14 = vld [vmem:[%s4128_s23 + $0x38] sm:$0xff] }
 0x236   : > { %v861_v23 = vmul.f32 0.35355338, %v837_v16  ;;  %v4100_v24 = vpack.c.bf16 %v837_v16, %v834_v12 }
 0x237   : > { %v4102_v25 = vpack.c.bf16 %v863_v18, %v862_v17  ;;  %v4194_v17 = vld [vmem:[%s4128_s23 + $0x28] sm:$0xff] }
 0x238   : > { %v4104_v26 = vpack.c.bf16 %v861_v23, %v860_v22  ;;  %888 = vrot.lane.b32.xlu1 %v4100_v24, %s3890_s25 }
 0x23c   : > { %890 = vrot.lane.b32.xlu1 %v4098_v19, %s3890_s25  ;;  %s3891_s25 = smov 64  }
 0x2a1   : > { %v887_v30 = vpop.permute.xlu1 %886 }
 0x2a2   : > { %v885_v27 = vpop.permute.xlu0 %884  ;;  %v909_v31 = vsel %vm892_vm1, %v887_v30, 0 }
 0x2a3   : > { %3623 = vmatprep.subr.msk.bf16.mxu1 %vm892_vm1, %v885_v27  ;;  %v906_v20 = vsel %vm892_vm1, %v885_v27, 0 }
 0x2a4   : > { %3396 = vmatpush3.bf16.xpose.msra.mxu1 %v906_v20 }
 0x2a5   : > { %3624 = vmatprep.subr.msk.bf16.mxu1 %vm892_vm1, %v887_v30 }
 0x2aa   : > { %v889_v32 = vpop.permute.xlu1 %888 }
 0x2ab   : > { %v912_v33 = vsel %vm892_vm1, %v889_v32, 0 }
 0x2ac   : > { %3398 = vmatpush3.bf16.xpose.msra.mxu1 %v909_v31 }
 0x2ad   : > { %3625 = vmatprep.subr.msk.bf16.mxu1 %vm892_vm1, %v889_v32 }
 0x2ae   : > { %v891_v34 = vpop.permute.xlu1 %890 }
 0x2af   : > { %v915_v35 = vsel %vm892_vm1, %v891_v34, 0 }
 0x2b4   : > { %3400 = vmatpush3.bf16.xpose.msra.mxu1 %v912_v33 }
 0x2b5   : > { %3626 = vmatprep.subr.msk.bf16.mxu1 %vm892_vm1, %v891_v34 }
 0x2bc   : > { %3402 = vmatpush3.bf16.xpose.msra.mxu1 %v915_v35 }
 0x2c3   : > { %3404 = vmatmul.mubr.msk.bf16.vlgmr.msra.gmra.mrb[8].mxu1 %vm892_vm1, %v4090_v7 }
 0x2c4   : > { %3407 = vmatprep.mubr.msk.bf16.mxu1 %vm892_vm1, %v4104_v26 }
 0x2cb   : > { %3408 = vmatmul.mubr.msk.bf16.gmra.mrb[12].mxu1 %vm892_vm1, %v4102_v25 }
 0x396   : > { %v3405_v40 = vpop.f32.mrb[8].mxu1 }
 0x397   : > { %v960_v41 = vadd.f32 %v3405_v40, %v874_v36  ;;  %v951_v42 = vpop.f32.mrb[9].mxu1 }
 0x398   : > { %v952_v44 = vadd.f32 %v951_v42, %v872_v37  ;;  %v3406_v45 = vpop.f32.mrb[10].mxu1 }
 0x399   : > { %v954_v47 = vpop.f32.mrb[11].mxu1  ;;  %v984_v50 = vadd.f32 %v960_v41, %v4137_v28  ;;  %v963_v38 = vadd.f32 %v3406_v45, %v875_v21 }
 0x39a   : > { %v955_v29 = vadd.f32 %v954_v47, %v873_v43  ;;  %v982_v53 = vadd.f32 %v952_v44, %v4146_v46 }
 0x39b   : > { %v997_v52 = vsel %vm990_vm2, %v984_v50, -inf  ;;  %v985_v60 = vadd.f32 %v963_v38, %v4159_v56 }
 0x39c   : > { %998 = vmax.xlane.f32.xlu0 %v997_v52  ;;  %v983_v55 = vadd.f32 %v955_v29, %v4150_v51  ;;  %v991_v59 = vsel %vm990_vm2, %v982_v53, -inf }
 0x39d   : > { %v1000_v1 = vsel %vm990_vm2, %v985_v60, -inf }
 0x39e   : > { %v3409_v57 = vpop.f32.mrb[12].mxu1  ;;  %v994_v39 = vsel %vm990_vm2, %v983_v55, -inf }
 0x39f   : > { %v976_v48 = vadd.f32 %v3409_v57, %v878_v54  ;;  %v967_v58 = vpop.f32.mrb[13].mxu1  ;;  %995 = vmax.xlane.f32.xlu1 %v994_v39 }
 0x3a0   : > { %v3410_v62 = vpop.f32.mrb[14].mxu1  ;;  %992 = vmax.xlane.f32.xlu0 %v991_v59  ;;  %v968_v0 = vadd.f32 %v967_v58, %v876_v61 }
 0x3a1   : > { %v970_v63 = vpop.f32.mrb[15].mxu1  ;;  %v988_v2 = vadd.f32 %v976_v48, %v4168_v49  ;;  %v979_v12 = vadd.f32 %v3410_v62, %v879_v11 }
 0x3a2   : > { %v986_v9 = vadd.f32 %v968_v0, %v4173_v4  ;;  %v971_v15 = vadd.f32 %v970_v63, %v877_v13 }
 0x3a3   : > { %v1009_v5 = vsel %vm990_vm2, %v988_v2, -inf  ;;  %v4191_v16 = vadd.f32 %v979_v12, %v4188_v14 }
 0x3a4   : > { %1001 = vmax.xlane.f32.xlu0 %v1000_v1  ;;  %v1003_v10 = vsel %vm990_vm2, %v986_v9, -inf  ;;  %v4199_v22 = vadd.f32 %v971_v15, %v4194_v17 }
 0x3a5   : > { %v1012_v18 = vsel %vm990_vm2, %v4191_v16, -inf }
 0x3a6   : > { %v1006_v23 = vsel %vm990_vm2, %v4199_v22, -inf }
 0x3a8   : > { %1010 = vmax.xlane.f32.xlu0 %v1009_v5 }
 0x3ac   : > { %1004 = vmax.xlane.f32.xlu0 %v1003_v10 }
 0x3b0   : > { %1085 = vrot.lane.b32.xlu1 %v4086_v3, %s3891_s25 }
 0x3b4   : > { %1087 = vrot.lane.b32.xlu1 %v4100_v24, %s3891_s25 }
 0x3c2   : > { %1083 = vrot.lane.b32.xlu0 %v4088_v6, %s3891_s25 }
 0x3d8   : > { %1013 = vmax.xlane.f32.xlu1 %v1012_v18 }
 0x3dc   : > { %1007 = vmax.xlane.f32.xlu1 %v1006_v23 }
 0x3ed   : > { %1089 = vrot.lane.b32.xlu1 %v4098_v19, %s3891_s25 }
 0x429   : > { %v999_v27 = vpop.xlane.xlu0 %998 }
 0x42a   : > { %v1017_v20 = vsub.f32 %v984_v50, %v999_v27 }
 0x42c   : > { %v1027_v30 = vmul.f32 1.442695, %v1017_v20  ;;  %v996_v31 = vpop.xlane.xlu1 %995 }
 0x42d   : > { %v993_v32 = vpop.xlane.xlu0 %992  ;;  %v1016_v34 = vsub.f32 %v983_v55, %v996_v31 }
 0x42e   : > { %3690 = vpow2.f32 %v1027_v30  ;;  %v1015_v33 = vsub.f32 %v982_v53, %v993_v32 }
 0x42f   : > { %v1025_v40 = vmul.f32 1.442695, %v1016_v34 }
 0x430   : > { %v1023_v35 = vmul.f32 1.442695, %v1015_v33  ;;  %v1086_v52 = vpop.permute.xlu1 %1085 }
 0x431   : > { %v1002_v36 = vpop.xlane.xlu0 %1001 }
 0x432   : > { %3692 = vpow2.f32 %v1023_v35  ;;  %v1018_v37 = vsub.f32 %v985_v60, %v1002_v36 }
 0x434   : > { %v1029_v41 = vmul.f32 1.442695, %v1018_v37  ;;  %v1088_v48 = vpop.permute.xlu1 %1087 }
 0x435   : > { %v1011_v42 = vpop.xlane.xlu0 %1010 }
 0x436   : > { %3694 = vpow2.f32 %v1029_v41  ;;  %v1021_v43 = vsub.f32 %v988_v2, %v1011_v42 }
 0x437   : > { %3696 = vpow2.f32 %v1025_v40 }
 0x438   : > { %v4204_v44 = vpop.eup %3690  ;;  %v1035_v21 = vmul.f32 1.442695, %v1021_v43 }
 0x439   : > { %v1005_v45 = vpop.xlane.xlu0 %1004  ;;  %v1045_v47 = vsel %vm990_vm2, %v4204_v44, 0.0 }
 0x43a   : > { %3698 = vpow2.f32 %v1035_v21  ;;  %v1019_v50 = vsub.f32 %v986_v9, %v1005_v45  ;;  %1046 = vadd.xlane.f32.xlu0 %v1045_v47 }
 0x43c   : > { %v4208_v29 = vpop.eup %3692  ;;  %v1031_v38 = vmul.f32 1.442695, %v1019_v50 }
 0x43d   : > { %v1084_v53 = vpop.permute.xlu0 %1083  ;;  %v1039_v54 = vsel %vm990_vm2, %v4208_v29, 0.0 }
 0x43e   : > { %3700 = vpow2.f32 %v1031_v38  ;;  %1040 = vadd.xlane.f32.xlu0 %v1039_v54  ;;  %3411 = vmatprep.subr.bf16.mxu0 %v1084_v53 }
 0x43f   : > { %3412 = vmatpush3.bf16.msra.mxu0 %v1084_v53 }
 0x440   : > { %v4212_v55 = vpop.eup %3694  ;;  %3413 = vmatprep.subr.bf16.mxu0 %v1086_v52 }
 0x441   : > { %v1048_v57 = vsel %vm990_vm2, %v4212_v55, 0.0  ;;  %v4216_v39 = vpop.eup %3696 }
 0x442   : > { %1049 = vadd.xlane.f32.xlu1 %v1048_v57  ;;  %v1042_v59 = vsel %vm990_vm2, %v4216_v39, 0.0 }
 0x443   : > { %3414 = vmatpush3.bf16.msra.mxu0 %v1086_v52 }
 0x444   : > { %v4218_v58 = vpop.eup %3698  ;;  %3415 = vmatprep.subr.bf16.mxu0 %v1088_v48 }
 0x445   : > { %v1057_v60 = vsel %vm990_vm2, %v4218_v58, 0.0 }
 0x446   : > { %1043 = vadd.xlane.f32.xlu1 %v1042_v59  ;;  %1058 = vadd.xlane.f32.xlu0 %v1057_v60 }
 0x447   : > { %3416 = vmatpush3.bf16.msra.mxu0 %v1088_v48 }
 0x448   : > { %v4224_v61 = vpop.eup %3700 }
 0x449   : > { %v1051_v62 = vsel %vm990_vm2, %v4224_v61, 0.0 }
 0x44a   : > { %1052 = vadd.xlane.f32.xlu0 %v1051_v62 }
 0x457   : > { %1200 = vrot.lane.b32.xlu1 %v4086_v3, %s3892_s21 }
 0x45b   : > { %1202 = vrot.lane.b32.xlu1 %v4100_v24, %s3892_s21 }
 0x465   : > { %v1014_v63 = vpop.xlane.xlu1 %1013 }
 0x466   : > { %v1022_v0 = vsub.f32 %v4191_v16, %v1014_v63 }
 0x468   : > { %v1037_v1 = vmul.f32 1.442695, %v1022_v0 }
 0x469   : > { %v1008_v2 = vpop.xlane.xlu1 %1007 }
 0x46a   : > { %3702 = vpow2.f32 %v1037_v1  ;;  %v1020_v5 = vsub.f32 %v4199_v22, %v1008_v2 }
 0x46c   : > { %v1033_v9 = vmul.f32 1.442695, %v1020_v5 }
 0x46d   : > { %v1090_v10 = vpop.permute.xlu1 %1089 }
 0x46e   : > { %3417 = vmatprep.subr.bf16.mxu0 %v1090_v10  ;;  %3704 = vpow2.f32 %v1033_v9 }
 0x46f   : > { %3418 = vmatpush3.bf16.msra.mxu0 %v1090_v10 }
 0x474   : > { %v4232_v11 = vpop.eup %3702 }
 0x475   : > { %v1060_v12 = vsel %vm990_vm2, %v4232_v11, 0.0 }
 0x476   : > { %1061 = vadd.xlane.f32.xlu0 %v1060_v12 }
 0x478   : > { %v4236_v13 = vpop.eup %3704 }
 0x479   : > { %v1054_v15 = vsel %vm990_vm2, %v4236_v13, 0.0 }
 0x47f   : > { %1055 = vadd.xlane.f32.xlu1 %v1054_v15 }
 0x48c   : > { %1198 = vrot.lane.b32.xlu0 %v4088_v6, %s3892_s21 }
 0x490   : > { %1204 = vrot.lane.b32.xlu1 %v4098_v19, %s3892_s21  ;;  %1190 = vrot.lane.b32.xlu0 %v4093_v8, %s3893_s29  ;;  %s3898_s21 = smov 104  }
 0x494   : > { %1192 = vrot.lane.b32.xlu1 %v4090_v7, %s3893_s29  ;;  %1194 = vrot.lane.b32.xlu0 %v4104_v26, %s3893_s29 }
 0x498   : > { %1196 = vrot.lane.b32.xlu1 %v4102_v25, %s3893_s29  ;;  %1667 = vrot.lane.b32.xlu0 %v4088_v6, %s3894_s30 }
 0x49c   : > { %1669 = vrot.lane.b32.xlu1 %v4086_v3, %s3894_s30  ;;  %1671 = vrot.lane.b32.xlu0 %v4100_v24, %s3894_s30 }
 0x4a0   : > { %1673 = vrot.lane.b32.xlu1 %v4098_v19, %s3894_s30  ;;  %1659 = vrot.lane.b32.xlu0 %v4093_v8, %s3895_s16 }
 0x4a4   : > { %1661 = vrot.lane.b32.xlu1 %v4090_v7, %s3895_s16  ;;  %1663 = vrot.lane.b32.xlu0 %v4104_v26, %s3895_s16 }
 0x4a8   : > { %1665 = vrot.lane.b32.xlu1 %v4102_v25, %s3895_s16  ;;  %s5115_s16 = sshll.u32 %s3993_s20, 6 }
 0x4a9   : > { %s598_s22 = scalar_lea.vmem %s5113_s15, %s5115_s16 }
 0x4c7   : > { %v1047_v16 = vpop.xlane.xlu0 %1046 }
 0x4cb   : > { %v1041_v18 = vpop.xlane.xlu0 %1040 }
 0x4cf   : > { %v1050_v22 = vpop.xlane.xlu1 %1049 }
 0x4d0   : > { %3706 = vrcp.f32 %v1050_v22 }
 0x4d1   : > { %3708 = vrcp.f32 %v1041_v18 }
 0x4d2   : > { %3710 = vrcp.f32 %v1047_v16 }
 0x4d3   : > { %v1044_v23 = vpop.xlane.xlu1 %1043  ;;  %v1059_v40 = vpop.xlane.xlu0 %1058 }
 0x4d4   : > { %3712 = vrcp.f32 %v1044_v23 }
 0x4d7   : > { %v1053_v41 = vpop.xlane.xlu0 %1052  ;;  %v1201_v42 = vpop.permute.xlu1 %1200 }
 0x4d8   : > { %v1222_v50 = vsel %vm892_vm1, %v1201_v42, 0 }
 0x4da   : > { %v3707_v27 = vpop.eup %3706 }
 0x4db   : > { %v3709_v20 = vpop.eup %3708  ;;  %v1074_v32 = vmul.f32 %v3707_v27, %v4212_v55  ;;  %v1203_v45 = vpop.permute.xlu1 %1202 }
 0x4dc   : > { %v3711_v30 = vpop.eup %3710  ;;  %v1071_v33 = vmul.f32 %v3709_v20, %v4208_v29 }
 0x4dd   : > { %v1073_v35 = vmul.f32 %v3711_v30, %v4204_v44 }
 0x4de   : > { %v3713_v31 = vpop.eup %3712 }
 0x4df   : > { %v1072_v34 = vmul.f32 %v3713_v31, %v4216_v39  ;;  %v1080_v37 = vpack.c.bf16 %v1074_v32, %v1073_v35  ;;  %v1225_v39 = vsel %vm892_vm1, %v1203_v45, 0 }
 0x4e1   : > { %v1079_v36 = vpack.c.bf16 %v1072_v34, %v1071_v33 }
 0x4e3   : > { %3419 = vmatprep.mubr.msk.bf16.mxu0 %vm990_vm2, %v1079_v36 }
 0x4e4   : > { %3420 = vmatmul.mubr.msk.bf16.vlgmr.msra.gmra.mrb[0].mxu0 %vm990_vm2, %v1080_v37 }
 0x503   : > { %v1062_v43 = vpop.xlane.xlu0 %1061 }
 0x504   : > { %3714 = vrcp.f32 %v1062_v43  ;;  %v3187_v43 = vld [vmem:[%s5099_s1 + $0x40] sm:$0xff] }
 0x505   : > { %3716 = vrcp.f32 %v1053_v41 }
 0x506   : > { %3718 = vrcp.f32 %v1059_v40 }
 0x507   : > { %v1199_v21 = vpop.permute.xlu0 %1198 }
 0x508   : > { %3627 = vmatprep.subr.msk.bf16.mxu0 %vm892_vm1, %v1199_v21  ;;  %v1219_v47 = vsel %vm892_vm1, %v1199_v21, 0 }
 0x509   : > { %3428 = vmatpush3.bf16.xpose.msra.mxu0 %v1219_v47  ;;  %v3188_v47 = vld [vmem:[%s5099_s1 + $0x48] sm:$0xff] }
 0x50a   : > { %3628 = vmatprep.subr.msk.bf16.mxu0 %vm892_vm1, %v1201_v42  ;;  %v3189_v42 = vld [vmem:[%s5099_s1 + $0x50] sm:$0xff] }
 0x50b   : > { %v1191_v52 = vpop.permute.xlu0 %1190 }
 0x50c   : > { %v1056_v44 = vpop.xlane.xlu1 %1055 }
 0x50d   : > { %3720 = vrcp.f32 %v1056_v44 }
 0x50e   : > { %v3715_v29 = vpop.eup %3714 }
 0x50f   : > { %v3717_v38 = vpop.eup %3716  ;;  %v1078_v57 = vmul.f32 %v3715_v29, %v4232_v11  ;;  %v1195_v63 = vpop.permute.xlu0 %1194 }
 0x510   : > { %v3719_v53 = vpop.eup %3718  ;;  %v1205_v55 = vpop.permute.xlu1 %1204  ;;  %v1075_v48 = vmul.f32 %v3717_v38, %v4224_v61  ;;  %v3190_v38 = vld [vmem:[%s5099_s1 + $0x58] sm:$0xff] }
 0x511   : > { %3430 = vmatpush3.bf16.xpose.msra.mxu0 %v1222_v50  ;;  %v1077_v60 = vmul.f32 %v3719_v53, %v4218_v58  ;;  %v1228_v2 = vsel %vm892_vm1, %v1205_v55, 0 }
 0x512   : > { %3629 = vmatprep.subr.msk.bf16.mxu0 %vm892_vm1, %v1203_v45 }
 0x513   : > { %v1082_v0 = vpack.c.bf16 %v1078_v57, %v1077_v60  ;;  %v1668_v61 = vpop.permute.xlu0 %1667 }
 0x514   : > { %v1193_v1 = vpop.permute.xlu1 %1192  ;;  %v1688_v58 = vsel %vm892_vm1, %v1668_v61, 0 }
 0x517   : > { %v3721_v54 = vpop.eup %3720  ;;  %v1672_v10 = vpop.permute.xlu0 %1671 }
 0x518   : > { %v1076_v59 = vmul.f32 %v3721_v54, %v4236_v13  ;;  %v1197_v5 = vpop.permute.xlu1 %1196  ;;  %v1694_v13 = vsel %vm892_vm1, %v1672_v10, 0 }
 0x519   : > { %3432 = vmatpush3.bf16.xpose.msra.mxu0 %v1225_v39 }
 0x51a   : > { %3630 = vmatprep.subr.msk.bf16.mxu0 %vm892_vm1, %v1205_v55  ;;  %v1081_v62 = vpack.c.bf16 %v1076_v59, %v1075_v48  ;;  %v3191_v59 = vld [vmem:[%s5099_s1 + $0x60] sm:$0xff] }
 0x51b   : > { %v1660_v11 = vpop.permute.xlu0 %1659 }
 0x51c   : > { %3423 = vmatprep.mubr.msk.bf16.mxu0 %vm990_vm2, %v1081_v62  ;;  %v1670_v9 = vpop.permute.xlu1 %1669 }
 0x51d   : > { %3424 = vmatmul.mubr.msk.bf16.gmra.mrb[4].mxu0 %vm990_vm2, %v1082_v0  ;;  %v1691_v12 = vsel %vm892_vm1, %v1670_v9, 0  ;;  %v3194_v0 = vld [vmem:[%s5099_s1 + $0x78] sm:$0xff] }
 0x51e   : > { %3435 = vmatprep.mubr.msk.bf16.mxu0 %vm892_vm1, %v1191_v52 }
 0x51f   : > { %v1664_v22 = vpop.permute.xlu0 %1663 }
 0x520   : > { %v1674_v15 = vpop.permute.xlu1 %1673 }
 0x521   : > { %3434 = vmatpush3.bf16.xpose.msra.mxu0 %v1228_v2  ;;  %v1697_v16 = vsel %vm892_vm1, %v1674_v15, 0 }
 0x522   : > { %3633 = vmatprep.subr.msk.bf16.mxu0 %vm892_vm1, %v1668_v61 }
 0x524   : > { %v1662_v18 = vpop.permute.xlu1 %1661 }
 0x528   : > { %3436 = vmatmul.mubr.msk.bf16.vlgmr.msra.gmra.mrb[8].mxu0 %vm892_vm1, %v1193_v1  ;;  %v1666_v23 = vpop.permute.xlu1 %1665  ;;  %v3192_v1 = vld [vmem:[%s5099_s1 + $0x68] sm:$0xff] }
 0x529   : > { %3439 = vmatprep.mubr.msk.bf16.mxu0 %vm892_vm1, %v1195_v63  ;;  %3480 = vmatpush3.bf16.xpose.msra.mxu0 %v1688_v58 }
 0x52a   : > { %3634 = vmatprep.subr.msk.bf16.mxu0 %vm892_vm1, %v1670_v9  ;;  %v3193_v9 = vld [vmem:[%s5099_s1 + $0x70] sm:$0xff] }
 0x530   : > { %3440 = vmatmul.mubr.msk.bf16.gmra.mrb[12].mxu0 %vm892_vm1, %v1197_v5 }
 0x531   : > { %3482 = vmatpush3.bf16.xpose.msra.mxu0 %v1691_v12  ;;  %3487 = vmatprep.mubr.msk.bf16.mxu0 %vm892_vm1, %v1660_v11 }
 0x532   : > { %3635 = vmatprep.subr.msk.bf16.mxu0 %vm892_vm1, %v1672_v10 }
 0x539   : > { %3484 = vmatpush3.bf16.xpose.msra.mxu0 %v1694_v13 }
 0x53a   : > { %3636 = vmatprep.subr.msk.bf16.mxu0 %vm892_vm1, %v1674_v15 }
 0x541   : > { %3486 = vmatpush3.bf16.xpose.msra.mxu0 %v1697_v16 }
 0x548   : > { %3488 = vmatmul.mubr.msk.bf16.vlgmr.msra.gmra.mrb[16].mxu0 %vm892_vm1, %v1662_v18 }
 0x549   : > { %3491 = vmatprep.mubr.msk.bf16.mxu0 %vm892_vm1, %v1664_v22 }
 0x550   : > { %3492 = vmatmul.mubr.msk.bf16.gmra.mrb[20].mxu0 %vm892_vm1, %v1666_v23 }
 0x5b7   : > { %v4290_v27 = vpop.f32.mrb[0].mxu0 }
 0x5b8   : > { %v4292_v20 = vpop.f32.mrb[1].mxu0 }
 0x5b9   : > { %v4294_v30 = vpop.f32.mrb[2].mxu0 }
 0x5ba   : > { %v1173_v31 = vpack.c.bf16 %v4294_v30, %v4290_v27  ;;  %v4298_v32 = vpop.f32.mrb[3].mxu0  ;;  %v3232_v30 = vld [vmem:[%s5099_s1 + $0xc8] sm:$0xff] }
 0x5bb   : > { %v1172_v33 = vpack.c.bf16 %v4298_v32, %v4292_v20 }
 0x5f0   : > { %v4302_v34 = vpop.f32.mrb[4].mxu0 }
 0x5f1   : > { %v4304_v35 = vpop.f32.mrb[5].mxu0 }
 0x5f2   : > { %v4306_v36 = vpop.f32.mrb[6].mxu0 }
 0x5f3   : > { %v1175_v37 = vpack.c.bf16 %v4306_v36, %v4302_v34  ;;  %v4310_v40 = vpop.f32.mrb[7].mxu0  ;;  %v3238_v34 = vld [vmem:[%s5099_s1 + $0xf8] sm:$0xff]  ;;  %v3236_v36 = vld [vmem:[%s5099_s1 + $0xe8] sm:$0xff] }
 0x5f4   : > { %v1174_v41 = vpack.c.bf16 %v4310_v40, %v4304_v35  ;;  %v3234_v35 = vld [vmem:[%s5099_s1 + $0xd8] sm:$0xff] }
 0x5fb   : > { %v3437_v21 = vpop.f32.mrb[8].mxu0 }
 0x5fc   : > { %v1264_v45 = vpop.f32.mrb[9].mxu0  ;;  %v1273_v44 = vadd.f32 %v3437_v21, %v3189_v42 }
 0x5fd   : > { %v1265_v50 = vadd.f32 %v3187_v43, %v1264_v45  ;;  %v3438_v29 = vpop.f32.mrb[10].mxu0 }
 0x5fe   : > { %v1267_v52 = vpop.f32.mrb[11].mxu0  ;;  %v1276_v55 = vadd.f32 %v3438_v29, %v3190_v38  ;;  %v1297_v48 = vadd.f32 %v1273_v44, %v4137_v28 }
 0x5ff   : > { %v1268_v53 = vadd.f32 %v3188_v47, %v1267_v52  ;;  %v1295_v54 = vadd.f32 %v1265_v50, %v4146_v46 }
 0x600   : > { %v1309_v5 = vsel %vm990_vm2, %v1297_v48, -inf  ;;  %v1298_v58 = vadd.f32 %v1276_v55, %v4159_v56 }
 0x601   : > { %v1303_v57 = vsel %vm990_vm2, %v1295_v54, -inf  ;;  %v1296_v39 = vadd.f32 %v1268_v53, %v4150_v51 }
 0x602   : > { %1304 = vmax.xlane.f32.xlu0 %v1303_v57  ;;  %v1312_v15 = vsel %vm990_vm2, %v1298_v58, -inf }
 0x603   : > { %v3441_v60 = vpop.f32.mrb[12].mxu0  ;;  %v1306_v62 = vsel %vm990_vm2, %v1296_v39, -inf }
 0x604   : > { %1307 = vmax.xlane.f32.xlu1 %v1306_v62  ;;  %v1280_v63 = vpop.f32.mrb[13].mxu0  ;;  %v1289_v13 = vadd.f32 %v3441_v60, %v3193_v9 }
 0x605   : > { %v1281_v2 = vadd.f32 %v3191_v59, %v1280_v63  ;;  %v3442_v61 = vpop.f32.mrb[14].mxu0 }
 0x606   : > { %1310 = vmax.xlane.f32.xlu0 %v1309_v5  ;;  %v1283_v10 = vpop.f32.mrb[15].mxu0  ;;  %v1292_v11 = vadd.f32 %v3442_v61, %v3194_v0  ;;  %v1301_v43 = vadd.f32 %v1289_v13, %v4168_v49 }
 0x607   : > { %v1284_v12 = vadd.f32 %v3192_v1, %v1283_v10  ;;  %v1299_v18 = vadd.f32 %v1281_v2, %v4173_v4 }
 0x608   : > { %v4353_v23 = vadd.f32 %v1292_v11, %v4188_v14  ;;  %v1321_v45 = vsel %vm990_vm2, %v1301_v43, -inf }
 0x609   : > { %v4347_v16 = vadd.f32 %v1284_v12, %v4194_v17  ;;  %v1315_v42 = vsel %vm990_vm2, %v1299_v18, -inf }
 0x60a   : > { %1313 = vmax.xlane.f32.xlu0 %v1312_v15  ;;  %v1324_v21 = vsel %vm990_vm2, %v4353_v23, -inf }
 0x60b   : > { %v1318_v22 = vsel %vm990_vm2, %v4347_v16, -inf }
 0x60c   : > { %1319 = vmax.xlane.f32.xlu1 %v1318_v22 }
 0x60e   : > { %1316 = vmax.xlane.f32.xlu0 %v1315_v42 }
 0x610   : > { %1325 = vmax.xlane.f32.xlu1 %v1324_v21 }
 0x612   : > { %1322 = vmax.xlane.f32.xlu0 %v1321_v45 }
 0x61b   : > { %v4360_v47 = vpop.f32.mrb[16].mxu0 }
 0x61c   : > { %v4362_v44 = vpop.f32.mrb[17].mxu0 }
 0x61d   : > { %v4364_v50 = vpop.f32.mrb[18].mxu0 }
 0x61e   : > { %v4366_v29 = vpop.f32.mrb[19].mxu0 }
 0x623   : > { %v4368_v38 = vpop.f32.mrb[20].mxu0 }
 0x624   : > { %v4370_v52 = vpop.f32.mrb[21].mxu0 }
 0x625   : > { %v4372_v53 = vpop.f32.mrb[22].mxu0 }
 0x626   : > { %v4374_v55 = vpop.f32.mrb[23].mxu0 }
 0x68f   : > { %v1305_v57 = vpop.xlane.xlu0 %1304 }
 0x690   : > { %v1327_v59 = vsub.f32 %v1295_v54, %v1305_v57 }
 0x691   : > { %v1308_v60 = vpop.xlane.xlu1 %1307 }
 0x692   : > { %v1335_v0 = vmul.f32 1.442695, %v1327_v59  ;;  %v1328_v1 = vsub.f32 %v1296_v39, %v1308_v60 }
 0x693   : > { %v1311_v62 = vpop.xlane.xlu0 %1310 }
 0x694   : > { %v1329_v63 = vsub.f32 %v1297_v48, %v1311_v62  ;;  %v1337_v9 = vmul.f32 1.442695, %v1328_v1 }
 0x696   : > { %v1339_v2 = vmul.f32 1.442695, %v1329_v63 }
 0x697   : > { %v1314_v61 = vpop.xlane.xlu0 %1313 }
 0x698   : > { %3722 = vpow2.f32 %v1339_v2  ;;  %v1330_v5 = vsub.f32 %v1298_v58, %v1314_v61 }
 0x699   : > { %3724 = vpow2.f32 %v1335_v0  ;;  %v1320_v63 = vpop.xlane.xlu1 %1319 }
 0x69a   : > { %v1341_v10 = vmul.f32 1.442695, %v1330_v5  ;;  %v1332_v2 = vsub.f32 %v4347_v16, %v1320_v63  ;;  %v3218_v63 = vld [vmem:[%s5099_s1 + $0xb8] sm:$0xff] }
 0x69b   : > { %v1317_v11 = vpop.xlane.xlu0 %1316 }
 0x69c   : > { %3726 = vpow2.f32 %v1341_v10  ;;  %v1331_v12 = vsub.f32 %v1299_v18, %v1317_v11  ;;  %v1345_v5 = vmul.f32 1.442695, %v1332_v2 }
 0x69d   : > { %3728 = vpow2.f32 %v1337_v9  ;;  %v1326_v0 = vpop.xlane.xlu1 %1325 }
 0x69e   : > { %v1343_v54 = vmul.f32 1.442695, %v1331_v12  ;;  %v1334_v1 = vsub.f32 %v4353_v23, %v1326_v0 }
 0x69f   : > { %v1323_v13 = vpop.xlane.xlu0 %1322 }
 0x6a0   : > { %v1333_v15 = vsub.f32 %v1301_v43, %v1323_v13  ;;  %v1349_v61 = vmul.f32 1.442695, %v1334_v1 }
 0x6a2   : > { %v4376_v22 = vpop.eup %3722  ;;  %v1347_v42 = vmul.f32 1.442695, %v1333_v15  ;;  %v3214_v15 = vld [vmem:[%s5099_s1 + $0x98] sm:$0xff] }
 0x6a3   : > { %v1357_v39 = vsel %vm990_vm2, %v4376_v22, 0.0  ;;  %v4380_v48 = vpop.eup %3724 }
 0x6a4   : > { %3730 = vpow2.f32 %v1347_v42  ;;  %1358 = vadd.xlane.f32.xlu0 %v1357_v39  ;;  %v1351_v21 = vsel %vm990_vm2, %v4380_v48, 0.0  ;;  %v3215_v39 = vld [vmem:[%s5099_s1 + $0xa0] sm:$0xff] }
 0x6a5   : > { %3732 = vpow2.f32 %v1343_v54  ;;  %v1745_v54 = vadd.f32 %v4364_v50, %v3214_v15 }
 0x6a6   : > { %v4382_v58 = vpop.eup %3726  ;;  %3734 = vpow2.f32 %v1349_v61 }
 0x6a7   : > { %v1360_v18 = vsel %vm990_vm2, %v4382_v58, 0.0  ;;  %v4388_v43 = vpop.eup %3728  ;;  %3736 = vpow2.f32 %v1345_v5  ;;  %v4453_v50 = vadd.f32 %v1745_v54, %v4159_v56 }
 0x6a8   : > { %1352 = vadd.xlane.f32.xlu0 %v1351_v21  ;;  %1361 = vadd.xlane.f32.xlu1 %v1360_v18  ;;  %v1354_v45 = vsel %vm990_vm2, %v4388_v43, 0.0 }
 0x6a9   : > { %v1781_v18 = vsel %vm990_vm2, %v4453_v50, -inf }
 0x6ac   : > { %1355 = vadd.xlane.f32.xlu1 %v1354_v45 }
 0x6ae   : > { %v4392_v57 = vpop.eup %3730 }
 0x6af   : > { %v1369_v59 = vsel %vm990_vm2, %v4392_v57, 0.0  ;;  %v4396_v60 = vpop.eup %3732 }
 0x6b0   : > { %1370 = vadd.xlane.f32.xlu0 %v1369_v59  ;;  %v1363_v62 = vsel %vm990_vm2, %v4396_v60, 0.0  ;;  %v4416_v9 = vpop.eup %3734 }
 0x6b1   : > { %v1372_v23 = vsel %vm990_vm2, %v4416_v9, 0.0  ;;  %v4420_v10 = vpop.eup %3736 }
 0x6b2   : > { %v1366_v16 = vsel %vm990_vm2, %v4420_v10, 0.0 }
 0x6b4   : > { %1364 = vadd.xlane.f32.xlu0 %v1363_v62 }
 0x6bd   : > { %1397 = vrot.lane.b32.xlu1 %v4086_v3, %s3896_s27 }
 0x6c1   : > { %1399 = vrot.lane.b32.xlu1 %v4100_v24, %s3896_s27 }
 0x6ca   : > { %1395 = vrot.lane.b32.xlu0 %v4088_v6, %s3896_s27 }
 0x6ce   : > { %2063 = vrot.lane.b32.xlu0 %v4088_v6, %s3897_s28 }
 0x6d2   : > { %2067 = vrot.lane.b32.xlu0 %v4100_v24, %s3897_s28 }
 0x6d6   : > { %2055 = vrot.lane.b32.xlu0 %v4093_v8, %s3898_s21  ;;  %v3211_v8 = vld [vmem:[%s5099_s1 + $0x80] sm:$0xff] }
 0x6d7   : > { %v1734_v11 = vadd.f32 %v3211_v8, %v4362_v44 }
 0x6d9   : > { %v4433_v13 = vadd.f32 %v1734_v11, %v4146_v46  ;;  %v1750_v46 = vadd.f32 %v3215_v39, %v4370_v52 }
 0x6da   : > { %2059 = vrot.lane.b32.xlu0 %v4104_v26, %s3898_s21  ;;  %v3213_v26 = vld [vmem:[%s5099_s1 + $0x90] sm:$0xff] }
 0x6db   : > { %v1742_v12 = vadd.f32 %v4360_v47, %v3213_v26  ;;  %v1772_v42 = vsel %vm990_vm2, %v4433_v13, -inf  ;;  %v4464_v52 = vadd.f32 %v1750_v46, %v4173_v4  ;;  %v3212_v4 = vld [vmem:[%s5099_s1 + $0x88] sm:$0xff] }
 0x6dc   : > { %v1737_v59 = vadd.f32 %v3212_v4, %v4366_v29 }
 0x6dd   : > { %v4442_v44 = vadd.f32 %v1742_v12, %v4137_v28  ;;  %v3217_v28 = vld [vmem:[%s5099_s1 + $0xb0] sm:$0xff]  ;;  %v1784_v56 = vsel %vm990_vm2, %v4464_v52, -inf }
 0x6de   : > { %v1758_v21 = vadd.f32 %v4368_v38, %v3217_v28 }
 0x6df   : > { %v1778_v47 = vsel %vm990_vm2, %v4442_v44, -inf }
 0x6e0   : > { %v4471_v45 = vadd.f32 %v1758_v21, %v4168_v49  ;;  %v3216_v49 = vld [vmem:[%s5099_s1 + $0xa8] sm:$0xff] }
 0x6e1   : > { %v1753_v62 = vadd.f32 %v3216_v49, %v4374_v55 }
 0x6e2   : > { %v1790_v38 = vsel %vm990_vm2, %v4471_v45, -inf }
 0x6e3   : > { %v4497_v29 = vadd.f32 %v1753_v62, %v4194_v17 }
 0x6e5   : > { %1373 = vadd.xlane.f32.xlu1 %v1372_v23  ;;  %v1787_v55 = vsel %vm990_vm2, %v4497_v29, -inf }
 0x6e9   : > { %1367 = vadd.xlane.f32.xlu1 %v1366_v16 }
 0x6f9   : > { %1773 = vmax.xlane.f32.xlu0 %v1772_v42 }
 0x6fa   : > { %1401 = vrot.lane.b32.xlu1 %v4098_v19, %s3896_s27 }
 0x6fd   : > { %1779 = vmax.xlane.f32.xlu0 %v1778_v47 }
 0x6fe   : > { %2065 = vrot.lane.b32.xlu1 %v4086_v3, %s3897_s28 }
 0x701   : > { %1782 = vmax.xlane.f32.xlu0 %v1781_v18 }
 0x702   : > { %2069 = vrot.lane.b32.xlu1 %v4098_v19, %s3897_s28 }
 0x705   : > { %1785 = vmax.xlane.f32.xlu0 %v1784_v56 }
 0x706   : > { %2057 = vrot.lane.b32.xlu1 %v4090_v7, %s3898_s21  ;;  %v4488_v7 = vadd.f32 %v1737_v59, %v4150_v51 }
 0x708   : > { %v1775_v0 = vsel %vm990_vm2, %v4488_v7, -inf }
 0x709   : > { %1791 = vmax.xlane.f32.xlu0 %v1790_v38 }
 0x70a   : > { %2061 = vrot.lane.b32.xlu1 %v4102_v25, %s3898_s21  ;;  %v1761_v25 = vadd.f32 %v4372_v53, %v3218_v63  ;;  %s3899_s21 = smov 48  }
 0x70c   : > { %v4502_v51 = vadd.f32 %v1761_v25, %v4188_v14 }
 0x70e   : > { %v1793_v53 = vsel %vm990_vm2, %v4502_v51, -inf }
 0x72e   : > { %1776 = vmax.xlane.f32.xlu1 %v1775_v0 }
 0x731   : > { %v1359_v1 = vpop.xlane.xlu0 %1358 }
 0x732   : > { %1788 = vmax.xlane.f32.xlu1 %v1787_v55 }
 0x735   : > { %v1362_v2 = vpop.xlane.xlu1 %1361  ;;  %v1353_v61 = vpop.xlane.xlu0 %1352 }
 0x736   : > { %1794 = vmax.xlane.f32.xlu1 %v1793_v53  ;;  %3738 = vrcp.f32 %v1353_v61 }
 0x739   : > { %v1356_v5 = vpop.xlane.xlu1 %1355 }
 0x73a   : > { %3740 = vrcp.f32 %v1356_v5 }
 0x73b   : > { %3742 = vrcp.f32 %v1362_v2 }
 0x73c   : > { %3744 = vrcp.f32 %v1359_v1 }
 0x73d   : > { %v1371_v17 = vpop.xlane.xlu0 %1370  ;;  %v1398_v11 = vpop.permute.xlu1 %1397 }
 0x740   : > { %v3739_v16 = vpop.eup %3738 }
 0x741   : > { %v1365_v23 = vpop.xlane.xlu0 %1364  ;;  %v1383_v12 = vmul.f32 %v3739_v16, %v4380_v48  ;;  %v1400_v39 = vpop.permute.xlu1 %1399 }
 0x744   : > { %v3741_v8 = vpop.eup %3740 }
 0x745   : > { %v1396_v26 = vpop.permute.xlu0 %1395  ;;  %v1384_v14 = vmul.f32 %v3741_v8, %v4388_v43  ;;  %v3743_v47 = vpop.eup %3742 }
 0x746   : > { %3443 = vmatprep.subr.bf16.mxu1 %v1396_v26  ;;  %v3745_v21 = vpop.eup %3744  ;;  %v1386_v18 = vmul.f32 %v3743_v47, %v4382_v58 }
 0x747   : > { %3444 = vmatpush3.bf16.msra.mxu1 %v1396_v26  ;;  %v1391_v15 = vpack.c.bf16 %v1384_v14, %v1383_v12  ;;  %v1385_v38 = vmul.f32 %v3745_v21, %v4376_v22 }
 0x748   : > { %3445 = vmatprep.subr.bf16.mxu1 %v1398_v11 }
 0x749   : > { %3451 = vmatprep.mubr.msk.bf16.mxu1 %vm990_vm2, %v1391_v15  ;;  %v2064_v54 = vpop.permute.xlu0 %2063  ;;  %v1392_v4 = vpack.c.bf16 %v1386_v18, %v1385_v38 }
 0x74a   : > { %v2084_v42 = vsel %vm892_vm1, %v2064_v54, 0  ;;  %3638 = vmatprep.subr.msk.bf16.mxu0 %vm892_vm1, %v2064_v54 }
 0x74b   : > { %3446 = vmatpush3.bf16.msra.mxu1 %v1398_v11  ;;  %3522 = vmatpush3.bf16.xpose.msra.mxu0 %v2084_v42 }
 0x74c   : > { %3447 = vmatprep.subr.bf16.mxu1 %v1400_v39 }
 0x74d   : > { %v2068_v46 = vpop.permute.xlu0 %2067 }
 0x74f   : > { %3448 = vmatpush3.bf16.msra.mxu1 %v1400_v39 }
 0x751   : > { %v2056_v48 = vpop.permute.xlu0 %2055 }
 0x752   : > { %3529 = vmatprep.mubr.msk.bf16.mxu0 %vm892_vm1, %v2056_v48 }
 0x755   : > { %v2060_v22 = vpop.permute.xlu0 %2059 }
 0x772   : > { %v1374_v43 = vpop.xlane.xlu1 %1373 }
 0x773   : > { %3746 = vrcp.f32 %v1374_v43 }
 0x774   : > { %3748 = vrcp.f32 %v1365_v23 }
 0x775   : > { %3750 = vrcp.f32 %v1371_v17  ;;  %v2090_v17 = vsel %vm892_vm1, %v2068_v46, 0 }
 0x776   : > { %v1368_v28 = vpop.xlane.xlu1 %1367 }
 0x777   : > { %3752 = vrcp.f32 %v1368_v28 }
 0x77a   : > { %v1402_v56 = vpop.permute.xlu1 %1401 }
 0x77b   : > { %3449 = vmatprep.subr.bf16.mxu1 %v1402_v56 }
 0x77c   : > { %3450 = vmatpush3.bf16.msra.mxu1 %v1402_v56 }
 0x77d   : > { %v3747_v59 = vpop.eup %3746 }
 0x77e   : > { %v2066_v49 = vpop.permute.xlu1 %2065  ;;  %v3749_v62 = vpop.eup %3748  ;;  %v1390_v58 = vmul.f32 %v3747_v59, %v4416_v9 }
 0x77f   : > { %v2087_v63 = vsel %vm892_vm1, %v2066_v49, 0  ;;  %3452 = vmatmul.mubr.msk.bf16.vlgmr.msra.gmra.mrb[16].mxu1 %vm990_vm2, %v1392_v4  ;;  %3639 = vmatprep.subr.msk.bf16.mxu0 %vm892_vm1, %v2066_v49  ;;  %v3751_v25 = vpop.eup %3750  ;;  %v1387_v1 = vmul.f32 %v3749_v62, %v4396_v60 }
 0x780   : > { %3524 = vmatpush3.bf16.xpose.msra.mxu0 %v2087_v63  ;;  %v1389_v2 = vmul.f32 %v3751_v25, %v4392_v57  ;;  %v1488_v63 = vld [vmem:[%s5105_s7 + $0x4] sm:$0xf]  ;;  %v1176_v25 = vld [vmem:[%s5105_s7] sm:$0xf] }
 0x781   : > { %v3753_v0 = vpop.eup %3752  ;;  %3640 = vmatprep.subr.msk.bf16.mxu0 %vm892_vm1, %v2068_v46  ;;  %3631 = vmatprep.subr.msk.bf16.mxu1 %vm1501_vm3, %v1488_v63 }
 0x782   : > { %v1388_v55 = vmul.f32 %v3753_v0, %v4420_v10  ;;  %v1394_v53 = vpack.c.bf16 %v1390_v58, %v1389_v2  ;;  %v2070_v23 = vpop.permute.xlu1 %2069 }
 0x783   : > { %v2093_v11 = vsel %vm892_vm1, %v2070_v23, 0 }
 0x784   : > { %v1393_v61 = vpack.c.bf16 %v1388_v55, %v1387_v1 }
 0x786   : > { %3455 = vmatprep.mubr.msk.bf16.mxu1 %vm990_vm2, %v1393_v61  ;;  %v1774_v5 = vpop.xlane.xlu0 %1773  ;;  %v2058_v15 = vpop.permute.xlu1 %2057 }
 0x787   : > { %3456 = vmatmul.mubr.msk.bf16.gmra.mrb[20].mxu1 %vm990_vm2, %v1394_v53  ;;  %v1796_v9 = vsub.f32 %v4433_v13, %v1774_v5 }
 0x788   : > { %3526 = vmatpush3.bf16.xpose.msra.mxu0 %v2090_v17 }
 0x789   : > { %3641 = vmatprep.subr.msk.bf16.mxu0 %vm892_vm1, %v2070_v23  ;;  %v1804_v16 = vmul.f32 1.442695, %v1796_v9 }
 0x78a   : > { %v1780_v60 = vpop.xlane.xlu0 %1779  ;;  %v2062_v43 = vpop.permute.xlu1 %2061 }
 0x78b   : > { %v1798_v10 = vsub.f32 %v4442_v44, %v1780_v60 }
 0x78d   : > { %v1808_v57 = vmul.f32 1.442695, %v1798_v10 }
 0x78e   : > { %v1783_v8 = vpop.xlane.xlu0 %1782 }
 0x78f   : > { %3754 = vpow2.f32 %v1808_v57  ;;  %v1799_v26 = vsub.f32 %v4453_v50, %v1783_v8 }
 0x790   : > { %3528 = vmatpush3.bf16.xpose.msra.mxu0 %v2093_v11  ;;  %3756 = vpow2.f32 %v1804_v16 }
 0x791   : > { %v1810_v12 = vmul.f32 1.442695, %v1799_v26 }
 0x792   : > { %v1786_v14 = vpop.xlane.xlu0 %1785 }
 0x793   : > { %3758 = vpow2.f32 %v1810_v12  ;;  %v1800_v13 = vsub.f32 %v4464_v52, %v1786_v14  ;;  %v1583_v12 = vsel %vm1501_vm3, %v1176_v25, 0 }
 0x795   : > { %v1812_v39 = vmul.f32 1.442695, %v1800_v13 }
 0x796   : > { %v1792_v54 = vpop.xlane.xlu0 %1791 }
 0x797   : > { %v1802_v42 = vsub.f32 %v4471_v45, %v1792_v54  ;;  %3530 = vmatmul.mubr.msk.bf16.vlgmr.msra.gmra.mrb[24].mxu0 %vm892_vm1, %v2058_v15 }
 0x798   : > { %3533 = vmatprep.mubr.msk.bf16.mxu0 %vm892_vm1, %v2060_v22 }
 0x799   : > { %v4534_v44 = vpop.eup %3754  ;;  %v1816_v46 = vmul.f32 1.442695, %v1802_v42 }
 0x79a   : > { %v1826_v50 = vsel %vm990_vm2, %v4534_v44, 0.0  ;;  %v4538_v48 = vpop.eup %3756 }
 0x79b   : > { %3760 = vpow2.f32 %v1816_v46  ;;  %1827 = vadd.xlane.f32.xlu0 %v1826_v50  ;;  %v1820_v45 = vsel %vm990_vm2, %v4538_v48, 0.0 }
 0x79c   : > { %3762 = vpow2.f32 %v1812_v39 }
 0x79d   : > { %v4540_v52 = vpop.eup %3758 }
 0x79e   : > { %v1829_v47 = vsel %vm990_vm2, %v4540_v52, 0.0 }
 0x79f   : > { %3534 = vmatmul.mubr.msk.bf16.gmra.mrb[28].mxu0 %vm892_vm1, %v2062_v43  ;;  %1821 = vadd.xlane.f32.xlu0 %v1820_v45 }
 0x7a0   : > { %1830 = vadd.xlane.f32.xlu1 %v1829_v47  ;;  %v3233_v47 = vld [vmem:[%s5099_s1 + $0xd0] sm:$0xff] }
 0x7a5   : > { %v4547_v28 = vpop.eup %3760 }
 0x7a6   : > { %v1838_v21 = vsel %vm990_vm2, %v4547_v28, 0.0  ;;  %v4551_v18 = vpop.eup %3762 }
 0x7a7   : > { %1839 = vadd.xlane.f32.xlu0 %v1838_v21  ;;  %v1832_v56 = vsel %vm990_vm2, %v4551_v18, 0.0  ;;  %v3231_v21 = vld [vmem:[%s5099_s1 + $0xc0] sm:$0xff] }
 0x7ab   : > { %1833 = vadd.xlane.f32.xlu0 %v1832_v56 }
 0x7bb   : > { %v1777_v38 = vpop.xlane.xlu1 %1776 }
 0x7bc   : > { %v1797_v4 = vsub.f32 %v4488_v7, %v1777_v38  ;;  %v1503_v7 = vsel %vm1501_vm3, %v1488_v63, 0 }
 0x7bd   : > { %3460 = vmatpush3.bf16.msra.mxu1 %v1503_v7 }
 0x7be   : > { %v1806_v59 = vmul.f32 1.442695, %v1797_v4  ;;  %3632 = vmatprep.subr.msk.bf16.mxu1 %vm1501_vm3, %v1176_v25 }
 0x7bf   : > { %v1789_v0 = vpop.xlane.xlu1 %1788 }
 0x7c0   : > { %3764 = vpow2.f32 %v1806_v59  ;;  %v1801_v1 = vsub.f32 %v4497_v29, %v1789_v0  ;;  %v3866_v59 = vld [vmem:[%s4128_s23] sm:$0xff] }
 0x7c1   : > { %1864 = vrot.lane.b32.xlu0 %v4088_v6, %s3899_s21 }
 0x7c2   : > { %v1814_v2 = vmul.f32 1.442695, %v1801_v1 }
 0x7c3   : > { %v1795_v58 = vpop.xlane.xlu1 %1794 }
 0x7c4   : > { %v1803_v22 = vsub.f32 %v4502_v51, %v1795_v58  ;;  %v3868_v58 = vld [vmem:[%s4128_s23 + $0x8] sm:$0xff] }
 0x7c6   : > { %v1818_v55 = vmul.f32 1.442695, %v1803_v22 }
 0x7c8   : > { %3766 = vpow2.f32 %v1818_v55 }
 0x7c9   : > { %3768 = vpow2.f32 %v1814_v2 }
 0x7ca   : > { %v4557_v49 = vpop.eup %3764 }
 0x7cb   : > { %v1823_v62 = vsel %vm990_vm2, %v4557_v49, 0.0 }
 0x7cc   : > { %1824 = vadd.xlane.f32.xlu1 %v1823_v62 }
 0x7d2   : > { %v4574_v61 = vpop.eup %3766 }
 0x7d3   : > { %v1841_v53 = vsel %vm990_vm2, %v4574_v61, 0.0  ;;  %v4578_v5 = vpop.eup %3768 }
 0x7d4   : > { %v1835_v17 = vsel %vm990_vm2, %v4578_v5, 0.0 }
 0x7dd   : > { %1866 = vrot.lane.b32.xlu1 %v4086_v3, %s3899_s21 }
 0x7e1   : > { %1868 = vrot.lane.b32.xlu1 %v4100_v24, %s3899_s21 }
 0x805   : > { %1842 = vadd.xlane.f32.xlu1 %v1841_v53 }
 0x809   : > { %1836 = vadd.xlane.f32.xlu1 %v1835_v17 }
 0x81a   : > { %1870 = vrot.lane.b32.xlu1 %v4098_v19, %s3899_s21  ;;  %s3900_s21 = smov 40  }
 0x828   : > { %v4583_v51 = vpop.xlane.xlu0 %1827 }
 0x82c   : > { %v1822_v29 = vpop.xlane.xlu0 %1821 }
 0x82d   : > { %v4589_v26 = vpop.xlane.xlu1 %1830 }
 0x834   : > { %v4585_v23 = vpop.xlane.xlu0 %1839 }
 0x838   : > { %v4587_v10 = vpop.xlane.xlu0 %1833 }
 0x83c   : > { %v1865_v14 = vpop.permute.xlu0 %1864 }
 0x852   : > { %v3453_v9 = vpop.f32.mrb[16].mxu1 }
 0x853   : > { %v1453_v60 = vpop.f32.mrb[17].mxu1 }
 0x854   : > { %v3454_v16 = vpop.f32.mrb[18].mxu1 }
 0x855   : > { %v1485_v57 = vpack.c.bf16 %v3454_v16, %v3453_v9  ;;  %v1456_v8 = vpop.f32.mrb[19].mxu1  ;;  %v3237_v16 = vld [vmem:[%s5099_s1 + $0xf0] sm:$0xff] }
 0x856   : > { %v1484_v11 = vpack.c.bf16 %v1456_v8, %v1453_v60 }
 0x858   : > { %3461 = vmatprep.mubr.msk.bf16.mxu1 %vm892_vm1, %v1484_v11 }
 0x859   : > { %3462 = vmatmul.mubr.msk.bf16.vlgmr.msra.gmra.mrb[24].mxu1 %vm892_vm1, %v1485_v57  ;;  %v1825_v15 = vpop.xlane.xlu1 %1824 }
 0x85a   : > { %3470 = vmatpush3.bf16.msra.mxu1 %v1583_v12  ;;  %v3457_v13 = vpop.f32.mrb[20].mxu1  ;;  %3770 = vrcp.f32 %v1825_v15  ;;  %v3871_v15 = vld [vmem:[%s4128_s23 + $0x28] sm:$0xff] }
 0x85b   : > { %3495 = vmatprep.subr.bf16.mxu1 %v1865_v14  ;;  %v1469_v54 = vpop.f32.mrb[21].mxu1  ;;  %3772 = vrcp.f32 %v1822_v29 }
 0x85c   : > { %v3458_v42 = vpop.f32.mrb[22].mxu1  ;;  %3774 = vrcp.f32 %v4589_v26 }
 0x85d   : > { %v1487_v39 = vpack.c.bf16 %v3458_v42, %v3457_v13  ;;  %v1472_v46 = vpop.f32.mrb[23].mxu1  ;;  %v1867_v45 = vpop.permute.xlu1 %1866  ;;  %3776 = vrcp.f32 %v4583_v51 }
 0x85e   : > { %v1486_v50 = vpack.c.bf16 %v1472_v46, %v1469_v54 }
 0x860   : > { %3465 = vmatprep.mubr.msk.bf16.mxu1 %vm892_vm1, %v1486_v50 }
 0x861   : > { %3466 = vmatmul.mubr.msk.bf16.gmra.mrb[28].mxu1 %vm892_vm1, %v1487_v39  ;;  %v1869_v4 = vpop.permute.xlu1 %1868  ;;  %v3872_v39 = vld [vmem:[%s4128_s23 + $0x38] sm:$0xff] }
 0x862   : > { %3471 = vmatprep.mubr.msk.bf16.mxu1 %vm892_vm1, %v1172_v33 }
 0x864   : > { %v3771_v43 = vpop.eup %3770 }
 0x865   : > { %v3773_v56 = vpop.eup %3772 }
 0x869   : > { %3472 = vmatmul.mubr.msk.bf16.vlgmr.msra.gmra.mrb[24].mxu1 %vm892_vm1, %v1173_v31  ;;  %v1853_v31 = vmul.f32 %v3771_v43, %v4557_v49  ;;  %v3867_v49 = vld [vmem:[%s4128_s23 + $0x10] sm:$0xff] }
 0x86a   : > { %3496 = vmatpush3.bf16.msra.mxu1 %v1865_v14  ;;  %3475 = vmatprep.mubr.msk.bf16.mxu1 %vm892_vm1, %v1174_v41  ;;  %v3531_v20 = vpop.f32.mrb[24].mxu0  ;;  %v1852_v41 = vmul.f32 %v3773_v56, %v4538_v48  ;;  %v3235_v48 = vld [vmem:[%s5099_s1 + $0xe0] sm:$0xff]  ;;  %v3873_v43 = vld [vmem:[%s4128_s23 + $0x30] sm:$0xff] }
 0x86b   : > { %3497 = vmatprep.subr.bf16.mxu1 %v1867_v45  ;;  %v2129_v27 = vpop.f32.mrb[25].mxu0  ;;  %v2138_v32 = vadd.f32 %v3531_v20, %v3233_v47  ;;  %v3870_v14 = vld [vmem:[%s4128_s23 + $0x20] sm:$0xff] }
 0x86c   : > { %v2130_v33 = vadd.f32 %v3231_v21, %v2129_v27  ;;  %v3532_v38 = vpop.f32.mrb[26].mxu0  ;;  %v1860_v7 = vpack.c.bf16 %v1853_v31, %v1852_v41  ;;  %v3775_v27 = vpop.eup %3774 }
 0x86d   : > { %v2132_v40 = vpop.f32.mrb[27].mxu0  ;;  %v4626_v25 = vadd.f32 %v3867_v49, %v2138_v32  ;;  %v2141_v0 = vadd.f32 %v3532_v38, %v3234_v35  ;;  %v3777_v31 = vpop.eup %3776  ;;  %v1855_v32 = vmul.f32 %v3775_v27, %v4540_v52 }
 0x86e   : > { %v4623_v62 = vadd.f32 %v3866_v59, %v2130_v33  ;;  %3498 = vmatpush3.bf16.msra.mxu1 %v1867_v45  ;;  %v2133_v63 = vadd.f32 %v3232_v30, %v2132_v40  ;;  %v1854_v38 = vmul.f32 %v3777_v31, %v4534_v44  ;;  %v1957_v44 = vld [vmem:[%s5105_s7 + $0x8] sm:$0xf] }
 0x86f   : > { %3499 = vmatprep.subr.bf16.mxu1 %v1869_v4  ;;  %v2174_v60 = vsel %vm990_vm2, %v4626_v25, -inf }
 0x870   : > { %v4629_v22 = vadd.f32 %v3868_v58, %v2133_v63  ;;  %v2168_v1 = vsel %vm990_vm2, %v4623_v62, -inf  ;;  %v1861_v26 = vpack.c.bf16 %v1855_v32, %v1854_v38 }
 0x871   : > { %3476 = vmatmul.mubr.msk.bf16.gmra.mrb[28].mxu1 %vm892_vm1, %v1175_v37  ;;  %2169 = vmax.xlane.f32.xlu0 %v2168_v1  ;;  %v3869_v37 = vld [vmem:[%s4128_s23 + $0x18] sm:$0xff] }
 0x872   : > { %3500 = vmatpush3.bf16.msra.mxu1 %v1869_v4  ;;  %3503 = vmatprep.mubr.msk.bf16.mxu1 %vm990_vm2, %v1860_v7  ;;  %v3535_v55 = vpop.f32.mrb[28].mxu0  ;;  %v2171_v2 = vsel %vm990_vm2, %v4629_v22, -inf  ;;  %v4650_v17 = vadd.f32 %v3869_v37, %v2141_v0 }
 0x873   : > { %v2145_v53 = vpop.f32.mrb[29].mxu0  ;;  %2172 = vmax.xlane.f32.xlu1 %v2171_v2  ;;  %v2154_v12 = vadd.f32 %v3535_v55, %v3237_v16 }
 0x874   : > { %v2146_v29 = vadd.f32 %v3235_v48, %v2145_v53  ;;  %v3536_v9 = vpop.f32.mrb[30].mxu0  ;;  %v2177_v42 = vsel %vm990_vm2, %v4650_v17, -inf }
 0x875   : > { %v2148_v57 = vpop.f32.mrb[31].mxu0  ;;  %2175 = vmax.xlane.f32.xlu0 %v2174_v60  ;;  %v2157_v8 = vadd.f32 %v3536_v9, %v3238_v34  ;;  %v2166_v45 = vadd.f32 %v3873_v43, %v2154_v12 }
 0x876   : > { %v2149_v11 = vadd.f32 %v3236_v36, %v2148_v57  ;;  %v4658_v13 = vadd.f32 %v3870_v14, %v2146_v29 }
 0x877   : > { %v4666_v46 = vadd.f32 %v3872_v39, %v2157_v8  ;;  %v2186_v56 = vsel %vm990_vm2, %v2166_v45, -inf }
 0x878   : > { %v4661_v54 = vadd.f32 %v3871_v15, %v2149_v11  ;;  %v2180_v47 = vsel %vm990_vm2, %v4658_v13, -inf }
 0x879   : > { %2178 = vmax.xlane.f32.xlu0 %v2177_v42  ;;  %v2189_v21 = vsel %vm990_vm2, %v4666_v46, -inf }
 0x87a   : > { %v2183_v50 = vsel %vm990_vm2, %v4661_v54, -inf }
 0x87b   : > { %2184 = vmax.xlane.f32.xlu1 %v2183_v50 }
 0x87d   : > { %2181 = vmax.xlane.f32.xlu0 %v2180_v47 }
 0x87f   : > { %2190 = vmax.xlane.f32.xlu1 %v2189_v21 }
 0x881   : > { %2187 = vmax.xlane.f32.xlu0 %v2186_v56 }
 0x892   : > { %v1843_v20 = vpop.xlane.xlu1 %1842 }
 0x893   : > { %3778 = vrcp.f32 %v1843_v20 }
 0x894   : > { %3780 = vrcp.f32 %v4587_v10 }
 0x895   : > { %3782 = vrcp.f32 %v4585_v23 }
 0x896   : > { %v1837_v30 = vpop.xlane.xlu1 %1836 }
 0x897   : > { %3784 = vrcp.f32 %v1837_v30 }
 0x89a   : > { %v1871_v33 = vpop.permute.xlu1 %1870 }
 0x89b   : > { %3501 = vmatprep.subr.bf16.mxu1 %v1871_v33 }
 0x89c   : > { %3502 = vmatpush3.bf16.msra.mxu1 %v1871_v33 }
 0x89d   : > { %v3779_v35 = vpop.eup %3778  ;;  %3637 = vmatprep.subr.msk.bf16.mxu1 %vm1501_vm3, %v1957_v44 }
 0x89e   : > { %v3781_v51 = vpop.eup %3780  ;;  %v1859_v41 = vmul.f32 %v3779_v35, %v4574_v61  ;;  %v1971_v61 = vsel %vm1501_vm3, %v1957_v44, 0 }
 0x89f   : > { %3504 = vmatmul.mubr.msk.bf16.vlgmr.msra.gmra.mrb[32].mxu1 %vm990_vm2, %v1861_v26  ;;  %v3783_v40 = vpop.eup %3782  ;;  %v1856_v23 = vmul.f32 %v3781_v51, %v4551_v18 }
 0x8a0   : > { %v1858_v52 = vmul.f32 %v3783_v40, %v4547_v28  ;;  %3512 = vmatpush3.bf16.msra.mxu1 %v1971_v61 }
 0x8a1   : > { %v3785_v10 = vpop.eup %3784 }
 0x8a2   : > { %v1857_v4 = vmul.f32 %v3785_v10, %v4578_v5  ;;  %v1863_v63 = vpack.c.bf16 %v1859_v41, %v1858_v52 }
 0x8a4   : > { %v1862_v59 = vpack.c.bf16 %v1857_v4, %v1856_v23 }
 0x8a6   : > { %3507 = vmatprep.mubr.msk.bf16.mxu1 %vm990_vm2, %v1862_v59 }
 0x8a7   : > { %3508 = vmatmul.mubr.msk.bf16.gmra.mrb[36].mxu1 %vm990_vm2, %v1863_v63 }
 0x8fe   : > { %v2170_v18 = vpop.xlane.xlu0 %2169 }
 0x8ff   : > { %v2192_v5 = vsub.f32 %v4623_v62, %v2170_v18 }
 0x900   : > { %v2173_v7 = vpop.xlane.xlu1 %2172 }
 0x901   : > { %v2200_v0 = vmul.f32 1.442695, %v2192_v5  ;;  %v2193_v58 = vsub.f32 %v4629_v22, %v2173_v7 }
 0x902   : > { %v2176_v28 = vpop.xlane.xlu0 %2175 }
 0x903   : > { %v2194_v49 = vsub.f32 %v4626_v25, %v2176_v28  ;;  %v2202_v2 = vmul.f32 1.442695, %v2193_v58 }
 0x905   : > { %v2204_v1 = vmul.f32 1.442695, %v2194_v49 }
 0x906   : > { %v2179_v48 = vpop.xlane.xlu0 %2178 }
 0x907   : > { %3786 = vpow2.f32 %v2204_v1  ;;  %v2195_v55 = vsub.f32 %v4650_v17, %v2179_v48  ;;  %v2353_v48 = vld [vmem:[%s5105_s7 + $0xc] sm:$0xf] }
 0x908   : > { %3788 = vpow2.f32 %v2200_v0  ;;  %v2185_v42 = vpop.xlane.xlu1 %2184 }
 0x909   : > { %v2206_v53 = vmul.f32 1.442695, %v2195_v55  ;;  %v2197_v43 = vsub.f32 %v4661_v54, %v2185_v42 }
 0x90a   : > { %v2182_v34 = vpop.xlane.xlu0 %2181 }
 0x90b   : > { %3790 = vpow2.f32 %v2206_v53  ;;  %v2196_v62 = vsub.f32 %v4658_v13, %v2182_v34  ;;  %v2210_v47 = vmul.f32 1.442695, %v2197_v43  ;;  %v2367_v53 = vsel %vm1501_vm3, %v2353_v48, 0 }
 0x90c   : > { %3792 = vpow2.f32 %v2202_v2  ;;  %v2191_v39 = vpop.xlane.xlu1 %2190 }
 0x90d   : > { %v2208_v25 = vmul.f32 1.442695, %v2196_v62  ;;  %v2199_v50 = vsub.f32 %v4666_v46, %v2191_v39 }
 0x90e   : > { %v2188_v36 = vpop.xlane.xlu0 %2187 }
 0x90f   : > { %v2198_v37 = vsub.f32 %v2166_v45, %v2188_v36  ;;  %v2214_v45 = vmul.f32 1.442695, %v2199_v50 }
 0x911   : > { %v4699_v29 = vpop.eup %3786  ;;  %v2212_v9 = vmul.f32 1.442695, %v2198_v37 }
 0x912   : > { %v2222_v22 = vsel %vm990_vm2, %v4699_v29, 0.0  ;;  %v4703_v60 = vpop.eup %3788 }
 0x913   : > { %3794 = vpow2.f32 %v2212_v9  ;;  %2223 = vadd.xlane.f32.xlu0 %v2222_v22  ;;  %v2216_v16 = vsel %vm990_vm2, %v4703_v60, 0.0 }
 0x914   : > { %3796 = vpow2.f32 %v2208_v25 }
 0x915   : > { %v4705_v17 = vpop.eup %3790  ;;  %3798 = vpow2.f32 %v2214_v45 }
 0x916   : > { %v2225_v57 = vsel %vm990_vm2, %v4705_v17, 0.0  ;;  %v3793_v8 = vpop.eup %3792  ;;  %3800 = vpow2.f32 %v2210_v47  ;;  %v3251_v47 = vld [vmem:[%s5106_s8] ss:$0 sm:$0xff] }
 0x917   : > { %2217 = vadd.xlane.f32.xlu0 %v2216_v16  ;;  %2226 = vadd.xlane.f32.xlu1 %v2225_v57  ;;  %v2219_v11 = vsel %vm990_vm2, %v3793_v8, 0.0 }
 0x91b   : > { %2220 = vadd.xlane.f32.xlu1 %v2219_v11 }
 0x91d   : > { %v4712_v12 = vpop.eup %3794 }
 0x91e   : > { %v2234_v14 = vsel %vm990_vm2, %v4712_v12, 0.0  ;;  %v4716_v13 = vpop.eup %3796 }
 0x91f   : > { %2235 = vadd.xlane.f32.xlu0 %v2234_v14  ;;  %v2228_v15 = vsel %vm990_vm2, %v4716_v13, 0.0  ;;  %v4725_v21 = vpop.eup %3798 }
 0x920   : > { %v2237_v56 = vsel %vm990_vm2, %v4725_v21, 0.0 }
 0x923   : > { %2229 = vadd.xlane.f32.xlu0 %v2228_v15 }
 0x92c   : > { %2262 = vrot.lane.b32.xlu1 %v4086_v3, %s3900_s21  ;;  %v4729_v3 = vpop.eup %3800 }
 0x930   : > { %2264 = vrot.lane.b32.xlu1 %v4100_v24, %s3900_s21 }
 0x939   : > { %2260 = vrot.lane.b32.xlu0 %v4088_v6, %s3900_s21  ;;  %v2231_v6 = vsel %vm990_vm2, %v4729_v3, 0.0 }
 0x954   : > { %2238 = vadd.xlane.f32.xlu1 %v2237_v56  ;;  %v3874_v56 = vld [vmem:[%s4001_s24 + $0x10] sm:$0xff] }
 0x958   : > { %2232 = vadd.xlane.f32.xlu1 %v2231_v6  ;;  %v3875_v6 = vld [vmem:[%s4001_s24] sm:$0xff] }
 0x969   : > { %2266 = vrot.lane.b32.xlu1 %v4098_v19, %s3900_s21 }
 0x972   : > { %v3505_v24 = vpop.f32.mrb[32].mxu1 }
 0x973   : > { %v1922_v54 = vpop.f32.mrb[33].mxu1 }
 0x974   : > { %v3506_v46 = vpop.f32.mrb[34].mxu1 }
 0x975   : > { %v1954_v20 = vpack.c.bf16 %v3506_v46, %v3505_v24  ;;  %v1925_v27 = vpop.f32.mrb[35].mxu1 }
 0x976   : > { %v1953_v30 = vpack.c.bf16 %v1925_v27, %v1922_v54  ;;  %v3876_v27 = vld [vmem:[%s4001_s24 + $0x8] sm:$0xff] }
 0x978   : > { %3513 = vmatprep.mubr.msk.bf16.mxu1 %vm892_vm1, %v1953_v30 }
 0x979   : > { %3514 = vmatmul.mubr.msk.bf16.vlgmr.msra.gmra.mrb[24].mxu1 %vm892_vm1, %v1954_v20 }
 0x97a   : > { %v3509_v31 = vpop.f32.mrb[36].mxu1 }
 0x97b   : > { %v1938_v32 = vpop.f32.mrb[37].mxu1 }
 0x97c   : > { %v3510_v33 = vpop.f32.mrb[38].mxu1 }
 0x97d   : > { %v1956_v38 = vpack.c.bf16 %v3510_v33, %v3509_v31  ;;  %v1941_v26 = vpop.f32.mrb[39].mxu1 }
 0x97e   : > { %v1955_v35 = vpack.c.bf16 %v1941_v26, %v1938_v32  ;;  %v3877_v32 = vld [vmem:[%s4001_s24 + $0x18] sm:$0xff] }
 0x980   : > { %3517 = vmatprep.mubr.msk.bf16.mxu1 %vm892_vm1, %v1955_v35 }
 0x981   : > { %3518 = vmatmul.mubr.msk.bf16.gmra.mrb[28].mxu1 %vm892_vm1, %v1956_v38 }
 0x9a0   : > { %v2224_v19 = vpop.xlane.xlu0 %2223 }
 0x9a4   : > { %v2227_v51 = vpop.xlane.xlu1 %2226  ;;  %v2218_v40 = vpop.xlane.xlu0 %2217 }
 0x9a5   : > { %3802 = vrcp.f32 %v2218_v40 }
 0x9a8   : > { %v2221_v10 = vpop.xlane.xlu1 %2220 }
 0x9a9   : > { %3804 = vrcp.f32 %v2221_v10  ;;  %v3878_v10 = vld [vmem:[%s4001_s24 + $0x20] sm:$0xff] }
 0x9aa   : > { %3806 = vrcp.f32 %v2227_v51 }
 0x9ab   : > { %3808 = vrcp.f32 %v2224_v19 }
 0x9ac   : > { %v2236_v41 = vpop.xlane.xlu0 %2235  ;;  %v2263_v59 = vpop.permute.xlu1 %2262 }
 0x9af   : > { %v3803_v4 = vpop.eup %3802 }
 0x9b0   : > { %v2230_v23 = vpop.xlane.xlu0 %2229  ;;  %v2248_v44 = vmul.f32 %v3803_v4, %v4703_v60  ;;  %v2265_v5 = vpop.permute.xlu1 %2264 }
 0x9b3   : > { %v3805_v52 = vpop.eup %3804 }
 0x9b4   : > { %v2261_v63 = vpop.permute.xlu0 %2260  ;;  %v2249_v61 = vmul.f32 %v3805_v52, %v3793_v8  ;;  %v3807_v28 = vpop.eup %3806 }
 0x9b5   : > { %3537 = vmatprep.subr.bf16.mxu1 %v2261_v63  ;;  %v3809_v0 = vpop.eup %3808  ;;  %v2251_v58 = vmul.f32 %v3807_v28, %v4705_v17 }
 0x9b6   : > { %3538 = vmatpush3.bf16.msra.mxu1 %v2261_v63  ;;  %v2256_v18 = vpack.c.bf16 %v2249_v61, %v2248_v44  ;;  %v2250_v55 = vmul.f32 %v3809_v0, %v4699_v29  ;;  %v3880_v44 = vld [vmem:[%s4001_s24 + $0x28] sm:$0xff] }
 0x9b7   : > { %3539 = vmatprep.subr.bf16.mxu1 %v2263_v59 }
 0x9b8   : > { %3545 = vmatprep.mubr.msk.bf16.mxu1 %vm990_vm2, %v2256_v18  ;;  %v2257_v2 = vpack.c.bf16 %v2251_v58, %v2250_v55  ;;  %v3881_v18 = vld [vmem:[%s4001_s24 + $0x30] sm:$0xff] }
 0x9ba   : > { %3540 = vmatpush3.bf16.msra.mxu1 %v2263_v59  ;;  %v3879_v59 = vld [vmem:[%s4001_s24 + $0x38] sm:$0xff] }
 0x9bb   : > { %3541 = vmatprep.subr.bf16.mxu1 %v2265_v5 }
 0x9be   : > { %3542 = vmatpush3.bf16.msra.mxu1 %v2265_v5 }
 0x9e1   : > { %v2239_v7 = vpop.xlane.xlu1 %2238 }
 0x9e2   : > { %3810 = vrcp.f32 %v2239_v7 }
 0x9e3   : > { %3812 = vrcp.f32 %v2230_v23 }
 0x9e4   : > { %3814 = vrcp.f32 %v2236_v41 }
 0x9e5   : > { %v2233_v49 = vpop.xlane.xlu1 %2232 }
 0x9e6   : > { %3816 = vrcp.f32 %v2233_v49 }
 0x9e9   : > { %v2267_v1 = vpop.permute.xlu1 %2266 }
 0x9ea   : > { %3543 = vmatprep.subr.bf16.mxu1 %v2267_v1 }
 0x9eb   : > { %3544 = vmatpush3.bf16.msra.mxu1 %v2267_v1 }
 0x9ec   : > { %3642 = vmatprep.subr.msk.bf16.mxu1 %vm1501_vm3, %v2353_v48  ;;  %v3811_v34 = vpop.eup %3810 }
 0x9ed   : > { %v3813_v62 = vpop.eup %3812  ;;  %v2255_v25 = vmul.f32 %v3811_v34, %v4725_v21 }
 0x9ee   : > { %3546 = vmatmul.mubr.msk.bf16.vlgmr.msra.gmra.mrb[40].mxu1 %vm990_vm2, %v2257_v2  ;;  %v3815_v36 = vpop.eup %3814  ;;  %v2252_v9 = vmul.f32 %v3813_v62, %v4716_v13 }
 0x9ef   : > { %3554 = vmatpush3.bf16.msra.mxu1 %v2367_v53  ;;  %v2254_v22 = vmul.f32 %v3815_v36, %v4712_v12 }
 0x9f0   : > { %v3817_v37 = vpop.eup %3816 }
 0x9f1   : > { %v2253_v29 = vmul.f32 %v3817_v37, %v4729_v3  ;;  %v2259_v17 = vpack.c.bf16 %v2255_v25, %v2254_v22 }
 0x9f3   : > { %v2258_v60 = vpack.c.bf16 %v2253_v29, %v2252_v9 }
 0x9f5   : > { %3549 = vmatprep.mubr.msk.bf16.mxu1 %vm990_vm2, %v2258_v60 }
 0x9f6   : > { %3550 = vmatmul.mubr.msk.bf16.gmra.mrb[44].mxu1 %vm990_vm2, %v2259_v17 }
 0xac1   : > { %v3547_v16 = vpop.f32.mrb[40].mxu1 }
 0xac2   : > { %v2318_v57 = vpop.f32.mrb[41].mxu1 }
 0xac3   : > { %v3548_v8 = vpop.f32.mrb[42].mxu1 }
 0xac4   : > { %v2350_v11 = vpack.c.bf16 %v3548_v8, %v3547_v16  ;;  %v2321_v14 = vpop.f32.mrb[43].mxu1 }
 0xac5   : > { %v2349_v15 = vpack.c.bf16 %v2321_v14, %v2318_v57 }
 0xac7   : > { %3555 = vmatprep.mubr.msk.bf16.mxu1 %vm892_vm1, %v2349_v15 }
 0xac8   : > { %3556 = vmatmul.mubr.msk.bf16.vlgmr.msra.gmra.mrb[24].mxu1 %vm892_vm1, %v2350_v11 }
 0xac9   : > { %v3551_v13 = vpop.f32.mrb[44].mxu1 }
 0xaca   : > { %v2334_v12 = vpop.f32.mrb[45].mxu1 }
 0xacb   : > { %v3552_v42 = vpop.f32.mrb[46].mxu1 }
 0xacc   : > { %v2352_v39 = vpack.c.bf16 %v3552_v42, %v3551_v13  ;;  %v2337_v50 = vpop.f32.mrb[47].mxu1 }
 0xacd   : > { %v2351_v43 = vpack.c.bf16 %v2337_v50, %v2334_v12 }
 0xacf   : > { %3559 = vmatprep.mubr.msk.bf16.mxu1 %vm892_vm1, %v2351_v43 }
 0xad0   : > { %3560 = vmatmul.mubr.msk.bf16.gmra.mrb[28].mxu1 %vm892_vm1, %v2352_v39 }
 0xb9b   : > { %v3557_v45 = vpop.f32.mrb[24].mxu1 }
 0xb9c   : > { %v2403_v21 = vpop.f32.mrb[25].mxu1  ;;  %v2444_v3 = vadd.f32 %v3874_v56, %v3557_v45 }
 0xb9d   : > { %v2442_v24 = vadd.f32 %v3875_v6, %v2403_v21  ;;  %v3558_v54 = vpop.f32.mrb[26].mxu1 }
 0xb9e   : > { %v2406_v46 = vpop.f32.mrb[27].mxu1  ;;  %v4766_v31 = vadd.f32 %v3251_v47, %v2444_v3  ;;  %v2445_v33 = vadd.f32 %v3877_v32, %v3558_v54 }
 0xb9f   : > { %v4763_v20 = vadd.f32 %v3251_v47, %v2442_v24  ;;  %v2443_v30 = vadd.f32 %v3876_v27, %v2406_v46 }
 0xba0   : > { %v4775_v40 = vadd.f32 %v3251_v47, %v2445_v33  ;;  %v2473_v4 = vsel %vm610_vm0, %v4766_v31, 0.0 }
 0xba1   : > { %v4769_v38 = vadd.f32 %v3251_v47, %v2443_v30  ;;  %v2467_v26 = vsel %vm610_vm0, %v4763_v20, 0.0 }
 0xba2   : > { %2468 = vadd.xlane.f32.xlu0 %v2467_v26  ;;  %v2476_v49 = vsel %vm610_vm0, %v4775_v40, 0.0 }
 0xba3   : > { %v3561_v35 = vpop.f32.mrb[28].mxu1  ;;  %v2470_v19 = vsel %vm610_vm0, %v4769_v38, 0.0 }
 0xba4   : > { %2471 = vadd.xlane.f32.xlu1 %v2470_v19  ;;  %v2419_v51 = vpop.f32.mrb[29].mxu1  ;;  %v2448_v5 = vadd.f32 %v3881_v18, %v3561_v35 }
 0xba5   : > { %v2446_v41 = vadd.f32 %v3878_v10, %v2419_v51  ;;  %v3562_v23 = vpop.f32.mrb[30].mxu1  ;;  %v3664_v10 = vld [vmem:[%s5109_s11] sm:$0xff]  }
 0xba6   : > { %2474 = vadd.xlane.f32.xlu0 %v2473_v4  ;;  %v2422_v52 = vpop.f32.mrb[31].mxu1  ;;  %v2449_v63 = vadd.f32 %v3879_v59, %v3562_v23  ;;  %v4793_v1 = vadd.f32 %v3251_v47, %v2448_v5  ;;  %3563 = vmatprep.subr.bf16.mxu0 %v3664_v10 }
 0xba7   : > { %v2447_v61 = vadd.f32 %v3880_v44, %v2422_v52  ;;  %v4783_v7 = vadd.f32 %v3251_v47, %v2446_v41  ;;  %3564 = vmatpush3.bf16.msra.mxu0 %v3664_v10  ;;  %v3665_v41 = vld [vmem:[%s5109_s11 + $0x8] sm:$0xff]  }
 0xba8   : > { %v4789_v0 = vadd.f32 %v3251_v47, %v2449_v63  ;;  %v2485_v2 = vsel %vm610_vm0, %v4793_v1, 0.0  ;;  %3565 = vmatprep.subr.bf16.mxu0 %v3665_v41 }
 0xba9   : > { %v4785_v28 = vadd.f32 %v3251_v47, %v2447_v61  ;;  %v2479_v48 = vsel %vm610_vm0, %v4783_v7, 0.0 }
 0xbaa   : > { %2477 = vadd.xlane.f32.xlu0 %v2476_v49  ;;  %v2488_v55 = vsel %vm610_vm0, %v4789_v0, 0.0 }
 0xbab   : > { %v2482_v58 = vsel %vm610_vm0, %v4785_v28, 0.0  ;;  %3566 = vmatpush3.bf16.msra.mxu0 %v3665_v41 }
 0xbac   : > { %2483 = vadd.xlane.f32.xlu1 %v2482_v58 }
 0xbae   : > { %2480 = vadd.xlane.f32.xlu0 %v2479_v48 }
 0xbb0   : > { %2489 = vadd.xlane.f32.xlu1 %v2488_v55 }
 0xbb2   : > { %2486 = vadd.xlane.f32.xlu0 %v2485_v2 }
 0xc2f   : > { %v2469_v53 = vpop.xlane.xlu0 %2468 }
 0xc30   : > { %v2491_v34 = vmul.f32 0.03125, %v2469_v53 }
 0xc31   : > { %v2472_v62 = vpop.xlane.xlu1 %2471 }
 0xc32   : > { %v4802_v36 = vsub.f32 %v4763_v20, %v2491_v34  ;;  %v2492_v37 = vmul.f32 0.03125, %v2472_v62 }
 0xc33   : > { %v2475_v25 = vpop.xlane.xlu0 %2474 }
 0xc34   : > { %v4805_v9 = vsub.f32 %v4769_v38, %v2492_v37  ;;  %v2493_v29 = vmul.f32 0.03125, %v2475_v25  ;;  %v2507_v22 = vmul.f32 %v4802_v36, %v4802_v36  ;;  %v3252_v37 = vld [vmem:[%s5107_s9] ss:$0 sm:$0xff] }
 0xc36   : > { %v4810_v60 = vsub.f32 %v4766_v31, %v2493_v29  ;;  %v2515_v17 = vsel %vm610_vm0, %v2507_v22, 0.0  ;;  %v2508_v16 = vmul.f32 %v4805_v9, %v4805_v9 }
 0xc37   : > { %v2478_v57 = vpop.xlane.xlu0 %2477  ;;  %2516 = vadd.xlane.f32.xlu0 %v2515_v17 }
 0xc38   : > { %v2494_v8 = vmul.f32 0.03125, %v2478_v57  ;;  %v2518_v11 = vsel %vm610_vm0, %v2508_v16, 0.0  ;;  %v2509_v14 = vmul.f32 %v4810_v60, %v4810_v60 }
 0xc39   : > { %2519 = vadd.xlane.f32.xlu1 %v2518_v11  ;;  %v2484_v15 = vpop.xlane.xlu1 %2483 }
 0xc3a   : > { %v4819_v13 = vsub.f32 %v4775_v40, %v2494_v8  ;;  %v2496_v12 = vmul.f32 0.03125, %v2484_v15  ;;  %v2521_v42 = vsel %vm610_vm0, %v2509_v14, 0.0 }
 0xc3b   : > { %2522 = vadd.xlane.f32.xlu0 %v2521_v42  ;;  %v2481_v39 = vpop.xlane.xlu0 %2480  ;;  %v3253_v42 = vld [vmem:[%s5108_s10] ss:$0 sm:$0xff] }
 0xc3c   : > { %v4823_v50 = vsub.f32 %v4785_v28, %v2496_v12  ;;  %v2495_v43 = vmul.f32 0.03125, %v2481_v39  ;;  %v2510_v45 = vmul.f32 %v4819_v13, %v4819_v13 }
 0xc3d   : > { %v2490_v47 = vpop.xlane.xlu1 %2489 }
 0xc3e   : > { %v4828_v21 = vsub.f32 %v4783_v7, %v2495_v43  ;;  %v2498_v56 = vmul.f32 0.03125, %v2490_v47  ;;  %v2524_v3 = vsel %vm610_vm0, %v2510_v45, 0.0  ;;  %v2512_v6 = vmul.f32 %v4823_v50, %v4823_v50 }
 0xc3f   : > { %v2487_v24 = vpop.xlane.xlu0 %2486  ;;  %2525 = vadd.xlane.f32.xlu1 %v2524_v3 }
 0xc40   : > { %v4834_v54 = vsub.f32 %v4789_v0, %v2498_v56  ;;  %v2497_v46 = vmul.f32 0.03125, %v2487_v24  ;;  %v2511_v27 = vmul.f32 %v4828_v21, %v4828_v21  ;;  %v2530_v33 = vsel %vm610_vm0, %v2512_v6, 0.0 }
 0xc42   : > { %v4839_v30 = vsub.f32 %v4793_v1, %v2497_v46  ;;  %v2527_v32 = vsel %vm610_vm0, %v2511_v27, 0.0  ;;  %v2514_v26 = vmul.f32 %v4834_v54, %v4834_v54 }
 0xc43   : > { %2528 = vadd.xlane.f32.xlu0 %v2527_v32  ;;  %2531 = vadd.xlane.f32.xlu1 %v2530_v33 }
 0xc44   : > { %v2513_v35 = vmul.f32 %v4839_v30, %v4839_v30  ;;  %v2536_v51 = vsel %vm610_vm0, %v2514_v26, 0.0 }
 0xc46   : > { %v2533_v19 = vsel %vm610_vm0, %v2513_v35, 0.0 }
 0xc47   : > { %2534 = vadd.xlane.f32.xlu0 %v2533_v19  ;;  %2537 = vadd.xlane.f32.xlu1 %v2536_v51 }
 0xcc4   : > { %v2517_v23 = vpop.xlane.xlu0 %2516 }
 0xcc5   : > { %v2539_v4 = vmul.f32 0.03125, %v2517_v23 }
 0xcc6   : > { %v2520_v52 = vpop.xlane.xlu1 %2519 }
 0xcc7   : > { %v2547_v59 = vadd.f32 1e-05, %v2539_v4  ;;  %v2540_v63 = vmul.f32 0.03125, %v2520_v52 }
 0xcc8   : > { %v2523_v44 = vpop.xlane.xlu0 %2522 }
 0xcc9   : > { %3818 = vrsqrt.f32 %v2547_v59  ;;  %v2548_v61 = vadd.f32 1e-05, %v2540_v63  ;;  %v2541_v18 = vmul.f32 0.03125, %v2523_v44 }
 0xccb   : > { %3820 = vrsqrt.f32 %v2548_v61  ;;  %v2549_v5 = vadd.f32 1e-05, %v2541_v18 }
 0xccc   : > { %v2526_v49 = vpop.xlane.xlu1 %2525 }
 0xccd   : > { %3822 = vrsqrt.f32 %v2549_v5  ;;  %v2542_v58 = vmul.f32 0.03125, %v2526_v49  ;;  %v3668_v5 = vld [vmem:[%s5111_s13 + $0x10] sm:$0xff]   ;;  %v3669_v49 = vld [vmem:[%s5111_s13 + $0x18] sm:$0xff]  }
 0xccf   : > { %v2550_v48 = vadd.f32 1e-05, %v2542_v58  ;;  %v3670_v58 = vld [vmem:[%s5111_s13 + $0x20] sm:$0xff]  }
 0xcd0   : > { %v2529_v55 = vpop.xlane.xlu0 %2528  ;;  %v2532_v2 = vpop.xlane.xlu1 %2531 }
 0xcd1   : > { %3824 = vrsqrt.f32 %v2550_v48  ;;  %v2543_v53 = vmul.f32 0.03125, %v2529_v55  ;;  %v2544_v34 = vmul.f32 0.03125, %v2532_v2  ;;  %v3671_v48 = vld [vmem:[%s5111_s13 + $0x28] sm:$0xff]   ;;  %v3672_v55 = vld [vmem:[%s5111_s13 + $0x30] sm:$0xff]   ;;  %v3673_v2 = vld [vmem:[%s5111_s13 + $0x38] sm:$0xff]  }
 0xcd3   : > { %v3819_v62 = vpop.eup %3818  ;;  %v2551_v25 = vadd.f32 1e-05, %v2543_v53  ;;  %v2552_v29 = vadd.f32 1e-05, %v2544_v34  ;;  %v3254_v53 = vld [vmem:[%s5110_s12] ss:$0 sm:$0xff] }
 0xcd4   : > { %v2563_v22 = vmul.f32 %v3819_v62, %v4802_v36  ;;  %v2535_v17 = vpop.xlane.xlu0 %2534  ;;  %v2538_v16 = vpop.xlane.xlu1 %2537 }
 0xcd5   : > { %v3821_v57 = vpop.eup %3820  ;;  %3826 = vrsqrt.f32 %v2551_v25  ;;  %v2545_v8 = vmul.f32 0.03125, %v2535_v17  ;;  %v2546_v11 = vmul.f32 0.03125, %v2538_v16 }
 0xcd6   : > { %v2564_v14 = vmul.f32 %v3821_v57, %v4805_v9  ;;  %3828 = vrsqrt.f32 %v2552_v29  ;;  %v2577_v15 = vmul.f32 %v3252_v37, %v2563_v22 }
 0xcd7   : > { %v3823_v12 = vpop.eup %3822  ;;  %v2553_v39 = vadd.f32 1e-05, %v2545_v8  ;;  %v2554_v43 = vadd.f32 1e-05, %v2546_v11 }
 0xcd8   : > { %v2565_v45 = vmul.f32 %v3823_v12, %v4810_v60  ;;  %v2578_v36 = vmul.f32 %v3252_v37, %v2564_v14  ;;  %v2591_v47 = vadd.f32 %v3253_v42, %v2577_v15 }
 0xcd9   : > { %3830 = vrsqrt.f32 %v2553_v39 }
 0xcda   : > { %3832 = vrsqrt.f32 %v2554_v43  ;;  %v2592_v56 = vadd.f32 %v3253_v42, %v2578_v36  ;;  %v2579_v6 = vmul.f32 %v3252_v37, %v2565_v45 }
 0xcdb   : > { %v3825_v3 = vpop.eup %3824 }
 0xcdc   : > { %v2566_v9 = vmul.f32 %v3825_v3, %v4819_v13  ;;  %v2599_v24 = vpack.c.bf16 %v2592_v56, %v2591_v47  ;;  %v2593_v33 = vadd.f32 %v3253_v42, %v2579_v6 }
 0xcde   : > { %v2580_v46 = vmul.f32 %v3252_v37, %v2566_v9  ;;  %3567 = vmatprep.mubr.msk.bf16.mxu0 %vm610_vm0, %v2599_v24 }
 0xcdf   : > { %v3827_v27 = vpop.eup %3826 }
 0xce0   : > { %v3829_v32 = vpop.eup %3828  ;;  %v2594_v26 = vadd.f32 %v3253_v42, %v2580_v46  ;;  %v2567_v35 = vmul.f32 %v3827_v27, %v4828_v21 }
 0xce1   : > { %v2568_v60 = vmul.f32 %v3829_v32, %v4823_v50 }
 0xce2   : > { %v2600_v19 = vpack.c.bf16 %v2594_v26, %v2593_v33  ;;  %v2581_v51 = vmul.f32 %v3252_v37, %v2567_v35 }
 0xce3   : > { %v3831_v10 = vpop.eup %3830  ;;  %v2582_v41 = vmul.f32 %v3252_v37, %v2568_v60 }
 0xce4   : > { %v3833_v23 = vpop.eup %3832  ;;  %v2569_v4 = vmul.f32 %v3831_v10, %v4839_v30  ;;  %3568 = vmatmul.mubr.msk.bf16.vlgmr.msra.gmra.mrb[32].mxu0 %vm610_vm0, %v2600_v19  ;;  %v2595_v13 = vadd.f32 %v3253_v42, %v2581_v51  ;;  %v3666_v30 = vld [vmem:[%s5111_s13] sm:$0xff]  }
 0xce5   : > { %v2570_v52 = vmul.f32 %v3833_v23, %v4834_v54  ;;  %v2596_v59 = vadd.f32 %v3253_v42, %v2582_v41  ;;  %3575 = vmatprep.subr.bf16.mxu0 %v3666_v30  ;;  %v3667_v54 = vld [vmem:[%s5111_s13 + $0x8] sm:$0xff]  }
 0xce6   : > { %v2583_v63 = vmul.f32 %v3252_v37, %v2569_v4  ;;  %3576 = vmatpush3.bf16.msra.mxu0 %v3666_v30 }
 0xce7   : > { %v2601_v44 = vpack.c.bf16 %v2596_v59, %v2595_v13  ;;  %v2584_v61 = vmul.f32 %v3252_v37, %v2570_v52  ;;  %3577 = vmatprep.subr.bf16.mxu0 %v3667_v54 }
 0xce8   : > { %v2597_v18 = vadd.f32 %v3253_v42, %v2583_v63 }
 0xce9   : > { %3571 = vmatprep.mubr.msk.bf16.mxu0 %vm610_vm0, %v2601_v44  ;;  %v2598_v50 = vadd.f32 %v3253_v42, %v2584_v61 }
 0xcea   : > { %3578 = vmatpush3.bf16.msra.mxu0 %v3667_v54 }
 0xceb   : > { %v2602_v21 = vpack.c.bf16 %v2598_v50, %v2597_v18  ;;  %3579 = vmatprep.subr.bf16.mxu0 %v3668_v5 }
 0xced   : > { %3572 = vmatmul.mubr.msk.bf16.gmra.mrb[36].mxu0 %vm610_vm0, %v2602_v21 }
 0xcee   : > { %3580 = vmatpush3.bf16.msra.mxu0 %v3668_v5 }
 0xcef   : > { %3581 = vmatprep.subr.bf16.mxu0 %v3669_v49 }
 0xcf2   : > { %3582 = vmatpush3.bf16.msra.mxu0 %v3669_v49 }
 0xcf3   : > { %3583 = vmatprep.subr.bf16.mxu0 %v3670_v58 }
 0xcf6   : > { %3584 = vmatpush3.bf16.msra.mxu0 %v3670_v58 }
 0xcf7   : > { %3585 = vmatprep.subr.bf16.mxu0 %v3671_v48 }
 0xcfa   : > { %3586 = vmatpush3.bf16.msra.mxu0 %v3671_v48 }
 0xcfb   : > { %3587 = vmatprep.subr.bf16.mxu0 %v3672_v55 }
 0xcfe   : > { %3588 = vmatpush3.bf16.msra.mxu0 %v3672_v55 }
 0xcff   : > { %3589 = vmatprep.subr.bf16.mxu0 %v3673_v2 }
 0xd02   : > { %3590 = vmatpush3.bf16.msra.mxu0 %v3673_v2 }
 0xdb7   : > { %v3569_v34 = vpop.f32.mrb[32].mxu0 }
 0xdb8   : > { %v4900_v62 = vadd.f32 %v3569_v34, %v3254_v53  ;;  %v2672_v37 = vpop.f32.mrb[33].mxu0 }
 0xdb9   : > { %v4902_v25 = vadd.f32 %v3254_v53, %v2672_v37  ;;  %v3570_v29 = vpop.f32.mrb[34].mxu0 }
 0xdba   : > { %v4905_v22 = vmul.f32 0.70710677, %v4900_v62  ;;  %v4907_v17 = vadd.f32 %v3570_v29, %v3254_v53  ;;  %v2675_v16 = vpop.f32.mrb[35].mxu0  ;;  %v4969_v2 = vmul.f32 0.5, %v4900_v62 }
 0xdbb   : > { %v4910_v57 = vmul.f32 0.70710677, %v4902_v25  ;;  %v4912_v8 = vadd.f32 %v3254_v53, %v2675_v16 }
 0xdbc   : > { %vm2721_vm4 = vcmp.ge.f32.partialorder %v4905_v22, 0.0  ;;  %v2729_v11 = vsub.f32 0.0, %v4905_v22  ;;  %v4917_v14 = vmul.f32 0.70710677, %v4907_v17 }
 0xdbd   : > { %vm2719_vm5 = vcmp.ge.f32.partialorder %v4910_v57, 0.0  ;;  %v2727_v15 = vsub.f32 0.0, %v4910_v57  ;;  %v4922_v12 = vmul.f32 0.70710677, %v4912_v8 }
 0xdbe   : > { %v2737_v42 = vsel %vm2721_vm4, %v4905_v22, %v2729_v11  ;;  %vm2722_vm6 = vcmp.ge.f32.partialorder %v4917_v14, 0.0  ;;  %v2730_v39 = vsub.f32 0.0, %v4917_v14 }
 0xdbf   : > { %v2745_v43 = vmul.f32 0.3275911, %v2737_v42  ;;  %v2735_v45 = vsel %vm2719_vm5, %v4910_v57, %v2727_v15  ;;  %vm2720_vm7 = vcmp.ge.f32.partialorder %v4922_v12, 0.0  ;;  %v2728_v56 = vsub.f32 0.0, %v4922_v12 }
 0xdc0   : > { %v2743_v36 = vmul.f32 0.3275911, %v2735_v45  ;;  %v2738_v47 = vsel %vm2722_vm6, %v4917_v14, %v2730_v39  ;;  %v3573_v3 = vpop.f32.mrb[36].mxu0  ;;  %v2849_v46 = vsub.f32 0.0, %v2737_v42  ;;  %v2847_v41 = vsub.f32 0.0, %v2735_v45 }
 0xdc1   : > { %v2753_v6 = vadd.f32 1.0, %v2745_v43  ;;  %v2746_v9 = vmul.f32 0.3275911, %v2738_v47  ;;  %v2688_v24 = vpop.f32.mrb[37].mxu0  ;;  %v2736_v32 = vsel %vm2720_vm7, %v4922_v12, %v2728_v56  ;;  %v4940_v33 = vadd.f32 %v3573_v3, %v3254_v53 }
 0xdc2   : > { %v2751_v27 = vadd.f32 1.0, %v2743_v36  ;;  %v3574_v26 = vpop.f32.mrb[38].mxu0  ;;  %v2744_v19 = vmul.f32 0.3275911, %v2736_v32  ;;  %v2857_v10 = vmul.f32 %v2849_v46, %v2737_v42  ;;  %v4945_v4 = vadd.f32 %v3254_v53, %v2688_v24 }
 0xdc3   : > { %3834 = vrcp.f32 %v2753_v6  ;;  %v2754_v35 = vadd.f32 1.0, %v2746_v9  ;;  %v2691_v60 = vpop.f32.mrb[39].mxu0  ;;  %v4943_v51 = vmul.f32 0.70710677, %v4940_v33  ;;  %v4949_v52 = vadd.f32 %v3574_v26, %v3254_v53 }
 0xdc4   : > { %3836 = vrcp.f32 %v2751_v27  ;;  %v2752_v23 = vadd.f32 1.0, %v2744_v19  ;;  %v2850_v59 = vsub.f32 0.0, %v2738_v47  ;;  %v4952_v63 = vmul.f32 0.70710677, %v4945_v4 }
 0xdc5   : > { %3838 = vrcp.f32 %v2754_v35  ;;  %vm2725_vm8 = vcmp.ge.f32.partialorder %v4943_v51, 0.0  ;;  %v2733_v13 = vsub.f32 0.0, %v4943_v51  ;;  %v4958_v61 = vmul.f32 0.70710677, %v4949_v52 }
 0xdc6   : > { %3840 = vrcp.f32 %v2752_v23  ;;  %v2867_v18 = vmul.f32 1.442695, %v2857_v10  ;;  %v2855_v50 = vmul.f32 %v2847_v41, %v2735_v45  ;;  %vm2723_vm9 = vcmp.ge.f32.partialorder %v4952_v63, 0.0 }
 0xdc7   : > { %v2741_v44 = vsel %vm2725_vm8, %v4943_v51, %v2733_v13  ;;  %v2731_v30 = vsub.f32 0.0, %v4952_v63  ;;  %vm2726_vm10 = vcmp.ge.f32.partialorder %v4958_v61, 0.0  ;;  %v2734_v54 = vsub.f32 0.0, %v4958_v61 }
 0xdc8   : > { %v2749_v21 = vmul.f32 0.3275911, %v2741_v44  ;;  %v4964_v5 = vadd.f32 %v3254_v53, %v2691_v60  ;;  %v2858_v49 = vmul.f32 %v2850_v59, %v2738_v47  ;;  %v2848_v58 = vsub.f32 0.0, %v2736_v32 }
 0xdc9   : > { %v2739_v34 = vsel %vm2723_vm9, %v4952_v63, %v2731_v30  ;;  %v2742_v37 = vsel %vm2726_vm10, %v4958_v61, %v2734_v54  ;;  %v2863_v11 = vmul.f32 1.442695, %v2855_v50  ;;  %v2853_v42 = vsub.f32 0.0, %v2741_v44  ;;  %v3261_v63 = vld [vmem:[%s5112_s14] ss:$0 sm:$0xff] }
 0xdca   : > { %v2757_v48 = vadd.f32 1.0, %v2749_v21  ;;  %v4978_v29 = vmul.f32 0.70710677, %v4964_v5  ;;  %v2747_v15 = vmul.f32 0.3275911, %v2739_v34  ;;  %v2856_v36 = vmul.f32 %v2848_v58, %v2736_v32 }
 0xdcb   : > { %v2750_v39 = vmul.f32 0.3275911, %v2742_v37  ;;  %v2869_v45 = vmul.f32 1.442695, %v2858_v49  ;;  %v2851_v6 = vsub.f32 0.0, %v2739_v34  ;;  %v2861_v32 = vmul.f32 %v2853_v42, %v2741_v44 }
 0xdcc   : > { %3842 = vrcp.f32 %v2757_v48  ;;  %v2755_v47 = vadd.f32 1.0, %v2747_v15  ;;  %vm2724_vm11 = vcmp.ge.f32.partialorder %v4978_v29, 0.0  ;;  %v2732_v27 = vsub.f32 0.0, %v4978_v29 }
 0xdcd   : > { %v4966_v55 = vpop.eup %3834  ;;  %3844 = vpow2.f32 %v2867_v18  ;;  %v2758_v9 = vadd.f32 1.0, %v2750_v39  ;;  %v2854_v60 = vsub.f32 0.0, %v2742_v37  ;;  %v2859_v59 = vmul.f32 %v2851_v6, %v2739_v34 }
 0xdce   : > { %v4980_v53 = vpop.eup %3836  ;;  %v2777_v16 = vmul.f32 1.0614054, %v4966_v55  ;;  %3846 = vrcp.f32 %v2755_v47  ;;  %v4997_v23 = vsel %vm2724_vm11, %v4978_v29, %v2732_v27  ;;  %v2865_v30 = vmul.f32 1.442695, %v2856_v36 }
 0xdcf   : > { %v2775_v62 = vmul.f32 1.0614054, %v4980_v53  ;;  %v4984_v56 = vpop.eup %3838  ;;  %3848 = vrcp.f32 %v2758_v9  ;;  %v2748_v18 = vmul.f32 0.3275911, %v4997_v23  ;;  %v2875_v49 = vmul.f32 1.442695, %v2861_v32 }
 0xdd0   : > { %v2785_v43 = vadd.f32 -1.4531521, %v2777_v16  ;;  %v2778_v46 = vmul.f32 1.0614054, %v4984_v56  ;;  %v4990_v26 = vpop.eup %3840  ;;  %3850 = vpow2.f32 %v2863_v11  ;;  %v2862_v34 = vmul.f32 %v2854_v60, %v2742_v37 }
 0xdd1   : > { %v2783_v3 = vadd.f32 -1.4531521, %v2775_v62  ;;  %v2776_v41 = vmul.f32 1.0614054, %v4990_v26  ;;  %3852 = vpow2.f32 %v2869_v45  ;;  %v2756_v58 = vadd.f32 1.0, %v2748_v18 }
 0xdd2   : > { %v2793_v24 = vmul.f32 %v4966_v55, %v2785_v43  ;;  %v2786_v10 = vadd.f32 -1.4531521, %v2778_v46  ;;  %v2871_v43 = vmul.f32 1.442695, %v2859_v59 }
 0xdd3   : > { %v2791_v35 = vmul.f32 %v4980_v53, %v2783_v3  ;;  %v2784_v21 = vadd.f32 -1.4531521, %v2776_v41  ;;  %3854 = vrcp.f32 %v2756_v58  ;;  %v5010_v3 = vmul.f32 0.5, %v4902_v25 }
 0xdd4   : > { %v2801_v19 = vadd.f32 1.4214138, %v2793_v24  ;;  %v2794_v44 = vmul.f32 %v4984_v56, %v2786_v10  ;;  %3856 = vpow2.f32 %v2865_v30  ;;  %v2852_v30 = vsub.f32 0.0, %v4997_v23 }
 0xdd5   : > { %v2799_v13 = vadd.f32 1.4214138, %v2791_v35  ;;  %v2792_v11 = vmul.f32 %v4990_v26, %v2784_v21  ;;  %3858 = vpow2.f32 %v2875_v49  ;;  %v2877_v35 = vmul.f32 1.442695, %v2862_v34 }
 0xdd6   : > { %v2809_v50 = vmul.f32 %v4966_v55, %v2801_v19  ;;  %v5003_v48 = vpop.eup %3842  ;;  %v2802_v15 = vadd.f32 1.4214138, %v2794_v44  ;;  %3860 = vpow2.f32 %v2871_v43 }
 0xdd7   : > { %v2807_v54 = vmul.f32 %v4980_v53, %v2799_v13  ;;  %v3845_v62 = vpop.eup %3844  ;;  %v2781_v39 = vmul.f32 1.0614054, %v5003_v48  ;;  %v2800_v45 = vadd.f32 1.4214138, %v2792_v11  ;;  %3862 = vpow2.f32 %v2877_v35 }
 0xdd8   : > { %v2817_v16 = vadd.f32 -0.28449672, %v2809_v50  ;;  %v2810_v47 = vmul.f32 %v4984_v56, %v2802_v15  ;;  %v5013_v37 = vpop.eup %3846 }
 0xdd9   : > { %v2815_v42 = vadd.f32 -0.28449672, %v2807_v54  ;;  %v2789_v9 = vadd.f32 -1.4531521, %v2781_v39  ;;  %v2808_v27 = vmul.f32 %v4990_v26, %v2800_v45  ;;  %v5016_v32 = vpop.eup %3848  ;;  %v2779_v10 = vmul.f32 1.0614054, %v5013_v37 }
 0xdda   : > { %v2825_v36 = vmul.f32 %v4966_v55, %v2817_v16  ;;  %v2818_v46 = vadd.f32 -0.28449672, %v2810_v47  ;;  %v2782_v59 = vmul.f32 1.0614054, %v5016_v32  ;;  %v3851_v18 = vpop.eup %3850 }
 0xddb   : > { %v2823_v6 = vmul.f32 %v4980_v53, %v2815_v42  ;;  %v2797_v19 = vmul.f32 %v5003_v48, %v2789_v9  ;;  %v2816_v13 = vadd.f32 -0.28449672, %v2808_v27  ;;  %v2787_v21 = vadd.f32 -1.4531521, %v2779_v10  ;;  %v3853_v15 = vpop.eup %3852 }
 0xddc   : > { %v2833_v24 = vadd.f32 0.2548296, %v2825_v36  ;;  %v2826_v41 = vmul.f32 %v4984_v56, %v2818_v46  ;;  %v2790_v16 = vadd.f32 -1.4531521, %v2782_v59 }
 0xddd   : > { %v2831_v60 = vadd.f32 0.2548296, %v2823_v6  ;;  %v2805_v44 = vadd.f32 1.4214138, %v2797_v19  ;;  %v2824_v58 = vmul.f32 %v4990_v26, %v2816_v13  ;;  %v2795_v34 = vmul.f32 %v5013_v37, %v2787_v21  ;;  %v5030_v36 = vpop.eup %3854 }
 0xdde   : > { %v2841_v25 = vmul.f32 %v4966_v55, %v2833_v24  ;;  %v2834_v49 = vadd.f32 0.2548296, %v2826_v41  ;;  %v2798_v43 = vmul.f32 %v5016_v32, %v2790_v16  ;;  %v2860_v6 = vmul.f32 %v2852_v30, %v4997_v23  ;;  %v3857_v9 = vpop.eup %3856 }
 0xddf   : > { %v2839_v50 = vmul.f32 %v4980_v53, %v2831_v60  ;;  %v2813_v55 = vmul.f32 %v5003_v48, %v2805_v44  ;;  %v2832_v53 = vadd.f32 0.2548296, %v2824_v58  ;;  %v2803_v45 = vadd.f32 1.4214138, %v2795_v34  ;;  %v3859_v35 = vpop.eup %3858 }
 0xde0   : > { %v2881_v54 = vmul.f32 %v3845_v62, %v2841_v25  ;;  %v2842_v39 = vmul.f32 %v4984_v56, %v2834_v49  ;;  %v2806_v60 = vadd.f32 1.4214138, %v2798_v43  ;;  %v2780_v25 = vmul.f32 1.0614054, %v5030_v36 }
 0xde1   : > { %v2879_v11 = vmul.f32 %v3851_v18, %v2839_v50  ;;  %v2821_v47 = vadd.f32 -0.28449672, %v2813_v55  ;;  %v2840_v27 = vmul.f32 %v4990_v26, %v2832_v53  ;;  %v2811_v10 = vmul.f32 %v5013_v37, %v2803_v45  ;;  %v3861_v18 = vpop.eup %3860 }
 0xde2   : > { %v2889_v42 = vsub.f32 1.0, %v2881_v54  ;;  %v2882_v46 = vmul.f32 %v3853_v15, %v2842_v39  ;;  %v2814_v23 = vmul.f32 %v5016_v32, %v2806_v60  ;;  %v2706_v50 = vmul.f32 0.5, %v4907_v17  ;;  %v3863_v17 = vpop.eup %3862 }
 0xde3   : > { %v2887_v62 = vsub.f32 1.0, %v2879_v11  ;;  %v2829_v56 = vmul.f32 %v5003_v48, %v2821_v47  ;;  %v2880_v59 = vmul.f32 %v3857_v9, %v2840_v27  ;;  %v2819_v21 = vadd.f32 -0.28449672, %v2811_v10 }
 0xde4   : > { %v2897_v24 = vsub.f32 0.0, %v2889_v42  ;;  %v2890_v13 = vsub.f32 1.0, %v2882_v46  ;;  %v2822_v58 = vadd.f32 -0.28449672, %v2814_v23  ;;  %v2788_v15 = vadd.f32 -1.4531521, %v2780_v25 }
 0xde5   : > { %v2895_v19 = vsub.f32 0.0, %v2887_v62  ;;  %v2837_v44 = vadd.f32 0.2548296, %v2829_v56  ;;  %v2888_v49 = vsub.f32 1.0, %v2880_v59  ;;  %v2827_v22 = vmul.f32 %v5013_v37, %v2819_v21 }
 0xde6   : > { %v2905_v41 = vsel %vm2721_vm4, %v2889_v42, %v2897_v24  ;;  %v2898_v54 = vsub.f32 0.0, %v2890_v13  ;;  %v2873_v11 = vmul.f32 1.442695, %v2860_v6  ;;  %v2830_v42 = vmul.f32 %v5016_v32, %v2822_v58 }
 0xde7   : > { %v2903_v26 = vsel %vm2719_vm5, %v2887_v62, %v2895_v19  ;;  %v2913_v30 = vadd.f32 1.0, %v2905_v41  ;;  %v2845_v16 = vmul.f32 %v5003_v48, %v2837_v44  ;;  %v2896_v57 = vsub.f32 0.0, %v2888_v49 }
 0xde8   : > { %v2911_v55 = vadd.f32 1.0, %v2903_v26  ;;  %v2906_v34 = vsel %vm2722_vm6, %v2890_v13, %v2898_v54  ;;  %v2835_v43 = vadd.f32 0.2548296, %v2827_v22  ;;  %v2796_v62 = vmul.f32 %v5030_v36, %v2788_v15 }
 0xde9   : > { %v2914_v39 = vadd.f32 1.0, %v2906_v34  ;;  %v2885_v53 = vmul.f32 %v3859_v35, %v2845_v16  ;;  %v2921_v47 = vmul.f32 %v2913_v30, %v4969_v2  ;;  %v2704_v48 = vmul.f32 0.5, %v4912_v8 }
 0xdea   : > { %v2904_v45 = vsel %vm2720_vm7, %v2888_v49, %v2896_v57  ;;  %v2838_v6 = vadd.f32 0.2548296, %v2830_v42  ;;  %v2843_v46 = vmul.f32 %v5013_v37, %v2835_v43  ;;  %v2804_v60 = vadd.f32 1.4214138, %v2796_v62 }
 0xdeb   : > { %v2922_v9 = vmul.f32 %v2914_v39, %v2706_v50  ;;  %v2912_v14 = vadd.f32 1.0, %v2904_v45  ;;  %v2893_v24 = vsub.f32 1.0, %v2885_v53  ;;  %3864 = vpow2.f32 %v2873_v11 }
 0xdec   : > { %v2846_v27 = vmul.f32 %v5016_v32, %v2838_v6  ;;  %v2919_v35 = vmul.f32 %v2911_v55, %v5010_v3  ;;  %v2883_v10 = vmul.f32 %v3861_v18, %v2843_v46  ;;  %v2812_v12 = vmul.f32 %v5030_v36, %v2804_v60 }
 0xded   : > { %v2928_v19 = vpack.c.bf16 %v2922_v9, %v2921_v47  ;;  %v2920_v56 = vmul.f32 %v2912_v14, %v2704_v48  ;;  %v2901_v2 = vsub.f32 0.0, %v2893_v24  ;;  %v2709_v50 = vmul.f32 0.5, %v4940_v33 }
 0xdee   : > { %v2886_v8 = vmul.f32 %v3863_v17, %v2846_v27  ;;  %v2820_v59 = vadd.f32 -0.28449672, %v2812_v12  ;;  %v2891_v37 = vsub.f32 1.0, %v2883_v10  ;;  %v2710_v44 = vmul.f32 0.5, %v4949_v52 }
 0xdef   : > { %v2927_v25 = vpack.c.bf16 %v2920_v56, %v2919_v35  ;;  %v2909_v41 = vsel %vm2725_vm8, %v2893_v24, %v2901_v2  ;;  %v2707_v52 = vmul.f32 0.5, %v4945_v4  ;;  %v2708_v34 = vmul.f32 0.5, %v4964_v5 }
 0xdf0   : > { %v2894_v13 = vsub.f32 1.0, %v2886_v8  ;;  %v2828_v23 = vmul.f32 %v5030_v36, %v2820_v59  ;;  %v2917_v3 = vadd.f32 1.0, %v2909_v41  ;;  %v2899_v30 = vsub.f32 0.0, %v2891_v37 }
 0xdf1   : > { %3591 = vmatprep.mubr.bf16.mxu0 %v2927_v25 }
 0xdf2   : > { %v2902_v32 = vsub.f32 0.0, %v2894_v13  ;;  %3592 = vmatmul.mubr.bf16.vlgmr.msra.gmra.mrb[40].mxu0 %v2928_v19  ;;  %v2836_v18 = vadd.f32 0.2548296, %v2828_v23  ;;  %v2925_v49 = vmul.f32 %v2917_v3, %v2709_v50  ;;  %v2907_v15 = vsel %vm2723_vm9, %v2891_v37, %v2899_v30 }
 0xdf3   : > { %v2915_v55 = vadd.f32 1.0, %v2907_v15 }
 0xdf4   : > { %v2910_v26 = vsel %vm2726_vm10, %v2894_v13, %v2902_v32  ;;  %v2844_v54 = vmul.f32 %v5030_v36, %v2836_v18 }
 0xdf5   : > { %v2918_v21 = vadd.f32 1.0, %v2910_v26  ;;  %v3865_v51 = vpop.eup %3864  ;;  %v2923_v36 = vmul.f32 %v2915_v55, %v2707_v52 }
 0xdf6   : > { %v2884_v16 = vmul.f32 %v3865_v51, %v2844_v54 }
 0xdf7   : > { %v2926_v58 = vmul.f32 %v2918_v21, %v2710_v44 }
 0xdf8   : > { %v2892_v11 = vsub.f32 1.0, %v2884_v16 }
 0xdf9   : > { %v2930_v22 = vpack.c.bf16 %v2926_v58, %v2925_v49 }
 0xdfa   : > { %v2900_v61 = vsub.f32 0.0, %v2892_v11 }
 0xdfc   : > { %v2908_v33 = vsel %vm2724_vm11, %v2892_v11, %v2900_v61 }
 0xdfd   : > { %v2916_v57 = vadd.f32 1.0, %v2908_v33 }
 0xdff   : > { %v2924_v42 = vmul.f32 %v2916_v57, %v2708_v34 }
 0xe01   : > { %v2929_v17 = vpack.c.bf16 %v2924_v42, %v2923_v36 }
 0xe03   : > { %3595 = vmatprep.mubr.bf16.mxu0 %v2929_v17 }
 0xe04   : > { %3596 = vmatmul.mubr.bf16.gmra.mrb[44].mxu0 %v2930_v22 }
 0xec5   : > { %v3593_v39 = vpop.f32.mrb[40].mxu0 }
 0xec6   : > { %v3045_v53 = vadd.f32 %v3593_v39, %v3261_v63  ;;  %v3036_v43 = vpop.f32.mrb[41].mxu0 }
 0xec7   : > { %v3037_v4 = vadd.f32 %v3261_v63, %v3036_v43  ;;  %v3594_v5 = vpop.f32.mrb[42].mxu0 }
 0xec8   : > { %v3069_v29 = vadd.f32 %v3045_v53, %v4766_v31  ;;  %v3048_v62 = vadd.f32 %v3594_v5, %v3261_v63  ;;  %v3039_v47 = vpop.f32.mrb[43].mxu0 }
 0xec9   : > { %v3067_v48 = vadd.f32 %v3037_v4, %v4763_v20  ;;  %v3040_v45 = vadd.f32 %v3261_v63, %v3039_v47 }
 0xeca   : > { %3077 = vst.msk [vmem:[%s598_s22 + $0x10] sm:$0xff] %vm610_vm0, %v3069_v29  ;;  %v3070_v6 = vadd.f32 %v3048_v62, %v4775_v40 }
 0xecb   : > { %3075 = vst.msk [vmem:[%s598_s22] sm:$0xff] %vm610_vm0, %v3067_v48  ;;  %v3068_v9 = vadd.f32 %v3040_v45, %v4769_v38 }
 0xecc   : > { %3078 = vst.msk [vmem:[%s598_s22 + $0x18] sm:$0xff] %vm610_vm0, %v3070_v6 }
 0xecd   : > { %3076 = vst.msk [vmem:[%s598_s22 + $0x8] sm:$0xff] %vm610_vm0, %v3068_v9 }
 0xed7   : > { %v3597_v14 = vpop.f32.mrb[44].mxu0 }
 0xed8   : > { %v3061_v24 = vadd.f32 %v3597_v14, %v3261_v63  ;;  %v3052_v31 = vpop.f32.mrb[45].mxu0 }
 0xed9   : > { %v3053_v46 = vadd.f32 %v3261_v63, %v3052_v31  ;;  %v3598_v27 = vpop.f32.mrb[46].mxu0 }
 0xeda   : > { %v3073_v20 = vadd.f32 %v3061_v24, %v4793_v1  ;;  %v3064_v60 = vadd.f32 %v3598_v27, %v3261_v63  ;;  %v3055_v35 = vpop.f32.mrb[47].mxu0 }
 0xedb   : > { %v3071_v19 = vadd.f32 %v3053_v46, %v4783_v7  ;;  %v3056_v40 = vadd.f32 %v3261_v63, %v3055_v35 }
 0xedc   : > { %3081 = vst.msk [vmem:[%s598_s22 + $0x30] sm:$0xff] %vm610_vm0, %v3073_v20  ;;  %v3074_v38 = vadd.f32 %v3064_v60, %v4789_v0 }
 0xedd   : > { %3079 = vst.msk [vmem:[%s598_s22 + $0x20] sm:$0xff] %vm610_vm0, %v3071_v19  ;;  %v3072_v56 = vadd.f32 %v3056_v40, %v4785_v28 }
 0xede   : > { %3082 = vst.msk [vmem:[%s598_s22 + $0x38] sm:$0xff] %vm610_vm0, %v3074_v38 }
 0xedf   : > { %3080 = vst.msk [vmem:[%s598_s22 + $0x28] sm:$0xff] %vm610_vm0, %v3072_v56 }
 0xee0 PF: > { %s25_s18 = sadd.s32 1, %s3888_s18  }
 0xee1   : > { %p22_p7 = scmp.ge.s32.totalorder %s25_s18, 10  }
 0xee3   :  { %24 = sbr.rel (!%p22_p7) target bundleno = 1 (0x1), region = 116 }

// kernel: swin_layers_forward.23
= control target key start
LH: loop header
LB: loop body
LE: loop exit
PB: predicated region body
PF: predicated region fallthrough
CT: control target
= control target key end

     0   :  { %9 = vsyncpa [#allocation4], 0  ;;  %s1599_s15 = smov 0   ;;  %s2264_s0 = inlined_call_operand.vmem [shape: f32[9,512,32], index: 0, kind: input, shape index: {}]   ;;  %s2265_s1 = inlined_call_operand.vmem [shape: bf16[9,32,32], index: 1, kind: input, shape index: {}]   ;;  %s2266_s2 = inlined_call_operand.vmem [shape: f32[1,32], index: 2, kind: input, shape index: {}]   ;;  %s2267_s3 = inlined_call_operand.vmem [shape: f32[512,32], index: 3, kind: input, shape index: {}]   ;;  %s2268_s4 = inlined_call_operand.hbm [shape: f32[512,32], index: 4, kind: output, shape index: {}]  }
   0x1 LB: > { %s1605_s16 = sadd.s32 4294967295, %s1568_s15   ;;  %p1358_p0 = scmp.ge.s32.totalorder %s1568_s15, 1  ;;  %s1568_s15 = sphi %s1599_s15, %s15_s15  }
   0x2   : > { %p168_p1 = scmp.lt.s32.totalorder %s1568_s15, 10 }
   0x4   : > { %p169_p2 = pnand %p1358_p0, %p168_p1 }
   0x5   : > { %p194_p3 = scmp.lt.s32.totalorder (!%p169_p2), %s1605_s16, 8  ;;  %p1363_p4 = scmp.ne.s32.totalorder (!%p169_p2), %s1605_s16, 0 }
   0x6   : > { %172 = sbr.rel (%p169_p2) target bundleno = 395 (0x18b), region = 36 }
   0xd   : > { %s195_s17 = scalar_select %p194_p3, %s1605_s16, 8 }
   0xe   : > { %208 = sbr.rel (%p1363_p4) target bundleno = 47 (0x2f), region = 40  ;;  %vm209_vm0 = vcmask (!%p1363_p4), 261120   ;;  %v1570_v0 = vmov (!%p1363_p4), 0.0  }
   0xf   : > { %s1404_s18 = sshll.u32 %s195_s17, 9  ;;  %s1405_s19 = sshll.u32 %s195_s17, 4  ;;  %210 = vst.msk [vmem:[#allocation2] sm:$0xff] (!%p1363_p4), %vm209_vm0, %v1570_v0  ;;  %211 = vst.msk [vmem:[#allocation2 + $0x8] sm:$0xff] (!%p1363_p4), %vm209_vm0, %v1570_v0 }
  0x10   : > { %s1614_s22 = scalar_lea.vmem %s2264_s0, %s1404_s18  ;;  %s1619_s25 = scalar_lea.vmem %s2265_s1, %s1405_s19  ;;  %212 = vst.msk [vmem:[#allocation2 + $0x10] sm:$0xff] (!%p1363_p4), %vm209_vm0, %v1570_v0  ;;  %213 = vst.msk [vmem:[#allocation2 + $0x18] sm:$0xff] (!%p1363_p4), %vm209_vm0, %v1570_v0 }
  0x11   : > { %214 = vst.msk [vmem:[#allocation2 + $0x20] sm:$0xff] (!%p1363_p4), %vm209_vm0, %v1570_v0  ;;  %215 = vst.msk [vmem:[#allocation2 + $0x28] sm:$0xff] (!%p1363_p4), %vm209_vm0, %v1570_v0 }
  0x12   : > { %216 = vst.msk [vmem:[#allocation2 + $0x30] sm:$0xff] (!%p1363_p4), %vm209_vm0, %v1570_v0  ;;  %217 = vst.msk [vmem:[#allocation2 + $0x38] sm:$0xff] (!%p1363_p4), %vm209_vm0, %v1570_v0 }
  0x13   : > { %218 = vst.msk [vmem:[#allocation2 + $0x40] sm:$0xff] (!%p1363_p4), %vm209_vm0, %v1570_v0  ;;  %219 = vst.msk [vmem:[#allocation2 + $0x48] sm:$0xff] (!%p1363_p4), %vm209_vm0, %v1570_v0 }
  0x14   : > { %220 = vst.msk [vmem:[#allocation2 + $0x50] sm:$0xff] (!%p1363_p4), %vm209_vm0, %v1570_v0  ;;  %221 = vst.msk [vmem:[#allocation2 + $0x58] sm:$0xff] (!%p1363_p4), %vm209_vm0, %v1570_v0 }
  0x15   : > { %222 = vst.msk [vmem:[#allocation2 + $0x60] sm:$0xff] %vm209_vm0, %v1570_v0  ;;  %223 = vst.msk [vmem:[#allocation2 + $0x68] sm:$0xff] %vm209_vm0, %v1570_v0 }
  0x16   : > { %224 = vst.msk [vmem:[#allocation2 + $0x70] sm:$0xff] %vm209_vm0, %v1570_v0  ;;  %225 = vst.msk [vmem:[#allocation2 + $0x78] sm:$0xff] %vm209_vm0, %v1570_v0 }
  0x17   : > { %226 = vst.msk [vmem:[#allocation2 + $0x80] sm:$0xff] %vm209_vm0, %v1570_v0  ;;  %227 = vst.msk [vmem:[#allocation2 + $0x88] sm:$0xff] %vm209_vm0, %v1570_v0 }
  0x18   : > { %228 = vst.msk [vmem:[#allocation2 + $0x90] sm:$0xff] %vm209_vm0, %v1570_v0  ;;  %229 = vst.msk [vmem:[#allocation2 + $0x98] sm:$0xff] %vm209_vm0, %v1570_v0 }
  0x19   : > { %230 = vst.msk [vmem:[#allocation2 + $0xa0] sm:$0xff] %vm209_vm0, %v1570_v0  ;;  %231 = vst.msk [vmem:[#allocation2 + $0xa8] sm:$0xff] %vm209_vm0, %v1570_v0 }
  0x1a   : > { %232 = vst.msk [vmem:[#allocation2 + $0xb0] sm:$0xff] %vm209_vm0, %v1570_v0  ;;  %233 = vst.msk [vmem:[#allocation2 + $0xb8] sm:$0xff] %vm209_vm0, %v1570_v0 }
  0x1b   : > { %234 = vst.msk [vmem:[#allocation2 + $0xc0] sm:$0xff] %vm209_vm0, %v1570_v0  ;;  %235 = vst.msk [vmem:[#allocation2 + $0xc8] sm:$0xff] %vm209_vm0, %v1570_v0 }
  0x1c   : > { %236 = vst.msk [vmem:[#allocation2 + $0xd0] sm:$0xff] %vm209_vm0, %v1570_v0  ;;  %237 = vst.msk [vmem:[#allocation2 + $0xd8] sm:$0xff] %vm209_vm0, %v1570_v0 }
  0x1d   : > { %238 = vst.msk [vmem:[#allocation2 + $0xe0] sm:$0xff] %vm209_vm0, %v1570_v0  ;;  %239 = vst.msk [vmem:[#allocation2 + $0xe8] sm:$0xff] %vm209_vm0, %v1570_v0 }
  0x1e   : > { %240 = vst.msk [vmem:[#allocation2 + $0xf0] sm:$0xff] %vm209_vm0, %v1570_v0  ;;  %241 = vst.msk [vmem:[#allocation2 + $0xf8] sm:$0xff] %vm209_vm0, %v1570_v0 }
  0x1f   : > { %242 = vst.msk [vmem:[#allocation2 + $0x100] sm:$0xff] %vm209_vm0, %v1570_v0  ;;  %243 = vst.msk [vmem:[#allocation2 + $0x108] sm:$0xff] %vm209_vm0, %v1570_v0 }
  0x20   : > { %244 = vst.msk [vmem:[#allocation2 + $0x110] sm:$0xff] %vm209_vm0, %v1570_v0  ;;  %245 = vst.msk [vmem:[#allocation2 + $0x118] sm:$0xff] %vm209_vm0, %v1570_v0 }
  0x21   : > { %246 = vst.msk [vmem:[#allocation2 + $0x120] sm:$0xff] %vm209_vm0, %v1570_v0  ;;  %247 = vst.msk [vmem:[#allocation2 + $0x128] sm:$0xff] %vm209_vm0, %v1570_v0 }
  0x22   : > { %248 = vst.msk [vmem:[#allocation2 + $0x130] sm:$0xff] %vm209_vm0, %v1570_v0  ;;  %249 = vst.msk [vmem:[#allocation2 + $0x138] sm:$0xff] %vm209_vm0, %v1570_v0 }
  0x23   : > { %250 = vst.msk [vmem:[#allocation2 + $0x140] sm:$0xff] %vm209_vm0, %v1570_v0  ;;  %251 = vst.msk [vmem:[#allocation2 + $0x148] sm:$0xff] %vm209_vm0, %v1570_v0 }
  0x24   : > { %252 = vst.msk [vmem:[#allocation2 + $0x150] sm:$0xff] %vm209_vm0, %v1570_v0  ;;  %253 = vst.msk [vmem:[#allocation2 + $0x158] sm:$0xff] %vm209_vm0, %v1570_v0 }
  0x25   : > { %254 = vst.msk [vmem:[#allocation2 + $0x160] sm:$0xff] %vm209_vm0, %v1570_v0  ;;  %255 = vst.msk [vmem:[#allocation2 + $0x168] sm:$0xff] %vm209_vm0, %v1570_v0 }
  0x26   : > { %256 = vst.msk [vmem:[#allocation2 + $0x170] sm:$0xff] %vm209_vm0, %v1570_v0  ;;  %257 = vst.msk [vmem:[#allocation2 + $0x178] sm:$0xff] %vm209_vm0, %v1570_v0 }
  0x27   : > { %258 = vst.msk [vmem:[#allocation2 + $0x180] sm:$0xff] %vm209_vm0, %v1570_v0  ;;  %259 = vst.msk [vmem:[#allocation2 + $0x188] sm:$0xff] %vm209_vm0, %v1570_v0 }
  0x28   : > { %260 = vst.msk [vmem:[#allocation2 + $0x190] sm:$0xff] %vm209_vm0, %v1570_v0  ;;  %261 = vst.msk [vmem:[#allocation2 + $0x198] sm:$0xff] %vm209_vm0, %v1570_v0 }
  0x29   : > { %262 = vst.msk [vmem:[#allocation2 + $0x1a0] sm:$0xff] %vm209_vm0, %v1570_v0  ;;  %263 = vst.msk [vmem:[#allocation2 + $0x1a8] sm:$0xff] %vm209_vm0, %v1570_v0 }
  0x2a   : > { %264 = vst.msk [vmem:[#allocation2 + $0x1b0] sm:$0xff] %vm209_vm0, %v1570_v0  ;;  %265 = vst.msk [vmem:[#allocation2 + $0x1b8] sm:$0xff] %vm209_vm0, %v1570_v0 }
  0x2b   : > { %266 = vst.msk [vmem:[#allocation2 + $0x1c0] sm:$0xff] %vm209_vm0, %v1570_v0  ;;  %267 = vst.msk [vmem:[#allocation2 + $0x1c8] sm:$0xff] %vm209_vm0, %v1570_v0 }
  0x2c   : > { %268 = vst.msk [vmem:[#allocation2 + $0x1d0] sm:$0xff] %vm209_vm0, %v1570_v0  ;;  %269 = vst.msk [vmem:[#allocation2 + $0x1d8] sm:$0xff] %vm209_vm0, %v1570_v0 }
  0x2d   : > { %270 = vst.msk [vmem:[#allocation2 + $0x1e0] sm:$0xff] %vm209_vm0, %v1570_v0  ;;  %271 = vst.msk [vmem:[#allocation2 + $0x1e8] sm:$0xff] %vm209_vm0, %v1570_v0 }
  0x2e   : > { %272 = vst.msk [vmem:[#allocation2 + $0x1f0] sm:$0xff] %vm209_vm0, %v1570_v0  ;;  %273 = vst.msk [vmem:[#allocation2 + $0x1f8] sm:$0xff] %vm209_vm0, %v1570_v0 }
  0x2f PF: > { %v1530_v1 = vld [vmem:[%s1619_s25] sm:$0xff]   ;;  %v1531_v2 = vld [vmem:[%s1619_s25 + $0x8] sm:$0xff]   ;;  %vm450_vm1 = vcmask 261120   ;;  %v340_v8 = vld [vmem:[%s1614_s22 + $0x10] sm:$0xff]  ;;  %p1398_p5 = scmp.ne.s32.totalorder %s1605_s16, 8 }
  0x30   : > { %1440 = vmatprep.subr.bf16.mxu0 %v1530_v1  ;;  %1508 = vmatprep.subr.bf16.mxu1 %v1530_v1  ;;  %v338_v3 = vld [vmem:[%s1614_s22] sm:$0xff]  ;;  %v339_v4 = vld [vmem:[%s1614_s22 + $0x8] sm:$0xff]  ;;  %v341_v9 = vld [vmem:[%s1614_s22 + $0x18] sm:$0xff] }
  0x31   : > { %v370_v5 = vld [vmem:[%s1614_s22 + $0x100] sm:$0xff]  ;;  %1441 = vmatpush3.bf16.msra.mxu0 %v1530_v1  ;;  %1510 = vmatpush3.bf16.msra.mxu1 %v1530_v1  ;;  %v402_v6 = vpack.c.bf16 %v339_v4, %v338_v3  ;;  %v371_v7 = vld [vmem:[%s1614_s22 + $0x108] sm:$0xff]  ;;  %v372_v11 = vld [vmem:[%s1614_s22 + $0x110] sm:$0xff]  ;;  %v403_v17 = vpack.c.bf16 %v341_v9, %v340_v8 }
  0x32   : > { %1442 = vmatprep.subr.bf16.mxu0 %v1531_v2  ;;  %1509 = vmatprep.subr.bf16.mxu1 %v1531_v2  ;;  %v418_v10 = vpack.c.bf16 %v371_v7, %v370_v5  ;;  %v373_v12 = vld [vmem:[%s1614_s22 + $0x118] sm:$0xff]  ;;  %v342_v13 = vld [vmem:[%s1614_s22 + $0x20] sm:$0xff]  ;;  %v343_v14 = vld [vmem:[%s1614_s22 + $0x28] sm:$0xff] }
  0x33   : > { %1444 = vmatprep.mubr.msk.bf16.mxu0 %vm450_vm1, %v402_v6  ;;  %v374_v15 = vld [vmem:[%s1614_s22 + $0x120] sm:$0xff]  ;;  %v375_v16 = vld [vmem:[%s1614_s22 + $0x128] sm:$0xff]  ;;  %v419_v18 = vpack.c.bf16 %v373_v12, %v372_v11  ;;  %v404_v19 = vpack.c.bf16 %v343_v14, %v342_v13  ;;  %v344_v21 = vld [vmem:[%s1614_s22 + $0x30] sm:$0xff] }
  0x34   : > { %1476 = vmatprep.mubr.msk.bf16.mxu1 %vm450_vm1, %v418_v10  ;;  %v420_v20 = vpack.c.bf16 %v375_v16, %v374_v15  ;;  %v345_v22 = vld [vmem:[%s1614_s22 + $0x38] sm:$0xff]  ;;  %v376_v23 = vld [vmem:[%s1614_s22 + $0x130] sm:$0xff]  ;;  %v346_v25 = vld [vmem:[%s1614_s22 + $0x40] sm:$0xff] }
  0x35   : > { %1443 = vmatpush3.bf16.msra.mxu0 %v1531_v2  ;;  %1511 = vmatpush3.bf16.msra.mxu1 %v1531_v2  ;;  %v377_v24 = vld [vmem:[%s1614_s22 + $0x138] sm:$0xff]  ;;  %v347_v26 = vld [vmem:[%s1614_s22 + $0x48] sm:$0xff]  ;;  %v378_v27 = vld [vmem:[%s1614_s22 + $0x140] sm:$0xff]  ;;  %v405_v29 = vpack.c.bf16 %v345_v22, %v344_v21 }
  0x36   : > { %v379_v28 = vld [vmem:[%s1614_s22 + $0x148] sm:$0xff]  ;;  %v421_v30 = vpack.c.bf16 %v377_v24, %v376_v23  ;;  %v406_v31 = vpack.c.bf16 %v347_v26, %v346_v25  ;;  %v348_v33 = vld [vmem:[%s1614_s22 + $0x50] sm:$0xff]  ;;  %v349_v34 = vld [vmem:[%s1614_s22 + $0x58] sm:$0xff] }
  0x37   : > { %v422_v32 = vpack.c.bf16 %v379_v28, %v378_v27  ;;  %v380_v35 = vld [vmem:[%s1614_s22 + $0x150] sm:$0xff]  ;;  %v381_v36 = vld [vmem:[%s1614_s22 + $0x158] sm:$0xff]  ;;  %v350_v37 = vld [vmem:[%s1614_s22 + $0x60] sm:$0xff]  ;;  %v407_v41 = vpack.c.bf16 %v349_v34, %v348_v33 }
  0x38   : > { %1445 = vmatmul.mubr.msk.bf16.vlgmr.msra.gmra.mrb[0].mxu0 %vm450_vm1, %v403_v17  ;;  %1477 = vmatmul.mubr.msk.bf16.vlgmr.msra.gmra.mrb[0].mxu1 %vm450_vm1, %v419_v18  ;;  %v351_v38 = vld [vmem:[%s1614_s22 + $0x68] sm:$0xff]  ;;  %v382_v39 = vld [vmem:[%s1614_s22 + $0x160] sm:$0xff]  ;;  %v423_v42 = vpack.c.bf16 %v381_v36, %v380_v35  ;;  %v352_v45 = vld [vmem:[%s1614_s22 + $0x70] sm:$0xff] }
  0x39   : > { %1448 = vmatprep.mubr.msk.bf16.mxu0 %vm450_vm1, %v404_v19  ;;  %1480 = vmatprep.mubr.msk.bf16.mxu1 %vm450_vm1, %v420_v20  ;;  %v383_v40 = vld [vmem:[%s1614_s22 + $0x168] sm:$0xff]  ;;  %v408_v43 = vpack.c.bf16 %v351_v38, %v350_v37  ;;  %v353_v46 = vld [vmem:[%s1614_s22 + $0x78] sm:$0xff]  ;;  %v384_v47 = vld [vmem:[%s1614_s22 + $0x170] sm:$0xff] }
  0x3a   : > { %v424_v44 = vpack.c.bf16 %v383_v40, %v382_v39  ;;  %v385_v48 = vld [vmem:[%s1614_s22 + $0x178] sm:$0xff]  ;;  %v354_v49 = vld [vmem:[%s1614_s22 + $0x80] sm:$0xff]  ;;  %v355_v50 = vld [vmem:[%s1614_s22 + $0x88] sm:$0xff]  ;;  %v409_v53 = vpack.c.bf16 %v353_v46, %v352_v45 }
  0x3b   : > { %v386_v51 = vld [vmem:[%s1614_s22 + $0x180] sm:$0xff]  ;;  %v387_v52 = vld [vmem:[%s1614_s22 + $0x188] sm:$0xff]  ;;  %v425_v54 = vpack.c.bf16 %v385_v48, %v384_v47  ;;  %v410_v55 = vpack.c.bf16 %v355_v50, %v354_v49  ;;  %v356_v57 = vld [vmem:[%s1614_s22 + $0x90] sm:$0xff] }
  0x3c   : > { %v426_v56 = vpack.c.bf16 %v387_v52, %v386_v51  ;;  %v357_v58 = vld [vmem:[%s1614_s22 + $0x98] sm:$0xff]  ;;  %v388_v59 = vld [vmem:[%s1614_s22 + $0x190] sm:$0xff]  ;;  %v358_v61 = vld [vmem:[%s1614_s22 + $0xa0] sm:$0xff] }
  0x3d   : > { %v389_v60 = vld [vmem:[%s1614_s22 + $0x198] sm:$0xff]  ;;  %v359_v62 = vld [vmem:[%s1614_s22 + $0xa8] sm:$0xff]  ;;  %v390_v63 = vld [vmem:[%s1614_s22 + $0x1a0] sm:$0xff]  ;;  %v411_v1 = vpack.c.bf16 %v357_v58, %v356_v57 }
  0x3e   : > { %v391_v0 = vld [vmem:[%s1614_s22 + $0x1a8] sm:$0xff]  ;;  %v427_v2 = vpack.c.bf16 %v389_v60, %v388_v59  ;;  %v412_v3 = vpack.c.bf16 %v359_v62, %v358_v61  ;;  %v360_v5 = vld [vmem:[%s1614_s22 + $0xb0] sm:$0xff]  ;;  %v361_v6 = vld [vmem:[%s1614_s22 + $0xb8] sm:$0xff] }
  0x3f   : > { %v428_v4 = vpack.c.bf16 %v391_v0, %v390_v63  ;;  %v392_v7 = vld [vmem:[%s1614_s22 + $0x1b0] sm:$0xff]  ;;  %v393_v8 = vld [vmem:[%s1614_s22 + $0x1b8] sm:$0xff]  ;;  %v362_v9 = vld [vmem:[%s1614_s22 + $0xc0] sm:$0xff]  ;;  %v413_v13 = vpack.c.bf16 %v361_v6, %v360_v5 }
  0x40   : > { %1449 = vmatmul.mubr.msk.bf16.gmra.mrb[4].mxu0 %vm450_vm1, %v405_v29  ;;  %1481 = vmatmul.mubr.msk.bf16.gmra.mrb[4].mxu1 %vm450_vm1, %v421_v30  ;;  %v363_v10 = vld [vmem:[%s1614_s22 + $0xc8] sm:$0xff]  ;;  %v394_v11 = vld [vmem:[%s1614_s22 + $0x1c0] sm:$0xff]  ;;  %v429_v14 = vpack.c.bf16 %v393_v8, %v392_v7  ;;  %v364_v17 = vld [vmem:[%s1614_s22 + $0xd0] sm:$0xff] }
  0x41   : > { %1452 = vmatprep.mubr.msk.bf16.mxu0 %vm450_vm1, %v406_v31  ;;  %1484 = vmatprep.mubr.msk.bf16.mxu1 %vm450_vm1, %v422_v32  ;;  %v395_v12 = vld [vmem:[%s1614_s22 + $0x1c8] sm:$0xff]  ;;  %v414_v15 = vpack.c.bf16 %v363_v10, %v362_v9  ;;  %v365_v18 = vld [vmem:[%s1614_s22 + $0xd8] sm:$0xff]  ;;  %v396_v19 = vld [vmem:[%s1614_s22 + $0x1d0] sm:$0xff] }
  0x42   : > { %v430_v16 = vpack.c.bf16 %v395_v12, %v394_v11  ;;  %v397_v20 = vld [vmem:[%s1614_s22 + $0x1d8] sm:$0xff]  ;;  %v366_v21 = vld [vmem:[%s1614_s22 + $0xe0] sm:$0xff]  ;;  %v367_v22 = vld [vmem:[%s1614_s22 + $0xe8] sm:$0xff]  ;;  %v415_v25 = vpack.c.bf16 %v365_v18, %v364_v17 }
  0x43   : > { %v398_v23 = vld [vmem:[%s1614_s22 + $0x1e0] sm:$0xff]  ;;  %v399_v24 = vld [vmem:[%s1614_s22 + $0x1e8] sm:$0xff]  ;;  %v431_v26 = vpack.c.bf16 %v397_v20, %v396_v19  ;;  %v416_v27 = vpack.c.bf16 %v367_v22, %v366_v21  ;;  %v368_v29 = vld [vmem:[%s1614_s22 + $0xf0] sm:$0xff] }
  0x44   : > { %v432_v28 = vpack.c.bf16 %v399_v24, %v398_v23  ;;  %v369_v30 = vld [vmem:[%s1614_s22 + $0xf8] sm:$0xff]  ;;  %v400_v31 = vld [vmem:[%s1614_s22 + $0x1f0] sm:$0xff]  ;;  %v274_v37 = vld [vmem:[#allocation2] sm:$0xff] }
  0x45   : > { %v401_v32 = vld [vmem:[%s1614_s22 + $0x1f8] sm:$0xff]  ;;  %v417_v33 = vpack.c.bf16 %v369_v30, %v368_v29  ;;  %v276_v35 = vld [vmem:[#allocation2 + $0x10] sm:$0xff]  ;;  %v306_v38 = vld [vmem:[#allocation2 + $0x100] sm:$0xff] }
  0x46   : > { %v433_v34 = vpack.c.bf16 %v401_v32, %v400_v31  ;;  %v308_v36 = vld [vmem:[#allocation2 + $0x110] sm:$0xff]  ;;  %v275_v47 = vld [vmem:[#allocation2 + $0x8] sm:$0xff]  ;;  %v278_v61 = vld [vmem:[#allocation2 + $0x20] sm:$0xff] }
  0x47   : > { %v307_v48 = vld [vmem:[#allocation2 + $0x108] sm:$0xff]  ;;  %v280_v59 = vld [vmem:[#allocation2 + $0x30] sm:$0xff]  ;;  %v310_v62 = vld [vmem:[#allocation2 + $0x120] sm:$0xff] }
  0x48   : > { %1453 = vmatmul.mubr.msk.bf16.gmra.mrb[8].mxu0 %vm450_vm1, %v407_v41  ;;  %1485 = vmatmul.mubr.msk.bf16.gmra.mrb[8].mxu1 %vm450_vm1, %v423_v42  ;;  %v277_v41 = vld [vmem:[#allocation2 + $0x18] sm:$0xff]  ;;  %v312_v60 = vld [vmem:[#allocation2 + $0x130] sm:$0xff]  ;;  %v279_v7 = vld [vmem:[#allocation2 + $0x28] sm:$0xff] }
  0x49   : > { %1456 = vmatprep.mubr.msk.bf16.mxu0 %vm450_vm1, %v408_v43  ;;  %1488 = vmatprep.mubr.msk.bf16.mxu1 %vm450_vm1, %v424_v44  ;;  %v309_v42 = vld [vmem:[#allocation2 + $0x118] sm:$0xff]  ;;  %v311_v8 = vld [vmem:[#allocation2 + $0x128] sm:$0xff]  ;;  %v284_v19 = vld [vmem:[#allocation2 + $0x50] sm:$0xff] }
  0x4a   : > { %v316_v20 = vld [vmem:[#allocation2 + $0x150] sm:$0xff]  ;;  %v282_v21 = vld [vmem:[#allocation2 + $0x40] sm:$0xff]  ;;  %v283_v31 = vld [vmem:[#allocation2 + $0x48] sm:$0xff] }
  0x4b   : > { %v314_v22 = vld [vmem:[#allocation2 + $0x140] sm:$0xff]  ;;  %v315_v32 = vld [vmem:[#allocation2 + $0x148] sm:$0xff] }
  0x50   : > { %1457 = vmatmul.mubr.msk.bf16.gmra.mrb[12].mxu0 %vm450_vm1, %v409_v53  ;;  %1489 = vmatmul.mubr.msk.bf16.gmra.mrb[12].mxu1 %vm450_vm1, %v425_v54 }
  0x51   : > { %1460 = vmatprep.mubr.msk.bf16.mxu0 %vm450_vm1, %v410_v55  ;;  %1492 = vmatprep.mubr.msk.bf16.mxu1 %vm450_vm1, %v426_v56 }
  0x58   : > { %1461 = vmatmul.mubr.msk.bf16.gmra.mrb[16].mxu0 %vm450_vm1, %v411_v1  ;;  %1493 = vmatmul.mubr.msk.bf16.gmra.mrb[16].mxu1 %vm450_vm1, %v427_v2  ;;  %v281_v1 = vld [vmem:[#allocation2 + $0x38] sm:$0xff] }
  0x59   : > { %1464 = vmatprep.mubr.msk.bf16.mxu0 %vm450_vm1, %v412_v3  ;;  %1496 = vmatprep.mubr.msk.bf16.mxu1 %vm450_vm1, %v428_v4  ;;  %v313_v2 = vld [vmem:[#allocation2 + $0x138] sm:$0xff] }
  0x60   : > { %1465 = vmatmul.mubr.msk.bf16.gmra.mrb[20].mxu0 %vm450_vm1, %v413_v13  ;;  %1497 = vmatmul.mubr.msk.bf16.gmra.mrb[20].mxu1 %vm450_vm1, %v429_v14 }
  0x61   : > { %1468 = vmatprep.mubr.msk.bf16.mxu0 %vm450_vm1, %v414_v15  ;;  %1500 = vmatprep.mubr.msk.bf16.mxu1 %vm450_vm1, %v430_v16 }
  0x68   : > { %1469 = vmatmul.mubr.msk.bf16.gmra.mrb[24].mxu0 %vm450_vm1, %v415_v25  ;;  %1501 = vmatmul.mubr.msk.bf16.gmra.mrb[24].mxu1 %vm450_vm1, %v431_v26  ;;  %v285_v25 = vld [vmem:[#allocation2 + $0x58] sm:$0xff] }
  0x69   : > { %1472 = vmatprep.mubr.msk.bf16.mxu0 %vm450_vm1, %v416_v27  ;;  %1504 = vmatprep.mubr.msk.bf16.mxu1 %vm450_vm1, %v432_v28  ;;  %v317_v26 = vld [vmem:[#allocation2 + $0x158] sm:$0xff] }
  0x70   : > { %1473 = vmatmul.mubr.msk.bf16.gmra.mrb[28].mxu0 %vm450_vm1, %v417_v33  ;;  %1505 = vmatmul.mubr.msk.bf16.gmra.mrb[28].mxu1 %vm450_vm1, %v433_v34 }
 0x10b   : > { %v1446_v39 = vpop.f32.mrb[0].mxu0  ;;  %v1478_v40 = vpop.f32.mrb[0].mxu1 }
 0x10c   : > { %v838_v43 = vadd.f32 %v1446_v39, %v276_v35  ;;  %v870_v44 = vadd.f32 %v1478_v40, %v308_v36  ;;  %v581_v45 = vpop.f32.mrb[1].mxu0  ;;  %v709_v46 = vpop.f32.mrb[1].mxu1 }
 0x10d   : > { %v836_v49 = vadd.f32 %v581_v45, %v274_v37  ;;  %v868_v50 = vadd.f32 %v709_v46, %v306_v38  ;;  %v1447_v51 = vpop.f32.mrb[2].mxu0  ;;  %v1479_v52 = vpop.f32.mrb[2].mxu1  ;;  %v286_v45 = vld [vmem:[#allocation2 + $0x60] sm:$0xff] }
 0x10e   : > { %902 = vst.msk [vmem:[#allocation2 + $0x10] sm:$0xff] %vm450_vm1, %v838_v43  ;;  %934 = vst.msk [vmem:[#allocation2 + $0x110] sm:$0xff] %vm450_vm1, %v870_v44  ;;  %v839_v53 = vadd.f32 %v1447_v51, %v277_v41  ;;  %v871_v54 = vadd.f32 %v1479_v52, %v309_v42  ;;  %v584_v55 = vpop.f32.mrb[3].mxu0  ;;  %v712_v56 = vpop.f32.mrb[3].mxu1  ;;  %v288_v43 = vld [vmem:[#allocation2 + $0x70] sm:$0xff]  ;;  %v318_v46 = vld [vmem:[#allocation2 + $0x160] sm:$0xff] }
 0x10f   : > { %900 = vst.msk [vmem:[#allocation2] sm:$0xff] %vm450_vm1, %v836_v49  ;;  %932 = vst.msk [vmem:[#allocation2 + $0x100] sm:$0xff] %vm450_vm1, %v868_v50  ;;  %v837_v57 = vadd.f32 %v584_v55, %v275_v47  ;;  %v869_v58 = vadd.f32 %v712_v56, %v307_v48  ;;  %v320_v44 = vld [vmem:[#allocation2 + $0x170] sm:$0xff]  ;;  %v289_v49 = vld [vmem:[#allocation2 + $0x78] sm:$0xff] }
 0x110   : > { %903 = vst.msk [vmem:[#allocation2 + $0x18] sm:$0xff] %vm450_vm1, %v839_v53  ;;  %935 = vst.msk [vmem:[#allocation2 + $0x118] sm:$0xff] %vm450_vm1, %v871_v54  ;;  %v321_v50 = vld [vmem:[#allocation2 + $0x178] sm:$0xff]  ;;  %v287_v55 = vld [vmem:[#allocation2 + $0x68] sm:$0xff] }
 0x111   : > { %901 = vst.msk [vmem:[#allocation2 + $0x8] sm:$0xff] %vm450_vm1, %v837_v57  ;;  %933 = vst.msk [vmem:[#allocation2 + $0x108] sm:$0xff] %vm450_vm1, %v869_v58  ;;  %v319_v56 = vld [vmem:[#allocation2 + $0x168] sm:$0xff] }
 0x113   : > { %v1450_v63 = vpop.f32.mrb[4].mxu0  ;;  %v1482_v0 = vpop.f32.mrb[4].mxu1 }
 0x114   : > { %v842_v3 = vadd.f32 %v1450_v63, %v280_v59  ;;  %v874_v4 = vadd.f32 %v1482_v0, %v312_v60  ;;  %v597_v5 = vpop.f32.mrb[5].mxu0  ;;  %v725_v6 = vpop.f32.mrb[5].mxu1 }
 0x115   : > { %v840_v9 = vadd.f32 %v597_v5, %v278_v61  ;;  %v872_v10 = vadd.f32 %v725_v6, %v310_v62  ;;  %v1451_v11 = vpop.f32.mrb[6].mxu0  ;;  %v1483_v12 = vpop.f32.mrb[6].mxu1  ;;  %v290_v5 = vld [vmem:[#allocation2 + $0x80] sm:$0xff] }
 0x116   : > { %906 = vst.msk [vmem:[#allocation2 + $0x30] sm:$0xff] %vm450_vm1, %v842_v3  ;;  %938 = vst.msk [vmem:[#allocation2 + $0x130] sm:$0xff] %vm450_vm1, %v874_v4  ;;  %v843_v13 = vadd.f32 %v1451_v11, %v281_v1  ;;  %v875_v14 = vadd.f32 %v1483_v12, %v313_v2  ;;  %v600_v15 = vpop.f32.mrb[7].mxu0  ;;  %v728_v16 = vpop.f32.mrb[7].mxu1  ;;  %v292_v3 = vld [vmem:[#allocation2 + $0x90] sm:$0xff]  ;;  %v322_v6 = vld [vmem:[#allocation2 + $0x180] sm:$0xff] }
 0x117   : > { %904 = vst.msk [vmem:[#allocation2 + $0x20] sm:$0xff] %vm450_vm1, %v840_v9  ;;  %936 = vst.msk [vmem:[#allocation2 + $0x120] sm:$0xff] %vm450_vm1, %v872_v10  ;;  %v841_v17 = vadd.f32 %v600_v15, %v279_v7  ;;  %v873_v18 = vadd.f32 %v728_v16, %v311_v8  ;;  %v324_v4 = vld [vmem:[#allocation2 + $0x190] sm:$0xff]  ;;  %v293_v9 = vld [vmem:[#allocation2 + $0x98] sm:$0xff] }
 0x118   : > { %907 = vst.msk [vmem:[#allocation2 + $0x38] sm:$0xff] %vm450_vm1, %v843_v13  ;;  %939 = vst.msk [vmem:[#allocation2 + $0x138] sm:$0xff] %vm450_vm1, %v875_v14  ;;  %v325_v10 = vld [vmem:[#allocation2 + $0x198] sm:$0xff]  ;;  %v291_v15 = vld [vmem:[#allocation2 + $0x88] sm:$0xff] }
 0x119   : > { %905 = vst.msk [vmem:[#allocation2 + $0x28] sm:$0xff] %vm450_vm1, %v841_v17  ;;  %937 = vst.msk [vmem:[#allocation2 + $0x128] sm:$0xff] %vm450_vm1, %v873_v18  ;;  %v323_v16 = vld [vmem:[#allocation2 + $0x188] sm:$0xff] }
 0x11b   : > { %v1454_v23 = vpop.f32.mrb[8].mxu0  ;;  %v1486_v24 = vpop.f32.mrb[8].mxu1 }
 0x11c   : > { %v846_v27 = vadd.f32 %v1454_v23, %v284_v19  ;;  %v878_v28 = vadd.f32 %v1486_v24, %v316_v20  ;;  %v613_v29 = vpop.f32.mrb[9].mxu0  ;;  %v741_v30 = vpop.f32.mrb[9].mxu1 }
 0x11d   : > { %v844_v33 = vadd.f32 %v613_v29, %v282_v21  ;;  %v876_v34 = vadd.f32 %v741_v30, %v314_v22  ;;  %v1455_v35 = vpop.f32.mrb[10].mxu0  ;;  %v1487_v36 = vpop.f32.mrb[10].mxu1  ;;  %v294_v29 = vld [vmem:[#allocation2 + $0xa0] sm:$0xff] }
 0x11e   : > { %910 = vst.msk [vmem:[#allocation2 + $0x50] sm:$0xff] %vm450_vm1, %v846_v27  ;;  %942 = vst.msk [vmem:[#allocation2 + $0x150] sm:$0xff] %vm450_vm1, %v878_v28  ;;  %v847_v37 = vadd.f32 %v1455_v35, %v285_v25  ;;  %v879_v38 = vadd.f32 %v1487_v36, %v317_v26  ;;  %v616_v39 = vpop.f32.mrb[11].mxu0  ;;  %v744_v40 = vpop.f32.mrb[11].mxu1  ;;  %v296_v27 = vld [vmem:[#allocation2 + $0xb0] sm:$0xff]  ;;  %v326_v30 = vld [vmem:[#allocation2 + $0x1a0] sm:$0xff] }
 0x11f   : > { %908 = vst.msk [vmem:[#allocation2 + $0x40] sm:$0xff] %vm450_vm1, %v844_v33  ;;  %940 = vst.msk [vmem:[#allocation2 + $0x140] sm:$0xff] %vm450_vm1, %v876_v34  ;;  %v845_v41 = vadd.f32 %v616_v39, %v283_v31  ;;  %v877_v42 = vadd.f32 %v744_v40, %v315_v32  ;;  %v328_v28 = vld [vmem:[#allocation2 + $0x1b0] sm:$0xff]  ;;  %v297_v33 = vld [vmem:[#allocation2 + $0xb8] sm:$0xff] }
 0x120   : > { %911 = vst.msk [vmem:[#allocation2 + $0x58] sm:$0xff] %vm450_vm1, %v847_v37  ;;  %943 = vst.msk [vmem:[#allocation2 + $0x158] sm:$0xff] %vm450_vm1, %v879_v38  ;;  %v329_v34 = vld [vmem:[#allocation2 + $0x1b8] sm:$0xff]  ;;  %v295_v39 = vld [vmem:[#allocation2 + $0xa8] sm:$0xff] }
 0x121   : > { %909 = vst.msk [vmem:[#allocation2 + $0x48] sm:$0xff] %vm450_vm1, %v845_v41  ;;  %941 = vst.msk [vmem:[#allocation2 + $0x148] sm:$0xff] %vm450_vm1, %v877_v42  ;;  %v327_v40 = vld [vmem:[#allocation2 + $0x1a8] sm:$0xff] }
 0x123   : > { %v1458_v47 = vpop.f32.mrb[12].mxu0  ;;  %v1490_v48 = vpop.f32.mrb[12].mxu1 }
 0x124   : > { %v850_v51 = vadd.f32 %v1458_v47, %v288_v43  ;;  %v882_v52 = vadd.f32 %v1490_v48, %v320_v44  ;;  %v629_v53 = vpop.f32.mrb[13].mxu0  ;;  %v757_v54 = vpop.f32.mrb[13].mxu1 }
 0x125   : > { %v848_v57 = vadd.f32 %v629_v53, %v286_v45  ;;  %v880_v58 = vadd.f32 %v757_v54, %v318_v46  ;;  %v1459_v59 = vpop.f32.mrb[14].mxu0  ;;  %v1491_v60 = vpop.f32.mrb[14].mxu1  ;;  %v298_v53 = vld [vmem:[#allocation2 + $0xc0] sm:$0xff] }
 0x126   : > { %914 = vst.msk [vmem:[#allocation2 + $0x70] sm:$0xff] %vm450_vm1, %v850_v51  ;;  %946 = vst.msk [vmem:[#allocation2 + $0x170] sm:$0xff] %vm450_vm1, %v882_v52  ;;  %v851_v61 = vadd.f32 %v1459_v59, %v289_v49  ;;  %v883_v62 = vadd.f32 %v1491_v60, %v321_v50  ;;  %v632_v63 = vpop.f32.mrb[15].mxu0  ;;  %v760_v0 = vpop.f32.mrb[15].mxu1  ;;  %v300_v51 = vld [vmem:[#allocation2 + $0xd0] sm:$0xff]  ;;  %v330_v54 = vld [vmem:[#allocation2 + $0x1c0] sm:$0xff] }
 0x127   : > { %912 = vst.msk [vmem:[#allocation2 + $0x60] sm:$0xff] %vm450_vm1, %v848_v57  ;;  %944 = vst.msk [vmem:[#allocation2 + $0x160] sm:$0xff] %vm450_vm1, %v880_v58  ;;  %v849_v1 = vadd.f32 %v632_v63, %v287_v55  ;;  %v881_v2 = vadd.f32 %v760_v0, %v319_v56  ;;  %v332_v52 = vld [vmem:[#allocation2 + $0x1d0] sm:$0xff]  ;;  %v301_v57 = vld [vmem:[#allocation2 + $0xd8] sm:$0xff] }
 0x128   : > { %915 = vst.msk [vmem:[#allocation2 + $0x78] sm:$0xff] %vm450_vm1, %v851_v61  ;;  %947 = vst.msk [vmem:[#allocation2 + $0x178] sm:$0xff] %vm450_vm1, %v883_v62  ;;  %v333_v58 = vld [vmem:[#allocation2 + $0x1d8] sm:$0xff]  ;;  %v299_v63 = vld [vmem:[#allocation2 + $0xc8] sm:$0xff] }
 0x129   : > { %913 = vst.msk [vmem:[#allocation2 + $0x68] sm:$0xff] %vm450_vm1, %v849_v1  ;;  %945 = vst.msk [vmem:[#allocation2 + $0x168] sm:$0xff] %vm450_vm1, %v881_v2  ;;  %v331_v0 = vld [vmem:[#allocation2 + $0x1c8] sm:$0xff] }
 0x12b   : > { %v1462_v7 = vpop.f32.mrb[16].mxu0  ;;  %v1494_v8 = vpop.f32.mrb[16].mxu1 }
 0x12c   : > { %v854_v11 = vadd.f32 %v1462_v7, %v292_v3  ;;  %v886_v12 = vadd.f32 %v1494_v8, %v324_v4  ;;  %v645_v13 = vpop.f32.mrb[17].mxu0  ;;  %v773_v14 = vpop.f32.mrb[17].mxu1 }
 0x12d   : > { %v852_v17 = vadd.f32 %v645_v13, %v290_v5  ;;  %v884_v18 = vadd.f32 %v773_v14, %v322_v6  ;;  %v1463_v19 = vpop.f32.mrb[18].mxu0  ;;  %v1495_v20 = vpop.f32.mrb[18].mxu1  ;;  %v302_v13 = vld [vmem:[#allocation2 + $0xe0] sm:$0xff] }
 0x12e   : > { %918 = vst.msk [vmem:[#allocation2 + $0x90] sm:$0xff] %vm450_vm1, %v854_v11  ;;  %950 = vst.msk [vmem:[#allocation2 + $0x190] sm:$0xff] %vm450_vm1, %v886_v12  ;;  %v855_v21 = vadd.f32 %v1463_v19, %v293_v9  ;;  %v887_v22 = vadd.f32 %v1495_v20, %v325_v10  ;;  %v648_v23 = vpop.f32.mrb[19].mxu0  ;;  %v776_v24 = vpop.f32.mrb[19].mxu1  ;;  %v304_v11 = vld [vmem:[#allocation2 + $0xf0] sm:$0xff]  ;;  %v334_v14 = vld [vmem:[#allocation2 + $0x1e0] sm:$0xff] }
 0x12f   : > { %916 = vst.msk [vmem:[#allocation2 + $0x80] sm:$0xff] %vm450_vm1, %v852_v17  ;;  %948 = vst.msk [vmem:[#allocation2 + $0x180] sm:$0xff] %vm450_vm1, %v884_v18  ;;  %v853_v25 = vadd.f32 %v648_v23, %v291_v15  ;;  %v885_v26 = vadd.f32 %v776_v24, %v323_v16  ;;  %v336_v12 = vld [vmem:[#allocation2 + $0x1f0] sm:$0xff]  ;;  %v305_v17 = vld [vmem:[#allocation2 + $0xf8] sm:$0xff] }
 0x130   : > { %919 = vst.msk [vmem:[#allocation2 + $0x98] sm:$0xff] %vm450_vm1, %v855_v21  ;;  %951 = vst.msk [vmem:[#allocation2 + $0x198] sm:$0xff] %vm450_vm1, %v887_v22  ;;  %v337_v18 = vld [vmem:[#allocation2 + $0x1f8] sm:$0xff]  ;;  %v303_v23 = vld [vmem:[#allocation2 + $0xe8] sm:$0xff] }
 0x131   : > { %917 = vst.msk [vmem:[#allocation2 + $0x88] sm:$0xff] %vm450_vm1, %v853_v25  ;;  %949 = vst.msk [vmem:[#allocation2 + $0x188] sm:$0xff] %vm450_vm1, %v885_v26  ;;  %v335_v24 = vld [vmem:[#allocation2 + $0x1e8] sm:$0xff] }
 0x133   : > { %v1466_v31 = vpop.f32.mrb[20].mxu0  ;;  %v1498_v32 = vpop.f32.mrb[20].mxu1 }
 0x134   : > { %v858_v35 = vadd.f32 %v1466_v31, %v296_v27  ;;  %v890_v36 = vadd.f32 %v1498_v32, %v328_v28  ;;  %v661_v37 = vpop.f32.mrb[21].mxu0  ;;  %v789_v38 = vpop.f32.mrb[21].mxu1 }
 0x135   : > { %v856_v41 = vadd.f32 %v661_v37, %v294_v29  ;;  %v888_v42 = vadd.f32 %v789_v38, %v326_v30  ;;  %v1467_v43 = vpop.f32.mrb[22].mxu0  ;;  %v1499_v44 = vpop.f32.mrb[22].mxu1  ;;  %v1103_v37 = vld [vmem:[%s2267_s3] sm:$0xff] (!%p1398_p5) }
 0x136   : > { %922 = vst.msk [vmem:[#allocation2 + $0xb0] sm:$0xff] %vm450_vm1, %v858_v35  ;;  %954 = vst.msk [vmem:[#allocation2 + $0x1b0] sm:$0xff] %vm450_vm1, %v890_v36  ;;  %v859_v45 = vadd.f32 %v1467_v43, %v297_v33  ;;  %v891_v46 = vadd.f32 %v1499_v44, %v329_v34  ;;  %v664_v47 = vpop.f32.mrb[23].mxu0  ;;  %v792_v48 = vpop.f32.mrb[23].mxu1  ;;  %v968_v35 = vld [vmem:[#allocation2] sm:$0xff] (!%p1398_p5)  ;;  %v1105_v44 = vld [vmem:[%s2267_s3 + $0x10] sm:$0xff] (!%p1398_p5) }
 0x137   : > { %920 = vst.msk [vmem:[#allocation2 + $0xa0] sm:$0xff] %vm450_vm1, %v856_v41  ;;  %952 = vst.msk [vmem:[#allocation2 + $0x1a0] sm:$0xff] %vm450_vm1, %v888_v42  ;;  %v857_v49 = vadd.f32 %v664_v47, %v295_v39  ;;  %v889_v50 = vadd.f32 %v792_v48, %v327_v40  ;;  %v1916_v36 = vld [vmem:[%s2266_s2] ss:$0 sm:$0xff] (!%p1398_p5)  ;;  %v969_v39 = vld [vmem:[#allocation2 + $0x8] sm:$0xff] (!%p1398_p5) }
 0x138   : > { %923 = vst.msk [vmem:[#allocation2 + $0xb8] sm:$0xff] %vm450_vm1, %v859_v45  ;;  %955 = vst.msk [vmem:[#allocation2 + $0x1b8] sm:$0xff] %vm450_vm1, %v891_v46  ;;  %v1039_v38 = vadd.f32 (!%p1398_p5), %v1916_v36, %v968_v35  ;;  %v1104_v40 = vld [vmem:[%s2267_s3 + $0x8] sm:$0xff] (!%p1398_p5)  ;;  %v970_v41 = vld [vmem:[#allocation2 + $0x10] sm:$0xff] (!%p1398_p5)  ;;  %v1040_v42 = vadd.f32 (!%p1398_p5), %v1916_v36, %v969_v39 }
 0x139   : > { %921 = vst.msk [vmem:[#allocation2 + $0xa8] sm:$0xff] %vm450_vm1, %v857_v49  ;;  %953 = vst.msk [vmem:[#allocation2 + $0x1a8] sm:$0xff] %vm450_vm1, %v889_v50  ;;  %v1041_v43 = vadd.f32 (!%p1398_p5), %v1916_v36, %v970_v41  ;;  %v971_v45 = vld [vmem:[#allocation2 + $0x18] sm:$0xff] (!%p1398_p5)  ;;  %v972_v49 = vld [vmem:[#allocation2 + $0x20] sm:$0xff] (!%p1398_p5) }
 0x13a   : > { %v1106_v46 = vld [vmem:[%s2267_s3 + $0x18] sm:$0xff] (!%p1398_p5)  ;;  %v1167_v47 = vadd.f32 (!%p1398_p5), %v1103_v37, %v1039_v38  ;;  %v1042_v48 = vadd.f32 (!%p1398_p5), %v1916_v36, %v971_v45  ;;  %v1107_v50 = vld [vmem:[%s2267_s3 + $0x20] sm:$0xff] (!%p1398_p5)  ;;  %v985_v35 = vld [vmem:[#allocation2 + $0x88] sm:$0xff] (!%p1398_p5) }
 0x13b   : > { %v1470_v55 = vpop.f32.mrb[24].mxu0  ;;  %v1502_v56 = vpop.f32.mrb[24].mxu1  ;;  %v1120_v41 = vld [vmem:[%s2267_s3 + $0x88] sm:$0xff] (!%p1398_p5) }
 0x13c   : > { %v862_v59 = vadd.f32 %v1470_v55, %v300_v51  ;;  %v894_v60 = vadd.f32 %v1502_v56, %v332_v52  ;;  %v677_v61 = vpop.f32.mrb[25].mxu0  ;;  %v805_v62 = vpop.f32.mrb[25].mxu1  ;;  %v973_v51 = vld [vmem:[#allocation2 + $0x28] sm:$0xff] (!%p1398_p5)  ;;  %v1168_v52 = vadd.f32 (!%p1398_p5), %v1104_v40, %v1040_v42  ;;  %1231 = vst.msk [vmem:[#allocation3] sm:$0xff] (!%p1398_p5), %vm450_vm1, %v1167_v47  ;;  %v1056_v40 = vadd.f32 (!%p1398_p5), %v1916_v36, %v985_v35  ;;  %v986_v42 = vld [vmem:[#allocation2 + $0x90] sm:$0xff] (!%p1398_p5)  ;;  %v1122_v47 = vld [vmem:[%s2267_s3 + $0x98] sm:$0xff] (!%p1398_p5) }
 0x13d   : > { %v860_v1 = vadd.f32 %v677_v61, %v298_v53  ;;  %v892_v2 = vadd.f32 %v805_v62, %v330_v54  ;;  %v1471_v3 = vpop.f32.mrb[26].mxu0  ;;  %v1503_v4 = vpop.f32.mrb[26].mxu1  ;;  %v1169_v53 = vadd.f32 (!%p1398_p5), %v1105_v44, %v1041_v43  ;;  %v1043_v54 = vadd.f32 (!%p1398_p5), %v1916_v36, %v972_v49  ;;  %v1108_v56 = vld [vmem:[%s2267_s3 + $0x28] sm:$0xff] (!%p1398_p5)  ;;  %v975_v61 = vld [vmem:[#allocation2 + $0x38] sm:$0xff] (!%p1398_p5)  ;;  %v1121_v43 = vld [vmem:[%s2267_s3 + $0x90] sm:$0xff] (!%p1398_p5) }
 0x13e   : > { %926 = vst.msk [vmem:[#allocation2 + $0xd0] sm:$0xff] %vm450_vm1, %v862_v59  ;;  %958 = vst.msk [vmem:[#allocation2 + $0x1d0] sm:$0xff] %vm450_vm1, %v894_v60  ;;  %v863_v5 = vadd.f32 %v1471_v3, %v301_v57  ;;  %v895_v6 = vadd.f32 %v1503_v4, %v333_v58  ;;  %v680_v7 = vpop.f32.mrb[27].mxu0  ;;  %v808_v8 = vpop.f32.mrb[27].mxu1  ;;  %v1044_v55 = vadd.f32 (!%p1398_p5), %v1916_v36, %v973_v51  ;;  %v974_v57 = vld [vmem:[#allocation2 + $0x30] sm:$0xff] (!%p1398_p5)  ;;  %v1110_v62 = vld [vmem:[%s2267_s3 + $0x38] sm:$0xff] (!%p1398_p5) }
 0x13f   : > { %924 = vst.msk [vmem:[#allocation2 + $0xc0] sm:$0xff] %vm450_vm1, %v860_v1  ;;  %956 = vst.msk [vmem:[#allocation2 + $0x1c0] sm:$0xff] %vm450_vm1, %v892_v2  ;;  %v861_v9 = vadd.f32 %v680_v7, %v299_v63  ;;  %v893_v10 = vadd.f32 %v808_v8, %v331_v0  ;;  %v1109_v58 = vld [vmem:[%s2267_s3 + $0x30] sm:$0xff] (!%p1398_p5)  ;;  %v1170_v59 = vadd.f32 (!%p1398_p5), %v1106_v46, %v1042_v48  ;;  %v976_v63 = vld [vmem:[#allocation2 + $0x40] sm:$0xff] (!%p1398_p5) }
 0x140   : > { %927 = vst.msk [vmem:[#allocation2 + $0xd8] sm:$0xff] %vm450_vm1, %v863_v5  ;;  %959 = vst.msk [vmem:[#allocation2 + $0x1d8] sm:$0xff] %vm450_vm1, %v895_v6  ;;  %v1045_v60 = vadd.f32 (!%p1398_p5), %v1916_v36, %v974_v57  ;;  %v1171_v0 = vadd.f32 (!%p1398_p5), %v1107_v50, %v1043_v54  ;;  %v1172_v1 = vadd.f32 (!%p1398_p5), %v1108_v56, %v1044_v55  ;;  %v1111_v4 = vld [vmem:[%s2267_s3 + $0x40] sm:$0xff] (!%p1398_p5)  ;;  %v977_v5 = vld [vmem:[#allocation2 + $0x48] sm:$0xff] (!%p1398_p5) }
 0x141   : > { %925 = vst.msk [vmem:[#allocation2 + $0xc8] sm:$0xff] %vm450_vm1, %v861_v9  ;;  %957 = vst.msk [vmem:[#allocation2 + $0x1c8] sm:$0xff] %vm450_vm1, %v893_v10  ;;  %v1046_v2 = vadd.f32 (!%p1398_p5), %v1916_v36, %v975_v61  ;;  %v1047_v3 = vadd.f32 (!%p1398_p5), %v1916_v36, %v976_v63  ;;  %v1112_v6 = vld [vmem:[%s2267_s3 + $0x48] sm:$0xff] (!%p1398_p5)  ;;  %v1048_v8 = vadd.f32 (!%p1398_p5), %v1916_v36, %v977_v5  ;;  %v978_v9 = vld [vmem:[#allocation2 + $0x50] sm:$0xff] (!%p1398_p5) }
 0x142   : > { %1232 = vst.msk [vmem:[#allocation3 + $0x8] sm:$0xff] (!%p1398_p5), %vm450_vm1, %v1168_v52  ;;  %1233 = vst.msk [vmem:[#allocation3 + $0x10] sm:$0xff] (!%p1398_p5), %vm450_vm1, %v1169_v53  ;;  %v1173_v7 = vadd.f32 (!%p1398_p5), %v1109_v58, %v1045_v60  ;;  %v1113_v10 = vld [vmem:[%s2267_s3 + $0x50] sm:$0xff] (!%p1398_p5)  ;;  %v1057_v45 = vadd.f32 (!%p1398_p5), %v1916_v36, %v986_v42  ;;  %v987_v46 = vld [vmem:[#allocation2 + $0x98] sm:$0xff] (!%p1398_p5)  ;;  %v1184_v50 = vadd.f32 (!%p1398_p5), %v1120_v41, %v1056_v40 }
 0x143   : > { %v1474_v15 = vpop.f32.mrb[28].mxu0  ;;  %v1506_v16 = vpop.f32.mrb[28].mxu1  ;;  %967 = sbr.rel (%p1398_p5) target bundleno = 369 (0x171), region = 44  ;;  %1234 = vst.msk [vmem:[#allocation3 + $0x18] sm:$0xff] (!%p1398_p5), %vm450_vm1, %v1170_v59  ;;  %1235 = vst.msk [vmem:[#allocation3 + $0x20] sm:$0xff] (!%p1398_p5), %vm450_vm1, %v1171_v0  ;;  %v988_v48 = vld [vmem:[#allocation2 + $0xa0] sm:$0xff] (!%p1398_p5)  ;;  %v1058_v51 = vadd.f32 (!%p1398_p5), %v1916_v36, %v987_v46 }
 0x144   : > { %v866_v19 = vadd.f32 %v1474_v15, %v304_v11  ;;  %v898_v20 = vadd.f32 %v1506_v16, %v336_v12  ;;  %v693_v21 = vpop.f32.mrb[29].mxu0  ;;  %v821_v22 = vpop.f32.mrb[29].mxu1  ;;  %v979_v11 = vld [vmem:[#allocation2 + $0x58] sm:$0xff] (!%p1398_p5)  ;;  %1236 = vst.msk [vmem:[#allocation3 + $0x28] sm:$0xff] (!%p1398_p5), %vm450_vm1, %v1172_v1  ;;  %v1174_v12 = vadd.f32 (!%p1398_p5), %v1110_v62, %v1046_v2  ;;  %1237 = vst.msk [vmem:[#allocation3 + $0x30] sm:$0xff] (!%p1398_p5), %vm450_vm1, %v1173_v7  ;;  %v1123_v53 = vld [vmem:[%s2267_s3 + $0xa0] sm:$0xff] (!%p1398_p5) }
 0x145   : > { %v864_v25 = vadd.f32 %v693_v21, %v302_v13  ;;  %v896_v26 = vadd.f32 %v821_v22, %v334_v14  ;;  %v1475_v27 = vpop.f32.mrb[30].mxu0  ;;  %v1507_v28 = vpop.f32.mrb[30].mxu1  ;;  %v1175_v13 = vadd.f32 (!%p1398_p5), %v1111_v4, %v1047_v3  ;;  %v1049_v14 = vadd.f32 (!%p1398_p5), %v1916_v36, %v978_v9  ;;  %v1114_v16 = vld [vmem:[%s2267_s3 + $0x58] sm:$0xff] (!%p1398_p5)  ;;  %v981_v21 = vld [vmem:[#allocation2 + $0x68] sm:$0xff] (!%p1398_p5)  ;;  %v990_v58 = vld [vmem:[#allocation2 + $0xb0] sm:$0xff] (!%p1398_p5)  ;;  %1248 = vst.msk [vmem:[#allocation3 + $0x88] sm:$0xff] (!%p1398_p5), %vm450_vm1, %v1184_v50 }
 0x146   : > { %930 = vst.msk [vmem:[#allocation2 + $0xf0] sm:$0xff] %vm450_vm1, %v866_v19  ;;  %962 = vst.msk [vmem:[#allocation2 + $0x1f0] sm:$0xff] %vm450_vm1, %v898_v20  ;;  %v867_v29 = vadd.f32 %v1475_v27, %v305_v17  ;;  %v899_v30 = vadd.f32 %v1507_v28, %v337_v18  ;;  %v696_v31 = vpop.f32.mrb[31].mxu0  ;;  %v824_v32 = vpop.f32.mrb[31].mxu1  ;;  %v1050_v15 = vadd.f32 (!%p1398_p5), %v1916_v36, %v979_v11  ;;  %v980_v17 = vld [vmem:[#allocation2 + $0x60] sm:$0xff] (!%p1398_p5)  ;;  %v1116_v22 = vld [vmem:[%s2267_s3 + $0x68] sm:$0xff] (!%p1398_p5) }
 0x147   : > { %928 = vst.msk [vmem:[#allocation2 + $0xe0] sm:$0xff] %vm450_vm1, %v864_v25  ;;  %960 = vst.msk [vmem:[#allocation2 + $0x1e0] sm:$0xff] %vm450_vm1, %v896_v26  ;;  %v865_v33 = vadd.f32 %v696_v31, %v303_v23  ;;  %v897_v34 = vadd.f32 %v824_v32, %v335_v24  ;;  %v1115_v18 = vld [vmem:[%s2267_s3 + $0x60] sm:$0xff] (!%p1398_p5)  ;;  %v1176_v19 = vadd.f32 (!%p1398_p5), %v1112_v6, %v1048_v8  ;;  %v982_v23 = vld [vmem:[#allocation2 + $0x70] sm:$0xff] (!%p1398_p5) }
 0x148   : > { %931 = vst.msk [vmem:[#allocation2 + $0xf8] sm:$0xff] %vm450_vm1, %v867_v29  ;;  %963 = vst.msk [vmem:[#allocation2 + $0x1f8] sm:$0xff] %vm450_vm1, %v899_v30  ;;  %v1051_v20 = vadd.f32 (!%p1398_p5), %v1916_v36, %v980_v17  ;;  %v1177_v24 = vadd.f32 (!%p1398_p5), %v1113_v10, %v1049_v14  ;;  %v1178_v25 = vadd.f32 (!%p1398_p5), %v1114_v16, %v1050_v15  ;;  %v1117_v28 = vld [vmem:[%s2267_s3 + $0x70] sm:$0xff] (!%p1398_p5)  ;;  %v983_v29 = vld [vmem:[#allocation2 + $0x78] sm:$0xff] (!%p1398_p5) }
 0x149   : > { %929 = vst.msk [vmem:[#allocation2 + $0xe8] sm:$0xff] %vm450_vm1, %v865_v33  ;;  %961 = vst.msk [vmem:[#allocation2 + $0x1e8] sm:$0xff] %vm450_vm1, %v897_v34  ;;  %v1052_v26 = vadd.f32 (!%p1398_p5), %v1916_v36, %v981_v21  ;;  %v1053_v27 = vadd.f32 (!%p1398_p5), %v1916_v36, %v982_v23  ;;  %v1118_v30 = vld [vmem:[%s2267_s3 + $0x78] sm:$0xff] (!%p1398_p5)  ;;  %v1054_v32 = vadd.f32 (!%p1398_p5), %v1916_v36, %v983_v29  ;;  %v984_v33 = vld [vmem:[#allocation2 + $0x80] sm:$0xff] (!%p1398_p5) }
 0x14a   : > { %1238 = vst.msk [vmem:[#allocation3 + $0x38] sm:$0xff] %vm450_vm1, %v1174_v12  ;;  %1239 = vst.msk [vmem:[#allocation3 + $0x40] sm:$0xff] %vm450_vm1, %v1175_v13  ;;  %v1179_v31 = vadd.f32 %v1115_v18, %v1051_v20  ;;  %v1119_v34 = vld [vmem:[%s2267_s3 + $0x80] sm:$0xff]  ;;  %v1055_v39 = vadd.f32 %v1916_v36, %v984_v33  ;;  %v1059_v52 = vadd.f32 %v1916_v36, %v988_v48  ;;  %v989_v54 = vld [vmem:[#allocation2 + $0xa8] sm:$0xff] }
 0x14b   : > { %1240 = vst.msk [vmem:[#allocation3 + $0x48] sm:$0xff] %vm450_vm1, %v1176_v19  ;;  %1241 = vst.msk [vmem:[#allocation3 + $0x50] sm:$0xff] %vm450_vm1, %v1177_v24  ;;  %v1180_v37 = vadd.f32 %v1116_v22, %v1052_v26  ;;  %v1181_v38 = vadd.f32 %v1117_v28, %v1053_v27  ;;  %v1182_v44 = vadd.f32 %v1118_v30, %v1054_v32  ;;  %v1124_v55 = vld [vmem:[%s2267_s3 + $0xa8] sm:$0xff]  ;;  %v1125_v59 = vld [vmem:[%s2267_s3 + $0xb0] sm:$0xff] }
 0x14c   : > { %1242 = vst.msk [vmem:[#allocation3 + $0x58] sm:$0xff] %vm450_vm1, %v1178_v25  ;;  %1243 = vst.msk [vmem:[#allocation3 + $0x60] sm:$0xff] %vm450_vm1, %v1179_v31  ;;  %v1183_v49 = vadd.f32 %v1119_v34, %v1055_v39  ;;  %v1185_v56 = vadd.f32 %v1121_v43, %v1057_v45  ;;  %v1060_v57 = vadd.f32 %v1916_v36, %v989_v54  ;;  %v991_v60 = vld [vmem:[#allocation2 + $0xb8] sm:$0xff]  ;;  %v992_v2 = vld [vmem:[#allocation2 + $0xc0] sm:$0xff] }
 0x14d   : > { %1244 = vst.msk [vmem:[#allocation3 + $0x68] sm:$0xff] %vm450_vm1, %v1180_v37  ;;  %1245 = vst.msk [vmem:[#allocation3 + $0x70] sm:$0xff] %vm450_vm1, %v1181_v38  ;;  %v1186_v61 = vadd.f32 %v1122_v47, %v1058_v51  ;;  %v1187_v62 = vadd.f32 %v1123_v53, %v1059_v52  ;;  %v1061_v63 = vadd.f32 %v1916_v36, %v990_v58  ;;  %v1126_v1 = vld [vmem:[%s2267_s3 + $0xb8] sm:$0xff]  ;;  %v1127_v3 = vld [vmem:[%s2267_s3 + $0xc0] sm:$0xff] }
 0x14e   : > { %1246 = vst.msk [vmem:[#allocation3 + $0x78] sm:$0xff] %vm450_vm1, %v1182_v44  ;;  %1247 = vst.msk [vmem:[#allocation3 + $0x80] sm:$0xff] %vm450_vm1, %v1183_v49  ;;  %v1062_v0 = vadd.f32 %v1916_v36, %v991_v60  ;;  %v1188_v4 = vadd.f32 %v1124_v55, %v1060_v57  ;;  %v1063_v5 = vadd.f32 %v1916_v36, %v992_v2  ;;  %v993_v6 = vld [vmem:[#allocation2 + $0xc8] sm:$0xff]  ;;  %v994_v8 = vld [vmem:[#allocation2 + $0xd0] sm:$0xff] }
 0x14f   : > { %1249 = vst.msk [vmem:[#allocation3 + $0x90] sm:$0xff] %vm450_vm1, %v1185_v56  ;;  %v1128_v7 = vld [vmem:[%s2267_s3 + $0xc8] sm:$0xff]  ;;  %1250 = vst.msk [vmem:[#allocation3 + $0x98] sm:$0xff] %vm450_vm1, %v1186_v61  ;;  %v1189_v9 = vadd.f32 %v1125_v59, %v1061_v63  ;;  %v1064_v11 = vadd.f32 %v1916_v36, %v993_v6  ;;  %v1065_v12 = vadd.f32 %v1916_v36, %v994_v8  ;;  %v1129_v13 = vld [vmem:[%s2267_s3 + $0xd0] sm:$0xff] }
 0x150   : > { %1251 = vst.msk [vmem:[#allocation3 + $0xa0] sm:$0xff] %vm450_vm1, %v1187_v62  ;;  %v1190_v10 = vadd.f32 %v1126_v1, %v1062_v0  ;;  %v995_v14 = vld [vmem:[#allocation2 + $0xd8] sm:$0xff]  ;;  %1252 = vst.msk [vmem:[#allocation3 + $0xa8] sm:$0xff] %vm450_vm1, %v1188_v4  ;;  %v1191_v16 = vadd.f32 %v1127_v3, %v1063_v5  ;;  %v996_v18 = vld [vmem:[#allocation2 + $0xe0] sm:$0xff] }
 0x151   : > { %v1130_v15 = vld [vmem:[%s2267_s3 + $0xd8] sm:$0xff]  ;;  %v1066_v17 = vadd.f32 %v1916_v36, %v995_v14  ;;  %v1131_v19 = vld [vmem:[%s2267_s3 + $0xe0] sm:$0xff]  ;;  %v997_v20 = vld [vmem:[#allocation2 + $0xe8] sm:$0xff]  ;;  %1253 = vst.msk [vmem:[#allocation3 + $0xb0] sm:$0xff] %vm450_vm1, %v1189_v9  ;;  %v1192_v21 = vadd.f32 %v1128_v7, %v1064_v11  ;;  %v1193_v22 = vadd.f32 %v1129_v13, %v1065_v12  ;;  %v1067_v23 = vadd.f32 %v1916_v36, %v996_v18 }
 0x152   : > { %1254 = vst.msk [vmem:[#allocation3 + $0xb8] sm:$0xff] %vm450_vm1, %v1190_v10  ;;  %v1068_v24 = vadd.f32 %v1916_v36, %v997_v20  ;;  %v1132_v25 = vld [vmem:[%s2267_s3 + $0xe8] sm:$0xff]  ;;  %v998_v26 = vld [vmem:[#allocation2 + $0xf0] sm:$0xff]  ;;  %1255 = vst.msk [vmem:[#allocation3 + $0xc0] sm:$0xff] %vm450_vm1, %v1191_v16 }
 0x153   : > { %v1133_v27 = vld [vmem:[%s2267_s3 + $0xf0] sm:$0xff]  ;;  %v1194_v28 = vadd.f32 %v1130_v15, %v1066_v17  ;;  %v1069_v29 = vadd.f32 %v1916_v36, %v998_v26  ;;  %v999_v30 = vld [vmem:[#allocation2 + $0xf8] sm:$0xff]  ;;  %v1000_v32 = vld [vmem:[#allocation2 + $0x100] sm:$0xff]  ;;  %1256 = vst.msk [vmem:[#allocation3 + $0xc8] sm:$0xff] %vm450_vm1, %v1192_v21  ;;  %v1195_v33 = vadd.f32 %v1131_v19, %v1067_v23 }
 0x154   : > { %v1134_v31 = vld [vmem:[%s2267_s3 + $0xf8] sm:$0xff]  ;;  %1257 = vst.msk [vmem:[#allocation3 + $0xd0] sm:$0xff] %vm450_vm1, %v1193_v22  ;;  %v1196_v34 = vadd.f32 %v1132_v25, %v1068_v24  ;;  %v1070_v35 = vadd.f32 %v1916_v36, %v999_v30  ;;  %v1071_v37 = vadd.f32 %v1916_v36, %v1000_v32  ;;  %v1135_v38 = vld [vmem:[%s2267_s3 + $0x100] sm:$0xff]  ;;  %v1001_v39 = vld [vmem:[#allocation2 + $0x108] sm:$0xff] }
 0x155   : > { %v1136_v40 = vld [vmem:[%s2267_s3 + $0x108] sm:$0xff]  ;;  %1258 = vst.msk [vmem:[#allocation3 + $0xd8] sm:$0xff] %vm450_vm1, %v1194_v28  ;;  %v1197_v41 = vadd.f32 %v1133_v27, %v1069_v29  ;;  %v1072_v42 = vadd.f32 %v1916_v36, %v1001_v39  ;;  %v1002_v43 = vld [vmem:[#allocation2 + $0x110] sm:$0xff]  ;;  %v1003_v45 = vld [vmem:[#allocation2 + $0x118] sm:$0xff] }
 0x156   : > { %v1137_v44 = vld [vmem:[%s2267_s3 + $0x110] sm:$0xff]  ;;  %1259 = vst.msk [vmem:[#allocation3 + $0xe0] sm:$0xff] %vm450_vm1, %v1195_v33  ;;  %1260 = vst.msk [vmem:[#allocation3 + $0xe8] sm:$0xff] %vm450_vm1, %v1196_v34  ;;  %v1198_v46 = vadd.f32 %v1134_v31, %v1070_v35  ;;  %v1199_v47 = vadd.f32 %v1135_v38, %v1071_v37  ;;  %v1073_v48 = vadd.f32 %v1916_v36, %v1002_v43  ;;  %v1138_v50 = vld [vmem:[%s2267_s3 + $0x118] sm:$0xff] }
 0x157   : > { %v1074_v49 = vadd.f32 %v1916_v36, %v1003_v45  ;;  %v1004_v51 = vld [vmem:[#allocation2 + $0x120] sm:$0xff]  ;;  %1261 = vst.msk [vmem:[#allocation3 + $0xf0] sm:$0xff] %vm450_vm1, %v1197_v41  ;;  %v1200_v53 = vadd.f32 %v1136_v40, %v1072_v42  ;;  %v1005_v55 = vld [vmem:[#allocation2 + $0x128] sm:$0xff]  ;;  %v1006_v57 = vld [vmem:[#allocation2 + $0x130] sm:$0xff] }
 0x158   : > { %v1139_v52 = vld [vmem:[%s2267_s3 + $0x120] sm:$0xff]  ;;  %v1075_v54 = vadd.f32 %v1916_v36, %v1004_v51  ;;  %v1140_v56 = vld [vmem:[%s2267_s3 + $0x128] sm:$0xff]  ;;  %1262 = vst.msk [vmem:[#allocation3 + $0xf8] sm:$0xff] %vm450_vm1, %v1198_v46  ;;  %1263 = vst.msk [vmem:[#allocation3 + $0x100] sm:$0xff] %vm450_vm1, %v1199_v47  ;;  %v1201_v58 = vadd.f32 %v1137_v44, %v1073_v48  ;;  %v1076_v60 = vadd.f32 %v1916_v36, %v1005_v55 }
 0x159   : > { %v1202_v59 = vadd.f32 %v1138_v50, %v1074_v49  ;;  %v1077_v61 = vadd.f32 %v1916_v36, %v1006_v57  ;;  %v1141_v62 = vld [vmem:[%s2267_s3 + $0x130] sm:$0xff]  ;;  %v1007_v63 = vld [vmem:[#allocation2 + $0x138] sm:$0xff]  ;;  %1264 = vst.msk [vmem:[#allocation3 + $0x108] sm:$0xff] %vm450_vm1, %v1200_v53  ;;  %v1008_v3 = vld [vmem:[#allocation2 + $0x140] sm:$0xff] }
 0x15a   : > { %v1142_v0 = vld [vmem:[%s2267_s3 + $0x138] sm:$0xff]  ;;  %v1203_v1 = vadd.f32 %v1139_v52, %v1075_v54  ;;  %v1078_v2 = vadd.f32 %v1916_v36, %v1007_v63  ;;  %v1143_v4 = vld [vmem:[%s2267_s3 + $0x140] sm:$0xff]  ;;  %v1009_v5 = vld [vmem:[#allocation2 + $0x148] sm:$0xff]  ;;  %1265 = vst.msk [vmem:[#allocation3 + $0x110] sm:$0xff] %vm450_vm1, %v1201_v58  ;;  %v1204_v6 = vadd.f32 %v1140_v56, %v1076_v60  ;;  %v1079_v8 = vadd.f32 %v1916_v36, %v1008_v3 }
 0x15b   : > { %1266 = vst.msk [vmem:[#allocation3 + $0x118] sm:$0xff] %vm450_vm1, %v1202_v59  ;;  %v1205_v7 = vadd.f32 %v1141_v62, %v1077_v61  ;;  %v1080_v9 = vadd.f32 %v1916_v36, %v1009_v5  ;;  %v1144_v10 = vld [vmem:[%s2267_s3 + $0x148] sm:$0xff]  ;;  %v1010_v11 = vld [vmem:[#allocation2 + $0x150] sm:$0xff]  ;;  %v1011_v15 = vld [vmem:[#allocation2 + $0x158] sm:$0xff] }
 0x15c   : > { %v1145_v12 = vld [vmem:[%s2267_s3 + $0x150] sm:$0xff]  ;;  %1267 = vst.msk [vmem:[#allocation3 + $0x120] sm:$0xff] %vm450_vm1, %v1203_v1  ;;  %v1206_v13 = vadd.f32 %v1142_v0, %v1078_v2  ;;  %v1081_v14 = vadd.f32 %v1916_v36, %v1010_v11  ;;  %v1146_v16 = vld [vmem:[%s2267_s3 + $0x158] sm:$0xff]  ;;  %v1012_v17 = vld [vmem:[#allocation2 + $0x160] sm:$0xff]  ;;  %v1207_v18 = vadd.f32 %v1143_v4, %v1079_v8  ;;  %v1082_v20 = vadd.f32 %v1916_v36, %v1011_v15 }
 0x15d   : > { %1268 = vst.msk [vmem:[#allocation3 + $0x128] sm:$0xff] %vm450_vm1, %v1204_v6  ;;  %1269 = vst.msk [vmem:[#allocation3 + $0x130] sm:$0xff] %vm450_vm1, %v1205_v7  ;;  %v1208_v19 = vadd.f32 %v1144_v10, %v1080_v9  ;;  %v1083_v21 = vadd.f32 %v1916_v36, %v1012_v17  ;;  %v1147_v22 = vld [vmem:[%s2267_s3 + $0x160] sm:$0xff]  ;;  %v1013_v23 = vld [vmem:[#allocation2 + $0x168] sm:$0xff] }
 0x15e   : > { %v1148_v24 = vld [vmem:[%s2267_s3 + $0x168] sm:$0xff]  ;;  %1270 = vst.msk [vmem:[#allocation3 + $0x138] sm:$0xff] %vm450_vm1, %v1206_v13  ;;  %v1209_v25 = vadd.f32 %v1145_v12, %v1081_v14  ;;  %v1084_v26 = vadd.f32 %v1916_v36, %v1013_v23  ;;  %v1014_v27 = vld [vmem:[#allocation2 + $0x170] sm:$0xff]  ;;  %v1015_v29 = vld [vmem:[#allocation2 + $0x178] sm:$0xff]  ;;  %v1210_v30 = vadd.f32 %v1146_v16, %v1082_v20 }
 0x15f   : > { %v1149_v28 = vld [vmem:[%s2267_s3 + $0x170] sm:$0xff]  ;;  %1271 = vst.msk [vmem:[#allocation3 + $0x140] sm:$0xff] %vm450_vm1, %v1207_v18  ;;  %1272 = vst.msk [vmem:[#allocation3 + $0x148] sm:$0xff] %vm450_vm1, %v1208_v19  ;;  %v1211_v31 = vadd.f32 %v1147_v22, %v1083_v21  ;;  %v1085_v32 = vadd.f32 %v1916_v36, %v1014_v27  ;;  %v1086_v33 = vadd.f32 %v1916_v36, %v1015_v29  ;;  %v1150_v34 = vld [vmem:[%s2267_s3 + $0x178] sm:$0xff] }
 0x160   : > { %v1016_v35 = vld [vmem:[#allocation2 + $0x180] sm:$0xff]  ;;  %1273 = vst.msk [vmem:[#allocation3 + $0x150] sm:$0xff] %vm450_vm1, %v1209_v25  ;;  %v1212_v38 = vadd.f32 %v1148_v24, %v1084_v26  ;;  %v1017_v40 = vld [vmem:[#allocation2 + $0x188] sm:$0xff]  ;;  %v1018_v42 = vld [vmem:[#allocation2 + $0x190] sm:$0xff] }
 0x161   : > { %v1151_v37 = vld [vmem:[%s2267_s3 + $0x180] sm:$0xff]  ;;  %v1087_v39 = vadd.f32 %v1916_v36, %v1016_v35  ;;  %v1152_v41 = vld [vmem:[%s2267_s3 + $0x188] sm:$0xff]  ;;  %1274 = vst.msk [vmem:[#allocation3 + $0x158] sm:$0xff] %vm450_vm1, %v1210_v30  ;;  %1275 = vst.msk [vmem:[#allocation3 + $0x160] sm:$0xff] %vm450_vm1, %v1211_v31  ;;  %v1213_v43 = vadd.f32 %v1149_v28, %v1085_v32  ;;  %v1214_v44 = vadd.f32 %v1150_v34, %v1086_v33 }
 0x162   : > { %v1088_v45 = vadd.f32 %v1916_v36, %v1017_v40  ;;  %v1089_v46 = vadd.f32 %v1916_v36, %v1018_v42  ;;  %v1153_v47 = vld [vmem:[%s2267_s3 + $0x190] sm:$0xff]  ;;  %v1019_v48 = vld [vmem:[#allocation2 + $0x198] sm:$0xff]  ;;  %1276 = vst.msk [vmem:[#allocation3 + $0x168] sm:$0xff] %vm450_vm1, %v1212_v38  ;;  %v1020_v52 = vld [vmem:[#allocation2 + $0x1a0] sm:$0xff] }
 0x163   : > { %v1154_v49 = vld [vmem:[%s2267_s3 + $0x198] sm:$0xff]  ;;  %v1215_v50 = vadd.f32 %v1151_v37, %v1087_v39  ;;  %v1090_v51 = vadd.f32 %v1916_v36, %v1019_v48  ;;  %v1155_v53 = vld [vmem:[%s2267_s3 + $0x1a0] sm:$0xff]  ;;  %v1021_v54 = vld [vmem:[#allocation2 + $0x1a8] sm:$0xff]  ;;  %1277 = vst.msk [vmem:[#allocation3 + $0x170] sm:$0xff] %vm450_vm1, %v1213_v43  ;;  %v1091_v57 = vadd.f32 %v1916_v36, %v1020_v52 }
 0x164   : > { %1278 = vst.msk [vmem:[#allocation3 + $0x178] sm:$0xff] %vm450_vm1, %v1214_v44  ;;  %v1216_v55 = vadd.f32 %v1152_v41, %v1088_v45  ;;  %v1217_v56 = vadd.f32 %v1153_v47, %v1089_v46  ;;  %v1092_v58 = vadd.f32 %v1916_v36, %v1021_v54  ;;  %v1156_v59 = vld [vmem:[%s2267_s3 + $0x1a8] sm:$0xff]  ;;  %v1022_v60 = vld [vmem:[#allocation2 + $0x1b0] sm:$0xff]  ;;  %v1023_v0 = vld [vmem:[#allocation2 + $0x1b8] sm:$0xff] }
 0x165   : > { %v1157_v61 = vld [vmem:[%s2267_s3 + $0x1b0] sm:$0xff]  ;;  %1279 = vst.msk [vmem:[#allocation3 + $0x180] sm:$0xff] %vm450_vm1, %v1215_v50  ;;  %v1218_v62 = vadd.f32 %v1154_v49, %v1090_v51  ;;  %v1093_v63 = vadd.f32 %v1916_v36, %v1022_v60  ;;  %v1158_v1 = vld [vmem:[%s2267_s3 + $0x1b8] sm:$0xff]  ;;  %v1024_v2 = vld [vmem:[#allocation2 + $0x1c0] sm:$0xff]  ;;  %v1219_v3 = vadd.f32 %v1155_v53, %v1091_v57  ;;  %v1094_v5 = vadd.f32 %v1916_v36, %v1023_v0 }
 0x166   : > { %1280 = vst.msk [vmem:[#allocation3 + $0x188] sm:$0xff] %vm450_vm1, %v1216_v55  ;;  %1281 = vst.msk [vmem:[#allocation3 + $0x190] sm:$0xff] %vm450_vm1, %v1217_v56  ;;  %v1220_v4 = vadd.f32 %v1156_v59, %v1092_v58  ;;  %v1095_v6 = vadd.f32 %v1916_v36, %v1024_v2  ;;  %v1159_v7 = vld [vmem:[%s2267_s3 + $0x1c0] sm:$0xff]  ;;  %v1025_v8 = vld [vmem:[#allocation2 + $0x1c8] sm:$0xff] }
 0x167   : > { %v1160_v9 = vld [vmem:[%s2267_s3 + $0x1c8] sm:$0xff]  ;;  %1282 = vst.msk [vmem:[#allocation3 + $0x198] sm:$0xff] %vm450_vm1, %v1218_v62  ;;  %v1221_v10 = vadd.f32 %v1157_v61, %v1093_v63  ;;  %v1096_v11 = vadd.f32 %v1916_v36, %v1025_v8  ;;  %v1026_v12 = vld [vmem:[#allocation2 + $0x1d0] sm:$0xff]  ;;  %v1027_v14 = vld [vmem:[#allocation2 + $0x1d8] sm:$0xff]  ;;  %v1222_v15 = vadd.f32 %v1158_v1, %v1094_v5 }
 0x168   : > { %v1161_v13 = vld [vmem:[%s2267_s3 + $0x1d0] sm:$0xff]  ;;  %1283 = vst.msk [vmem:[#allocation3 + $0x1a0] sm:$0xff] %vm450_vm1, %v1219_v3  ;;  %1284 = vst.msk [vmem:[#allocation3 + $0x1a8] sm:$0xff] %vm450_vm1, %v1220_v4  ;;  %v1223_v16 = vadd.f32 %v1159_v7, %v1095_v6  ;;  %v1097_v17 = vadd.f32 %v1916_v36, %v1026_v12  ;;  %v1098_v18 = vadd.f32 %v1916_v36, %v1027_v14  ;;  %v1162_v19 = vld [vmem:[%s2267_s3 + $0x1d8] sm:$0xff] }
 0x169   : > { %v1028_v20 = vld [vmem:[#allocation2 + $0x1e0] sm:$0xff]  ;;  %1285 = vst.msk [vmem:[#allocation3 + $0x1b0] sm:$0xff] %vm450_vm1, %v1221_v10  ;;  %v1224_v22 = vadd.f32 %v1160_v9, %v1096_v11  ;;  %v1029_v24 = vld [vmem:[#allocation2 + $0x1e8] sm:$0xff]  ;;  %v1030_v26 = vld [vmem:[#allocation2 + $0x1f0] sm:$0xff] }
 0x16a   : > { %v1163_v21 = vld [vmem:[%s2267_s3 + $0x1e0] sm:$0xff]  ;;  %v1099_v23 = vadd.f32 %v1916_v36, %v1028_v20  ;;  %v1164_v25 = vld [vmem:[%s2267_s3 + $0x1e8] sm:$0xff]  ;;  %1286 = vst.msk [vmem:[#allocation3 + $0x1b8] sm:$0xff] %vm450_vm1, %v1222_v15  ;;  %1287 = vst.msk [vmem:[#allocation3 + $0x1c0] sm:$0xff] %vm450_vm1, %v1223_v16  ;;  %v1225_v27 = vadd.f32 %v1161_v13, %v1097_v17  ;;  %v1226_v28 = vadd.f32 %v1162_v19, %v1098_v18 }
 0x16b   : > { %v1100_v29 = vadd.f32 %v1916_v36, %v1029_v24  ;;  %v1101_v30 = vadd.f32 %v1916_v36, %v1030_v26  ;;  %v1165_v31 = vld [vmem:[%s2267_s3 + $0x1f0] sm:$0xff]  ;;  %v1031_v32 = vld [vmem:[#allocation2 + $0x1f8] sm:$0xff]  ;;  %1288 = vst.msk [vmem:[#allocation3 + $0x1c8] sm:$0xff] %vm450_vm1, %v1224_v22 }
 0x16c   : > { %v1166_v33 = vld [vmem:[%s2267_s3 + $0x1f8] sm:$0xff]  ;;  %v1227_v34 = vadd.f32 %v1163_v21, %v1099_v23  ;;  %v1102_v35 = vadd.f32 %v1916_v36, %v1031_v32  ;;  %1289 = vst.msk [vmem:[#allocation3 + $0x1d0] sm:$0xff] %vm450_vm1, %v1225_v27  ;;  %1290 = vst.msk [vmem:[#allocation3 + $0x1d8] sm:$0xff] %vm450_vm1, %v1226_v28 }
 0x16d   : > { %v1228_v37 = vadd.f32 %v1164_v25, %v1100_v29  ;;  %v1229_v38 = vadd.f32 %v1165_v31, %v1101_v30 }
 0x16e   : > { %1291 = vst.msk [vmem:[#allocation3 + $0x1e0] sm:$0xff] %vm450_vm1, %v1227_v34  ;;  %v1230_v39 = vadd.f32 %v1166_v33, %v1102_v35 }
 0x16f   : > { %1292 = vst.msk [vmem:[#allocation3 + $0x1e8] sm:$0xff] %vm450_vm1, %v1228_v37  ;;  %1293 = vst.msk [vmem:[#allocation3 + $0x1f0] sm:$0xff] %vm450_vm1, %v1229_v38 }
 0x170   : > { %1294 = vst.msk [vmem:[#allocation3 + $0x1f8] sm:$0xff] %vm450_vm1, %v1230_v39 }
 0x171 PF: > { %p1516_p6 = scmp.eq.s32.totalorder %s1605_s16, 8  ;;  %s1571_s10 = smov [#allocation3]  }
 0x172   : > { %s1301_s11 = sshll.u32 %s1571_s10, 4  ;;  %s1302_s11 = int_to_ptr.vmem [resolvable:$true] %s1301_s11 }
 0x173   : > { %s1532_s12 = scalar_lea.vmem %s1302_s11, 8192  ;;  %p1539_p10 = scmp.lt.s32.totalorder %s1302_s11, %s1302_s11 }
 0x174   : > { %p1533_p7 = scmp.ne.s32.totalorder %s1302_s11, %s1532_s12  ;;  %p1540_p11 = scmp.lt.s32.totalorder %s1532_s12, %s1532_s12 }
 0x176   : > { %p1534_p8 = pnand %p1533_p7, %p1516_p6  ;;  %p1541_p12 = por %p1540_p11, %p1539_p10 }
 0x178   : > { %p1535_p9 = pneg %p1534_p8 }
 0x17a   : > { %p1542_p13 = pnand %p1541_p12, %p1535_p9 }
 0x17c   : > { %1545 = shalt.err (!%p1542_p13)
}
 0x17d   : > { %s1546_s17 = scalar_lea.hbm %s2268_s4, 8192 }
 0x17e   : > { %p1547_p0 = scmp.ne.s32.totalorder %s2268_s4, %s1546_s17  ;;  %p1552_p3 = scmp.lt.u32.totalorder %s1546_s17, %s2268_s4 }
 0x180   : > { %p1548_p1 = pnand %p1547_p0, %p1516_p6 }
 0x182   : > { %p1549_p2 = pneg %p1548_p1 }
 0x184   : > { %p1554_p4 = pnand %p1552_p3, %p1549_p2 }
 0x186   : > { %1557 = shalt.err (!%p1554_p4)
}
 0x187   : > { %s1572_s22 = smov 128   ;;  %s1573_s23 = smov 8  }
 0x188   : > { %1513 = dma.vmem_to_hbm [thread:$0]  (%p1516_p6), %s1302_s11, 8192, %s2268_s4, [#allocation4], %s1572_s22, %s1572_s22, %s1573_s23  }
 0x189   : > { %1563 = dma.done.wait (%p1516_p6), [#allocation4], 8192  }
 0x18a   : > { %1565 = vsyncadd (%p1516_p6), [#allocation4], 4294959104 }
 0x18b PF: > { %s15_s15 = sadd.s32 1, %s1568_s15  }
 0x18c   : > { %p12_p5 = scmp.ge.s32.totalorder %s15_s15, 11  }
 0x18e   :  { %14 = sbr.rel (!%p12_p5) target bundleno = 1 (0x1), region = 74 }
 0x195   :  { %1317 = vsyncpa [#allocation4], 1 }
 0x196   :  { %1319 = vsyncpa [#allocation4 + $0x1], 1 }

// kernel: swin_layers_forward.14
= control target key start
LH: loop header
LB: loop body
LE: loop exit
PB: predicated region body
PF: predicated region fallthrough
CT: control target
= control target key end

     0   :  { %s1534_s15 = smov 0   ;;  %s2368_s0 = inlined_call_operand.vmem [shape: f32[9,512,32], index: 0, kind: input, shape index: {}]   ;;  %s2369_s1 = inlined_call_operand.vmem [shape: bf16[9,32,32], index: 1, kind: input, shape index: {}]   ;;  %s2370_s2 = inlined_call_operand.vmem [shape: f32[1,32], index: 2, kind: input, shape index: {}]   ;;  %s2371_s3 = inlined_call_operand.vmem [shape: f32[512,32], index: 3, kind: input, shape index: {}]   ;;  %s2372_s4 = inlined_call_operand.vmem [shape: f32[512,32], index: 4, kind: output, shape index: {}]  }
   0x1 LB: > { %s1540_s16 = sadd.s32 4294967295, %s1506_s15   ;;  %p1337_p0 = scmp.ge.s32.totalorder %s1506_s15, 1  ;;  %s1506_s15 = sphi %s1534_s15, %s14_s15  }
   0x2   : > { %p167_p1 = scmp.lt.s32.totalorder %s1506_s15, 10 }
   0x4   : > { %p168_p2 = pnand %p1337_p0, %p167_p1 }
   0x5   : > { %p193_p3 = scmp.lt.s32.totalorder (!%p168_p2), %s1540_s16, 8  ;;  %p1342_p4 = scmp.ne.s32.totalorder (!%p168_p2), %s1540_s16, 0 }
   0x6   : > { %171 = sbr.rel (%p168_p2) target bundleno = 369 (0x171), region = 36 }
   0xd   : > { %s194_s17 = scalar_select %p193_p3, %s1540_s16, 8 }
   0xe   : > { %207 = sbr.rel (%p1342_p4) target bundleno = 47 (0x2f), region = 40  ;;  %vm208_vm0 = vcmask (!%p1342_p4), 261120   ;;  %v1508_v0 = vmov (!%p1342_p4), 0.0  }
   0xf   : > { %s1381_s18 = sshll.u32 %s194_s17, 9  ;;  %s1382_s19 = sshll.u32 %s194_s17, 4  ;;  %209 = vst.msk [vmem:[#allocation2] sm:$0xff] (!%p1342_p4), %vm208_vm0, %v1508_v0  ;;  %210 = vst.msk [vmem:[#allocation2 + $0x8] sm:$0xff] (!%p1342_p4), %vm208_vm0, %v1508_v0 }
  0x10   : > { %s1549_s22 = scalar_lea.vmem %s2368_s0, %s1381_s18  ;;  %s1554_s25 = scalar_lea.vmem %s2369_s1, %s1382_s19  ;;  %211 = vst.msk [vmem:[#allocation2 + $0x10] sm:$0xff] (!%p1342_p4), %vm208_vm0, %v1508_v0  ;;  %212 = vst.msk [vmem:[#allocation2 + $0x18] sm:$0xff] (!%p1342_p4), %vm208_vm0, %v1508_v0 }
  0x11   : > { %213 = vst.msk [vmem:[#allocation2 + $0x20] sm:$0xff] (!%p1342_p4), %vm208_vm0, %v1508_v0  ;;  %214 = vst.msk [vmem:[#allocation2 + $0x28] sm:$0xff] (!%p1342_p4), %vm208_vm0, %v1508_v0 }
  0x12   : > { %215 = vst.msk [vmem:[#allocation2 + $0x30] sm:$0xff] (!%p1342_p4), %vm208_vm0, %v1508_v0  ;;  %216 = vst.msk [vmem:[#allocation2 + $0x38] sm:$0xff] (!%p1342_p4), %vm208_vm0, %v1508_v0 }
  0x13   : > { %217 = vst.msk [vmem:[#allocation2 + $0x40] sm:$0xff] (!%p1342_p4), %vm208_vm0, %v1508_v0  ;;  %218 = vst.msk [vmem:[#allocation2 + $0x48] sm:$0xff] (!%p1342_p4), %vm208_vm0, %v1508_v0 }
  0x14   : > { %219 = vst.msk [vmem:[#allocation2 + $0x50] sm:$0xff] (!%p1342_p4), %vm208_vm0, %v1508_v0  ;;  %220 = vst.msk [vmem:[#allocation2 + $0x58] sm:$0xff] (!%p1342_p4), %vm208_vm0, %v1508_v0 }
  0x15   : > { %221 = vst.msk [vmem:[#allocation2 + $0x60] sm:$0xff] %vm208_vm0, %v1508_v0  ;;  %222 = vst.msk [vmem:[#allocation2 + $0x68] sm:$0xff] %vm208_vm0, %v1508_v0 }
  0x16   : > { %223 = vst.msk [vmem:[#allocation2 + $0x70] sm:$0xff] %vm208_vm0, %v1508_v0  ;;  %224 = vst.msk [vmem:[#allocation2 + $0x78] sm:$0xff] %vm208_vm0, %v1508_v0 }
  0x17   : > { %225 = vst.msk [vmem:[#allocation2 + $0x80] sm:$0xff] %vm208_vm0, %v1508_v0  ;;  %226 = vst.msk [vmem:[#allocation2 + $0x88] sm:$0xff] %vm208_vm0, %v1508_v0 }
  0x18   : > { %227 = vst.msk [vmem:[#allocation2 + $0x90] sm:$0xff] %vm208_vm0, %v1508_v0  ;;  %228 = vst.msk [vmem:[#allocation2 + $0x98] sm:$0xff] %vm208_vm0, %v1508_v0 }
  0x19   : > { %229 = vst.msk [vmem:[#allocation2 + $0xa0] sm:$0xff] %vm208_vm0, %v1508_v0  ;;  %230 = vst.msk [vmem:[#allocation2 + $0xa8] sm:$0xff] %vm208_vm0, %v1508_v0 }
  0x1a   : > { %231 = vst.msk [vmem:[#allocation2 + $0xb0] sm:$0xff] %vm208_vm0, %v1508_v0  ;;  %232 = vst.msk [vmem:[#allocation2 + $0xb8] sm:$0xff] %vm208_vm0, %v1508_v0 }
  0x1b   : > { %233 = vst.msk [vmem:[#allocation2 + $0xc0] sm:$0xff] %vm208_vm0, %v1508_v0  ;;  %234 = vst.msk [vmem:[#allocation2 + $0xc8] sm:$0xff] %vm208_vm0, %v1508_v0 }
  0x1c   : > { %235 = vst.msk [vmem:[#allocation2 + $0xd0] sm:$0xff] %vm208_vm0, %v1508_v0  ;;  %236 = vst.msk [vmem:[#allocation2 + $0xd8] sm:$0xff] %vm208_vm0, %v1508_v0 }
  0x1d   : > { %237 = vst.msk [vmem:[#allocation2 + $0xe0] sm:$0xff] %vm208_vm0, %v1508_v0  ;;  %238 = vst.msk [vmem:[#allocation2 + $0xe8] sm:$0xff] %vm208_vm0, %v1508_v0 }
  0x1e   : > { %239 = vst.msk [vmem:[#allocation2 + $0xf0] sm:$0xff] %vm208_vm0, %v1508_v0  ;;  %240 = vst.msk [vmem:[#allocation2 + $0xf8] sm:$0xff] %vm208_vm0, %v1508_v0 }
  0x1f   : > { %241 = vst.msk [vmem:[#allocation2 + $0x100] sm:$0xff] %vm208_vm0, %v1508_v0  ;;  %242 = vst.msk [vmem:[#allocation2 + $0x108] sm:$0xff] %vm208_vm0, %v1508_v0 }
  0x20   : > { %243 = vst.msk [vmem:[#allocation2 + $0x110] sm:$0xff] %vm208_vm0, %v1508_v0  ;;  %244 = vst.msk [vmem:[#allocation2 + $0x118] sm:$0xff] %vm208_vm0, %v1508_v0 }
  0x21   : > { %245 = vst.msk [vmem:[#allocation2 + $0x120] sm:$0xff] %vm208_vm0, %v1508_v0  ;;  %246 = vst.msk [vmem:[#allocation2 + $0x128] sm:$0xff] %vm208_vm0, %v1508_v0 }
  0x22   : > { %247 = vst.msk [vmem:[#allocation2 + $0x130] sm:$0xff] %vm208_vm0, %v1508_v0  ;;  %248 = vst.msk [vmem:[#allocation2 + $0x138] sm:$0xff] %vm208_vm0, %v1508_v0 }
  0x23   : > { %249 = vst.msk [vmem:[#allocation2 + $0x140] sm:$0xff] %vm208_vm0, %v1508_v0  ;;  %250 = vst.msk [vmem:[#allocation2 + $0x148] sm:$0xff] %vm208_vm0, %v1508_v0 }
  0x24   : > { %251 = vst.msk [vmem:[#allocation2 + $0x150] sm:$0xff] %vm208_vm0, %v1508_v0  ;;  %252 = vst.msk [vmem:[#allocation2 + $0x158] sm:$0xff] %vm208_vm0, %v1508_v0 }
  0x25   : > { %253 = vst.msk [vmem:[#allocation2 + $0x160] sm:$0xff] %vm208_vm0, %v1508_v0  ;;  %254 = vst.msk [vmem:[#allocation2 + $0x168] sm:$0xff] %vm208_vm0, %v1508_v0 }
  0x26   : > { %255 = vst.msk [vmem:[#allocation2 + $0x170] sm:$0xff] %vm208_vm0, %v1508_v0  ;;  %256 = vst.msk [vmem:[#allocation2 + $0x178] sm:$0xff] %vm208_vm0, %v1508_v0 }
  0x27   : > { %257 = vst.msk [vmem:[#allocation2 + $0x180] sm:$0xff] %vm208_vm0, %v1508_v0  ;;  %258 = vst.msk [vmem:[#allocation2 + $0x188] sm:$0xff] %vm208_vm0, %v1508_v0 }
  0x28   : > { %259 = vst.msk [vmem:[#allocation2 + $0x190] sm:$0xff] %vm208_vm0, %v1508_v0  ;;  %260 = vst.msk [vmem:[#allocation2 + $0x198] sm:$0xff] %vm208_vm0, %v1508_v0 }
  0x29   : > { %261 = vst.msk [vmem:[#allocation2 + $0x1a0] sm:$0xff] %vm208_vm0, %v1508_v0  ;;  %262 = vst.msk [vmem:[#allocation2 + $0x1a8] sm:$0xff] %vm208_vm0, %v1508_v0 }
  0x2a   : > { %263 = vst.msk [vmem:[#allocation2 + $0x1b0] sm:$0xff] %vm208_vm0, %v1508_v0  ;;  %264 = vst.msk [vmem:[#allocation2 + $0x1b8] sm:$0xff] %vm208_vm0, %v1508_v0 }
  0x2b   : > { %265 = vst.msk [vmem:[#allocation2 + $0x1c0] sm:$0xff] %vm208_vm0, %v1508_v0  ;;  %266 = vst.msk [vmem:[#allocation2 + $0x1c8] sm:$0xff] %vm208_vm0, %v1508_v0 }
  0x2c   : > { %267 = vst.msk [vmem:[#allocation2 + $0x1d0] sm:$0xff] %vm208_vm0, %v1508_v0  ;;  %268 = vst.msk [vmem:[#allocation2 + $0x1d8] sm:$0xff] %vm208_vm0, %v1508_v0 }
  0x2d   : > { %269 = vst.msk [vmem:[#allocation2 + $0x1e0] sm:$0xff] %vm208_vm0, %v1508_v0  ;;  %270 = vst.msk [vmem:[#allocation2 + $0x1e8] sm:$0xff] %vm208_vm0, %v1508_v0 }
  0x2e   : > { %271 = vst.msk [vmem:[#allocation2 + $0x1f0] sm:$0xff] %vm208_vm0, %v1508_v0  ;;  %272 = vst.msk [vmem:[#allocation2 + $0x1f8] sm:$0xff] %vm208_vm0, %v1508_v0 }
  0x2f PF: > { %v1498_v1 = vld [vmem:[%s1554_s25] sm:$0xff]   ;;  %v1499_v2 = vld [vmem:[%s1554_s25 + $0x8] sm:$0xff]   ;;  %vm449_vm1 = vcmask 261120   ;;  %v339_v8 = vld [vmem:[%s1549_s22 + $0x10] sm:$0xff]  ;;  %p1377_p5 = scmp.ne.s32.totalorder %s1540_s16, 8 }
  0x30   : > { %1417 = vmatprep.subr.bf16.mxu0 %v1498_v1  ;;  %1485 = vmatprep.subr.bf16.mxu1 %v1498_v1  ;;  %v337_v3 = vld [vmem:[%s1549_s22] sm:$0xff]  ;;  %v338_v4 = vld [vmem:[%s1549_s22 + $0x8] sm:$0xff]  ;;  %v340_v9 = vld [vmem:[%s1549_s22 + $0x18] sm:$0xff] }
  0x31   : > { %v369_v5 = vld [vmem:[%s1549_s22 + $0x100] sm:$0xff]  ;;  %1418 = vmatpush3.bf16.msra.mxu0 %v1498_v1  ;;  %1487 = vmatpush3.bf16.msra.mxu1 %v1498_v1  ;;  %v401_v6 = vpack.c.bf16 %v338_v4, %v337_v3  ;;  %v370_v7 = vld [vmem:[%s1549_s22 + $0x108] sm:$0xff]  ;;  %v371_v11 = vld [vmem:[%s1549_s22 + $0x110] sm:$0xff]  ;;  %v402_v17 = vpack.c.bf16 %v340_v9, %v339_v8 }
  0x32   : > { %1419 = vmatprep.subr.bf16.mxu0 %v1499_v2  ;;  %1486 = vmatprep.subr.bf16.mxu1 %v1499_v2  ;;  %v417_v10 = vpack.c.bf16 %v370_v7, %v369_v5  ;;  %v372_v12 = vld [vmem:[%s1549_s22 + $0x118] sm:$0xff]  ;;  %v341_v13 = vld [vmem:[%s1549_s22 + $0x20] sm:$0xff]  ;;  %v342_v14 = vld [vmem:[%s1549_s22 + $0x28] sm:$0xff] }
  0x33   : > { %1421 = vmatprep.mubr.msk.bf16.mxu0 %vm449_vm1, %v401_v6  ;;  %v373_v15 = vld [vmem:[%s1549_s22 + $0x120] sm:$0xff]  ;;  %v374_v16 = vld [vmem:[%s1549_s22 + $0x128] sm:$0xff]  ;;  %v418_v18 = vpack.c.bf16 %v372_v12, %v371_v11  ;;  %v403_v19 = vpack.c.bf16 %v342_v14, %v341_v13  ;;  %v343_v21 = vld [vmem:[%s1549_s22 + $0x30] sm:$0xff] }
  0x34   : > { %1453 = vmatprep.mubr.msk.bf16.mxu1 %vm449_vm1, %v417_v10  ;;  %v419_v20 = vpack.c.bf16 %v374_v16, %v373_v15  ;;  %v344_v22 = vld [vmem:[%s1549_s22 + $0x38] sm:$0xff]  ;;  %v375_v23 = vld [vmem:[%s1549_s22 + $0x130] sm:$0xff]  ;;  %v345_v25 = vld [vmem:[%s1549_s22 + $0x40] sm:$0xff] }
  0x35   : > { %1420 = vmatpush3.bf16.msra.mxu0 %v1499_v2  ;;  %1488 = vmatpush3.bf16.msra.mxu1 %v1499_v2  ;;  %v376_v24 = vld [vmem:[%s1549_s22 + $0x138] sm:$0xff]  ;;  %v346_v26 = vld [vmem:[%s1549_s22 + $0x48] sm:$0xff]  ;;  %v377_v27 = vld [vmem:[%s1549_s22 + $0x140] sm:$0xff]  ;;  %v404_v29 = vpack.c.bf16 %v344_v22, %v343_v21 }
  0x36   : > { %v378_v28 = vld [vmem:[%s1549_s22 + $0x148] sm:$0xff]  ;;  %v420_v30 = vpack.c.bf16 %v376_v24, %v375_v23  ;;  %v405_v31 = vpack.c.bf16 %v346_v26, %v345_v25  ;;  %v347_v33 = vld [vmem:[%s1549_s22 + $0x50] sm:$0xff]  ;;  %v348_v34 = vld [vmem:[%s1549_s22 + $0x58] sm:$0xff] }
  0x37   : > { %v421_v32 = vpack.c.bf16 %v378_v28, %v377_v27  ;;  %v379_v35 = vld [vmem:[%s1549_s22 + $0x150] sm:$0xff]  ;;  %v380_v36 = vld [vmem:[%s1549_s22 + $0x158] sm:$0xff]  ;;  %v349_v37 = vld [vmem:[%s1549_s22 + $0x60] sm:$0xff]  ;;  %v406_v41 = vpack.c.bf16 %v348_v34, %v347_v33 }
  0x38   : > { %1422 = vmatmul.mubr.msk.bf16.vlgmr.msra.gmra.mrb[0].mxu0 %vm449_vm1, %v402_v17  ;;  %1454 = vmatmul.mubr.msk.bf16.vlgmr.msra.gmra.mrb[0].mxu1 %vm449_vm1, %v418_v18  ;;  %v350_v38 = vld [vmem:[%s1549_s22 + $0x68] sm:$0xff]  ;;  %v381_v39 = vld [vmem:[%s1549_s22 + $0x160] sm:$0xff]  ;;  %v422_v42 = vpack.c.bf16 %v380_v36, %v379_v35  ;;  %v351_v45 = vld [vmem:[%s1549_s22 + $0x70] sm:$0xff] }
  0x39   : > { %1425 = vmatprep.mubr.msk.bf16.mxu0 %vm449_vm1, %v403_v19  ;;  %1457 = vmatprep.mubr.msk.bf16.mxu1 %vm449_vm1, %v419_v20  ;;  %v382_v40 = vld [vmem:[%s1549_s22 + $0x168] sm:$0xff]  ;;  %v407_v43 = vpack.c.bf16 %v350_v38, %v349_v37  ;;  %v352_v46 = vld [vmem:[%s1549_s22 + $0x78] sm:$0xff]  ;;  %v383_v47 = vld [vmem:[%s1549_s22 + $0x170] sm:$0xff] }
  0x3a   : > { %v423_v44 = vpack.c.bf16 %v382_v40, %v381_v39  ;;  %v384_v48 = vld [vmem:[%s1549_s22 + $0x178] sm:$0xff]  ;;  %v353_v49 = vld [vmem:[%s1549_s22 + $0x80] sm:$0xff]  ;;  %v354_v50 = vld [vmem:[%s1549_s22 + $0x88] sm:$0xff]  ;;  %v408_v53 = vpack.c.bf16 %v352_v46, %v351_v45 }
  0x3b   : > { %v385_v51 = vld [vmem:[%s1549_s22 + $0x180] sm:$0xff]  ;;  %v386_v52 = vld [vmem:[%s1549_s22 + $0x188] sm:$0xff]  ;;  %v424_v54 = vpack.c.bf16 %v384_v48, %v383_v47  ;;  %v409_v55 = vpack.c.bf16 %v354_v50, %v353_v49  ;;  %v355_v57 = vld [vmem:[%s1549_s22 + $0x90] sm:$0xff] }
  0x3c   : > { %v425_v56 = vpack.c.bf16 %v386_v52, %v385_v51  ;;  %v356_v58 = vld [vmem:[%s1549_s22 + $0x98] sm:$0xff]  ;;  %v387_v59 = vld [vmem:[%s1549_s22 + $0x190] sm:$0xff]  ;;  %v357_v61 = vld [vmem:[%s1549_s22 + $0xa0] sm:$0xff] }
  0x3d   : > { %v388_v60 = vld [vmem:[%s1549_s22 + $0x198] sm:$0xff]  ;;  %v358_v62 = vld [vmem:[%s1549_s22 + $0xa8] sm:$0xff]  ;;  %v389_v63 = vld [vmem:[%s1549_s22 + $0x1a0] sm:$0xff]  ;;  %v410_v1 = vpack.c.bf16 %v356_v58, %v355_v57 }
  0x3e   : > { %v390_v0 = vld [vmem:[%s1549_s22 + $0x1a8] sm:$0xff]  ;;  %v426_v2 = vpack.c.bf16 %v388_v60, %v387_v59  ;;  %v411_v3 = vpack.c.bf16 %v358_v62, %v357_v61  ;;  %v359_v5 = vld [vmem:[%s1549_s22 + $0xb0] sm:$0xff]  ;;  %v360_v6 = vld [vmem:[%s1549_s22 + $0xb8] sm:$0xff] }
  0x3f   : > { %v427_v4 = vpack.c.bf16 %v390_v0, %v389_v63  ;;  %v391_v7 = vld [vmem:[%s1549_s22 + $0x1b0] sm:$0xff]  ;;  %v392_v8 = vld [vmem:[%s1549_s22 + $0x1b8] sm:$0xff]  ;;  %v361_v9 = vld [vmem:[%s1549_s22 + $0xc0] sm:$0xff]  ;;  %v412_v13 = vpack.c.bf16 %v360_v6, %v359_v5 }
  0x40   : > { %1426 = vmatmul.mubr.msk.bf16.gmra.mrb[4].mxu0 %vm449_vm1, %v404_v29  ;;  %1458 = vmatmul.mubr.msk.bf16.gmra.mrb[4].mxu1 %vm449_vm1, %v420_v30  ;;  %v362_v10 = vld [vmem:[%s1549_s22 + $0xc8] sm:$0xff]  ;;  %v393_v11 = vld [vmem:[%s1549_s22 + $0x1c0] sm:$0xff]  ;;  %v428_v14 = vpack.c.bf16 %v392_v8, %v391_v7  ;;  %v363_v17 = vld [vmem:[%s1549_s22 + $0xd0] sm:$0xff] }
  0x41   : > { %1429 = vmatprep.mubr.msk.bf16.mxu0 %vm449_vm1, %v405_v31  ;;  %1461 = vmatprep.mubr.msk.bf16.mxu1 %vm449_vm1, %v421_v32  ;;  %v394_v12 = vld [vmem:[%s1549_s22 + $0x1c8] sm:$0xff]  ;;  %v413_v15 = vpack.c.bf16 %v362_v10, %v361_v9  ;;  %v364_v18 = vld [vmem:[%s1549_s22 + $0xd8] sm:$0xff]  ;;  %v395_v19 = vld [vmem:[%s1549_s22 + $0x1d0] sm:$0xff] }
  0x42   : > { %v429_v16 = vpack.c.bf16 %v394_v12, %v393_v11  ;;  %v396_v20 = vld [vmem:[%s1549_s22 + $0x1d8] sm:$0xff]  ;;  %v365_v21 = vld [vmem:[%s1549_s22 + $0xe0] sm:$0xff]  ;;  %v366_v22 = vld [vmem:[%s1549_s22 + $0xe8] sm:$0xff]  ;;  %v414_v25 = vpack.c.bf16 %v364_v18, %v363_v17 }
  0x43   : > { %v397_v23 = vld [vmem:[%s1549_s22 + $0x1e0] sm:$0xff]  ;;  %v398_v24 = vld [vmem:[%s1549_s22 + $0x1e8] sm:$0xff]  ;;  %v430_v26 = vpack.c.bf16 %v396_v20, %v395_v19  ;;  %v415_v27 = vpack.c.bf16 %v366_v22, %v365_v21  ;;  %v367_v29 = vld [vmem:[%s1549_s22 + $0xf0] sm:$0xff] }
  0x44   : > { %v431_v28 = vpack.c.bf16 %v398_v24, %v397_v23  ;;  %v368_v30 = vld [vmem:[%s1549_s22 + $0xf8] sm:$0xff]  ;;  %v399_v31 = vld [vmem:[%s1549_s22 + $0x1f0] sm:$0xff]  ;;  %v273_v37 = vld [vmem:[#allocation2] sm:$0xff] }
  0x45   : > { %v400_v32 = vld [vmem:[%s1549_s22 + $0x1f8] sm:$0xff]  ;;  %v416_v33 = vpack.c.bf16 %v368_v30, %v367_v29  ;;  %v275_v35 = vld [vmem:[#allocation2 + $0x10] sm:$0xff]  ;;  %v305_v38 = vld [vmem:[#allocation2 + $0x100] sm:$0xff] }
  0x46   : > { %v432_v34 = vpack.c.bf16 %v400_v32, %v399_v31  ;;  %v307_v36 = vld [vmem:[#allocation2 + $0x110] sm:$0xff]  ;;  %v274_v47 = vld [vmem:[#allocation2 + $0x8] sm:$0xff]  ;;  %v277_v61 = vld [vmem:[#allocation2 + $0x20] sm:$0xff] }
  0x47   : > { %v306_v48 = vld [vmem:[#allocation2 + $0x108] sm:$0xff]  ;;  %v279_v59 = vld [vmem:[#allocation2 + $0x30] sm:$0xff]  ;;  %v309_v62 = vld [vmem:[#allocation2 + $0x120] sm:$0xff] }
  0x48   : > { %1430 = vmatmul.mubr.msk.bf16.gmra.mrb[8].mxu0 %vm449_vm1, %v406_v41  ;;  %1462 = vmatmul.mubr.msk.bf16.gmra.mrb[8].mxu1 %vm449_vm1, %v422_v42  ;;  %v276_v41 = vld [vmem:[#allocation2 + $0x18] sm:$0xff]  ;;  %v311_v60 = vld [vmem:[#allocation2 + $0x130] sm:$0xff]  ;;  %v278_v7 = vld [vmem:[#allocation2 + $0x28] sm:$0xff] }
  0x49   : > { %1433 = vmatprep.mubr.msk.bf16.mxu0 %vm449_vm1, %v407_v43  ;;  %1465 = vmatprep.mubr.msk.bf16.mxu1 %vm449_vm1, %v423_v44  ;;  %v308_v42 = vld [vmem:[#allocation2 + $0x118] sm:$0xff]  ;;  %v310_v8 = vld [vmem:[#allocation2 + $0x128] sm:$0xff]  ;;  %v283_v19 = vld [vmem:[#allocation2 + $0x50] sm:$0xff] }
  0x4a   : > { %v315_v20 = vld [vmem:[#allocation2 + $0x150] sm:$0xff]  ;;  %v281_v21 = vld [vmem:[#allocation2 + $0x40] sm:$0xff]  ;;  %v282_v31 = vld [vmem:[#allocation2 + $0x48] sm:$0xff] }
  0x4b   : > { %v313_v22 = vld [vmem:[#allocation2 + $0x140] sm:$0xff]  ;;  %v314_v32 = vld [vmem:[#allocation2 + $0x148] sm:$0xff] }
  0x50   : > { %1434 = vmatmul.mubr.msk.bf16.gmra.mrb[12].mxu0 %vm449_vm1, %v408_v53  ;;  %1466 = vmatmul.mubr.msk.bf16.gmra.mrb[12].mxu1 %vm449_vm1, %v424_v54 }
  0x51   : > { %1437 = vmatprep.mubr.msk.bf16.mxu0 %vm449_vm1, %v409_v55  ;;  %1469 = vmatprep.mubr.msk.bf16.mxu1 %vm449_vm1, %v425_v56 }
  0x58   : > { %1438 = vmatmul.mubr.msk.bf16.gmra.mrb[16].mxu0 %vm449_vm1, %v410_v1  ;;  %1470 = vmatmul.mubr.msk.bf16.gmra.mrb[16].mxu1 %vm449_vm1, %v426_v2  ;;  %v280_v1 = vld [vmem:[#allocation2 + $0x38] sm:$0xff] }
  0x59   : > { %1441 = vmatprep.mubr.msk.bf16.mxu0 %vm449_vm1, %v411_v3  ;;  %1473 = vmatprep.mubr.msk.bf16.mxu1 %vm449_vm1, %v427_v4  ;;  %v312_v2 = vld [vmem:[#allocation2 + $0x138] sm:$0xff] }
  0x60   : > { %1442 = vmatmul.mubr.msk.bf16.gmra.mrb[20].mxu0 %vm449_vm1, %v412_v13  ;;  %1474 = vmatmul.mubr.msk.bf16.gmra.mrb[20].mxu1 %vm449_vm1, %v428_v14 }
  0x61   : > { %1445 = vmatprep.mubr.msk.bf16.mxu0 %vm449_vm1, %v413_v15  ;;  %1477 = vmatprep.mubr.msk.bf16.mxu1 %vm449_vm1, %v429_v16 }
  0x68   : > { %1446 = vmatmul.mubr.msk.bf16.gmra.mrb[24].mxu0 %vm449_vm1, %v414_v25  ;;  %1478 = vmatmul.mubr.msk.bf16.gmra.mrb[24].mxu1 %vm449_vm1, %v430_v26  ;;  %v284_v25 = vld [vmem:[#allocation2 + $0x58] sm:$0xff] }
  0x69   : > { %1449 = vmatprep.mubr.msk.bf16.mxu0 %vm449_vm1, %v415_v27  ;;  %1481 = vmatprep.mubr.msk.bf16.mxu1 %vm449_vm1, %v431_v28  ;;  %v316_v26 = vld [vmem:[#allocation2 + $0x158] sm:$0xff] }
  0x70   : > { %1450 = vmatmul.mubr.msk.bf16.gmra.mrb[28].mxu0 %vm449_vm1, %v416_v33  ;;  %1482 = vmatmul.mubr.msk.bf16.gmra.mrb[28].mxu1 %vm449_vm1, %v432_v34 }
 0x10b   : > { %v1423_v39 = vpop.f32.mrb[0].mxu0  ;;  %v1455_v40 = vpop.f32.mrb[0].mxu1 }
 0x10c   : > { %v837_v43 = vadd.f32 %v1423_v39, %v275_v35  ;;  %v869_v44 = vadd.f32 %v1455_v40, %v307_v36  ;;  %v580_v45 = vpop.f32.mrb[1].mxu0  ;;  %v708_v46 = vpop.f32.mrb[1].mxu1 }
 0x10d   : > { %v835_v49 = vadd.f32 %v580_v45, %v273_v37  ;;  %v867_v50 = vadd.f32 %v708_v46, %v305_v38  ;;  %v1424_v51 = vpop.f32.mrb[2].mxu0  ;;  %v1456_v52 = vpop.f32.mrb[2].mxu1  ;;  %v285_v45 = vld [vmem:[#allocation2 + $0x60] sm:$0xff] }
 0x10e   : > { %901 = vst.msk [vmem:[#allocation2 + $0x10] sm:$0xff] %vm449_vm1, %v837_v43  ;;  %933 = vst.msk [vmem:[#allocation2 + $0x110] sm:$0xff] %vm449_vm1, %v869_v44  ;;  %v838_v53 = vadd.f32 %v1424_v51, %v276_v41  ;;  %v870_v54 = vadd.f32 %v1456_v52, %v308_v42  ;;  %v583_v55 = vpop.f32.mrb[3].mxu0  ;;  %v711_v56 = vpop.f32.mrb[3].mxu1  ;;  %v287_v43 = vld [vmem:[#allocation2 + $0x70] sm:$0xff]  ;;  %v317_v46 = vld [vmem:[#allocation2 + $0x160] sm:$0xff] }
 0x10f   : > { %899 = vst.msk [vmem:[#allocation2] sm:$0xff] %vm449_vm1, %v835_v49  ;;  %931 = vst.msk [vmem:[#allocation2 + $0x100] sm:$0xff] %vm449_vm1, %v867_v50  ;;  %v836_v57 = vadd.f32 %v583_v55, %v274_v47  ;;  %v868_v58 = vadd.f32 %v711_v56, %v306_v48  ;;  %v319_v44 = vld [vmem:[#allocation2 + $0x170] sm:$0xff]  ;;  %v288_v49 = vld [vmem:[#allocation2 + $0x78] sm:$0xff] }
 0x110   : > { %902 = vst.msk [vmem:[#allocation2 + $0x18] sm:$0xff] %vm449_vm1, %v838_v53  ;;  %934 = vst.msk [vmem:[#allocation2 + $0x118] sm:$0xff] %vm449_vm1, %v870_v54  ;;  %v320_v50 = vld [vmem:[#allocation2 + $0x178] sm:$0xff]  ;;  %v286_v55 = vld [vmem:[#allocation2 + $0x68] sm:$0xff] }
 0x111   : > { %900 = vst.msk [vmem:[#allocation2 + $0x8] sm:$0xff] %vm449_vm1, %v836_v57  ;;  %932 = vst.msk [vmem:[#allocation2 + $0x108] sm:$0xff] %vm449_vm1, %v868_v58  ;;  %v318_v56 = vld [vmem:[#allocation2 + $0x168] sm:$0xff] }
 0x113   : > { %v1427_v63 = vpop.f32.mrb[4].mxu0  ;;  %v1459_v0 = vpop.f32.mrb[4].mxu1 }
 0x114   : > { %v841_v3 = vadd.f32 %v1427_v63, %v279_v59  ;;  %v873_v4 = vadd.f32 %v1459_v0, %v311_v60  ;;  %v596_v5 = vpop.f32.mrb[5].mxu0  ;;  %v724_v6 = vpop.f32.mrb[5].mxu1 }
 0x115   : > { %v839_v9 = vadd.f32 %v596_v5, %v277_v61  ;;  %v871_v10 = vadd.f32 %v724_v6, %v309_v62  ;;  %v1428_v11 = vpop.f32.mrb[6].mxu0  ;;  %v1460_v12 = vpop.f32.mrb[6].mxu1  ;;  %v289_v5 = vld [vmem:[#allocation2 + $0x80] sm:$0xff] }
 0x116   : > { %905 = vst.msk [vmem:[#allocation2 + $0x30] sm:$0xff] %vm449_vm1, %v841_v3  ;;  %937 = vst.msk [vmem:[#allocation2 + $0x130] sm:$0xff] %vm449_vm1, %v873_v4  ;;  %v842_v13 = vadd.f32 %v1428_v11, %v280_v1  ;;  %v874_v14 = vadd.f32 %v1460_v12, %v312_v2  ;;  %v599_v15 = vpop.f32.mrb[7].mxu0  ;;  %v727_v16 = vpop.f32.mrb[7].mxu1  ;;  %v291_v3 = vld [vmem:[#allocation2 + $0x90] sm:$0xff]  ;;  %v321_v6 = vld [vmem:[#allocation2 + $0x180] sm:$0xff] }
 0x117   : > { %903 = vst.msk [vmem:[#allocation2 + $0x20] sm:$0xff] %vm449_vm1, %v839_v9  ;;  %935 = vst.msk [vmem:[#allocation2 + $0x120] sm:$0xff] %vm449_vm1, %v871_v10  ;;  %v840_v17 = vadd.f32 %v599_v15, %v278_v7  ;;  %v872_v18 = vadd.f32 %v727_v16, %v310_v8  ;;  %v323_v4 = vld [vmem:[#allocation2 + $0x190] sm:$0xff]  ;;  %v292_v9 = vld [vmem:[#allocation2 + $0x98] sm:$0xff] }
 0x118   : > { %906 = vst.msk [vmem:[#allocation2 + $0x38] sm:$0xff] %vm449_vm1, %v842_v13  ;;  %938 = vst.msk [vmem:[#allocation2 + $0x138] sm:$0xff] %vm449_vm1, %v874_v14  ;;  %v324_v10 = vld [vmem:[#allocation2 + $0x198] sm:$0xff]  ;;  %v290_v15 = vld [vmem:[#allocation2 + $0x88] sm:$0xff] }
 0x119   : > { %904 = vst.msk [vmem:[#allocation2 + $0x28] sm:$0xff] %vm449_vm1, %v840_v17  ;;  %936 = vst.msk [vmem:[#allocation2 + $0x128] sm:$0xff] %vm449_vm1, %v872_v18  ;;  %v322_v16 = vld [vmem:[#allocation2 + $0x188] sm:$0xff] }
 0x11b   : > { %v1431_v23 = vpop.f32.mrb[8].mxu0  ;;  %v1463_v24 = vpop.f32.mrb[8].mxu1 }
 0x11c   : > { %v845_v27 = vadd.f32 %v1431_v23, %v283_v19  ;;  %v877_v28 = vadd.f32 %v1463_v24, %v315_v20  ;;  %v612_v29 = vpop.f32.mrb[9].mxu0  ;;  %v740_v30 = vpop.f32.mrb[9].mxu1 }
 0x11d   : > { %v843_v33 = vadd.f32 %v612_v29, %v281_v21  ;;  %v875_v34 = vadd.f32 %v740_v30, %v313_v22  ;;  %v1432_v35 = vpop.f32.mrb[10].mxu0  ;;  %v1464_v36 = vpop.f32.mrb[10].mxu1  ;;  %v293_v29 = vld [vmem:[#allocation2 + $0xa0] sm:$0xff] }
 0x11e   : > { %909 = vst.msk [vmem:[#allocation2 + $0x50] sm:$0xff] %vm449_vm1, %v845_v27  ;;  %941 = vst.msk [vmem:[#allocation2 + $0x150] sm:$0xff] %vm449_vm1, %v877_v28  ;;  %v846_v37 = vadd.f32 %v1432_v35, %v284_v25  ;;  %v878_v38 = vadd.f32 %v1464_v36, %v316_v26  ;;  %v615_v39 = vpop.f32.mrb[11].mxu0  ;;  %v743_v40 = vpop.f32.mrb[11].mxu1  ;;  %v295_v27 = vld [vmem:[#allocation2 + $0xb0] sm:$0xff]  ;;  %v325_v30 = vld [vmem:[#allocation2 + $0x1a0] sm:$0xff] }
 0x11f   : > { %907 = vst.msk [vmem:[#allocation2 + $0x40] sm:$0xff] %vm449_vm1, %v843_v33  ;;  %939 = vst.msk [vmem:[#allocation2 + $0x140] sm:$0xff] %vm449_vm1, %v875_v34  ;;  %v844_v41 = vadd.f32 %v615_v39, %v282_v31  ;;  %v876_v42 = vadd.f32 %v743_v40, %v314_v32  ;;  %v327_v28 = vld [vmem:[#allocation2 + $0x1b0] sm:$0xff]  ;;  %v296_v33 = vld [vmem:[#allocation2 + $0xb8] sm:$0xff] }
 0x120   : > { %910 = vst.msk [vmem:[#allocation2 + $0x58] sm:$0xff] %vm449_vm1, %v846_v37  ;;  %942 = vst.msk [vmem:[#allocation2 + $0x158] sm:$0xff] %vm449_vm1, %v878_v38  ;;  %v328_v34 = vld [vmem:[#allocation2 + $0x1b8] sm:$0xff]  ;;  %v294_v39 = vld [vmem:[#allocation2 + $0xa8] sm:$0xff] }
 0x121   : > { %908 = vst.msk [vmem:[#allocation2 + $0x48] sm:$0xff] %vm449_vm1, %v844_v41  ;;  %940 = vst.msk [vmem:[#allocation2 + $0x148] sm:$0xff] %vm449_vm1, %v876_v42  ;;  %v326_v40 = vld [vmem:[#allocation2 + $0x1a8] sm:$0xff] }
 0x123   : > { %v1435_v47 = vpop.f32.mrb[12].mxu0  ;;  %v1467_v48 = vpop.f32.mrb[12].mxu1 }
 0x124   : > { %v849_v51 = vadd.f32 %v1435_v47, %v287_v43  ;;  %v881_v52 = vadd.f32 %v1467_v48, %v319_v44  ;;  %v628_v53 = vpop.f32.mrb[13].mxu0  ;;  %v756_v54 = vpop.f32.mrb[13].mxu1 }
 0x125   : > { %v847_v57 = vadd.f32 %v628_v53, %v285_v45  ;;  %v879_v58 = vadd.f32 %v756_v54, %v317_v46  ;;  %v1436_v59 = vpop.f32.mrb[14].mxu0  ;;  %v1468_v60 = vpop.f32.mrb[14].mxu1  ;;  %v297_v53 = vld [vmem:[#allocation2 + $0xc0] sm:$0xff] }
 0x126   : > { %913 = vst.msk [vmem:[#allocation2 + $0x70] sm:$0xff] %vm449_vm1, %v849_v51  ;;  %945 = vst.msk [vmem:[#allocation2 + $0x170] sm:$0xff] %vm449_vm1, %v881_v52  ;;  %v850_v61 = vadd.f32 %v1436_v59, %v288_v49  ;;  %v882_v62 = vadd.f32 %v1468_v60, %v320_v50  ;;  %v631_v63 = vpop.f32.mrb[15].mxu0  ;;  %v759_v0 = vpop.f32.mrb[15].mxu1  ;;  %v299_v51 = vld [vmem:[#allocation2 + $0xd0] sm:$0xff]  ;;  %v329_v54 = vld [vmem:[#allocation2 + $0x1c0] sm:$0xff] }
 0x127   : > { %911 = vst.msk [vmem:[#allocation2 + $0x60] sm:$0xff] %vm449_vm1, %v847_v57  ;;  %943 = vst.msk [vmem:[#allocation2 + $0x160] sm:$0xff] %vm449_vm1, %v879_v58  ;;  %v848_v1 = vadd.f32 %v631_v63, %v286_v55  ;;  %v880_v2 = vadd.f32 %v759_v0, %v318_v56  ;;  %v331_v52 = vld [vmem:[#allocation2 + $0x1d0] sm:$0xff]  ;;  %v300_v57 = vld [vmem:[#allocation2 + $0xd8] sm:$0xff] }
 0x128   : > { %914 = vst.msk [vmem:[#allocation2 + $0x78] sm:$0xff] %vm449_vm1, %v850_v61  ;;  %946 = vst.msk [vmem:[#allocation2 + $0x178] sm:$0xff] %vm449_vm1, %v882_v62  ;;  %v332_v58 = vld [vmem:[#allocation2 + $0x1d8] sm:$0xff]  ;;  %v298_v63 = vld [vmem:[#allocation2 + $0xc8] sm:$0xff] }
 0x129   : > { %912 = vst.msk [vmem:[#allocation2 + $0x68] sm:$0xff] %vm449_vm1, %v848_v1  ;;  %944 = vst.msk [vmem:[#allocation2 + $0x168] sm:$0xff] %vm449_vm1, %v880_v2  ;;  %v330_v0 = vld [vmem:[#allocation2 + $0x1c8] sm:$0xff] }
 0x12b   : > { %v1439_v7 = vpop.f32.mrb[16].mxu0  ;;  %v1471_v8 = vpop.f32.mrb[16].mxu1 }
 0x12c   : > { %v853_v11 = vadd.f32 %v1439_v7, %v291_v3  ;;  %v885_v12 = vadd.f32 %v1471_v8, %v323_v4  ;;  %v644_v13 = vpop.f32.mrb[17].mxu0  ;;  %v772_v14 = vpop.f32.mrb[17].mxu1 }
 0x12d   : > { %v851_v17 = vadd.f32 %v644_v13, %v289_v5  ;;  %v883_v18 = vadd.f32 %v772_v14, %v321_v6  ;;  %v1440_v19 = vpop.f32.mrb[18].mxu0  ;;  %v1472_v20 = vpop.f32.mrb[18].mxu1  ;;  %v301_v13 = vld [vmem:[#allocation2 + $0xe0] sm:$0xff] }
 0x12e   : > { %917 = vst.msk [vmem:[#allocation2 + $0x90] sm:$0xff] %vm449_vm1, %v853_v11  ;;  %949 = vst.msk [vmem:[#allocation2 + $0x190] sm:$0xff] %vm449_vm1, %v885_v12  ;;  %v854_v21 = vadd.f32 %v1440_v19, %v292_v9  ;;  %v886_v22 = vadd.f32 %v1472_v20, %v324_v10  ;;  %v647_v23 = vpop.f32.mrb[19].mxu0  ;;  %v775_v24 = vpop.f32.mrb[19].mxu1  ;;  %v303_v11 = vld [vmem:[#allocation2 + $0xf0] sm:$0xff]  ;;  %v333_v14 = vld [vmem:[#allocation2 + $0x1e0] sm:$0xff] }
 0x12f   : > { %915 = vst.msk [vmem:[#allocation2 + $0x80] sm:$0xff] %vm449_vm1, %v851_v17  ;;  %947 = vst.msk [vmem:[#allocation2 + $0x180] sm:$0xff] %vm449_vm1, %v883_v18  ;;  %v852_v25 = vadd.f32 %v647_v23, %v290_v15  ;;  %v884_v26 = vadd.f32 %v775_v24, %v322_v16  ;;  %v335_v12 = vld [vmem:[#allocation2 + $0x1f0] sm:$0xff]  ;;  %v304_v17 = vld [vmem:[#allocation2 + $0xf8] sm:$0xff] }
 0x130   : > { %918 = vst.msk [vmem:[#allocation2 + $0x98] sm:$0xff] %vm449_vm1, %v854_v21  ;;  %950 = vst.msk [vmem:[#allocation2 + $0x198] sm:$0xff] %vm449_vm1, %v886_v22  ;;  %v336_v18 = vld [vmem:[#allocation2 + $0x1f8] sm:$0xff]  ;;  %v302_v23 = vld [vmem:[#allocation2 + $0xe8] sm:$0xff] }
 0x131   : > { %916 = vst.msk [vmem:[#allocation2 + $0x88] sm:$0xff] %vm449_vm1, %v852_v25  ;;  %948 = vst.msk [vmem:[#allocation2 + $0x188] sm:$0xff] %vm449_vm1, %v884_v26  ;;  %v334_v24 = vld [vmem:[#allocation2 + $0x1e8] sm:$0xff] }
 0x133   : > { %v1443_v31 = vpop.f32.mrb[20].mxu0  ;;  %v1475_v32 = vpop.f32.mrb[20].mxu1 }
 0x134   : > { %v857_v35 = vadd.f32 %v1443_v31, %v295_v27  ;;  %v889_v36 = vadd.f32 %v1475_v32, %v327_v28  ;;  %v660_v37 = vpop.f32.mrb[21].mxu0  ;;  %v788_v38 = vpop.f32.mrb[21].mxu1 }
 0x135   : > { %v855_v41 = vadd.f32 %v660_v37, %v293_v29  ;;  %v887_v42 = vadd.f32 %v788_v38, %v325_v30  ;;  %v1444_v43 = vpop.f32.mrb[22].mxu0  ;;  %v1476_v44 = vpop.f32.mrb[22].mxu1  ;;  %v1102_v37 = vld [vmem:[%s2371_s3] sm:$0xff] (!%p1377_p5) }
 0x136   : > { %921 = vst.msk [vmem:[#allocation2 + $0xb0] sm:$0xff] %vm449_vm1, %v857_v35  ;;  %953 = vst.msk [vmem:[#allocation2 + $0x1b0] sm:$0xff] %vm449_vm1, %v889_v36  ;;  %v858_v45 = vadd.f32 %v1444_v43, %v296_v33  ;;  %v890_v46 = vadd.f32 %v1476_v44, %v328_v34  ;;  %v663_v47 = vpop.f32.mrb[23].mxu0  ;;  %v791_v48 = vpop.f32.mrb[23].mxu1  ;;  %v967_v35 = vld [vmem:[#allocation2] sm:$0xff] (!%p1377_p5)  ;;  %v1104_v44 = vld [vmem:[%s2371_s3 + $0x10] sm:$0xff] (!%p1377_p5) }
 0x137   : > { %919 = vst.msk [vmem:[#allocation2 + $0xa0] sm:$0xff] %vm449_vm1, %v855_v41  ;;  %951 = vst.msk [vmem:[#allocation2 + $0x1a0] sm:$0xff] %vm449_vm1, %v887_v42  ;;  %v856_v49 = vadd.f32 %v663_v47, %v294_v39  ;;  %v888_v50 = vadd.f32 %v791_v48, %v326_v40  ;;  %v1851_v36 = vld [vmem:[%s2370_s2] ss:$0 sm:$0xff] (!%p1377_p5)  ;;  %v968_v39 = vld [vmem:[#allocation2 + $0x8] sm:$0xff] (!%p1377_p5) }
 0x138   : > { %922 = vst.msk [vmem:[#allocation2 + $0xb8] sm:$0xff] %vm449_vm1, %v858_v45  ;;  %954 = vst.msk [vmem:[#allocation2 + $0x1b8] sm:$0xff] %vm449_vm1, %v890_v46  ;;  %v1038_v38 = vadd.f32 (!%p1377_p5), %v1851_v36, %v967_v35  ;;  %v1103_v40 = vld [vmem:[%s2371_s3 + $0x8] sm:$0xff] (!%p1377_p5)  ;;  %v969_v41 = vld [vmem:[#allocation2 + $0x10] sm:$0xff] (!%p1377_p5)  ;;  %v1039_v42 = vadd.f32 (!%p1377_p5), %v1851_v36, %v968_v39 }
 0x139   : > { %920 = vst.msk [vmem:[#allocation2 + $0xa8] sm:$0xff] %vm449_vm1, %v856_v49  ;;  %952 = vst.msk [vmem:[#allocation2 + $0x1a8] sm:$0xff] %vm449_vm1, %v888_v50  ;;  %v1040_v43 = vadd.f32 (!%p1377_p5), %v1851_v36, %v969_v41  ;;  %v970_v45 = vld [vmem:[#allocation2 + $0x18] sm:$0xff] (!%p1377_p5)  ;;  %v971_v49 = vld [vmem:[#allocation2 + $0x20] sm:$0xff] (!%p1377_p5) }
 0x13a   : > { %v1105_v46 = vld [vmem:[%s2371_s3 + $0x18] sm:$0xff] (!%p1377_p5)  ;;  %v1166_v47 = vadd.f32 (!%p1377_p5), %v1102_v37, %v1038_v38  ;;  %v1041_v48 = vadd.f32 (!%p1377_p5), %v1851_v36, %v970_v45  ;;  %v1106_v50 = vld [vmem:[%s2371_s3 + $0x20] sm:$0xff] (!%p1377_p5)  ;;  %v984_v35 = vld [vmem:[#allocation2 + $0x88] sm:$0xff] (!%p1377_p5) }
 0x13b   : > { %v1447_v55 = vpop.f32.mrb[24].mxu0  ;;  %v1479_v56 = vpop.f32.mrb[24].mxu1  ;;  %v1119_v41 = vld [vmem:[%s2371_s3 + $0x88] sm:$0xff] (!%p1377_p5) }
 0x13c   : > { %v861_v59 = vadd.f32 %v1447_v55, %v299_v51  ;;  %v893_v60 = vadd.f32 %v1479_v56, %v331_v52  ;;  %v676_v61 = vpop.f32.mrb[25].mxu0  ;;  %v804_v62 = vpop.f32.mrb[25].mxu1  ;;  %v972_v51 = vld [vmem:[#allocation2 + $0x28] sm:$0xff] (!%p1377_p5)  ;;  %v1167_v52 = vadd.f32 (!%p1377_p5), %v1103_v40, %v1039_v42  ;;  %1230 = vst.msk [vmem:[%s2372_s4] sm:$0xff] (!%p1377_p5), %vm449_vm1, %v1166_v47  ;;  %v1055_v40 = vadd.f32 (!%p1377_p5), %v1851_v36, %v984_v35  ;;  %v985_v42 = vld [vmem:[#allocation2 + $0x90] sm:$0xff] (!%p1377_p5)  ;;  %v1121_v47 = vld [vmem:[%s2371_s3 + $0x98] sm:$0xff] (!%p1377_p5) }
 0x13d   : > { %v859_v1 = vadd.f32 %v676_v61, %v297_v53  ;;  %v891_v2 = vadd.f32 %v804_v62, %v329_v54  ;;  %v1448_v3 = vpop.f32.mrb[26].mxu0  ;;  %v1480_v4 = vpop.f32.mrb[26].mxu1  ;;  %v1168_v53 = vadd.f32 (!%p1377_p5), %v1104_v44, %v1040_v43  ;;  %v1042_v54 = vadd.f32 (!%p1377_p5), %v1851_v36, %v971_v49  ;;  %v1107_v56 = vld [vmem:[%s2371_s3 + $0x28] sm:$0xff] (!%p1377_p5)  ;;  %v974_v61 = vld [vmem:[#allocation2 + $0x38] sm:$0xff] (!%p1377_p5)  ;;  %v1120_v43 = vld [vmem:[%s2371_s3 + $0x90] sm:$0xff] (!%p1377_p5) }
 0x13e   : > { %925 = vst.msk [vmem:[#allocation2 + $0xd0] sm:$0xff] %vm449_vm1, %v861_v59  ;;  %957 = vst.msk [vmem:[#allocation2 + $0x1d0] sm:$0xff] %vm449_vm1, %v893_v60  ;;  %v862_v5 = vadd.f32 %v1448_v3, %v300_v57  ;;  %v894_v6 = vadd.f32 %v1480_v4, %v332_v58  ;;  %v679_v7 = vpop.f32.mrb[27].mxu0  ;;  %v807_v8 = vpop.f32.mrb[27].mxu1  ;;  %v1043_v55 = vadd.f32 (!%p1377_p5), %v1851_v36, %v972_v51  ;;  %v973_v57 = vld [vmem:[#allocation2 + $0x30] sm:$0xff] (!%p1377_p5)  ;;  %v1109_v62 = vld [vmem:[%s2371_s3 + $0x38] sm:$0xff] (!%p1377_p5) }
 0x13f   : > { %923 = vst.msk [vmem:[#allocation2 + $0xc0] sm:$0xff] %vm449_vm1, %v859_v1  ;;  %955 = vst.msk [vmem:[#allocation2 + $0x1c0] sm:$0xff] %vm449_vm1, %v891_v2  ;;  %v860_v9 = vadd.f32 %v679_v7, %v298_v63  ;;  %v892_v10 = vadd.f32 %v807_v8, %v330_v0  ;;  %v1108_v58 = vld [vmem:[%s2371_s3 + $0x30] sm:$0xff] (!%p1377_p5)  ;;  %v1169_v59 = vadd.f32 (!%p1377_p5), %v1105_v46, %v1041_v48  ;;  %v975_v63 = vld [vmem:[#allocation2 + $0x40] sm:$0xff] (!%p1377_p5) }
 0x140   : > { %926 = vst.msk [vmem:[#allocation2 + $0xd8] sm:$0xff] %vm449_vm1, %v862_v5  ;;  %958 = vst.msk [vmem:[#allocation2 + $0x1d8] sm:$0xff] %vm449_vm1, %v894_v6  ;;  %v1044_v60 = vadd.f32 (!%p1377_p5), %v1851_v36, %v973_v57  ;;  %v1170_v0 = vadd.f32 (!%p1377_p5), %v1106_v50, %v1042_v54  ;;  %v1171_v1 = vadd.f32 (!%p1377_p5), %v1107_v56, %v1043_v55  ;;  %v1110_v4 = vld [vmem:[%s2371_s3 + $0x40] sm:$0xff] (!%p1377_p5)  ;;  %v976_v5 = vld [vmem:[#allocation2 + $0x48] sm:$0xff] (!%p1377_p5) }
 0x141   : > { %924 = vst.msk [vmem:[#allocation2 + $0xc8] sm:$0xff] %vm449_vm1, %v860_v9  ;;  %956 = vst.msk [vmem:[#allocation2 + $0x1c8] sm:$0xff] %vm449_vm1, %v892_v10  ;;  %v1045_v2 = vadd.f32 (!%p1377_p5), %v1851_v36, %v974_v61  ;;  %v1046_v3 = vadd.f32 (!%p1377_p5), %v1851_v36, %v975_v63  ;;  %v1111_v6 = vld [vmem:[%s2371_s3 + $0x48] sm:$0xff] (!%p1377_p5)  ;;  %v1047_v8 = vadd.f32 (!%p1377_p5), %v1851_v36, %v976_v5  ;;  %v977_v9 = vld [vmem:[#allocation2 + $0x50] sm:$0xff] (!%p1377_p5) }
 0x142   : > { %1231 = vst.msk [vmem:[%s2372_s4 + $0x8] sm:$0xff] (!%p1377_p5), %vm449_vm1, %v1167_v52  ;;  %1232 = vst.msk [vmem:[%s2372_s4 + $0x10] sm:$0xff] (!%p1377_p5), %vm449_vm1, %v1168_v53  ;;  %v1172_v7 = vadd.f32 (!%p1377_p5), %v1108_v58, %v1044_v60  ;;  %v1112_v10 = vld [vmem:[%s2371_s3 + $0x50] sm:$0xff] (!%p1377_p5)  ;;  %v1056_v45 = vadd.f32 (!%p1377_p5), %v1851_v36, %v985_v42  ;;  %v986_v46 = vld [vmem:[#allocation2 + $0x98] sm:$0xff] (!%p1377_p5)  ;;  %v1183_v50 = vadd.f32 (!%p1377_p5), %v1119_v41, %v1055_v40 }
 0x143   : > { %v1451_v15 = vpop.f32.mrb[28].mxu0  ;;  %v1483_v16 = vpop.f32.mrb[28].mxu1  ;;  %966 = sbr.rel (%p1377_p5) target bundleno = 369 (0x171), region = 44  ;;  %1233 = vst.msk [vmem:[%s2372_s4 + $0x18] sm:$0xff] (!%p1377_p5), %vm449_vm1, %v1169_v59  ;;  %1234 = vst.msk [vmem:[%s2372_s4 + $0x20] sm:$0xff] (!%p1377_p5), %vm449_vm1, %v1170_v0  ;;  %v987_v48 = vld [vmem:[#allocation2 + $0xa0] sm:$0xff] (!%p1377_p5)  ;;  %v1057_v51 = vadd.f32 (!%p1377_p5), %v1851_v36, %v986_v46 }
 0x144   : > { %v865_v19 = vadd.f32 %v1451_v15, %v303_v11  ;;  %v897_v20 = vadd.f32 %v1483_v16, %v335_v12  ;;  %v692_v21 = vpop.f32.mrb[29].mxu0  ;;  %v820_v22 = vpop.f32.mrb[29].mxu1  ;;  %v978_v11 = vld [vmem:[#allocation2 + $0x58] sm:$0xff] (!%p1377_p5)  ;;  %1235 = vst.msk [vmem:[%s2372_s4 + $0x28] sm:$0xff] (!%p1377_p5), %vm449_vm1, %v1171_v1  ;;  %v1173_v12 = vadd.f32 (!%p1377_p5), %v1109_v62, %v1045_v2  ;;  %1236 = vst.msk [vmem:[%s2372_s4 + $0x30] sm:$0xff] (!%p1377_p5), %vm449_vm1, %v1172_v7  ;;  %v1122_v53 = vld [vmem:[%s2371_s3 + $0xa0] sm:$0xff] (!%p1377_p5) }
 0x145   : > { %v863_v25 = vadd.f32 %v692_v21, %v301_v13  ;;  %v895_v26 = vadd.f32 %v820_v22, %v333_v14  ;;  %v1452_v27 = vpop.f32.mrb[30].mxu0  ;;  %v1484_v28 = vpop.f32.mrb[30].mxu1  ;;  %v1174_v13 = vadd.f32 (!%p1377_p5), %v1110_v4, %v1046_v3  ;;  %v1048_v14 = vadd.f32 (!%p1377_p5), %v1851_v36, %v977_v9  ;;  %v1113_v16 = vld [vmem:[%s2371_s3 + $0x58] sm:$0xff] (!%p1377_p5)  ;;  %v980_v21 = vld [vmem:[#allocation2 + $0x68] sm:$0xff] (!%p1377_p5)  ;;  %v989_v58 = vld [vmem:[#allocation2 + $0xb0] sm:$0xff] (!%p1377_p5)  ;;  %1247 = vst.msk [vmem:[%s2372_s4 + $0x88] sm:$0xff] (!%p1377_p5), %vm449_vm1, %v1183_v50 }
 0x146   : > { %929 = vst.msk [vmem:[#allocation2 + $0xf0] sm:$0xff] %vm449_vm1, %v865_v19  ;;  %961 = vst.msk [vmem:[#allocation2 + $0x1f0] sm:$0xff] %vm449_vm1, %v897_v20  ;;  %v866_v29 = vadd.f32 %v1452_v27, %v304_v17  ;;  %v898_v30 = vadd.f32 %v1484_v28, %v336_v18  ;;  %v695_v31 = vpop.f32.mrb[31].mxu0  ;;  %v823_v32 = vpop.f32.mrb[31].mxu1  ;;  %v1049_v15 = vadd.f32 (!%p1377_p5), %v1851_v36, %v978_v11  ;;  %v979_v17 = vld [vmem:[#allocation2 + $0x60] sm:$0xff] (!%p1377_p5)  ;;  %v1115_v22 = vld [vmem:[%s2371_s3 + $0x68] sm:$0xff] (!%p1377_p5) }
 0x147   : > { %927 = vst.msk [vmem:[#allocation2 + $0xe0] sm:$0xff] %vm449_vm1, %v863_v25  ;;  %959 = vst.msk [vmem:[#allocation2 + $0x1e0] sm:$0xff] %vm449_vm1, %v895_v26  ;;  %v864_v33 = vadd.f32 %v695_v31, %v302_v23  ;;  %v896_v34 = vadd.f32 %v823_v32, %v334_v24  ;;  %v1114_v18 = vld [vmem:[%s2371_s3 + $0x60] sm:$0xff] (!%p1377_p5)  ;;  %v1175_v19 = vadd.f32 (!%p1377_p5), %v1111_v6, %v1047_v8  ;;  %v981_v23 = vld [vmem:[#allocation2 + $0x70] sm:$0xff] (!%p1377_p5) }
 0x148   : > { %930 = vst.msk [vmem:[#allocation2 + $0xf8] sm:$0xff] %vm449_vm1, %v866_v29  ;;  %962 = vst.msk [vmem:[#allocation2 + $0x1f8] sm:$0xff] %vm449_vm1, %v898_v30  ;;  %v1050_v20 = vadd.f32 (!%p1377_p5), %v1851_v36, %v979_v17  ;;  %v1176_v24 = vadd.f32 (!%p1377_p5), %v1112_v10, %v1048_v14  ;;  %v1177_v25 = vadd.f32 (!%p1377_p5), %v1113_v16, %v1049_v15  ;;  %v1116_v28 = vld [vmem:[%s2371_s3 + $0x70] sm:$0xff] (!%p1377_p5)  ;;  %v982_v29 = vld [vmem:[#allocation2 + $0x78] sm:$0xff] (!%p1377_p5) }
 0x149   : > { %928 = vst.msk [vmem:[#allocation2 + $0xe8] sm:$0xff] %vm449_vm1, %v864_v33  ;;  %960 = vst.msk [vmem:[#allocation2 + $0x1e8] sm:$0xff] %vm449_vm1, %v896_v34  ;;  %v1051_v26 = vadd.f32 (!%p1377_p5), %v1851_v36, %v980_v21  ;;  %v1052_v27 = vadd.f32 (!%p1377_p5), %v1851_v36, %v981_v23  ;;  %v1117_v30 = vld [vmem:[%s2371_s3 + $0x78] sm:$0xff] (!%p1377_p5)  ;;  %v1053_v32 = vadd.f32 (!%p1377_p5), %v1851_v36, %v982_v29  ;;  %v983_v33 = vld [vmem:[#allocation2 + $0x80] sm:$0xff] (!%p1377_p5) }
 0x14a   : > { %1237 = vst.msk [vmem:[%s2372_s4 + $0x38] sm:$0xff] %vm449_vm1, %v1173_v12  ;;  %1238 = vst.msk [vmem:[%s2372_s4 + $0x40] sm:$0xff] %vm449_vm1, %v1174_v13  ;;  %v1178_v31 = vadd.f32 %v1114_v18, %v1050_v20  ;;  %v1118_v34 = vld [vmem:[%s2371_s3 + $0x80] sm:$0xff]  ;;  %v1054_v39 = vadd.f32 %v1851_v36, %v983_v33  ;;  %v1058_v52 = vadd.f32 %v1851_v36, %v987_v48  ;;  %v988_v54 = vld [vmem:[#allocation2 + $0xa8] sm:$0xff] }
 0x14b   : > { %1239 = vst.msk [vmem:[%s2372_s4 + $0x48] sm:$0xff] %vm449_vm1, %v1175_v19  ;;  %1240 = vst.msk [vmem:[%s2372_s4 + $0x50] sm:$0xff] %vm449_vm1, %v1176_v24  ;;  %v1179_v37 = vadd.f32 %v1115_v22, %v1051_v26  ;;  %v1180_v38 = vadd.f32 %v1116_v28, %v1052_v27  ;;  %v1181_v44 = vadd.f32 %v1117_v30, %v1053_v32  ;;  %v1123_v55 = vld [vmem:[%s2371_s3 + $0xa8] sm:$0xff]  ;;  %v1124_v59 = vld [vmem:[%s2371_s3 + $0xb0] sm:$0xff] }
 0x14c   : > { %1241 = vst.msk [vmem:[%s2372_s4 + $0x58] sm:$0xff] %vm449_vm1, %v1177_v25  ;;  %1242 = vst.msk [vmem:[%s2372_s4 + $0x60] sm:$0xff] %vm449_vm1, %v1178_v31  ;;  %v1182_v49 = vadd.f32 %v1118_v34, %v1054_v39  ;;  %v1184_v56 = vadd.f32 %v1120_v43, %v1056_v45  ;;  %v1059_v57 = vadd.f32 %v1851_v36, %v988_v54  ;;  %v990_v60 = vld [vmem:[#allocation2 + $0xb8] sm:$0xff]  ;;  %v991_v2 = vld [vmem:[#allocation2 + $0xc0] sm:$0xff] }
 0x14d   : > { %1243 = vst.msk [vmem:[%s2372_s4 + $0x68] sm:$0xff] %vm449_vm1, %v1179_v37  ;;  %1244 = vst.msk [vmem:[%s2372_s4 + $0x70] sm:$0xff] %vm449_vm1, %v1180_v38  ;;  %v1185_v61 = vadd.f32 %v1121_v47, %v1057_v51  ;;  %v1186_v62 = vadd.f32 %v1122_v53, %v1058_v52  ;;  %v1060_v63 = vadd.f32 %v1851_v36, %v989_v58  ;;  %v1125_v1 = vld [vmem:[%s2371_s3 + $0xb8] sm:$0xff]  ;;  %v1126_v3 = vld [vmem:[%s2371_s3 + $0xc0] sm:$0xff] }
 0x14e   : > { %1245 = vst.msk [vmem:[%s2372_s4 + $0x78] sm:$0xff] %vm449_vm1, %v1181_v44  ;;  %1246 = vst.msk [vmem:[%s2372_s4 + $0x80] sm:$0xff] %vm449_vm1, %v1182_v49  ;;  %v1061_v0 = vadd.f32 %v1851_v36, %v990_v60  ;;  %v1187_v4 = vadd.f32 %v1123_v55, %v1059_v57  ;;  %v1062_v5 = vadd.f32 %v1851_v36, %v991_v2  ;;  %v992_v6 = vld [vmem:[#allocation2 + $0xc8] sm:$0xff]  ;;  %v993_v8 = vld [vmem:[#allocation2 + $0xd0] sm:$0xff] }
 0x14f   : > { %1248 = vst.msk [vmem:[%s2372_s4 + $0x90] sm:$0xff] %vm449_vm1, %v1184_v56  ;;  %v1127_v7 = vld [vmem:[%s2371_s3 + $0xc8] sm:$0xff]  ;;  %1249 = vst.msk [vmem:[%s2372_s4 + $0x98] sm:$0xff] %vm449_vm1, %v1185_v61  ;;  %v1188_v9 = vadd.f32 %v1124_v59, %v1060_v63  ;;  %v1063_v11 = vadd.f32 %v1851_v36, %v992_v6  ;;  %v1064_v12 = vadd.f32 %v1851_v36, %v993_v8  ;;  %v1128_v13 = vld [vmem:[%s2371_s3 + $0xd0] sm:$0xff] }
 0x150   : > { %1250 = vst.msk [vmem:[%s2372_s4 + $0xa0] sm:$0xff] %vm449_vm1, %v1186_v62  ;;  %v1189_v10 = vadd.f32 %v1125_v1, %v1061_v0  ;;  %v994_v14 = vld [vmem:[#allocation2 + $0xd8] sm:$0xff]  ;;  %1251 = vst.msk [vmem:[%s2372_s4 + $0xa8] sm:$0xff] %vm449_vm1, %v1187_v4  ;;  %v1190_v16 = vadd.f32 %v1126_v3, %v1062_v5  ;;  %v995_v18 = vld [vmem:[#allocation2 + $0xe0] sm:$0xff] }
 0x151   : > { %v1129_v15 = vld [vmem:[%s2371_s3 + $0xd8] sm:$0xff]  ;;  %v1065_v17 = vadd.f32 %v1851_v36, %v994_v14  ;;  %v1130_v19 = vld [vmem:[%s2371_s3 + $0xe0] sm:$0xff]  ;;  %v996_v20 = vld [vmem:[#allocation2 + $0xe8] sm:$0xff]  ;;  %1252 = vst.msk [vmem:[%s2372_s4 + $0xb0] sm:$0xff] %vm449_vm1, %v1188_v9  ;;  %v1191_v21 = vadd.f32 %v1127_v7, %v1063_v11  ;;  %v1192_v22 = vadd.f32 %v1128_v13, %v1064_v12  ;;  %v1066_v23 = vadd.f32 %v1851_v36, %v995_v18 }
 0x152   : > { %1253 = vst.msk [vmem:[%s2372_s4 + $0xb8] sm:$0xff] %vm449_vm1, %v1189_v10  ;;  %v1067_v24 = vadd.f32 %v1851_v36, %v996_v20  ;;  %v1131_v25 = vld [vmem:[%s2371_s3 + $0xe8] sm:$0xff]  ;;  %v997_v26 = vld [vmem:[#allocation2 + $0xf0] sm:$0xff]  ;;  %1254 = vst.msk [vmem:[%s2372_s4 + $0xc0] sm:$0xff] %vm449_vm1, %v1190_v16 }
 0x153   : > { %v1132_v27 = vld [vmem:[%s2371_s3 + $0xf0] sm:$0xff]  ;;  %v1193_v28 = vadd.f32 %v1129_v15, %v1065_v17  ;;  %v1068_v29 = vadd.f32 %v1851_v36, %v997_v26  ;;  %v998_v30 = vld [vmem:[#allocation2 + $0xf8] sm:$0xff]  ;;  %v999_v32 = vld [vmem:[#allocation2 + $0x100] sm:$0xff]  ;;  %1255 = vst.msk [vmem:[%s2372_s4 + $0xc8] sm:$0xff] %vm449_vm1, %v1191_v21  ;;  %v1194_v33 = vadd.f32 %v1130_v19, %v1066_v23 }
 0x154   : > { %v1133_v31 = vld [vmem:[%s2371_s3 + $0xf8] sm:$0xff]  ;;  %1256 = vst.msk [vmem:[%s2372_s4 + $0xd0] sm:$0xff] %vm449_vm1, %v1192_v22  ;;  %v1195_v34 = vadd.f32 %v1131_v25, %v1067_v24  ;;  %v1069_v35 = vadd.f32 %v1851_v36, %v998_v30  ;;  %v1070_v37 = vadd.f32 %v1851_v36, %v999_v32  ;;  %v1134_v38 = vld [vmem:[%s2371_s3 + $0x100] sm:$0xff]  ;;  %v1000_v39 = vld [vmem:[#allocation2 + $0x108] sm:$0xff] }
 0x155   : > { %v1135_v40 = vld [vmem:[%s2371_s3 + $0x108] sm:$0xff]  ;;  %1257 = vst.msk [vmem:[%s2372_s4 + $0xd8] sm:$0xff] %vm449_vm1, %v1193_v28  ;;  %v1196_v41 = vadd.f32 %v1132_v27, %v1068_v29  ;;  %v1071_v42 = vadd.f32 %v1851_v36, %v1000_v39  ;;  %v1001_v43 = vld [vmem:[#allocation2 + $0x110] sm:$0xff]  ;;  %v1002_v45 = vld [vmem:[#allocation2 + $0x118] sm:$0xff] }
 0x156   : > { %v1136_v44 = vld [vmem:[%s2371_s3 + $0x110] sm:$0xff]  ;;  %1258 = vst.msk [vmem:[%s2372_s4 + $0xe0] sm:$0xff] %vm449_vm1, %v1194_v33  ;;  %1259 = vst.msk [vmem:[%s2372_s4 + $0xe8] sm:$0xff] %vm449_vm1, %v1195_v34  ;;  %v1197_v46 = vadd.f32 %v1133_v31, %v1069_v35  ;;  %v1198_v47 = vadd.f32 %v1134_v38, %v1070_v37  ;;  %v1072_v48 = vadd.f32 %v1851_v36, %v1001_v43  ;;  %v1137_v50 = vld [vmem:[%s2371_s3 + $0x118] sm:$0xff] }
 0x157   : > { %v1073_v49 = vadd.f32 %v1851_v36, %v1002_v45  ;;  %v1003_v51 = vld [vmem:[#allocation2 + $0x120] sm:$0xff]  ;;  %1260 = vst.msk [vmem:[%s2372_s4 + $0xf0] sm:$0xff] %vm449_vm1, %v1196_v41  ;;  %v1199_v53 = vadd.f32 %v1135_v40, %v1071_v42  ;;  %v1004_v55 = vld [vmem:[#allocation2 + $0x128] sm:$0xff]  ;;  %v1005_v57 = vld [vmem:[#allocation2 + $0x130] sm:$0xff] }
 0x158   : > { %v1138_v52 = vld [vmem:[%s2371_s3 + $0x120] sm:$0xff]  ;;  %v1074_v54 = vadd.f32 %v1851_v36, %v1003_v51  ;;  %v1139_v56 = vld [vmem:[%s2371_s3 + $0x128] sm:$0xff]  ;;  %1261 = vst.msk [vmem:[%s2372_s4 + $0xf8] sm:$0xff] %vm449_vm1, %v1197_v46  ;;  %1262 = vst.msk [vmem:[%s2372_s4 + $0x100] sm:$0xff] %vm449_vm1, %v1198_v47  ;;  %v1200_v58 = vadd.f32 %v1136_v44, %v1072_v48  ;;  %v1075_v60 = vadd.f32 %v1851_v36, %v1004_v55 }
 0x159   : > { %v1201_v59 = vadd.f32 %v1137_v50, %v1073_v49  ;;  %v1076_v61 = vadd.f32 %v1851_v36, %v1005_v57  ;;  %v1140_v62 = vld [vmem:[%s2371_s3 + $0x130] sm:$0xff]  ;;  %v1006_v63 = vld [vmem:[#allocation2 + $0x138] sm:$0xff]  ;;  %1263 = vst.msk [vmem:[%s2372_s4 + $0x108] sm:$0xff] %vm449_vm1, %v1199_v53  ;;  %v1007_v3 = vld [vmem:[#allocation2 + $0x140] sm:$0xff] }
 0x15a   : > { %v1141_v0 = vld [vmem:[%s2371_s3 + $0x138] sm:$0xff]  ;;  %v1202_v1 = vadd.f32 %v1138_v52, %v1074_v54  ;;  %v1077_v2 = vadd.f32 %v1851_v36, %v1006_v63  ;;  %v1142_v4 = vld [vmem:[%s2371_s3 + $0x140] sm:$0xff]  ;;  %v1008_v5 = vld [vmem:[#allocation2 + $0x148] sm:$0xff]  ;;  %1264 = vst.msk [vmem:[%s2372_s4 + $0x110] sm:$0xff] %vm449_vm1, %v1200_v58  ;;  %v1203_v6 = vadd.f32 %v1139_v56, %v1075_v60  ;;  %v1078_v8 = vadd.f32 %v1851_v36, %v1007_v3 }
 0x15b   : > { %1265 = vst.msk [vmem:[%s2372_s4 + $0x118] sm:$0xff] %vm449_vm1, %v1201_v59  ;;  %v1204_v7 = vadd.f32 %v1140_v62, %v1076_v61  ;;  %v1079_v9 = vadd.f32 %v1851_v36, %v1008_v5  ;;  %v1143_v10 = vld [vmem:[%s2371_s3 + $0x148] sm:$0xff]  ;;  %v1009_v11 = vld [vmem:[#allocation2 + $0x150] sm:$0xff]  ;;  %v1010_v15 = vld [vmem:[#allocation2 + $0x158] sm:$0xff] }
 0x15c   : > { %v1144_v12 = vld [vmem:[%s2371_s3 + $0x150] sm:$0xff]  ;;  %1266 = vst.msk [vmem:[%s2372_s4 + $0x120] sm:$0xff] %vm449_vm1, %v1202_v1  ;;  %v1205_v13 = vadd.f32 %v1141_v0, %v1077_v2  ;;  %v1080_v14 = vadd.f32 %v1851_v36, %v1009_v11  ;;  %v1145_v16 = vld [vmem:[%s2371_s3 + $0x158] sm:$0xff]  ;;  %v1011_v17 = vld [vmem:[#allocation2 + $0x160] sm:$0xff]  ;;  %v1206_v18 = vadd.f32 %v1142_v4, %v1078_v8  ;;  %v1081_v20 = vadd.f32 %v1851_v36, %v1010_v15 }
 0x15d   : > { %1267 = vst.msk [vmem:[%s2372_s4 + $0x128] sm:$0xff] %vm449_vm1, %v1203_v6  ;;  %1268 = vst.msk [vmem:[%s2372_s4 + $0x130] sm:$0xff] %vm449_vm1, %v1204_v7  ;;  %v1207_v19 = vadd.f32 %v1143_v10, %v1079_v9  ;;  %v1082_v21 = vadd.f32 %v1851_v36, %v1011_v17  ;;  %v1146_v22 = vld [vmem:[%s2371_s3 + $0x160] sm:$0xff]  ;;  %v1012_v23 = vld [vmem:[#allocation2 + $0x168] sm:$0xff] }
 0x15e   : > { %v1147_v24 = vld [vmem:[%s2371_s3 + $0x168] sm:$0xff]  ;;  %1269 = vst.msk [vmem:[%s2372_s4 + $0x138] sm:$0xff] %vm449_vm1, %v1205_v13  ;;  %v1208_v25 = vadd.f32 %v1144_v12, %v1080_v14  ;;  %v1083_v26 = vadd.f32 %v1851_v36, %v1012_v23  ;;  %v1013_v27 = vld [vmem:[#allocation2 + $0x170] sm:$0xff]  ;;  %v1014_v29 = vld [vmem:[#allocation2 + $0x178] sm:$0xff]  ;;  %v1209_v30 = vadd.f32 %v1145_v16, %v1081_v20 }
 0x15f   : > { %v1148_v28 = vld [vmem:[%s2371_s3 + $0x170] sm:$0xff]  ;;  %1270 = vst.msk [vmem:[%s2372_s4 + $0x140] sm:$0xff] %vm449_vm1, %v1206_v18  ;;  %1271 = vst.msk [vmem:[%s2372_s4 + $0x148] sm:$0xff] %vm449_vm1, %v1207_v19  ;;  %v1210_v31 = vadd.f32 %v1146_v22, %v1082_v21  ;;  %v1084_v32 = vadd.f32 %v1851_v36, %v1013_v27  ;;  %v1085_v33 = vadd.f32 %v1851_v36, %v1014_v29  ;;  %v1149_v34 = vld [vmem:[%s2371_s3 + $0x178] sm:$0xff] }
 0x160   : > { %v1015_v35 = vld [vmem:[#allocation2 + $0x180] sm:$0xff]  ;;  %1272 = vst.msk [vmem:[%s2372_s4 + $0x150] sm:$0xff] %vm449_vm1, %v1208_v25  ;;  %v1211_v38 = vadd.f32 %v1147_v24, %v1083_v26  ;;  %v1016_v40 = vld [vmem:[#allocation2 + $0x188] sm:$0xff]  ;;  %v1017_v42 = vld [vmem:[#allocation2 + $0x190] sm:$0xff] }
 0x161   : > { %v1150_v37 = vld [vmem:[%s2371_s3 + $0x180] sm:$0xff]  ;;  %v1086_v39 = vadd.f32 %v1851_v36, %v1015_v35  ;;  %v1151_v41 = vld [vmem:[%s2371_s3 + $0x188] sm:$0xff]  ;;  %1273 = vst.msk [vmem:[%s2372_s4 + $0x158] sm:$0xff] %vm449_vm1, %v1209_v30  ;;  %1274 = vst.msk [vmem:[%s2372_s4 + $0x160] sm:$0xff] %vm449_vm1, %v1210_v31  ;;  %v1212_v43 = vadd.f32 %v1148_v28, %v1084_v32  ;;  %v1213_v44 = vadd.f32 %v1149_v34, %v1085_v33 }
 0x162   : > { %v1087_v45 = vadd.f32 %v1851_v36, %v1016_v40  ;;  %v1088_v46 = vadd.f32 %v1851_v36, %v1017_v42  ;;  %v1152_v47 = vld [vmem:[%s2371_s3 + $0x190] sm:$0xff]  ;;  %v1018_v48 = vld [vmem:[#allocation2 + $0x198] sm:$0xff]  ;;  %1275 = vst.msk [vmem:[%s2372_s4 + $0x168] sm:$0xff] %vm449_vm1, %v1211_v38  ;;  %v1019_v52 = vld [vmem:[#allocation2 + $0x1a0] sm:$0xff] }
 0x163   : > { %v1153_v49 = vld [vmem:[%s2371_s3 + $0x198] sm:$0xff]  ;;  %v1214_v50 = vadd.f32 %v1150_v37, %v1086_v39  ;;  %v1089_v51 = vadd.f32 %v1851_v36, %v1018_v48  ;;  %v1154_v53 = vld [vmem:[%s2371_s3 + $0x1a0] sm:$0xff]  ;;  %v1020_v54 = vld [vmem:[#allocation2 + $0x1a8] sm:$0xff]  ;;  %1276 = vst.msk [vmem:[%s2372_s4 + $0x170] sm:$0xff] %vm449_vm1, %v1212_v43  ;;  %v1090_v57 = vadd.f32 %v1851_v36, %v1019_v52 }
 0x164   : > { %1277 = vst.msk [vmem:[%s2372_s4 + $0x178] sm:$0xff] %vm449_vm1, %v1213_v44  ;;  %v1215_v55 = vadd.f32 %v1151_v41, %v1087_v45  ;;  %v1216_v56 = vadd.f32 %v1152_v47, %v1088_v46  ;;  %v1091_v58 = vadd.f32 %v1851_v36, %v1020_v54  ;;  %v1155_v59 = vld [vmem:[%s2371_s3 + $0x1a8] sm:$0xff]  ;;  %v1021_v60 = vld [vmem:[#allocation2 + $0x1b0] sm:$0xff]  ;;  %v1022_v0 = vld [vmem:[#allocation2 + $0x1b8] sm:$0xff] }
 0x165   : > { %v1156_v61 = vld [vmem:[%s2371_s3 + $0x1b0] sm:$0xff]  ;;  %1278 = vst.msk [vmem:[%s2372_s4 + $0x180] sm:$0xff] %vm449_vm1, %v1214_v50  ;;  %v1217_v62 = vadd.f32 %v1153_v49, %v1089_v51  ;;  %v1092_v63 = vadd.f32 %v1851_v36, %v1021_v60  ;;  %v1157_v1 = vld [vmem:[%s2371_s3 + $0x1b8] sm:$0xff]  ;;  %v1023_v2 = vld [vmem:[#allocation2 + $0x1c0] sm:$0xff]  ;;  %v1218_v3 = vadd.f32 %v1154_v53, %v1090_v57  ;;  %v1093_v5 = vadd.f32 %v1851_v36, %v1022_v0 }
 0x166   : > { %1279 = vst.msk [vmem:[%s2372_s4 + $0x188] sm:$0xff] %vm449_vm1, %v1215_v55  ;;  %1280 = vst.msk [vmem:[%s2372_s4 + $0x190] sm:$0xff] %vm449_vm1, %v1216_v56  ;;  %v1219_v4 = vadd.f32 %v1155_v59, %v1091_v58  ;;  %v1094_v6 = vadd.f32 %v1851_v36, %v1023_v2  ;;  %v1158_v7 = vld [vmem:[%s2371_s3 + $0x1c0] sm:$0xff]  ;;  %v1024_v8 = vld [vmem:[#allocation2 + $0x1c8] sm:$0xff] }
 0x167   : > { %v1159_v9 = vld [vmem:[%s2371_s3 + $0x1c8] sm:$0xff]  ;;  %1281 = vst.msk [vmem:[%s2372_s4 + $0x198] sm:$0xff] %vm449_vm1, %v1217_v62  ;;  %v1220_v10 = vadd.f32 %v1156_v61, %v1092_v63  ;;  %v1095_v11 = vadd.f32 %v1851_v36, %v1024_v8  ;;  %v1025_v12 = vld [vmem:[#allocation2 + $0x1d0] sm:$0xff]  ;;  %v1026_v14 = vld [vmem:[#allocation2 + $0x1d8] sm:$0xff]  ;;  %v1221_v15 = vadd.f32 %v1157_v1, %v1093_v5 }
 0x168   : > { %v1160_v13 = vld [vmem:[%s2371_s3 + $0x1d0] sm:$0xff]  ;;  %1282 = vst.msk [vmem:[%s2372_s4 + $0x1a0] sm:$0xff] %vm449_vm1, %v1218_v3  ;;  %1283 = vst.msk [vmem:[%s2372_s4 + $0x1a8] sm:$0xff] %vm449_vm1, %v1219_v4  ;;  %v1222_v16 = vadd.f32 %v1158_v7, %v1094_v6  ;;  %v1096_v17 = vadd.f32 %v1851_v36, %v1025_v12  ;;  %v1097_v18 = vadd.f32 %v1851_v36, %v1026_v14  ;;  %v1161_v19 = vld [vmem:[%s2371_s3 + $0x1d8] sm:$0xff] }
 0x169   : > { %v1027_v20 = vld [vmem:[#allocation2 + $0x1e0] sm:$0xff]  ;;  %1284 = vst.msk [vmem:[%s2372_s4 + $0x1b0] sm:$0xff] %vm449_vm1, %v1220_v10  ;;  %v1223_v22 = vadd.f32 %v1159_v9, %v1095_v11  ;;  %v1028_v24 = vld [vmem:[#allocation2 + $0x1e8] sm:$0xff]  ;;  %v1029_v26 = vld [vmem:[#allocation2 + $0x1f0] sm:$0xff] }
 0x16a   : > { %v1162_v21 = vld [vmem:[%s2371_s3 + $0x1e0] sm:$0xff]  ;;  %v1098_v23 = vadd.f32 %v1851_v36, %v1027_v20  ;;  %v1163_v25 = vld [vmem:[%s2371_s3 + $0x1e8] sm:$0xff]  ;;  %1285 = vst.msk [vmem:[%s2372_s4 + $0x1b8] sm:$0xff] %vm449_vm1, %v1221_v15  ;;  %1286 = vst.msk [vmem:[%s2372_s4 + $0x1c0] sm:$0xff] %vm449_vm1, %v1222_v16  ;;  %v1224_v27 = vadd.f32 %v1160_v13, %v1096_v17  ;;  %v1225_v28 = vadd.f32 %v1161_v19, %v1097_v18 }
 0x16b   : > { %v1099_v29 = vadd.f32 %v1851_v36, %v1028_v24  ;;  %v1100_v30 = vadd.f32 %v1851_v36, %v1029_v26  ;;  %v1164_v31 = vld [vmem:[%s2371_s3 + $0x1f0] sm:$0xff]  ;;  %v1030_v32 = vld [vmem:[#allocation2 + $0x1f8] sm:$0xff]  ;;  %1287 = vst.msk [vmem:[%s2372_s4 + $0x1c8] sm:$0xff] %vm449_vm1, %v1223_v22 }
 0x16c   : > { %v1165_v33 = vld [vmem:[%s2371_s3 + $0x1f8] sm:$0xff]  ;;  %v1226_v34 = vadd.f32 %v1162_v21, %v1098_v23  ;;  %v1101_v35 = vadd.f32 %v1851_v36, %v1030_v32  ;;  %1288 = vst.msk [vmem:[%s2372_s4 + $0x1d0] sm:$0xff] %vm449_vm1, %v1224_v27  ;;  %1289 = vst.msk [vmem:[%s2372_s4 + $0x1d8] sm:$0xff] %vm449_vm1, %v1225_v28 }
 0x16d   : > { %v1227_v37 = vadd.f32 %v1163_v25, %v1099_v29  ;;  %v1228_v38 = vadd.f32 %v1164_v31, %v1100_v30 }
 0x16e   : > { %1290 = vst.msk [vmem:[%s2372_s4 + $0x1e0] sm:$0xff] %vm449_vm1, %v1226_v34  ;;  %v1229_v39 = vadd.f32 %v1165_v33, %v1101_v35 }
 0x16f   : > { %1291 = vst.msk [vmem:[%s2372_s4 + $0x1e8] sm:$0xff] %vm449_vm1, %v1227_v37  ;;  %1292 = vst.msk [vmem:[%s2372_s4 + $0x1f0] sm:$0xff] %vm449_vm1, %v1228_v38 }
 0x170   : > { %1293 = vst.msk [vmem:[%s2372_s4 + $0x1f8] sm:$0xff] %vm449_vm1, %v1229_v39 }
 0x171 PF: > { %s14_s15 = sadd.s32 1, %s1506_s15  }
 0x172   : > { %p11_p6 = scmp.ge.s32.totalorder %s14_s15, 11  }
 0x174   :  { %13 = sbr.rel (!%p11_p6) target bundleno = 1 (0x1), region = 73 }

</bundles_post_ra>
